<compile_context>
chip_gen: v6e
topology: v6e:2x2x1
jax: 0.10.0
libtpu: 0.0.40
codegen_flags: <defaults>
</compile_context>

<pallas_src>
import functools
import math

import jax
import jax.numpy as jnp
from jax import lax
from jax.experimental import pallas as pl
from jax.experimental.pallas import tpu as pltpu

# ---------------------------------------------------------------- config ----
VOCAB = 64
D_MODEL = 32
N_HEADS = 4
D_HEAD = D_MODEL // N_HEADS
D_FFN = 64
N_ENC_LAYERS = 2
N_DEC_LAYERS = 2
FEAT_DIM = 8
LFR_M, LFR_N = 3, 2
SOS, EOS = 1, 2
IGNORE_ID = -1
CTC_WEIGHT = 0.0
LSM_WEIGHT = 0.1
SAMPLING_RATIO = 0.75
LN_EPS = 1e-5
MM_DTYPE = jnp.bfloat16      # weight-matmul operand dtype (f32 accumulation)

# ------------------------------------------------------------ spec helpers --


def _rep_spec(arr):
    """BlockSpec for an operand replicated across the (batch) grid."""
    nd = arr.ndim
    return pl.BlockSpec(arr.shape, lambda *args, _nd=nd: (0,) * _nd)


def _batch_spec(shape):
    """BlockSpec for a per-batch (1, ...) block of a (B, ...) array."""
    nd = len(shape)
    return pl.BlockSpec(shape, lambda b, *_, _nd=nd: (b,) + (0,) * (_nd - 1))


def _cost(flops, trans, operands, out_bytes):
    in_bytes = sum(int(o.size) * o.dtype.itemsize for o in operands)
    return pl.CostEstimate(flops=int(flops), transcendentals=int(trans),
                           bytes_accessed=int(in_bytes + out_bytes))


# ---------------------------------------------------- in-kernel primitives --


def _ln(x, g, b):
    """LayerNorm over the last dim; g, b are (1, D) f32."""
    mean = jnp.mean(x, axis=-1, keepdims=True)
    var = jnp.mean(jnp.square(x - mean), axis=-1, keepdims=True)
    return (x - mean) * lax.rsqrt(var + LN_EPS) * g + b


def _mha_core(q, k, v, klen, wo, bo):
    """Heads handled via static lane slices of packed projections.

    q: (Lq, D) f32, k/v: (Lk, D) f32 (biases already added), klen: int32.
    Scores and p@v stay in f32 (MXU has huge slack at these shapes; avoids the
    per-head bf16 pack/unpack cost on v5e). Output projection is a single
    (Lq, D) @ (D, D) bf16 matmul after a lane concat of the head outputs.
    """
    Lq, Lk = q.shape[0], k.shape[0]
    kbias = jnp.where(
        lax.broadcasted_iota(jnp.int32, (Lq, Lk), 1) < klen, 0.0, -1e9
    ).astype(jnp.float32)
    scale = 1.0 / math.sqrt(D_HEAD)
    heads = []
    for h in range(N_HEADS):
        sl = slice(h * D_HEAD, (h + 1) * D_HEAD)
        s = lax.dot_general(q[:, sl], k[:, sl], (((1,), (1,)), ((), ())),
                            preferred_element_type=jnp.float32)
        s = s * scale + kbias
        s = s - jnp.max(s, axis=-1, keepdims=True)
        p = jnp.exp(s)
        p = p / jnp.sum(p, axis=-1, keepdims=True)     # exact softmax
        heads.append(jnp.dot(p, v[:, sl], preferred_element_type=jnp.float32))
    o = jnp.concatenate(heads, axis=-1)                # (Lq, D)
    return jnp.dot(o.astype(MM_DTYPE), wo, preferred_element_type=jnp.float32) + bo


def _self_attn(x, klen, wqkv, bqkv, wo, bo):
    """Single packed (L, D) @ (D, 3D) QKV projection."""
    qkv = jnp.dot(x.astype(MM_DTYPE), wqkv,
                  preferred_element_type=jnp.float32) + bqkv          # (L, 3D)
    return _mha_core(qkv[:, :D_MODEL], qkv[:, D_MODEL:2 * D_MODEL],
                     qkv[:, 2 * D_MODEL:], klen, wo, bo)


def _cross_attn(x, mem, mlen, wq, bq, wkv, bkv, wo, bo):
    """Query from x, packed (T, D) @ (D, 2D) KV projection from memory."""
    q = jnp.dot(x.astype(MM_DTYPE), wq, preferred_element_type=jnp.float32) + bq
    kv = jnp.dot(mem.astype(MM_DTYPE), wkv,
                 preferred_element_type=jnp.float32) + bkv            # (T, 2D)
    return _mha_core(q, kv[:, :D_MODEL], kv[:, D_MODEL:], mlen, wo, bo)


def _ffn(x, w1, b1, w2, b2):
    h = jnp.dot(x.astype(MM_DTYPE), w1, preferred_element_type=jnp.float32) + b1
    h = jnp.maximum(h, 0.0)
    return jnp.dot(h.astype(MM_DTYPE), w2, preferred_element_type=jnp.float32) + b2


# ----------------------------------------------------- fused encoder call ---


def _encoder_kernel(len_ref, feats_ref, emb_w, emb_b,
                    wqkv_a, bqkv_a, wo_a, bo_a,
                    w1_a, b1_a, w2_a, b2_a, ln_a,
                    an_g, an_b,
                    pconv_w, pconv_b, pout_w, pout_b,
                    enc_ref, alpha_ref):
    """embed + all encoder layers + after_norm + Cif alpha head, one batch row."""
    b = pl.program_id(0)
    klen = len_ref[b]
    T = feats_ref.shape[1]

    x = jnp.dot(feats_ref[0].astype(MM_DTYPE), emb_w[...],
                preferred_element_type=jnp.float32) + emb_b[...]      # (T, D)
    for li in range(N_ENC_LAYERS):                      # static layer loop
        xn = _ln(x, ln_a[li, 0], ln_a[li, 1])
        x = x + _self_attn(xn, klen, wqkv_a[li], bqkv_a[li], wo_a[li], bo_a[li])
        xn = _ln(x, ln_a[li, 2], ln_a[li, 3])
        x = x + _ffn(xn, w1_a[li], b1_a[li], w2_a[li], b2_a[li])
    x = _ln(x, an_g[...], an_b[...])
    enc_ref[0] = x

    # --- Cif predictor alpha head fused in (conv k=3 as one packed matmul) ---
    row = lax.broadcasted_iota(jnp.int32, (T, 1), 0)
    x_prev = jnp.where(row == 0, 0.0, pltpu.roll(x, shift=1, axis=0))
    x_next = jnp.where(row == T - 1, 0.0, pltpu.roll(x, shift=T - 1, axis=0))
    xcat = jnp.concatenate([x_prev, x, x_next], axis=-1)              # (T, 3D)
    conv = jnp.dot(xcat.astype(MM_DTYPE), pconv_w[...],
                   preferred_element_type=jnp.float32) + pconv_b[...]
    h = jnp.maximum(conv + x, 0.0)
    # alpha row produced directly lane-dense as (1, T): (1,D) x (T,D) contract D
    a = lax.dot_general(pout_w[...], h.astype(MM_DTYPE),
                        (((1,), (1,)), ((), ())),
                        preferred_element_type=jnp.float32) + pout_b[...]
    a = jax.nn.sigmoid(a)
    lane = lax.broadcasted_iota(jnp.int32, (1, T), 1)
    alpha_ref[0] = jnp.where(lane < klen, a, 0.0)


def encoder_predictor_forward(enc_p, pred_p, feats, feat_lens):
    B, T, Fin = feats.shape
    D = D_MODEL
    operands = [feats,
                enc_p['emb_w'], enc_p['emb_b'],
                enc_p['wqkv'], enc_p['bqkv'], enc_p['wo'], enc_p['bo'],
                enc_p['w1'], enc_p['b1'], enc_p['w2'], enc_p['b2'],
                enc_p['ln'], enc_p['an_g'], enc_p['an_b'],
                pred_p['wconv'], pred_p['bconv'], pred_p['wout'], pred_p['bout']]
    in_specs = [_batch_spec((1, T, Fin))] + [_rep_spec(o) for o in operands[1:]]

    per_layer = (2 * T * D * 3 * D + 4 * N_HEADS * T * T * D_HEAD
                 + 2 * T * D * D + 4 * T * D * D_FFN)
    flops = B * (2 * T * Fin * D + N_ENC_LAYERS * per_layer
                 + 2 * T * 3 * D * D + 2 * T * D)
    trans = B * (N_ENC_LAYERS * N_HEADS * T * T + T)
    out_bytes = B * T * D * 4 + B * T * 4

    enc_out, alphas = pl.pallas_call(
        _encoder_kernel,
        out_shape=(jax.ShapeDtypeStruct((B, T, D), jnp.float32),
                   jax.ShapeDtypeStruct((B, 1, T), jnp.float32)),
        grid_spec=pltpu.PrefetchScalarGridSpec(
            num_scalar_prefetch=1, grid=(B,),
            in_specs=in_specs,
            out_specs=[_batch_spec((1, T, D)), _batch_spec((1, 1, T))]),
        compiler_params=pltpu.CompilerParams(dimension_semantics=("parallel",)),
        cost_estimate=_cost(flops, trans, operands, out_bytes),
    )(feat_lens, *operands)
    return enc_out, alphas[:, 0, :]                     # (B, T, D), (B, T)


# ----------------------------------------------------- fused decoder call ---


def _decoder_kernel(tlen_ref, mlen_ref, tgt_ref, mem_ref,
                    s_wqkv_a, s_bqkv_a, s_wo_a, s_bo_a,
                    c_wq_a, c_bq_a, c_wkv_a, c_bkv_a, c_wo_a, c_bo_a,
                    w1_a, b1_a, w2_a, b2_a, ln_a,
                    an_g, an_b, out_w, out_b,
                    *rest, mode):
    """All decoder layers + after_norm + output projection + argmax OR
    fused label-smoothing KL, one batch row; logits never leave VMEM."""
    if mode == 'loss':
        ys_ref, out_ref = rest
    else:
        (out_ref,) = rest
    b = pl.program_id(0)
    tlen = tlen_ref[b]
    mlen = mlen_ref[b]
    x = tgt_ref[0]                                      # (L, D)
    mem = mem_ref[0]                                    # (T, D)

    for li in range(N_DEC_LAYERS):                      # static layer loop
        xn = _ln(x, ln_a[li, 0], ln_a[li, 1])
        x = x + _self_attn(xn, tlen, s_wqkv_a[li], s_bqkv_a[li],
                           s_wo_a[li], s_bo_a[li])
        xn = _ln(x, ln_a[li, 2], ln_a[li, 3])
        x = x + _cross_attn(xn, mem, mlen, c_wq_a[li], c_bq_a[li],
                            c_wkv_a[li], c_bkv_a[li], c_wo_a[li], c_bo_a[li])
        xn = _ln(x, ln_a[li, 4], ln_a[li, 5])
        x = x + _ffn(xn, w1_a[li], b1_a[li], w2_a[li], b2_a[li])

    xn = _ln(x, an_g[...], an_b[...])
    logits = jnp.dot(xn.astype(MM_DTYPE), out_w[...],
                     preferred_element_type=jnp.float32) + out_b[...]  # (L, V)
    L, V = logits.shape

    if mode == 'loss':
        t = ys_ref[0]                                   # (L, 1) int32
        m = jnp.max(logits, axis=-1, keepdims=True)
        z = logits - m
        lse = jnp.log(jnp.sum(jnp.exp(z), axis=-1, keepdims=True))
        logp = z - lse
        onehot = lax.broadcasted_iota(jnp.int32, (L, V), 1) == t
        logp_t = jnp.sum(jnp.where(onehot, logp, 0.0), axis=-1, keepdims=True)
        row_sum = jnp.sum(logp, axis=-1, keepdims=True)
        conf = 1.0 - LSM_WEIGHT
        low = LSM_WEIGHT / (V - 1)
        ent = conf * math.log(conf) + (V - 1) * low * math.log(low)
        kl = ent - conf * logp_t - low * (row_sum - logp_t)            # (L, 1)
        kl = jnp.where(t != IGNORE_ID, kl, 0.0)
        out_ref[0] = jnp.sum(kl, axis=0, keepdims=True)                # (1, 1)
    else:
        # argmax without materializing logits in HBM (first-max index).
        maxv = jnp.max(logits, axis=-1, keepdims=True)
        lane = lax.broadcasted_iota(jnp.int32, (L, V), 1)
        idx = jnp.min(jnp.where(logits == maxv, lane, V), axis=-1,
                      keepdims=True)                                   # (L, 1)
        out_ref[0] = idx


def decoder_call(dec_p, tgt_emb, memory, tgt_lens, mem_lens, ys=None,
                 mode='loss'):
    B, L, D = tgt_emb.shape
    T = memory.shape[1]
    operands = [tgt_emb, memory,
                dec_p['s_wqkv'], dec_p['s_bqkv'], dec_p['s_wo'], dec_p['s_bo'],
                dec_p['c_wq'], dec_p['c_bq'], dec_p['c_wkv'], dec_p['c_bkv'],
                dec_p['c_wo'], dec_p['c_bo'],
                dec_p['w1'], dec_p['b1'], dec_p['w2'], dec_p['b2'],
                dec_p['ln'], dec_p['an_g'], dec_p['an_b'],
                dec_p['out_w'], dec_p['out_b']]
    in_specs = ([_batch_spec((1, L, D)), _batch_spec((1, T, D))]
                + [_rep_spec(o) for o in operands[2:]])
    if mode == 'loss':
        operands.append(ys.reshape(B, L, 1).astype(jnp.int32))
        in_specs.append(_batch_spec((1, L, 1)))
        out_shape = jax.ShapeDtypeStruct((B, 1, 1), jnp.float32)
        out_spec = _batch_spec((1, 1, 1))
        out_bytes = B * 4
    else:
        out_shape = jax.ShapeDtypeStruct((B, L, 1), jnp.int32)
        out_spec = _batch_spec((1, L, 1))
        out_bytes = B * L * 4

    per_layer = (2 * L * D * 3 * D + 4 * N_HEADS * L * L * D_HEAD
                 + 2 * L * D * D                       # self-attn
                 + 2 * L * D * D + 2 * T * D * 2 * D
                 + 4 * N_HEADS * L * T * D_HEAD + 2 * L * D * D  # cross-attn
                 + 4 * L * D * D_FFN)
    flops = B * (N_DEC_LAYERS * per_layer + 2 * L * D * VOCAB)
    trans = B * (N_DEC_LAYERS * N_HEADS * (L * L + L * T) + L * VOCAB)

    out = pl.pallas_call(
        functools.partial(_decoder_kernel, mode=mode),
        out_shape=out_shape,
        grid_spec=pltpu.PrefetchScalarGridSpec(
            num_scalar_prefetch=2, grid=(B,),
            in_specs=in_specs, out_specs=out_spec),
        compiler_params=pltpu.CompilerParams(dimension_semantics=("parallel",)),
        cost_estimate=_cost(flops, trans, operands, out_bytes),
    )(tgt_lens, mem_lens, *operands)
    if mode == 'loss':
        return out[:, 0, 0]                             # (B,)
    return out[:, :, 0]                                 # (B, L) int32


# ----------------------------------------------------------------- helpers --


def make_non_pad_mask(lengths, max_len):
    return jnp.arange(max_len)[None, :] < lengths[:, None]


def lfr(speech, speech_lengths, m=LFR_M, n=LFR_N):
    """Low frame rate: stack m frames every n frames (simplified wenet LFR)."""
    # TODO(synk): wenet LFR pads per-utterance by its true length; here we pad
    # the padded batch tensor uniformly (lengths handled via the masks anyway).
    B, T, F = speech.shape
    t_lfr = math.ceil(T / n)
    left_pad = (m - 1) // 2
    needed = left_pad + (t_lfr - 1) * n + m
    right_pad = max(needed - left_pad - T, 0)
    x = jnp.concatenate(
        [jnp.repeat(speech[:, :1], left_pad, axis=1),
         speech,
         jnp.repeat(speech[:, -1:], right_pad, axis=1)], axis=1)
    feats = jnp.stack(
        [x[:, i * n:i * n + m].reshape(B, m * F) for i in range(t_lfr)], axis=1)
    lfr_lens = (speech_lengths + n - 1) // n
    return feats, lfr_lens


def add_eos_only(text, text_lengths):
    """ys_out of wenet add_sos_eos: text + <eos>, padded with ignore_id."""
    B, L = text.shape
    Lo = L + 1
    text_ext = jnp.pad(text, ((0, 0), (0, 1)), constant_values=IGNORE_ID)
    pos = jnp.arange(Lo)[None, :]
    ys = jnp.where(pos < text_lengths[:, None], text_ext,
                   jnp.where(pos == text_lengths[:, None], EOS, IGNORE_ID))
    return ys.astype(jnp.int32)


def cif(hidden, alphas, threshold, max_len):
    """Continuous integrate-and-fire."""
    # TODO(synk): inherently sequential recurrence -> lax.scan (not a Pallas hot path).
    B, T, D = hidden.shape

    def step(carry, inp):
        integrate, frame = carry
        alpha, h = inp
        dist_comp = 1.0 - integrate
        integrate = integrate + alpha
        fire_place = integrate >= threshold
        fires_out = integrate
        integrate = jnp.where(fire_place, integrate - threshold, integrate)
        cur = jnp.where(fire_place, dist_comp, alpha)
        remainds = alpha - cur
        frame = frame + cur[:, None] * h
        frames_out = frame
        frame = jnp.where(fire_place[:, None], remainds[:, None] * h, frame)
        return (integrate, frame), (fires_out, frames_out, fire_place)

    (_, _), (fires, frames, fire_flags) = lax.scan(
        step,
        (jnp.zeros((B,), jnp.float32), jnp.zeros((B, D), jnp.float32)),
        (jnp.swapaxes(alphas, 0, 1), jnp.swapaxes(hidden, 0, 1)),
    )
    fires = jnp.swapaxes(fires, 0, 1)               # (B, T)
    frames = jnp.swapaxes(frames, 0, 1)             # (B, T, D)
    fire_flags = jnp.swapaxes(fire_flags, 0, 1)     # (B, T)

    idx = jnp.cumsum(fire_flags.astype(jnp.int32), axis=1) - 1
    safe_idx = jnp.where(fire_flags & (idx < max_len), idx, max_len)
    b_idx = jnp.broadcast_to(jnp.arange(B)[:, None], (B, T))
    out = jnp.zeros((B, max_len + 1, D), jnp.float32)
    out = out.at[b_idx.reshape(-1), safe_idx.reshape(-1)].set(frames.reshape(-1, D))
    return out[:, :max_len], fires


def sampler(params, rng_key, pred_tokens, ys_pad, ys_pad_lens,
            pre_acoustic_embeds):
    """Device-side sampler (no host sync): torch.randperm replaced by a random
    ranking of valid positions with jax.random; the no-grad decoder argmax is
    produced by the fused decoder kernel."""
    B, L = ys_pad.shape
    tgt_mask = make_non_pad_mask(ys_pad_lens, L)                       # (B, L)
    ys_masked = ys_pad * tgt_mask.astype(ys_pad.dtype)
    ys_pad_embed = jnp.take(params['embed'], ys_masked, axis=0)

    same_num = jnp.sum(((pred_tokens == ys_masked) & tgt_mask).astype(jnp.int32),
                       axis=1)
    target_num = jnp.floor(
        (ys_pad_lens - same_num).astype(jnp.float32) * SAMPLING_RATIO
    ).astype(jnp.int32)

    scores = jax.random.uniform(rng_key, (B, L))
    scores = jnp.where(tgt_mask, scores, 2.0)        # padded positions never chosen
    ranks = jnp.argsort(jnp.argsort(scores, axis=-1), axis=-1)
    drop = ranks < target_num[:, None]               # positions replaced by GT embeds
    input_mask = (~drop) & tgt_mask                  # 1 -> keep acoustic embed
    sematic = jnp.where(input_mask[..., None], pre_acoustic_embeds, ys_pad_embed)
    return sematic * tgt_mask[..., None].astype(jnp.float32)


# -------------------------------------------------------------- top-level ---


def paraformer_forward(params, speech, speech_lengths, text, text_lengths, rng_key):
    features, features_lens = lfr(speech, speech_lengths)
    features_lens = features_lens.astype(jnp.int32)

    # fused encoder + predictor alpha head (1 pallas_call)
    encoder_out, alphas = encoder_predictor_forward(
        params['encoder'], params['predictor'], features, features_lens)

    # add_eos=True
    ys_pad = add_eos_only(text, text_lengths)
    ys_pad_lens = (text_lengths + 1).astype(jnp.int32)

    # predictor tail: alpha scaling + CIF (tiny, sequential -> plain XLA)
    token_num = jnp.sum(alphas, axis=-1)
    target_length = jnp.sum((ys_pad != IGNORE_ID).astype(jnp.float32), axis=-1)
    alphas_scaled = alphas * (target_length / jnp.maximum(token_num, 1e-6))[:, None]
    max_len = ys_pad.shape[1]
    acoustic_embd, _ = cif(encoder_out, alphas_scaled, 1.0, max_len)
    # TODO(synk): wenet Cif tail_threshold handling omitted (training path).

    # sampler: fused decoder pass emitting argmax tokens only (1 pallas_call)
    pred_tokens = decoder_call(params['decoder'], acoustic_embd, encoder_out,
                               ys_pad_lens, features_lens, mode='argmax')
    sematic = sampler(params, rng_key, pred_tokens, ys_pad, ys_pad_lens,
                      acoustic_embd)

    # final decoder pass with fused label-smoothing KL (1 pallas_call)
    kl_per_utt = decoder_call(params['decoder'], sematic, encoder_out,
                              ys_pad_lens, features_lens, ys=ys_pad, mode='loss')
    B = speech.shape[0]
    loss_decoder = jnp.sum(kl_per_utt) / B           # normalize_length=False

    loss_ctc = None  # ctc_weight == 0.0 -> CTC branch not executed
    # TODO(synk): CTC forward-backward loss not implemented (ctc_weight=0 path).

    loss_quantity = jnp.sum(jnp.abs(token_num - ys_pad_lens.astype(jnp.float32)))
    loss_quantity = loss_quantity / jnp.sum(ys_pad_lens).astype(jnp.float32)
    loss = loss_decoder + loss_quantity
    return {'loss': loss, 'loss_ctc': loss_ctc,
            'loss_decoder': loss_decoder, 'loss_quantity': loss_quantity}


# ------------------------------------------------------------ param init ----


def init_params(key):
    """PyTorch-like parameter layout (Linear (in,out), Conv1d (out,in,k))."""
    keys = iter(jax.random.split(key, 128))

    def lin(din, dout, scale=0.1):
        kw, kb = jax.random.split(next(keys))
        return {'w': scale * jax.random.normal(kw, (din, dout), jnp.float32),
                'b': scale * jax.random.normal(kb, (dout,), jnp.float32)}

    def lnp(d):
        return {'g': jnp.ones((d,), jnp.float32), 'b': jnp.zeros((d,), jnp.float32)}

    def mha_params():
        return {'q': lin(D_MODEL, D_MODEL), 'k': lin(D_MODEL, D_MODEL),
                'v': lin(D_MODEL, D_MODEL), 'o': lin(D_MODEL, D_MODEL)}

    def enc_layer():
        return {'self_attn': mha_params(),
                'ffn': {'w1': lin(D_MODEL, D_FFN), 'w2': lin(D_FFN, D_MODEL)},
                'ln1': lnp(D_MODEL), 'ln2': lnp(D_MODEL)}

    def dec_layer():
        return {'self_attn': mha_params(), 'src_attn': mha_params(),
                'ffn': {'w1': lin(D_MODEL, D_FFN), 'w2': lin(D_FFN, D_MODEL)},
                'ln1': lnp(D_MODEL), 'ln2': lnp(D_MODEL), 'ln3': lnp(D_MODEL)}

    return {
        'encoder': {'embed': lin(FEAT_DIM * LFR_M, D_MODEL),
                    'layers': [enc_layer() for _ in range(N_ENC_LAYERS)],
                    'after_norm': lnp(D_MODEL)},
        'decoder': {'layers': [dec_layer() for _ in range(N_DEC_LAYERS)],
                    'after_norm': lnp(D_MODEL),
                    'output': lin(D_MODEL, VOCAB)},
        'predictor': {
            # TODO(synk): wenet Cif uses a depthwise conv; a dense k=3 conv is
            # used here, consistent with the synthetic parameterisation.
            'conv_w': 0.1 * jax.random.normal(next(keys), (D_MODEL, D_MODEL, 3),
                                              jnp.float32),
            'conv_b': 0.1 * jax.random.normal(next(keys), (D_MODEL,), jnp.float32),
            'out': lin(D_MODEL, 1)},
        'embed': 0.1 * jax.random.normal(next(keys), (VOCAB, D_MODEL), jnp.float32),
    }


def pack_params(raw):
    """Re-lay-out PyTorch-style weights into kernel-friendly packed tensors:
    packed QKV / KV / conv-tap matrices, layer-stacked weight arrays (one per
    weight kind -> few DMA descriptors per call), bf16 matmul weights,
    f32 LN params / biases."""
    f32 = jnp.float32

    def vec(x):
        return x.reshape(1, -1).astype(f32)

    def stack(xs):
        return jnp.stack(xs)

    def self_attn_pack(layers, key):
        wqkv = stack([jnp.concatenate([l[key]['q']['w'], l[key]['k']['w'],
                                       l[key]['v']['w']], axis=1)
                      for l in layers]).astype(MM_DTYPE)              # (NL, D, 3D)
        bqkv = stack([jnp.concatenate([l[key]['q']['b'], l[key]['k']['b'],
                                       l[key]['v']['b']]).reshape(1, -1)
                      for l in layers]).astype(f32)                   # (NL, 1, 3D)
        wo = stack([l[key]['o']['w'] for l in layers]).astype(MM_DTYPE)
        bo = stack([vec(l[key]['o']['b']) for l in layers]).astype(f32)
        return wqkv, bqkv, wo, bo

    def ffn_pack(layers):
        w1 = stack([l['ffn']['w1']['w'] for l in layers]).astype(MM_DTYPE)
        b1 = stack([vec(l['ffn']['w1']['b']) for l in layers]).astype(f32)
        w2 = stack([l['ffn']['w2']['w'] for l in layers]).astype(MM_DTYPE)
        b2 = stack([vec(l['ffn']['w2']['b']) for l in layers]).astype(f32)
        return w1, b1, w2, b2

    def ln_pack(layers, names):
        return stack([stack([vec(l[n]['g']) for gb in [0] for n in names
                             for vecx in [0]][:0] +
                            [v for n in names for v in (vec(l[n]['g']),
                                                        vec(l[n]['b']))])
                      for l in layers]).astype(f32)                   # (NL, 2k, 1, D)

    # ---- encoder ----
    el = raw['encoder']['layers']
    e_wqkv, e_bqkv, e_wo, e_bo = self_attn_pack(el, 'self_attn')
    e_w1, e_b1, e_w2, e_b2 = ffn_pack(el)
    e_ln = ln_pack(el, ['ln1', 'ln2'])                                # (NL,4,1,D)
    encoder = {
        'emb_w': raw['encoder']['embed']['w'].astype(MM_DTYPE),
        'emb_b': vec(raw['encoder']['embed']['b']),
        'wqkv': e_wqkv, 'bqkv': e_bqkv, 'wo': e_wo, 'bo': e_bo,
        'w1': e_w1, 'b1': e_b1, 'w2': e_w2, 'b2': e_b2, 'ln': e_ln,
        'an_g': vec(raw['encoder']['after_norm']['g']),
        'an_b': vec(raw['encoder']['after_norm']['b']),
    }

    # ---- decoder ----
    dl = raw['decoder']['layers']
    s_wqkv, s_bqkv, s_wo, s_bo = self_attn_pack(dl, 'self_attn')
    c_wq = stack([l['src_attn']['q']['w'] for l in dl]).astype(MM_DTYPE)
    c_bq = stack([vec(l['src_attn']['q']['b']) for l in dl]).astype(f32)
    c_wkv = stack([jnp.concatenate([l['src_attn']['k']['w'],
                                    l['src_attn']['v']['w']], axis=1)
                   for l in dl]).astype(MM_DTYPE)                     # (NL, D, 2D)
    c_bkv = stack([jnp.concatenate([l['src_attn']['k']['b'],
                                    l['src_attn']['v']['b']]).reshape(1, -1)
                   for l in dl]).astype(f32)
    c_wo = stack([l['src_attn']['o']['w'] for l in dl]).astype(MM_DTYPE)
    c_bo = stack([vec(l['src_attn']['o']['b']) for l in dl]).astype(f32)
    d_w1, d_b1, d_w2, d_b2 = ffn_pack(dl)
    d_ln = ln_pack(dl, ['ln1', 'ln2', 'ln3'])                         # (NL,6,1,D)
    decoder = {
        's_wqkv': s_wqkv, 's_bqkv': s_bqkv, 's_wo': s_wo, 's_bo': s_bo,
        'c_wq': c_wq, 'c_bq': c_bq, 'c_wkv': c_wkv, 'c_bkv': c_bkv,
        'c_wo': c_wo, 'c_bo': c_bo,
        'w1': d_w1, 'b1': d_b1, 'w2': d_w2, 'b2': d_b2, 'ln': d_ln,
        'an_g': vec(raw['decoder']['after_norm']['g']),
        'an_b': vec(raw['decoder']['after_norm']['b']),
        'out_w': raw['decoder']['output']['w'].astype(MM_DTYPE),
        'out_b': vec(raw['decoder']['output']['b']),
    }

    # ---- predictor: conv taps packed into one (3*Din, Dout) matrix ----
    cw = raw['predictor']['conv_w']                                   # (Dout,Din,3)
    wconv = jnp.concatenate([cw[:, :, 0].T, cw[:, :, 1].T, cw[:, :, 2].T],
                            axis=0).astype(MM_DTYPE)                  # (3D, D)
    predictor = {
        'wconv': wconv,
        'bconv': vec(raw['predictor']['conv_b']),
        'wout': raw['predictor']['out']['w'].T.astype(MM_DTYPE),      # (1, D)
        'bout': raw['predictor']['out']['b'].reshape(1, 1).astype(f32),
    }

    return {'encoder': encoder, 'decoder': decoder, 'predictor': predictor,
            'embed': raw['embed'].astype(f32)}


# ----------------------------------------------------------------- main -----

if __name__ == "__main__":
    key = jax.random.PRNGKey(0)
    pkey, skey, tkey, mkey = jax.random.split(key, 4)
    params = pack_params(init_params(pkey))

    B, T = 2, 16
    speech = jax.random.normal(skey, (B, T, FEAT_DIM), jnp.float32)
    speech_lengths = jnp.array([16, 12], jnp.int32)

    L_txt = 4
    text_lengths = jnp.array([4, 3], jnp.int32)
    toks = jax.random.randint(tkey, (B, L_txt), 3, VOCAB)
    text = jnp.where(jnp.arange(L_txt)[None, :] < text_lengths[:, None],
                     toks, IGNORE_ID).astype(jnp.int32)

    fwd = jax.jit(paraformer_forward)
    out = fwd(params, speech, speech_lengths, text, text_lengths, mkey)
    jax.block_until_ready(out['loss'])
    assert bool(jnp.isfinite(out['loss']))
    assert bool(jnp.isfinite(out['loss_decoder']))
    assert bool(jnp.isfinite(out['loss_quantity']))
    print("KERNEL_OK")
</pallas_src>

<mosaic_0001>
module attributes {stable_mosaic.version = 11 : i64} {
  func.func @_encoder_kernel(%arg0: i32, %arg1: memref<2xi32, #tpu.memory_space<smem>>, %arg2: memref<1x8x24xf32, #tpu.memory_space<vmem>>, %arg3: memref<24x32xbf16, #tpu.memory_space<vmem>>, %arg4: memref<1x32xf32, #tpu.memory_space<vmem>>, %arg5: memref<2x32x96xbf16, #tpu.memory_space<vmem>>, %arg6: memref<2x1x96xf32, #tpu.memory_space<vmem>>, %arg7: memref<2x32x32xbf16, #tpu.memory_space<vmem>>, %arg8: memref<2x1x32xf32, #tpu.memory_space<vmem>>, %arg9: memref<2x32x64xbf16, #tpu.memory_space<vmem>>, %arg10: memref<2x1x64xf32, #tpu.memory_space<vmem>>, %arg11: memref<2x64x32xbf16, #tpu.memory_space<vmem>>, %arg12: memref<2x1x32xf32, #tpu.memory_space<vmem>>, %arg13: memref<2x4x1x32xf32, #tpu.memory_space<vmem>>, %arg14: memref<1x32xf32, #tpu.memory_space<vmem>>, %arg15: memref<1x32xf32, #tpu.memory_space<vmem>>, %arg16: memref<96x32xbf16, #tpu.memory_space<vmem>>, %arg17: memref<1x32xf32, #tpu.memory_space<vmem>>, %arg18: memref<1x32xbf16, #tpu.memory_space<vmem>>, %arg19: memref<1x1xf32, #tpu.memory_space<vmem>>, %arg20: memref<1x8x32xf32, #tpu.memory_space<vmem>>, %arg21: memref<1x1x8xf32, #tpu.memory_space<vmem>>) attributes {dimension_semantics = [#tpu.dimension_semantics<parallel>], iteration_bounds = array<i64: 2>, scalar_prefetch = 1 : i64, scratch_operands = 0 : i64, tpu.core_type = #tpu.core_type<tc>, window_params = [{transform_indices = @transform_0, window_bounds = array<i64: 1, 8, 24>}, {pipeline_mode = #tpu.pipeline_mode<synchronous>, transform_indices = @transform_1, window_bounds = array<i64: 24, 32>}, {pipeline_mode = #tpu.pipeline_mode<synchronous>, transform_indices = @transform_2, window_bounds = array<i64: 1, 32>}, {pipeline_mode = #tpu.pipeline_mode<synchronous>, transform_indices = @transform_3, window_bounds = array<i64: 2, 32, 96>}, {pipeline_mode = #tpu.pipeline_mode<synchronous>, transform_indices = @transform_4, window_bounds = array<i64: 2, 1, 96>}, {pipeline_mode = #tpu.pipeline_mode<synchronous>, transform_indices = @transform_5, window_bounds = array<i64: 2, 32, 32>}, {pipeline_mode = #tpu.pipeline_mode<synchronous>, transform_indices = @transform_6, window_bounds = array<i64: 2, 1, 32>}, {pipeline_mode = #tpu.pipeline_mode<synchronous>, transform_indices = @transform_7, window_bounds = array<i64: 2, 32, 64>}, {pipeline_mode = #tpu.pipeline_mode<synchronous>, transform_indices = @transform_8, window_bounds = array<i64: 2, 1, 64>}, {pipeline_mode = #tpu.pipeline_mode<synchronous>, transform_indices = @transform_9, window_bounds = array<i64: 2, 64, 32>}, {pipeline_mode = #tpu.pipeline_mode<synchronous>, transform_indices = @transform_10, window_bounds = array<i64: 2, 1, 32>}, {pipeline_mode = #tpu.pipeline_mode<synchronous>, transform_indices = @transform_11, window_bounds = array<i64: 2, 4, 1, 32>}, {pipeline_mode = #tpu.pipeline_mode<synchronous>, transform_indices = @transform_12, window_bounds = array<i64: 1, 32>}, {pipeline_mode = #tpu.pipeline_mode<synchronous>, transform_indices = @transform_13, window_bounds = array<i64: 1, 32>}, {pipeline_mode = #tpu.pipeline_mode<synchronous>, transform_indices = @transform_14, window_bounds = array<i64: 96, 32>}, {pipeline_mode = #tpu.pipeline_mode<synchronous>, transform_indices = @transform_15, window_bounds = array<i64: 1, 32>}, {pipeline_mode = #tpu.pipeline_mode<synchronous>, transform_indices = @transform_16, window_bounds = array<i64: 1, 32>}, {pipeline_mode = #tpu.pipeline_mode<synchronous>, transform_indices = @transform_17, window_bounds = array<i64: 1, 1>}, {transform_indices = @transform_18, window_bounds = array<i64: 1, 8, 32>}, {transform_indices = @transform_19, window_bounds = array<i64: 1, 1, 8>}]} {
    %0 = arith.index_cast %arg0 : i32 to index
    %1 = memref.load %arg1[%0] : memref<2xi32, #tpu.memory_space<smem>>
    %c0 = arith.constant 0 : index
    %c0_0 = arith.constant 0 : index
    %c0_1 = arith.constant 0 : index
    %2 = vector.load %arg2[%c0, %c0_0, %c0_1] : memref<1x8x24xf32, #tpu.memory_space<vmem>>, vector<1x8x24xf32>
    %3 = vector.shape_cast %2 : vector<1x8x24xf32> to vector<8x24xf32>
    %4 = arith.truncf %3 : vector<8x24xf32> to vector<8x24xbf16>
    %c0_2 = arith.constant 0 : index
    %c0_3 = arith.constant 0 : index
    %5 = vector.load %arg3[%c0_2, %c0_3] : memref<24x32xbf16, #tpu.memory_space<vmem>>, vector<24x32xbf16>
    %cst = arith.constant dense<0.000000e+00> : vector<8x32xf32>
    %6 = tpu.matmul %4, %5, %cst {dimension_numbers = #tpu.dot_dimension_numbers<[1], [0], [0], [1], [0, 0, 1, 1], [], []>} : vector<8x24xbf16>, vector<24x32xbf16>, vector<8x32xf32> -> vector<8x32xf32>
    %c0_4 = arith.constant 0 : index
    %c0_5 = arith.constant 0 : index
    %7 = vector.load %arg4[%c0_4, %c0_5] : memref<1x32xf32, #tpu.memory_space<vmem>>, vector<1x32xf32>
    %8 = vector.broadcast %7 : vector<1x32xf32> to vector<8x32xf32>
    %9 = arith.addf %6, %8 : vector<8x32xf32>
    %c0_6 = arith.constant 0 : index
    %c0_7 = arith.constant 0 : index
    %c0_8 = arith.constant 0 : index
    %c0_9 = arith.constant 0 : index
    %10 = vector.load %arg13[%c0_6, %c0_7, %c0_8, %c0_9] : memref<2x4x1x32xf32, #tpu.memory_space<vmem>>, vector<1x1x1x32xf32>
    %11 = vector.shape_cast %10 : vector<1x1x1x32xf32> to vector<1x32xf32>
    %c0_10 = arith.constant 0 : index
    %c1 = arith.constant 1 : index
    %c0_11 = arith.constant 0 : index
    %c0_12 = arith.constant 0 : index
    %12 = vector.load %arg13[%c0_10, %c1, %c0_11, %c0_12] : memref<2x4x1x32xf32, #tpu.memory_space<vmem>>, vector<1x1x1x32xf32>
    %13 = vector.shape_cast %12 : vector<1x1x1x32xf32> to vector<1x32xf32>
    %cst_13 = arith.constant dense<0.000000e+00> : vector<8xf32>
    %14 = vector.multi_reduction <add>, %9, %cst_13 [1] : vector<8x32xf32> to vector<8xf32>
    %15 = vector.shape_cast %14 : vector<8xf32> to vector<8x1xf32>
    %cst_14 = arith.constant 3.200000e+01 : f32
    %16 = vector.broadcast %cst_14 : f32 to vector<8x1xf32>
    %17 = arith.divf %15, %16 : vector<8x1xf32>
    %18 = vector.broadcast %17 : vector<8x1xf32> to vector<8x32xf32>
    %19 = arith.subf %9, %18 : vector<8x32xf32>
    %20 = arith.mulf %19, %19 : vector<8x32xf32>
    %cst_15 = arith.constant dense<0.000000e+00> : vector<8xf32>
    %21 = vector.multi_reduction <add>, %20, %cst_15 [1] : vector<8x32xf32> to vector<8xf32>
    %22 = vector.shape_cast %21 : vector<8xf32> to vector<8x1xf32>
    %cst_16 = arith.constant 3.200000e+01 : f32
    %23 = vector.broadcast %cst_16 : f32 to vector<8x1xf32>
    %24 = arith.divf %22, %23 : vector<8x1xf32>
    %25 = vector.broadcast %17 : vector<8x1xf32> to vector<8x32xf32>
    %26 = arith.subf %9, %25 : vector<8x32xf32>
    %cst_17 = arith.constant 9.99999974E-6 : f32
    %27 = vector.broadcast %cst_17 : f32 to vector<8x1xf32>
    %28 = arith.addf %24, %27 : vector<8x1xf32>
    %29 = math.rsqrt %28 : vector<8x1xf32>
    %30 = vector.broadcast %29 : vector<8x1xf32> to vector<8x32xf32>
    %31 = arith.mulf %26, %30 : vector<8x32xf32>
    %32 = vector.broadcast %11 : vector<1x32xf32> to vector<8x32xf32>
    %33 = arith.mulf %31, %32 : vector<8x32xf32>
    %34 = vector.broadcast %13 : vector<1x32xf32> to vector<8x32xf32>
    %35 = arith.addf %33, %34 : vector<8x32xf32>
    %c0_18 = arith.constant 0 : index
    %c0_19 = arith.constant 0 : index
    %c0_20 = arith.constant 0 : index
    %36 = vector.load %arg5[%c0_18, %c0_19, %c0_20] : memref<2x32x96xbf16, #tpu.memory_space<vmem>>, vector<1x32x96xbf16>
    %37 = vector.shape_cast %36 : vector<1x32x96xbf16> to vector<32x96xbf16>
    %c0_21 = arith.constant 0 : index
    %c0_22 = arith.constant 0 : index
    %c0_23 = arith.constant 0 : index
    %38 = vector.load %arg6[%c0_21, %c0_22, %c0_23] : memref<2x1x96xf32, #tpu.memory_space<vmem>>, vector<1x1x96xf32>
    %39 = vector.shape_cast %38 : vector<1x1x96xf32> to vector<1x96xf32>
    %c0_24 = arith.constant 0 : index
    %c0_25 = arith.constant 0 : index
    %c0_26 = arith.constant 0 : index
    %40 = vector.load %arg7[%c0_24, %c0_25, %c0_26] : memref<2x32x32xbf16, #tpu.memory_space<vmem>>, vector<1x32x32xbf16>
    %41 = vector.shape_cast %40 : vector<1x32x32xbf16> to vector<32x32xbf16>
    %c0_27 = arith.constant 0 : index
    %c0_28 = arith.constant 0 : index
    %c0_29 = arith.constant 0 : index
    %42 = vector.load %arg8[%c0_27, %c0_28, %c0_29] : memref<2x1x32xf32, #tpu.memory_space<vmem>>, vector<1x1x32xf32>
    %43 = vector.shape_cast %42 : vector<1x1x32xf32> to vector<1x32xf32>
    %44 = arith.truncf %35 : vector<8x32xf32> to vector<8x32xbf16>
    %cst_30 = arith.constant dense<0.000000e+00> : vector<8x96xf32>
    %45 = tpu.matmul %44, %37, %cst_30 {dimension_numbers = #tpu.dot_dimension_numbers<[1], [0], [0], [1], [0, 0, 1, 1], [], []>} : vector<8x32xbf16>, vector<32x96xbf16>, vector<8x96xf32> -> vector<8x96xf32>
    %46 = vector.broadcast %39 : vector<1x96xf32> to vector<8x96xf32>
    %47 = arith.addf %45, %46 : vector<8x96xf32>
    %48 = vector.extract_strided_slice %47 {offsets = [0, 0], sizes = [8, 32], strides = [1, 1]} : vector<8x96xf32> to vector<8x32xf32>
    %49 = vector.extract_strided_slice %47 {offsets = [0, 32], sizes = [8, 32], strides = [1, 1]} : vector<8x96xf32> to vector<8x32xf32>
    %50 = vector.extract_strided_slice %47 {offsets = [0, 64], sizes = [8, 32], strides = [1, 1]} : vector<8x96xf32> to vector<8x32xf32>
    %51 = tpu.iota {dimensions = array<i32: 1>} : vector<8x8xi32>
    %52 = vector.broadcast %1 : i32 to vector<8x8xi32>
    %53 = arith.cmpi slt, %51, %52 : vector<8x8xi32>
    %cst_31 = arith.constant 0.000000e+00 : f32
    %cst_32 = arith.constant -1.000000e+09 : f32
    %54 = vector.broadcast %cst_31 : f32 to vector<8x8xf32>
    %55 = vector.broadcast %cst_32 : f32 to vector<8x8xf32>
    %56 = arith.select %53, %54, %55 : vector<8x8xi1>, vector<8x8xf32>
    %57 = vector.extract_strided_slice %48 {offsets = [0, 0], sizes = [8, 8], strides = [1, 1]} : vector<8x32xf32> to vector<8x8xf32>
    %58 = vector.extract_strided_slice %49 {offsets = [0, 0], sizes = [8, 8], strides = [1, 1]} : vector<8x32xf32> to vector<8x8xf32>
    %cst_33 = arith.constant dense<0.000000e+00> : vector<8x8xf32>
    %59 = tpu.matmul %57, %58, %cst_33 {dimension_numbers = #tpu.dot_dimension_numbers<[1], [1], [0], [0], [0, 0, 1, 0], [], []>} : vector<8x8xf32>, vector<8x8xf32>, vector<8x8xf32> -> vector<8x8xf32>
    %cst_34 = arith.constant 0.353553385 : f32
    %60 = vector.broadcast %cst_34 : f32 to vector<8x8xf32>
    %61 = arith.mulf %59, %60 : vector<8x8xf32>
    %62 = arith.addf %61, %56 : vector<8x8xf32>
    %cst_35 = arith.constant dense<0xFF800000> : vector<8xf32>
    %63 = vector.multi_reduction <maximumf>, %62, %cst_35 [1] : vector<8x8xf32> to vector<8xf32>
    %64 = vector.shape_cast %63 : vector<8xf32> to vector<8x1xf32>
    %65 = vector.broadcast %64 : vector<8x1xf32> to vector<8x8xf32>
    %66 = arith.subf %62, %65 : vector<8x8xf32>
    %67 = math.exp %66 : vector<8x8xf32>
    %cst_36 = arith.constant dense<0.000000e+00> : vector<8xf32>
    %68 = vector.multi_reduction <add>, %67, %cst_36 [1] : vector<8x8xf32> to vector<8xf32>
    %69 = vector.shape_cast %68 : vector<8xf32> to vector<8x1xf32>
    %70 = vector.broadcast %69 : vector<8x1xf32> to vector<8x8xf32>
    %71 = arith.divf %67, %70 : vector<8x8xf32>
    %72 = vector.extract_strided_slice %50 {offsets = [0, 0], sizes = [8, 8], strides = [1, 1]} : vector<8x32xf32> to vector<8x8xf32>
    %cst_37 = arith.constant dense<0.000000e+00> : vector<8x8xf32>
    %73 = tpu.matmul %71, %72, %cst_37 {dimension_numbers = #tpu.dot_dimension_numbers<[1], [0], [0], [1], [0, 0, 1, 1], [], []>} : vector<8x8xf32>, vector<8x8xf32>, vector<8x8xf32> -> vector<8x8xf32>
    %74 = vector.extract_strided_slice %48 {offsets = [0, 8], sizes = [8, 8], strides = [1, 1]} : vector<8x32xf32> to vector<8x8xf32>
    %75 = vector.extract_strided_slice %49 {offsets = [0, 8], sizes = [8, 8], strides = [1, 1]} : vector<8x32xf32> to vector<8x8xf32>
    %cst_38 = arith.constant dense<0.000000e+00> : vector<8x8xf32>
    %76 = tpu.matmul %74, %75, %cst_38 {dimension_numbers = #tpu.dot_dimension_numbers<[1], [1], [0], [0], [0, 0, 1, 0], [], []>} : vector<8x8xf32>, vector<8x8xf32>, vector<8x8xf32> -> vector<8x8xf32>
    %cst_39 = arith.constant 0.353553385 : f32
    %77 = vector.broadcast %cst_39 : f32 to vector<8x8xf32>
    %78 = arith.mulf %76, %77 : vector<8x8xf32>
    %79 = arith.addf %78, %56 : vector<8x8xf32>
    %cst_40 = arith.constant dense<0xFF800000> : vector<8xf32>
    %80 = vector.multi_reduction <maximumf>, %79, %cst_40 [1] : vector<8x8xf32> to vector<8xf32>
    %81 = vector.shape_cast %80 : vector<8xf32> to vector<8x1xf32>
    %82 = vector.broadcast %81 : vector<8x1xf32> to vector<8x8xf32>
    %83 = arith.subf %79, %82 : vector<8x8xf32>
    %84 = math.exp %83 : vector<8x8xf32>
    %cst_41 = arith.constant dense<0.000000e+00> : vector<8xf32>
    %85 = vector.multi_reduction <add>, %84, %cst_41 [1] : vector<8x8xf32> to vector<8xf32>
    %86 = vector.shape_cast %85 : vector<8xf32> to vector<8x1xf32>
    %87 = vector.broadcast %86 : vector<8x1xf32> to vector<8x8xf32>
    %88 = arith.divf %84, %87 : vector<8x8xf32>
    %89 = vector.extract_strided_slice %50 {offsets = [0, 8], sizes = [8, 8], strides = [1, 1]} : vector<8x32xf32> to vector<8x8xf32>
    %cst_42 = arith.constant dense<0.000000e+00> : vector<8x8xf32>
    %90 = tpu.matmul %88, %89, %cst_42 {dimension_numbers = #tpu.dot_dimension_numbers<[1], [0], [0], [1], [0, 0, 1, 1], [], []>} : vector<8x8xf32>, vector<8x8xf32>, vector<8x8xf32> -> vector<8x8xf32>
    %91 = vector.extract_strided_slice %48 {offsets = [0, 16], sizes = [8, 8], strides = [1, 1]} : vector<8x32xf32> to vector<8x8xf32>
    %92 = vector.extract_strided_slice %49 {offsets = [0, 16], sizes = [8, 8], strides = [1, 1]} : vector<8x32xf32> to vector<8x8xf32>
    %cst_43 = arith.constant dense<0.000000e+00> : vector<8x8xf32>
    %93 = tpu.matmul %91, %92, %cst_43 {dimension_numbers = #tpu.dot_dimension_numbers<[1], [1], [0], [0], [0, 0, 1, 0], [], []>} : vector<8x8xf32>, vector<8x8xf32>, vector<8x8xf32> -> vector<8x8xf32>
    %cst_44 = arith.constant 0.353553385 : f32
    %94 = vector.broadcast %cst_44 : f32 to vector<8x8xf32>
    %95 = arith.mulf %93, %94 : vector<8x8xf32>
    %96 = arith.addf %95, %56 : vector<8x8xf32>
    %cst_45 = arith.constant dense<0xFF800000> : vector<8xf32>
    %97 = vector.multi_reduction <maximumf>, %96, %cst_45 [1] : vector<8x8xf32> to vector<8xf32>
    %98 = vector.shape_cast %97 : vector<8xf32> to vector<8x1xf32>
    %99 = vector.broadcast %98 : vector<8x1xf32> to vector<8x8xf32>
    %100 = arith.subf %96, %99 : vector<8x8xf32>
    %101 = math.exp %100 : vector<8x8xf32>
    %cst_46 = arith.constant dense<0.000000e+00> : vector<8xf32>
    %102 = vector.multi_reduction <add>, %101, %cst_46 [1] : vector<8x8xf32> to vector<8xf32>
    %103 = vector.shape_cast %102 : vector<8xf32> to vector<8x1xf32>
    %104 = vector.broadcast %103 : vector<8x1xf32> to vector<8x8xf32>
    %105 = arith.divf %101, %104 : vector<8x8xf32>
    %106 = vector.extract_strided_slice %50 {offsets = [0, 16], sizes = [8, 8], strides = [1, 1]} : vector<8x32xf32> to vector<8x8xf32>
    %cst_47 = arith.constant dense<0.000000e+00> : vector<8x8xf32>
    %107 = tpu.matmul %105, %106, %cst_47 {dimension_numbers = #tpu.dot_dimension_numbers<[1], [0], [0], [1], [0, 0, 1, 1], [], []>} : vector<8x8xf32>, vector<8x8xf32>, vector<8x8xf32> -> vector<8x8xf32>
    %108 = vector.extract_strided_slice %48 {offsets = [0, 24], sizes = [8, 8], strides = [1, 1]} : vector<8x32xf32> to vector<8x8xf32>
    %109 = vector.extract_strided_slice %49 {offsets = [0, 24], sizes = [8, 8], strides = [1, 1]} : vector<8x32xf32> to vector<8x8xf32>
    %cst_48 = arith.constant dense<0.000000e+00> : vector<8x8xf32>
    %110 = tpu.matmul %108, %109, %cst_48 {dimension_numbers = #tpu.dot_dimension_numbers<[1], [1], [0], [0], [0, 0, 1, 0], [], []>} : vector<8x8xf32>, vector<8x8xf32>, vector<8x8xf32> -> vector<8x8xf32>
    %cst_49 = arith.constant 0.353553385 : f32
    %111 = vector.broadcast %cst_49 : f32 to vector<8x8xf32>
    %112 = arith.mulf %110, %111 : vector<8x8xf32>
    %113 = arith.addf %112, %56 : vector<8x8xf32>
    %cst_50 = arith.constant dense<0xFF800000> : vector<8xf32>
    %114 = vector.multi_reduction <maximumf>, %113, %cst_50 [1] : vector<8x8xf32> to vector<8xf32>
    %115 = vector.shape_cast %114 : vector<8xf32> to vector<8x1xf32>
    %116 = vector.broadcast %115 : vector<8x1xf32> to vector<8x8xf32>
    %117 = arith.subf %113, %116 : vector<8x8xf32>
    %118 = math.exp %117 : vector<8x8xf32>
    %cst_51 = arith.constant dense<0.000000e+00> : vector<8xf32>
    %119 = vector.multi_reduction <add>, %118, %cst_51 [1] : vector<8x8xf32> to vector<8xf32>
    %120 = vector.shape_cast %119 : vector<8xf32> to vector<8x1xf32>
    %121 = vector.broadcast %120 : vector<8x1xf32> to vector<8x8xf32>
    %122 = arith.divf %118, %121 : vector<8x8xf32>
    %123 = vector.extract_strided_slice %50 {offsets = [0, 24], sizes = [8, 8], strides = [1, 1]} : vector<8x32xf32> to vector<8x8xf32>
    %cst_52 = arith.constant dense<0.000000e+00> : vector<8x8xf32>
    %124 = tpu.matmul %122, %123, %cst_52 {dimension_numbers = #tpu.dot_dimension_numbers<[1], [0], [0], [1], [0, 0, 1, 1], [], []>} : vector<8x8xf32>, vector<8x8xf32>, vector<8x8xf32> -> vector<8x8xf32>
    %125 = tpu.concatenate %73, %90, %107, %124 in 1 : vector<8x8xf32>, vector<8x8xf32>, vector<8x8xf32>, vector<8x8xf32> -> vector<8x32xf32>
    %126 = arith.truncf %125 : vector<8x32xf32> to vector<8x32xbf16>
    %cst_53 = arith.constant dense<0.000000e+00> : vector<8x32xf32>
    %127 = tpu.matmul %126, %41, %cst_53 {dimension_numbers = #tpu.dot_dimension_numbers<[1], [0], [0], [1], [0, 0, 1, 1], [], []>} : vector<8x32xbf16>, vector<32x32xbf16>, vector<8x32xf32> -> vector<8x32xf32>
    %128 = vector.broadcast %43 : vector<1x32xf32> to vector<8x32xf32>
    %129 = arith.addf %127, %128 : vector<8x32xf32>
    %130 = arith.addf %9, %129 : vector<8x32xf32>
    %c0_54 = arith.constant 0 : index
    %c2 = arith.constant 2 : index
    %c0_55 = arith.constant 0 : index
    %c0_56 = arith.constant 0 : index
    %131 = vector.load %arg13[%c0_54, %c2, %c0_55, %c0_56] : memref<2x4x1x32xf32, #tpu.memory_space<vmem>>, vector<1x1x1x32xf32>
    %132 = vector.shape_cast %131 : vector<1x1x1x32xf32> to vector<1x32xf32>
    %c0_57 = arith.constant 0 : index
    %c3 = arith.constant 3 : index
    %c0_58 = arith.constant 0 : index
    %c0_59 = arith.constant 0 : index
    %133 = vector.load %arg13[%c0_57, %c3, %c0_58, %c0_59] : memref<2x4x1x32xf32, #tpu.memory_space<vmem>>, vector<1x1x1x32xf32>
    %134 = vector.shape_cast %133 : vector<1x1x1x32xf32> to vector<1x32xf32>
    %cst_60 = arith.constant dense<0.000000e+00> : vector<8xf32>
    %135 = vector.multi_reduction <add>, %130, %cst_60 [1] : vector<8x32xf32> to vector<8xf32>
    %136 = vector.shape_cast %135 : vector<8xf32> to vector<8x1xf32>
    %cst_61 = arith.constant 3.200000e+01 : f32
    %137 = vector.broadcast %cst_61 : f32 to vector<8x1xf32>
    %138 = arith.divf %136, %137 : vector<8x1xf32>
    %139 = vector.broadcast %138 : vector<8x1xf32> to vector<8x32xf32>
    %140 = arith.subf %130, %139 : vector<8x32xf32>
    %141 = arith.mulf %140, %140 : vector<8x32xf32>
    %cst_62 = arith.constant dense<0.000000e+00> : vector<8xf32>
    %142 = vector.multi_reduction <add>, %141, %cst_62 [1] : vector<8x32xf32> to vector<8xf32>
    %143 = vector.shape_cast %142 : vector<8xf32> to vector<8x1xf32>
    %cst_63 = arith.constant 3.200000e+01 : f32
    %144 = vector.broadcast %cst_63 : f32 to vector<8x1xf32>
    %145 = arith.divf %143, %144 : vector<8x1xf32>
    %146 = vector.broadcast %138 : vector<8x1xf32> to vector<8x32xf32>
    %147 = arith.subf %130, %146 : vector<8x32xf32>
    %cst_64 = arith.constant 9.99999974E-6 : f32
    %148 = vector.broadcast %cst_64 : f32 to vector<8x1xf32>
    %149 = arith.addf %145, %148 : vector<8x1xf32>
    %150 = math.rsqrt %149 : vector<8x1xf32>
    %151 = vector.broadcast %150 : vector<8x1xf32> to vector<8x32xf32>
    %152 = arith.mulf %147, %151 : vector<8x32xf32>
    %153 = vector.broadcast %132 : vector<1x32xf32> to vector<8x32xf32>
    %154 = arith.mulf %152, %153 : vector<8x32xf32>
    %155 = vector.broadcast %134 : vector<1x32xf32> to vector<8x32xf32>
    %156 = arith.addf %154, %155 : vector<8x32xf32>
    %c0_65 = arith.constant 0 : index
    %c0_66 = arith.constant 0 : index
    %c0_67 = arith.constant 0 : index
    %157 = vector.load %arg9[%c0_65, %c0_66, %c0_67] : memref<2x32x64xbf16, #tpu.memory_space<vmem>>, vector<1x32x64xbf16>
    %158 = vector.shape_cast %157 : vector<1x32x64xbf16> to vector<32x64xbf16>
    %c0_68 = arith.constant 0 : index
    %c0_69 = arith.constant 0 : index
    %c0_70 = arith.constant 0 : index
    %159 = vector.load %arg10[%c0_68, %c0_69, %c0_70] : memref<2x1x64xf32, #tpu.memory_space<vmem>>, vector<1x1x64xf32>
    %160 = vector.shape_cast %159 : vector<1x1x64xf32> to vector<1x64xf32>
    %c0_71 = arith.constant 0 : index
    %c0_72 = arith.constant 0 : index
    %c0_73 = arith.constant 0 : index
    %161 = vector.load %arg11[%c0_71, %c0_72, %c0_73] : memref<2x64x32xbf16, #tpu.memory_space<vmem>>, vector<1x64x32xbf16>
    %162 = vector.shape_cast %161 : vector<1x64x32xbf16> to vector<64x32xbf16>
    %c0_74 = arith.constant 0 : index
    %c0_75 = arith.constant 0 : index
    %c0_76 = arith.constant 0 : index
    %163 = vector.load %arg12[%c0_74, %c0_75, %c0_76] : memref<2x1x32xf32, #tpu.memory_space<vmem>>, vector<1x1x32xf32>
    %164 = vector.shape_cast %163 : vector<1x1x32xf32> to vector<1x32xf32>
    %165 = arith.truncf %156 : vector<8x32xf32> to vector<8x32xbf16>
    %cst_77 = arith.constant dense<0.000000e+00> : vector<8x64xf32>
    %166 = tpu.matmul %165, %158, %cst_77 {dimension_numbers = #tpu.dot_dimension_numbers<[1], [0], [0], [1], [0, 0, 1, 1], [], []>} : vector<8x32xbf16>, vector<32x64xbf16>, vector<8x64xf32> -> vector<8x64xf32>
    %167 = vector.broadcast %160 : vector<1x64xf32> to vector<8x64xf32>
    %168 = arith.addf %166, %167 : vector<8x64xf32>
    %cst_78 = arith.constant 0.000000e+00 : f32
    %169 = vector.broadcast %cst_78 : f32 to vector<8x64xf32>
    %170 = arith.maximumf %168, %169 : vector<8x64xf32>
    %171 = arith.truncf %170 : vector<8x64xf32> to vector<8x64xbf16>
    %cst_79 = arith.constant dense<0.000000e+00> : vector<8x32xf32>
    %172 = tpu.matmul %171, %162, %cst_79 {dimension_numbers = #tpu.dot_dimension_numbers<[1], [0], [0], [1], [0, 0, 1, 1], [], []>} : vector<8x64xbf16>, vector<64x32xbf16>, vector<8x32xf32> -> vector<8x32xf32>
    %173 = vector.broadcast %164 : vector<1x32xf32> to vector<8x32xf32>
    %174 = arith.addf %172, %173 : vector<8x32xf32>
    %175 = arith.addf %130, %174 : vector<8x32xf32>
    %c1_80 = arith.constant 1 : index
    %c0_81 = arith.constant 0 : index
    %c0_82 = arith.constant 0 : index
    %c0_83 = arith.constant 0 : index
    %176 = vector.load %arg13[%c1_80, %c0_81, %c0_82, %c0_83] : memref<2x4x1x32xf32, #tpu.memory_space<vmem>>, vector<1x1x1x32xf32>
    %177 = vector.shape_cast %176 : vector<1x1x1x32xf32> to vector<1x32xf32>
    %c1_84 = arith.constant 1 : index
    %c1_85 = arith.constant 1 : index
    %c0_86 = arith.constant 0 : index
    %c0_87 = arith.constant 0 : index
    %178 = vector.load %arg13[%c1_84, %c1_85, %c0_86, %c0_87] : memref<2x4x1x32xf32, #tpu.memory_space<vmem>>, vector<1x1x1x32xf32>
    %179 = vector.shape_cast %178 : vector<1x1x1x32xf32> to vector<1x32xf32>
    %cst_88 = arith.constant dense<0.000000e+00> : vector<8xf32>
    %180 = vector.multi_reduction <add>, %175, %cst_88 [1] : vector<8x32xf32> to vector<8xf32>
    %181 = vector.shape_cast %180 : vector<8xf32> to vector<8x1xf32>
    %cst_89 = arith.constant 3.200000e+01 : f32
    %182 = vector.broadcast %cst_89 : f32 to vector<8x1xf32>
    %183 = arith.divf %181, %182 : vector<8x1xf32>
    %184 = vector.broadcast %183 : vector<8x1xf32> to vector<8x32xf32>
    %185 = arith.subf %175, %184 : vector<8x32xf32>
    %186 = arith.mulf %185, %185 : vector<8x32xf32>
    %cst_90 = arith.constant dense<0.000000e+00> : vector<8xf32>
    %187 = vector.multi_reduction <add>, %186, %cst_90 [1] : vector<8x32xf32> to vector<8xf32>
    %188 = vector.shape_cast %187 : vector<8xf32> to vector<8x1xf32>
    %cst_91 = arith.constant 3.200000e+01 : f32
    %189 = vector.broadcast %cst_91 : f32 to vector<8x1xf32>
    %190 = arith.divf %188, %189 : vector<8x1xf32>
    %191 = vector.broadcast %183 : vector<8x1xf32> to vector<8x32xf32>
    %192 = arith.subf %175, %191 : vector<8x32xf32>
    %cst_92 = arith.constant 9.99999974E-6 : f32
    %193 = vector.broadcast %cst_92 : f32 to vector<8x1xf32>
    %194 = arith.addf %190, %193 : vector<8x1xf32>
    %195 = math.rsqrt %194 : vector<8x1xf32>
    %196 = vector.broadcast %195 : vector<8x1xf32> to vector<8x32xf32>
    %197 = arith.mulf %192, %196 : vector<8x32xf32>
    %198 = vector.broadcast %177 : vector<1x32xf32> to vector<8x32xf32>
    %199 = arith.mulf %197, %198 : vector<8x32xf32>
    %200 = vector.broadcast %179 : vector<1x32xf32> to vector<8x32xf32>
    %201 = arith.addf %199, %200 : vector<8x32xf32>
    %c1_93 = arith.constant 1 : index
    %c0_94 = arith.constant 0 : index
    %c0_95 = arith.constant 0 : index
    %202 = vector.load %arg5[%c1_93, %c0_94, %c0_95] : memref<2x32x96xbf16, #tpu.memory_space<vmem>>, vector<1x32x96xbf16>
    %203 = vector.shape_cast %202 : vector<1x32x96xbf16> to vector<32x96xbf16>
    %c1_96 = arith.constant 1 : index
    %c0_97 = arith.constant 0 : index
    %c0_98 = arith.constant 0 : index
    %204 = vector.load %arg6[%c1_96, %c0_97, %c0_98] : memref<2x1x96xf32, #tpu.memory_space<vmem>>, vector<1x1x96xf32>
    %205 = vector.shape_cast %204 : vector<1x1x96xf32> to vector<1x96xf32>
    %c1_99 = arith.constant 1 : index
    %c0_100 = arith.constant 0 : index
    %c0_101 = arith.constant 0 : index
    %206 = vector.load %arg7[%c1_99, %c0_100, %c0_101] : memref<2x32x32xbf16, #tpu.memory_space<vmem>>, vector<1x32x32xbf16>
    %207 = vector.shape_cast %206 : vector<1x32x32xbf16> to vector<32x32xbf16>
    %c1_102 = arith.constant 1 : index
    %c0_103 = arith.constant 0 : index
    %c0_104 = arith.constant 0 : index
    %208 = vector.load %arg8[%c1_102, %c0_103, %c0_104] : memref<2x1x32xf32, #tpu.memory_space<vmem>>, vector<1x1x32xf32>
    %209 = vector.shape_cast %208 : vector<1x1x32xf32> to vector<1x32xf32>
    %210 = arith.truncf %201 : vector<8x32xf32> to vector<8x32xbf16>
    %cst_105 = arith.constant dense<0.000000e+00> : vector<8x96xf32>
    %211 = tpu.matmul %210, %203, %cst_105 {dimension_numbers = #tpu.dot_dimension_numbers<[1], [0], [0], [1], [0, 0, 1, 1], [], []>} : vector<8x32xbf16>, vector<32x96xbf16>, vector<8x96xf32> -> vector<8x96xf32>
    %212 = vector.broadcast %205 : vector<1x96xf32> to vector<8x96xf32>
    %213 = arith.addf %211, %212 : vector<8x96xf32>
    %214 = vector.extract_strided_slice %213 {offsets = [0, 0], sizes = [8, 32], strides = [1, 1]} : vector<8x96xf32> to vector<8x32xf32>
    %215 = vector.extract_strided_slice %213 {offsets = [0, 32], sizes = [8, 32], strides = [1, 1]} : vector<8x96xf32> to vector<8x32xf32>
    %216 = vector.extract_strided_slice %213 {offsets = [0, 64], sizes = [8, 32], strides = [1, 1]} : vector<8x96xf32> to vector<8x32xf32>
    %217 = tpu.iota {dimensions = array<i32: 1>} : vector<8x8xi32>
    %218 = vector.broadcast %1 : i32 to vector<8x8xi32>
    %219 = arith.cmpi slt, %217, %218 : vector<8x8xi32>
    %cst_106 = arith.constant 0.000000e+00 : f32
    %cst_107 = arith.constant -1.000000e+09 : f32
    %220 = vector.broadcast %cst_106 : f32 to vector<8x8xf32>
    %221 = vector.broadcast %cst_107 : f32 to vector<8x8xf32>
    %222 = arith.select %219, %220, %221 : vector<8x8xi1>, vector<8x8xf32>
    %223 = vector.extract_strided_slice %214 {offsets = [0, 0], sizes = [8, 8], strides = [1, 1]} : vector<8x32xf32> to vector<8x8xf32>
    %224 = vector.extract_strided_slice %215 {offsets = [0, 0], sizes = [8, 8], strides = [1, 1]} : vector<8x32xf32> to vector<8x8xf32>
    %cst_108 = arith.constant dense<0.000000e+00> : vector<8x8xf32>
    %225 = tpu.matmul %223, %224, %cst_108 {dimension_numbers = #tpu.dot_dimension_numbers<[1], [1], [0], [0], [0, 0, 1, 0], [], []>} : vector<8x8xf32>, vector<8x8xf32>, vector<8x8xf32> -> vector<8x8xf32>
    %cst_109 = arith.constant 0.353553385 : f32
    %226 = vector.broadcast %cst_109 : f32 to vector<8x8xf32>
    %227 = arith.mulf %225, %226 : vector<8x8xf32>
    %228 = arith.addf %227, %222 : vector<8x8xf32>
    %cst_110 = arith.constant dense<0xFF800000> : vector<8xf32>
    %229 = vector.multi_reduction <maximumf>, %228, %cst_110 [1] : vector<8x8xf32> to vector<8xf32>
    %230 = vector.shape_cast %229 : vector<8xf32> to vector<8x1xf32>
    %231 = vector.broadcast %230 : vector<8x1xf32> to vector<8x8xf32>
    %232 = arith.subf %228, %231 : vector<8x8xf32>
    %233 = math.exp %232 : vector<8x8xf32>
    %cst_111 = arith.constant dense<0.000000e+00> : vector<8xf32>
    %234 = vector.multi_reduction <add>, %233, %cst_111 [1] : vector<8x8xf32> to vector<8xf32>
    %235 = vector.shape_cast %234 : vector<8xf32> to vector<8x1xf32>
    %236 = vector.broadcast %235 : vector<8x1xf32> to vector<8x8xf32>
    %237 = arith.divf %233, %236 : vector<8x8xf32>
    %238 = vector.extract_strided_slice %216 {offsets = [0, 0], sizes = [8, 8], strides = [1, 1]} : vector<8x32xf32> to vector<8x8xf32>
    %cst_112 = arith.constant dense<0.000000e+00> : vector<8x8xf32>
    %239 = tpu.matmul %237, %238, %cst_112 {dimension_numbers = #tpu.dot_dimension_numbers<[1], [0], [0], [1], [0, 0, 1, 1], [], []>} : vector<8x8xf32>, vector<8x8xf32>, vector<8x8xf32> -> vector<8x8xf32>
    %240 = vector.extract_strided_slice %214 {offsets = [0, 8], sizes = [8, 8], strides = [1, 1]} : vector<8x32xf32> to vector<8x8xf32>
    %241 = vector.extract_strided_slice %215 {offsets = [0, 8], sizes = [8, 8], strides = [1, 1]} : vector<8x32xf32> to vector<8x8xf32>
    %cst_113 = arith.constant dense<0.000000e+00> : vector<8x8xf32>
    %242 = tpu.matmul %240, %241, %cst_113 {dimension_numbers = #tpu.dot_dimension_numbers<[1], [1], [0], [0], [0, 0, 1, 0], [], []>} : vector<8x8xf32>, vector<8x8xf32>, vector<8x8xf32> -> vector<8x8xf32>
    %cst_114 = arith.constant 0.353553385 : f32
    %243 = vector.broadcast %cst_114 : f32 to vector<8x8xf32>
    %244 = arith.mulf %242, %243 : vector<8x8xf32>
    %245 = arith.addf %244, %222 : vector<8x8xf32>
    %cst_115 = arith.constant dense<0xFF800000> : vector<8xf32>
    %246 = vector.multi_reduction <maximumf>, %245, %cst_115 [1] : vector<8x8xf32> to vector<8xf32>
    %247 = vector.shape_cast %246 : vector<8xf32> to vector<8x1xf32>
    %248 = vector.broadcast %247 : vector<8x1xf32> to vector<8x8xf32>
    %249 = arith.subf %245, %248 : vector<8x8xf32>
    %250 = math.exp %249 : vector<8x8xf32>
    %cst_116 = arith.constant dense<0.000000e+00> : vector<8xf32>
    %251 = vector.multi_reduction <add>, %250, %cst_116 [1] : vector<8x8xf32> to vector<8xf32>
    %252 = vector.shape_cast %251 : vector<8xf32> to vector<8x1xf32>
    %253 = vector.broadcast %252 : vector<8x1xf32> to vector<8x8xf32>
    %254 = arith.divf %250, %253 : vector<8x8xf32>
    %255 = vector.extract_strided_slice %216 {offsets = [0, 8], sizes = [8, 8], strides = [1, 1]} : vector<8x32xf32> to vector<8x8xf32>
    %cst_117 = arith.constant dense<0.000000e+00> : vector<8x8xf32>
    %256 = tpu.matmul %254, %255, %cst_117 {dimension_numbers = #tpu.dot_dimension_numbers<[1], [0], [0], [1], [0, 0, 1, 1], [], []>} : vector<8x8xf32>, vector<8x8xf32>, vector<8x8xf32> -> vector<8x8xf32>
    %257 = vector.extract_strided_slice %214 {offsets = [0, 16], sizes = [8, 8], strides = [1, 1]} : vector<8x32xf32> to vector<8x8xf32>
    %258 = vector.extract_strided_slice %215 {offsets = [0, 16], sizes = [8, 8], strides = [1, 1]} : vector<8x32xf32> to vector<8x8xf32>
    %cst_118 = arith.constant dense<0.000000e+00> : vector<8x8xf32>
    %259 = tpu.matmul %257, %258, %cst_118 {dimension_numbers = #tpu.dot_dimension_numbers<[1], [1], [0], [0], [0, 0, 1, 0], [], []>} : vector<8x8xf32>, vector<8x8xf32>, vector<8x8xf32> -> vector<8x8xf32>
    %cst_119 = arith.constant 0.353553385 : f32
    %260 = vector.broadcast %cst_119 : f32 to vector<8x8xf32>
    %261 = arith.mulf %259, %260 : vector<8x8xf32>
    %262 = arith.addf %261, %222 : vector<8x8xf32>
    %cst_120 = arith.constant dense<0xFF800000> : vector<8xf32>
    %263 = vector.multi_reduction <maximumf>, %262, %cst_120 [1] : vector<8x8xf32> to vector<8xf32>
    %264 = vector.shape_cast %263 : vector<8xf32> to vector<8x1xf32>
    %265 = vector.broadcast %264 : vector<8x1xf32> to vector<8x8xf32>
    %266 = arith.subf %262, %265 : vector<8x8xf32>
    %267 = math.exp %266 : vector<8x8xf32>
    %cst_121 = arith.constant dense<0.000000e+00> : vector<8xf32>
    %268 = vector.multi_reduction <add>, %267, %cst_121 [1] : vector<8x8xf32> to vector<8xf32>
    %269 = vector.shape_cast %268 : vector<8xf32> to vector<8x1xf32>
    %270 = vector.broadcast %269 : vector<8x1xf32> to vector<8x8xf32>
    %271 = arith.divf %267, %270 : vector<8x8xf32>
    %272 = vector.extract_strided_slice %216 {offsets = [0, 16], sizes = [8, 8], strides = [1, 1]} : vector<8x32xf32> to vector<8x8xf32>
    %cst_122 = arith.constant dense<0.000000e+00> : vector<8x8xf32>
    %273 = tpu.matmul %271, %272, %cst_122 {dimension_numbers = #tpu.dot_dimension_numbers<[1], [0], [0], [1], [0, 0, 1, 1], [], []>} : vector<8x8xf32>, vector<8x8xf32>, vector<8x8xf32> -> vector<8x8xf32>
    %274 = vector.extract_strided_slice %214 {offsets = [0, 24], sizes = [8, 8], strides = [1, 1]} : vector<8x32xf32> to vector<8x8xf32>
    %275 = vector.extract_strided_slice %215 {offsets = [0, 24], sizes = [8, 8], strides = [1, 1]} : vector<8x32xf32> to vector<8x8xf32>
    %cst_123 = arith.constant dense<0.000000e+00> : vector<8x8xf32>
    %276 = tpu.matmul %274, %275, %cst_123 {dimension_numbers = #tpu.dot_dimension_numbers<[1], [1], [0], [0], [0, 0, 1, 0], [], []>} : vector<8x8xf32>, vector<8x8xf32>, vector<8x8xf32> -> vector<8x8xf32>
    %cst_124 = arith.constant 0.353553385 : f32
    %277 = vector.broadcast %cst_124 : f32 to vector<8x8xf32>
    %278 = arith.mulf %276, %277 : vector<8x8xf32>
    %279 = arith.addf %278, %222 : vector<8x8xf32>
    %cst_125 = arith.constant dense<0xFF800000> : vector<8xf32>
    %280 = vector.multi_reduction <maximumf>, %279, %cst_125 [1] : vector<8x8xf32> to vector<8xf32>
    %281 = vector.shape_cast %280 : vector<8xf32> to vector<8x1xf32>
    %282 = vector.broadcast %281 : vector<8x1xf32> to vector<8x8xf32>
    %283 = arith.subf %279, %282 : vector<8x8xf32>
    %284 = math.exp %283 : vector<8x8xf32>
    %cst_126 = arith.constant dense<0.000000e+00> : vector<8xf32>
    %285 = vector.multi_reduction <add>, %284, %cst_126 [1] : vector<8x8xf32> to vector<8xf32>
    %286 = vector.shape_cast %285 : vector<8xf32> to vector<8x1xf32>
    %287 = vector.broadcast %286 : vector<8x1xf32> to vector<8x8xf32>
    %288 = arith.divf %284, %287 : vector<8x8xf32>
    %289 = vector.extract_strided_slice %216 {offsets = [0, 24], sizes = [8, 8], strides = [1, 1]} : vector<8x32xf32> to vector<8x8xf32>
    %cst_127 = arith.constant dense<0.000000e+00> : vector<8x8xf32>
    %290 = tpu.matmul %288, %289, %cst_127 {dimension_numbers = #tpu.dot_dimension_numbers<[1], [0], [0], [1], [0, 0, 1, 1], [], []>} : vector<8x8xf32>, vector<8x8xf32>, vector<8x8xf32> -> vector<8x8xf32>
    %291 = tpu.concatenate %239, %256, %273, %290 in 1 : vector<8x8xf32>, vector<8x8xf32>, vector<8x8xf32>, vector<8x8xf32> -> vector<8x32xf32>
    %292 = arith.truncf %291 : vector<8x32xf32> to vector<8x32xbf16>
    %cst_128 = arith.constant dense<0.000000e+00> : vector<8x32xf32>
    %293 = tpu.matmul %292, %207, %cst_128 {dimension_numbers = #tpu.dot_dimension_numbers<[1], [0], [0], [1], [0, 0, 1, 1], [], []>} : vector<8x32xbf16>, vector<32x32xbf16>, vector<8x32xf32> -> vector<8x32xf32>
    %294 = vector.broadcast %209 : vector<1x32xf32> to vector<8x32xf32>
    %295 = arith.addf %293, %294 : vector<8x32xf32>
    %296 = arith.addf %175, %295 : vector<8x32xf32>
    %c1_129 = arith.constant 1 : index
    %c2_130 = arith.constant 2 : index
    %c0_131 = arith.constant 0 : index
    %c0_132 = arith.constant 0 : index
    %297 = vector.load %arg13[%c1_129, %c2_130, %c0_131, %c0_132] : memref<2x4x1x32xf32, #tpu.memory_space<vmem>>, vector<1x1x1x32xf32>
    %298 = vector.shape_cast %297 : vector<1x1x1x32xf32> to vector<1x32xf32>
    %c1_133 = arith.constant 1 : index
    %c3_134 = arith.constant 3 : index
    %c0_135 = arith.constant 0 : index
    %c0_136 = arith.constant 0 : index
    %299 = vector.load %arg13[%c1_133, %c3_134, %c0_135, %c0_136] : memref<2x4x1x32xf32, #tpu.memory_space<vmem>>, vector<1x1x1x32xf32>
    %300 = vector.shape_cast %299 : vector<1x1x1x32xf32> to vector<1x32xf32>
    %cst_137 = arith.constant dense<0.000000e+00> : vector<8xf32>
    %301 = vector.multi_reduction <add>, %296, %cst_137 [1] : vector<8x32xf32> to vector<8xf32>
    %302 = vector.shape_cast %301 : vector<8xf32> to vector<8x1xf32>
    %cst_138 = arith.constant 3.200000e+01 : f32
    %303 = vector.broadcast %cst_138 : f32 to vector<8x1xf32>
    %304 = arith.divf %302, %303 : vector<8x1xf32>
    %305 = vector.broadcast %304 : vector<8x1xf32> to vector<8x32xf32>
    %306 = arith.subf %296, %305 : vector<8x32xf32>
    %307 = arith.mulf %306, %306 : vector<8x32xf32>
    %cst_139 = arith.constant dense<0.000000e+00> : vector<8xf32>
    %308 = vector.multi_reduction <add>, %307, %cst_139 [1] : vector<8x32xf32> to vector<8xf32>
    %309 = vector.shape_cast %308 : vector<8xf32> to vector<8x1xf32>
    %cst_140 = arith.constant 3.200000e+01 : f32
    %310 = vector.broadcast %cst_140 : f32 to vector<8x1xf32>
    %311 = arith.divf %309, %310 : vector<8x1xf32>
    %312 = vector.broadcast %304 : vector<8x1xf32> to vector<8x32xf32>
    %313 = arith.subf %296, %312 : vector<8x32xf32>
    %cst_141 = arith.constant 9.99999974E-6 : f32
    %314 = vector.broadcast %cst_141 : f32 to vector<8x1xf32>
    %315 = arith.addf %311, %314 : vector<8x1xf32>
    %316 = math.rsqrt %315 : vector<8x1xf32>
    %317 = vector.broadcast %316 : vector<8x1xf32> to vector<8x32xf32>
    %318 = arith.mulf %313, %317 : vector<8x32xf32>
    %319 = vector.broadcast %298 : vector<1x32xf32> to vector<8x32xf32>
    %320 = arith.mulf %318, %319 : vector<8x32xf32>
    %321 = vector.broadcast %300 : vector<1x32xf32> to vector<8x32xf32>
    %322 = arith.addf %320, %321 : vector<8x32xf32>
    %c1_142 = arith.constant 1 : index
    %c0_143 = arith.constant 0 : index
    %c0_144 = arith.constant 0 : index
    %323 = vector.load %arg9[%c1_142, %c0_143, %c0_144] : memref<2x32x64xbf16, #tpu.memory_space<vmem>>, vector<1x32x64xbf16>
    %324 = vector.shape_cast %323 : vector<1x32x64xbf16> to vector<32x64xbf16>
    %c1_145 = arith.constant 1 : index
    %c0_146 = arith.constant 0 : index
    %c0_147 = arith.constant 0 : index
    %325 = vector.load %arg10[%c1_145, %c0_146, %c0_147] : memref<2x1x64xf32, #tpu.memory_space<vmem>>, vector<1x1x64xf32>
    %326 = vector.shape_cast %325 : vector<1x1x64xf32> to vector<1x64xf32>
    %c1_148 = arith.constant 1 : index
    %c0_149 = arith.constant 0 : index
    %c0_150 = arith.constant 0 : index
    %327 = vector.load %arg11[%c1_148, %c0_149, %c0_150] : memref<2x64x32xbf16, #tpu.memory_space<vmem>>, vector<1x64x32xbf16>
    %328 = vector.shape_cast %327 : vector<1x64x32xbf16> to vector<64x32xbf16>
    %c1_151 = arith.constant 1 : index
    %c0_152 = arith.constant 0 : index
    %c0_153 = arith.constant 0 : index
    %329 = vector.load %arg12[%c1_151, %c0_152, %c0_153] : memref<2x1x32xf32, #tpu.memory_space<vmem>>, vector<1x1x32xf32>
    %330 = vector.shape_cast %329 : vector<1x1x32xf32> to vector<1x32xf32>
    %331 = arith.truncf %322 : vector<8x32xf32> to vector<8x32xbf16>
    %cst_154 = arith.constant dense<0.000000e+00> : vector<8x64xf32>
    %332 = tpu.matmul %331, %324, %cst_154 {dimension_numbers = #tpu.dot_dimension_numbers<[1], [0], [0], [1], [0, 0, 1, 1], [], []>} : vector<8x32xbf16>, vector<32x64xbf16>, vector<8x64xf32> -> vector<8x64xf32>
    %333 = vector.broadcast %326 : vector<1x64xf32> to vector<8x64xf32>
    %334 = arith.addf %332, %333 : vector<8x64xf32>
    %cst_155 = arith.constant 0.000000e+00 : f32
    %335 = vector.broadcast %cst_155 : f32 to vector<8x64xf32>
    %336 = arith.maximumf %334, %335 : vector<8x64xf32>
    %337 = arith.truncf %336 : vector<8x64xf32> to vector<8x64xbf16>
    %cst_156 = arith.constant dense<0.000000e+00> : vector<8x32xf32>
    %338 = tpu.matmul %337, %328, %cst_156 {dimension_numbers = #tpu.dot_dimension_numbers<[1], [0], [0], [1], [0, 0, 1, 1], [], []>} : vector<8x64xbf16>, vector<64x32xbf16>, vector<8x32xf32> -> vector<8x32xf32>
    %339 = vector.broadcast %330 : vector<1x32xf32> to vector<8x32xf32>
    %340 = arith.addf %338, %339 : vector<8x32xf32>
    %341 = arith.addf %296, %340 : vector<8x32xf32>
    %c0_157 = arith.constant 0 : index
    %c0_158 = arith.constant 0 : index
    %342 = vector.load %arg14[%c0_157, %c0_158] : memref<1x32xf32, #tpu.memory_space<vmem>>, vector<1x32xf32>
    %c0_159 = arith.constant 0 : index
    %c0_160 = arith.constant 0 : index
    %343 = vector.load %arg15[%c0_159, %c0_160] : memref<1x32xf32, #tpu.memory_space<vmem>>, vector<1x32xf32>
    %cst_161 = arith.constant dense<0.000000e+00> : vector<8xf32>
    %344 = vector.multi_reduction <add>, %341, %cst_161 [1] : vector<8x32xf32> to vector<8xf32>
    %345 = vector.shape_cast %344 : vector<8xf32> to vector<8x1xf32>
    %cst_162 = arith.constant 3.200000e+01 : f32
    %346 = vector.broadcast %cst_162 : f32 to vector<8x1xf32>
    %347 = arith.divf %345, %346 : vector<8x1xf32>
    %348 = vector.broadcast %347 : vector<8x1xf32> to vector<8x32xf32>
    %349 = arith.subf %341, %348 : vector<8x32xf32>
    %350 = arith.mulf %349, %349 : vector<8x32xf32>
    %cst_163 = arith.constant dense<0.000000e+00> : vector<8xf32>
    %351 = vector.multi_reduction <add>, %350, %cst_163 [1] : vector<8x32xf32> to vector<8xf32>
    %352 = vector.shape_cast %351 : vector<8xf32> to vector<8x1xf32>
    %cst_164 = arith.constant 3.200000e+01 : f32
    %353 = vector.broadcast %cst_164 : f32 to vector<8x1xf32>
    %354 = arith.divf %352, %353 : vector<8x1xf32>
    %355 = vector.broadcast %347 : vector<8x1xf32> to vector<8x32xf32>
    %356 = arith.subf %341, %355 : vector<8x32xf32>
    %cst_165 = arith.constant 9.99999974E-6 : f32
    %357 = vector.broadcast %cst_165 : f32 to vector<8x1xf32>
    %358 = arith.addf %354, %357 : vector<8x1xf32>
    %359 = math.rsqrt %358 : vector<8x1xf32>
    %360 = vector.broadcast %359 : vector<8x1xf32> to vector<8x32xf32>
    %361 = arith.mulf %356, %360 : vector<8x32xf32>
    %362 = vector.broadcast %342 : vector<1x32xf32> to vector<8x32xf32>
    %363 = arith.mulf %361, %362 : vector<8x32xf32>
    %364 = vector.broadcast %343 : vector<1x32xf32> to vector<8x32xf32>
    %365 = arith.addf %363, %364 : vector<8x32xf32>
    %c0_166 = arith.constant 0 : index
    %c0_167 = arith.constant 0 : index
    %c0_168 = arith.constant 0 : index
    %366 = vector.load %arg20[%c0_166, %c0_167, %c0_168] : memref<1x8x32xf32, #tpu.memory_space<vmem>>, vector<1x8x32xf32>
    %367 = vector.shape_cast %366 : vector<1x8x32xf32> to vector<8x32xf32>
    %368 = vector.shape_cast %365 : vector<8x32xf32> to vector<1x8x32xf32>
    tpu.vector_store %arg20[%c0_166, %c0_167, %c0_168], %368 {strides = array<i32>} : memref<1x8x32xf32, #tpu.memory_space<vmem>>, vector<1x8x32xf32>,
    %369 = tpu.iota {dimensions = array<i32: 0>} : vector<8x1xi32>
    %c0_i32 = arith.constant 0 : i32
    %370 = vector.broadcast %c0_i32 : i32 to vector<8x1xi32>
    %371 = arith.cmpi eq, %369, %370 : vector<8x1xi32>
    %c1_i32 = arith.constant 1 : i32
    %372 = tpu.dynamic_rotate %365 by %c1_i32 dim 0 : vector<8x32xf32>, i32 -> vector<8x32xf32>
    %cst_169 = arith.constant 0.000000e+00 : f32
    %373 = vector.shape_cast %371 : vector<8x1xi1> to vector<8x1xi1>
    %374 = vector.broadcast %373 : vector<8x1xi1> to vector<8x32xi1>
    %375 = vector.broadcast %cst_169 : f32 to vector<8x32xf32>
    %376 = arith.select %374, %375, %372 : vector<8x32xi1>, vector<8x32xf32>
    %c7_i32 = arith.constant 7 : i32
    %377 = vector.broadcast %c7_i32 : i32 to vector<8x1xi32>
    %378 = arith.cmpi eq, %369, %377 : vector<8x1xi32>
    %c7_i32_170 = arith.constant 7 : i32
    %379 = tpu.dynamic_rotate %365 by %c7_i32_170 dim 0 : vector<8x32xf32>, i32 -> vector<8x32xf32>
    %cst_171 = arith.constant 0.000000e+00 : f32
    %380 = vector.shape_cast %378 : vector<8x1xi1> to vector<8x1xi1>
    %381 = vector.broadcast %380 : vector<8x1xi1> to vector<8x32xi1>
    %382 = vector.broadcast %cst_171 : f32 to vector<8x32xf32>
    %383 = arith.select %381, %382, %379 : vector<8x32xi1>, vector<8x32xf32>
    %384 = tpu.concatenate %376, %365, %383 in 1 : vector<8x32xf32>, vector<8x32xf32>, vector<8x32xf32> -> vector<8x96xf32>
    %385 = arith.truncf %384 : vector<8x96xf32> to vector<8x96xbf16>
    %c0_172 = arith.constant 0 : index
    %c0_173 = arith.constant 0 : index
    %386 = vector.load %arg16[%c0_172, %c0_173] : memref<96x32xbf16, #tpu.memory_space<vmem>>, vector<96x32xbf16>
    %cst_174 = arith.constant dense<0.000000e+00> : vector<8x32xf32>
    %387 = tpu.matmul %385, %386, %cst_174 {dimension_numbers = #tpu.dot_dimension_numbers<[1], [0], [0], [1], [0, 0, 1, 1], [], []>} : vector<8x96xbf16>, vector<96x32xbf16>, vector<8x32xf32> -> vector<8x32xf32>
    %c0_175 = arith.constant 0 : index
    %c0_176 = arith.constant 0 : index
    %388 = vector.load %arg17[%c0_175, %c0_176] : memref<1x32xf32, #tpu.memory_space<vmem>>, vector<1x32xf32>
    %389 = vector.broadcast %388 : vector<1x32xf32> to vector<8x32xf32>
    %390 = arith.addf %387, %389 : vector<8x32xf32>
    %391 = arith.addf %390, %365 : vector<8x32xf32>
    %cst_177 = arith.constant 0.000000e+00 : f32
    %392 = vector.broadcast %cst_177 : f32 to vector<8x32xf32>
    %393 = arith.maximumf %391, %392 : vector<8x32xf32>
    %c0_178 = arith.constant 0 : index
    %c0_179 = arith.constant 0 : index
    %394 = vector.load %arg18[%c0_178, %c0_179] : memref<1x32xbf16, #tpu.memory_space<vmem>>, vector<1x32xbf16>
    %395 = arith.truncf %393 : vector<8x32xf32> to vector<8x32xbf16>
    %cst_180 = arith.constant dense<0.000000e+00> : vector<1x8xf32>
    %396 = tpu.matmul %394, %395, %cst_180 {dimension_numbers = #tpu.dot_dimension_numbers<[1], [1], [0], [0], [0, 0, 1, 0], [], []>} : vector<1x32xbf16>, vector<8x32xbf16>, vector<1x8xf32> -> vector<1x8xf32>
    %c0_181 = arith.constant 0 : index
    %c0_182 = arith.constant 0 : index
    %397 = vector.load %arg19[%c0_181, %c0_182] : memref<1x1xf32, #tpu.memory_space<vmem>>, vector<1x1xf32>
    %398 = vector.broadcast %397 : vector<1x1xf32> to vector<1x8xf32>
    %399 = arith.addf %396, %398 : vector<1x8xf32>
    %400 = arith.negf %399 : vector<1x8xf32>
    %401 = math.exp %400 : vector<1x8xf32>
    %cst_183 = arith.constant 1.000000e+00 : f32
    %402 = vector.broadcast %cst_183 : f32 to vector<1x8xf32>
    %403 = arith.addf %402, %401 : vector<1x8xf32>
    %404 = arith.divf %402, %403 : vector<1x8xf32>
    %405 = tpu.iota {dimensions = array<i32: 1>} : vector<1x8xi32>
    %406 = vector.broadcast %1 : i32 to vector<1x8xi32>
    %407 = arith.cmpi slt, %405, %406 : vector<1x8xi32>
    %cst_184 = arith.constant 0.000000e+00 : f32
    %408 = vector.broadcast %cst_184 : f32 to vector<1x8xf32>
    %409 = arith.select %407, %404, %408 : vector<1x8xi1>, vector<1x8xf32>
    %c0_185 = arith.constant 0 : index
    %c0_186 = arith.constant 0 : index
    %c0_187 = arith.constant 0 : index
    %410 = vector.load %arg21[%c0_185, %c0_186, %c0_187] : memref<1x1x8xf32, #tpu.memory_space<vmem>>, vector<1x1x8xf32>
    %411 = vector.shape_cast %410 : vector<1x1x8xf32> to vector<1x8xf32>
    %412 = vector.shape_cast %409 : vector<1x8xf32> to vector<1x1x8xf32>
    tpu.vector_store %arg21[%c0_185, %c0_186, %c0_187], %412 {strides = array<i32>} : memref<1x1x8xf32, #tpu.memory_space<vmem>>, vector<1x1x8xf32>,
    return
  }
  func.func @transform_0(%arg0: i32, %arg1: memref<2xi32, #tpu.memory_space<smem>>) -> (i32, i32, i32) {
    %c0_i32 = arith.constant 0 : i32
    %c0_i32_0 = arith.constant 0 : i32
    %c0_i32_1 = arith.constant 0 : i32
    return %arg0, %c0_i32, %c0_i32_0 : i32, i32, i32
  }
  func.func @transform_1(%arg0: i32, %arg1: memref<2xi32, #tpu.memory_space<smem>>) -> (i32, i32) {
    %c0_i32 = arith.constant 0 : i32
    %c0_i32_0 = arith.constant 0 : i32
    %c0_i32_1 = arith.constant 0 : i32
    return %c0_i32, %c0_i32_0 : i32, i32
  }
  func.func @transform_2(%arg0: i32, %arg1: memref<2xi32, #tpu.memory_space<smem>>) -> (i32, i32) {
    %c0_i32 = arith.constant 0 : i32
    %c0_i32_0 = arith.constant 0 : i32
    %c0_i32_1 = arith.constant 0 : i32
    return %c0_i32, %c0_i32_0 : i32, i32
  }
  func.func @transform_3(%arg0: i32, %arg1: memref<2xi32, #tpu.memory_space<smem>>) -> (i32, i32, i32) {
    %c0_i32 = arith.constant 0 : i32
    %c0_i32_0 = arith.constant 0 : i32
    %c0_i32_1 = arith.constant 0 : i32
    %c0_i32_2 = arith.constant 0 : i32
    return %c0_i32, %c0_i32_0, %c0_i32_1 : i32, i32, i32
  }
  func.func @transform_4(%arg0: i32, %arg1: memref<2xi32, #tpu.memory_space<smem>>) -> (i32, i32, i32) {
    %c0_i32 = arith.constant 0 : i32
    %c0_i32_0 = arith.constant 0 : i32
    %c0_i32_1 = arith.constant 0 : i32
    %c0_i32_2 = arith.constant 0 : i32
    return %c0_i32, %c0_i32_0, %c0_i32_1 : i32, i32, i32
  }
  func.func @transform_5(%arg0: i32, %arg1: memref<2xi32, #tpu.memory_space<smem>>) -> (i32, i32, i32) {
    %c0_i32 = arith.constant 0 : i32
    %c0_i32_0 = arith.constant 0 : i32
    %c0_i32_1 = arith.constant 0 : i32
    %c0_i32_2 = arith.constant 0 : i32
    return %c0_i32, %c0_i32_0, %c0_i32_1 : i32, i32, i32
  }
  func.func @transform_6(%arg0: i32, %arg1: memref<2xi32, #tpu.memory_space<smem>>) -> (i32, i32, i32) {
    %c0_i32 = arith.constant 0 : i32
    %c0_i32_0 = arith.constant 0 : i32
    %c0_i32_1 = arith.constant 0 : i32
    %c0_i32_2 = arith.constant 0 : i32
    return %c0_i32, %c0_i32_0, %c0_i32_1 : i32, i32, i32
  }
  func.func @transform_7(%arg0: i32, %arg1: memref<2xi32, #tpu.memory_space<smem>>) -> (i32, i32, i32) {
    %c0_i32 = arith.constant 0 : i32
    %c0_i32_0 = arith.constant 0 : i32
    %c0_i32_1 = arith.constant 0 : i32
    %c0_i32_2 = arith.constant 0 : i32
    return %c0_i32, %c0_i32_0, %c0_i32_1 : i32, i32, i32
  }
  func.func @transform_8(%arg0: i32, %arg1: memref<2xi32, #tpu.memory_space<smem>>) -> (i32, i32, i32) {
    %c0_i32 = arith.constant 0 : i32
    %c0_i32_0 = arith.constant 0 : i32
    %c0_i32_1 = arith.constant 0 : i32
    %c0_i32_2 = arith.constant 0 : i32
    return %c0_i32, %c0_i32_0, %c0_i32_1 : i32, i32, i32
  }
  func.func @transform_9(%arg0: i32, %arg1: memref<2xi32, #tpu.memory_space<smem>>) -> (i32, i32, i32) {
    %c0_i32 = arith.constant 0 : i32
    %c0_i32_0 = arith.constant 0 : i32
    %c0_i32_1 = arith.constant 0 : i32
    %c0_i32_2 = arith.constant 0 : i32
    return %c0_i32, %c0_i32_0, %c0_i32_1 : i32, i32, i32
  }
  func.func @transform_10(%arg0: i32, %arg1: memref<2xi32, #tpu.memory_space<smem>>) -> (i32, i32, i32) {
    %c0_i32 = arith.constant 0 : i32
    %c0_i32_0 = arith.constant 0 : i32
    %c0_i32_1 = arith.constant 0 : i32
    %c0_i32_2 = arith.constant 0 : i32
    return %c0_i32, %c0_i32_0, %c0_i32_1 : i32, i32, i32
  }
  func.func @transform_11(%arg0: i32, %arg1: memref<2xi32, #tpu.memory_space<smem>>) -> (i32, i32, i32, i32) {
    %c0_i32 = arith.constant 0 : i32
    %c0_i32_0 = arith.constant 0 : i32
    %c0_i32_1 = arith.constant 0 : i32
    %c0_i32_2 = arith.constant 0 : i32
    %c0_i32_3 = arith.constant 0 : i32
    return %c0_i32, %c0_i32_0, %c0_i32_1, %c0_i32_2 : i32, i32, i32, i32
  }
  func.func @transform_12(%arg0: i32, %arg1: memref<2xi32, #tpu.memory_space<smem>>) -> (i32, i32) {
    %c0_i32 = arith.constant 0 : i32
    %c0_i32_0 = arith.constant 0 : i32
    %c0_i32_1 = arith.constant 0 : i32
    return %c0_i32, %c0_i32_0 : i32, i32
  }
  func.func @transform_13(%arg0: i32, %arg1: memref<2xi32, #tpu.memory_space<smem>>) -> (i32, i32) {
    %c0_i32 = arith.constant 0 : i32
    %c0_i32_0 = arith.constant 0 : i32
    %c0_i32_1 = arith.constant 0 : i32
    return %c0_i32, %c0_i32_0 : i32, i32
  }
  func.func @transform_14(%arg0: i32, %arg1: memref<2xi32, #tpu.memory_space<smem>>) -> (i32, i32) {
    %c0_i32 = arith.constant 0 : i32
    %c0_i32_0 = arith.constant 0 : i32
    %c0_i32_1 = arith.constant 0 : i32
    return %c0_i32, %c0_i32_0 : i32, i32
  }
  func.func @transform_15(%arg0: i32, %arg1: memref<2xi32, #tpu.memory_space<smem>>) -> (i32, i32) {
    %c0_i32 = arith.constant 0 : i32
    %c0_i32_0 = arith.constant 0 : i32
    %c0_i32_1 = arith.constant 0 : i32
    return %c0_i32, %c0_i32_0 : i32, i32
  }
  func.func @transform_16(%arg0: i32, %arg1: memref<2xi32, #tpu.memory_space<smem>>) -> (i32, i32) {
    %c0_i32 = arith.constant 0 : i32
    %c0_i32_0 = arith.constant 0 : i32
    %c0_i32_1 = arith.constant 0 : i32
    return %c0_i32, %c0_i32_0 : i32, i32
  }
  func.func @transform_17(%arg0: i32, %arg1: memref<2xi32, #tpu.memory_space<smem>>) -> (i32, i32) {
    %c0_i32 = arith.constant 0 : i32
    %c0_i32_0 = arith.constant 0 : i32
    %c0_i32_1 = arith.constant 0 : i32
    return %c0_i32, %c0_i32_0 : i32, i32
  }
  func.func @transform_18(%arg0: i32, %arg1: memref<2xi32, #tpu.memory_space<smem>>) -> (i32, i32, i32) {
    %c0_i32 = arith.constant 0 : i32
    %c0_i32_0 = arith.constant 0 : i32
    %c0_i32_1 = arith.constant 0 : i32
    return %arg0, %c0_i32, %c0_i32_0 : i32, i32, i32
  }
  func.func @transform_19(%arg0: i32, %arg1: memref<2xi32, #tpu.memory_space<smem>>) -> (i32, i32, i32) {
    %c0_i32 = arith.constant 0 : i32
    %c0_i32_0 = arith.constant 0 : i32
    %c0_i32_1 = arith.constant 0 : i32
    return %arg0, %c0_i32, %c0_i32_0 : i32, i32, i32
  }
}

module attributes {stable_mosaic.version = 11 : i64} {
  func.func @_decoder_kernel(%arg0: i32, %arg1: memref<2xi32, #tpu.memory_space<smem>>, %arg2: memref<2xi32, #tpu.memory_space<smem>>, %arg3: memref<1x5x32xf32, #tpu.memory_space<vmem>>, %arg4: memref<1x8x32xf32, #tpu.memory_space<vmem>>, %arg5: memref<2x32x96xbf16, #tpu.memory_space<vmem>>, %arg6: memref<2x1x96xf32, #tpu.memory_space<vmem>>, %arg7: memref<2x32x32xbf16, #tpu.memory_space<vmem>>, %arg8: memref<2x1x32xf32, #tpu.memory_space<vmem>>, %arg9: memref<2x32x32xbf16, #tpu.memory_space<vmem>>, %arg10: memref<2x1x32xf32, #tpu.memory_space<vmem>>, %arg11: memref<2x32x64xbf16, #tpu.memory_space<vmem>>, %arg12: memref<2x1x64xf32, #tpu.memory_space<vmem>>, %arg13: memref<2x32x32xbf16, #tpu.memory_space<vmem>>, %arg14: memref<2x1x32xf32, #tpu.memory_space<vmem>>, %arg15: memref<2x32x64xbf16, #tpu.memory_space<vmem>>, %arg16: memref<2x1x64xf32, #tpu.memory_space<vmem>>, %arg17: memref<2x64x32xbf16, #tpu.memory_space<vmem>>, %arg18: memref<2x1x32xf32, #tpu.memory_space<vmem>>, %arg19: memref<2x6x1x32xf32, #tpu.memory_space<vmem>>, %arg20: memref<1x32xf32, #tpu.memory_space<vmem>>, %arg21: memref<1x32xf32, #tpu.memory_space<vmem>>, %arg22: memref<32x64xbf16, #tpu.memory_space<vmem>>, %arg23: memref<1x64xf32, #tpu.memory_space<vmem>>, %arg24: memref<1x5x1xi32, #tpu.memory_space<vmem>>) attributes {dimension_semantics = [#tpu.dimension_semantics<parallel>], iteration_bounds = array<i64: 2>, scalar_prefetch = 2 : i64, scratch_operands = 0 : i64, tpu.core_type = #tpu.core_type<tc>, window_params = [{transform_indices = @transform_0, window_bounds = array<i64: 1, 5, 32>}, {transform_indices = @transform_1, window_bounds = array<i64: 1, 8, 32>}, {pipeline_mode = #tpu.pipeline_mode<synchronous>, transform_indices = @transform_2, window_bounds = array<i64: 2, 32, 96>}, {pipeline_mode = #tpu.pipeline_mode<synchronous>, transform_indices = @transform_3, window_bounds = array<i64: 2, 1, 96>}, {pipeline_mode = #tpu.pipeline_mode<synchronous>, transform_indices = @transform_4, window_bounds = array<i64: 2, 32, 32>}, {pipeline_mode = #tpu.pipeline_mode<synchronous>, transform_indices = @transform_5, window_bounds = array<i64: 2, 1, 32>}, {pipeline_mode = #tpu.pipeline_mode<synchronous>, transform_indices = @transform_6, window_bounds = array<i64: 2, 32, 32>}, {pipeline_mode = #tpu.pipeline_mode<synchronous>, transform_indices = @transform_7, window_bounds = array<i64: 2, 1, 32>}, {pipeline_mode = #tpu.pipeline_mode<synchronous>, transform_indices = @transform_8, window_bounds = array<i64: 2, 32, 64>}, {pipeline_mode = #tpu.pipeline_mode<synchronous>, transform_indices = @transform_9, window_bounds = array<i64: 2, 1, 64>}, {pipeline_mode = #tpu.pipeline_mode<synchronous>, transform_indices = @transform_10, window_bounds = array<i64: 2, 32, 32>}, {pipeline_mode = #tpu.pipeline_mode<synchronous>, transform_indices = @transform_11, window_bounds = array<i64: 2, 1, 32>}, {pipeline_mode = #tpu.pipeline_mode<synchronous>, transform_indices = @transform_12, window_bounds = array<i64: 2, 32, 64>}, {pipeline_mode = #tpu.pipeline_mode<synchronous>, transform_indices = @transform_13, window_bounds = array<i64: 2, 1, 64>}, {pipeline_mode = #tpu.pipeline_mode<synchronous>, transform_indices = @transform_14, window_bounds = array<i64: 2, 64, 32>}, {pipeline_mode = #tpu.pipeline_mode<synchronous>, transform_indices = @transform_15, window_bounds = array<i64: 2, 1, 32>}, {pipeline_mode = #tpu.pipeline_mode<synchronous>, transform_indices = @transform_16, window_bounds = array<i64: 2, 6, 1, 32>}, {pipeline_mode = #tpu.pipeline_mode<synchronous>, transform_indices = @transform_17, window_bounds = array<i64: 1, 32>}, {pipeline_mode = #tpu.pipeline_mode<synchronous>, transform_indices = @transform_18, window_bounds = array<i64: 1, 32>}, {pipeline_mode = #tpu.pipeline_mode<synchronous>, transform_indices = @transform_19, window_bounds = array<i64: 32, 64>}, {pipeline_mode = #tpu.pipeline_mode<synchronous>, transform_indices = @transform_20, window_bounds = array<i64: 1, 64>}, {transform_indices = @transform_21, window_bounds = array<i64: 1, 5, 1>}]} {
    %0 = arith.index_cast %arg0 : i32 to index
    %1 = memref.load %arg1[%0] : memref<2xi32, #tpu.memory_space<smem>>
    %2 = arith.index_cast %arg0 : i32 to index
    %3 = memref.load %arg2[%2] : memref<2xi32, #tpu.memory_space<smem>>
    %c0 = arith.constant 0 : index
    %c0_0 = arith.constant 0 : index
    %c0_1 = arith.constant 0 : index
    %4 = vector.load %arg3[%c0, %c0_0, %c0_1] : memref<1x5x32xf32, #tpu.memory_space<vmem>>, vector<1x5x32xf32>
    %5 = vector.shape_cast %4 : vector<1x5x32xf32> to vector<5x32xf32>
    %c0_2 = arith.constant 0 : index
    %c0_3 = arith.constant 0 : index
    %c0_4 = arith.constant 0 : index
    %6 = vector.load %arg4[%c0_2, %c0_3, %c0_4] : memref<1x8x32xf32, #tpu.memory_space<vmem>>, vector<1x8x32xf32>
    %7 = vector.shape_cast %6 : vector<1x8x32xf32> to vector<8x32xf32>
    %c0_5 = arith.constant 0 : index
    %c0_6 = arith.constant 0 : index
    %c0_7 = arith.constant 0 : index
    %c0_8 = arith.constant 0 : index
    %8 = vector.load %arg19[%c0_5, %c0_6, %c0_7, %c0_8] : memref<2x6x1x32xf32, #tpu.memory_space<vmem>>, vector<1x1x1x32xf32>
    %9 = vector.shape_cast %8 : vector<1x1x1x32xf32> to vector<1x32xf32>
    %c0_9 = arith.constant 0 : index
    %c1 = arith.constant 1 : index
    %c0_10 = arith.constant 0 : index
    %c0_11 = arith.constant 0 : index
    %10 = vector.load %arg19[%c0_9, %c1, %c0_10, %c0_11] : memref<2x6x1x32xf32, #tpu.memory_space<vmem>>, vector<1x1x1x32xf32>
    %11 = vector.shape_cast %10 : vector<1x1x1x32xf32> to vector<1x32xf32>
    %cst = arith.constant dense<0.000000e+00> : vector<5xf32>
    %12 = vector.multi_reduction <add>, %5, %cst [1] : vector<5x32xf32> to vector<5xf32>
    %13 = vector.shape_cast %12 : vector<5xf32> to vector<5x1xf32>
    %cst_12 = arith.constant 3.200000e+01 : f32
    %14 = vector.broadcast %cst_12 : f32 to vector<5x1xf32>
    %15 = arith.divf %13, %14 : vector<5x1xf32>
    %16 = vector.broadcast %15 : vector<5x1xf32> to vector<5x32xf32>
    %17 = arith.subf %5, %16 : vector<5x32xf32>
    %18 = arith.mulf %17, %17 : vector<5x32xf32>
    %cst_13 = arith.constant dense<0.000000e+00> : vector<5xf32>
    %19 = vector.multi_reduction <add>, %18, %cst_13 [1] : vector<5x32xf32> to vector<5xf32>
    %20 = vector.shape_cast %19 : vector<5xf32> to vector<5x1xf32>
    %cst_14 = arith.constant 3.200000e+01 : f32
    %21 = vector.broadcast %cst_14 : f32 to vector<5x1xf32>
    %22 = arith.divf %20, %21 : vector<5x1xf32>
    %23 = vector.broadcast %15 : vector<5x1xf32> to vector<5x32xf32>
    %24 = arith.subf %5, %23 : vector<5x32xf32>
    %cst_15 = arith.constant 9.99999974E-6 : f32
    %25 = vector.broadcast %cst_15 : f32 to vector<5x1xf32>
    %26 = arith.addf %22, %25 : vector<5x1xf32>
    %27 = math.rsqrt %26 : vector<5x1xf32>
    %28 = vector.broadcast %27 : vector<5x1xf32> to vector<5x32xf32>
    %29 = arith.mulf %24, %28 : vector<5x32xf32>
    %30 = vector.broadcast %9 : vector<1x32xf32> to vector<5x32xf32>
    %31 = arith.mulf %29, %30 : vector<5x32xf32>
    %32 = vector.broadcast %11 : vector<1x32xf32> to vector<5x32xf32>
    %33 = arith.addf %31, %32 : vector<5x32xf32>
    %c0_16 = arith.constant 0 : index
    %c0_17 = arith.constant 0 : index
    %c0_18 = arith.constant 0 : index
    %34 = vector.load %arg5[%c0_16, %c0_17, %c0_18] : memref<2x32x96xbf16, #tpu.memory_space<vmem>>, vector<1x32x96xbf16>
    %35 = vector.shape_cast %34 : vector<1x32x96xbf16> to vector<32x96xbf16>
    %c0_19 = arith.constant 0 : index
    %c0_20 = arith.constant 0 : index
    %c0_21 = arith.constant 0 : index
    %36 = vector.load %arg6[%c0_19, %c0_20, %c0_21] : memref<2x1x96xf32, #tpu.memory_space<vmem>>, vector<1x1x96xf32>
    %37 = vector.shape_cast %36 : vector<1x1x96xf32> to vector<1x96xf32>
    %c0_22 = arith.constant 0 : index
    %c0_23 = arith.constant 0 : index
    %c0_24 = arith.constant 0 : index
    %38 = vector.load %arg7[%c0_22, %c0_23, %c0_24] : memref<2x32x32xbf16, #tpu.memory_space<vmem>>, vector<1x32x32xbf16>
    %39 = vector.shape_cast %38 : vector<1x32x32xbf16> to vector<32x32xbf16>
    %c0_25 = arith.constant 0 : index
    %c0_26 = arith.constant 0 : index
    %c0_27 = arith.constant 0 : index
    %40 = vector.load %arg8[%c0_25, %c0_26, %c0_27] : memref<2x1x32xf32, #tpu.memory_space<vmem>>, vector<1x1x32xf32>
    %41 = vector.shape_cast %40 : vector<1x1x32xf32> to vector<1x32xf32>
    %42 = arith.truncf %33 : vector<5x32xf32> to vector<5x32xbf16>
    %cst_28 = arith.constant dense<0.000000e+00> : vector<5x96xf32>
    %43 = tpu.matmul %42, %35, %cst_28 {dimension_numbers = #tpu.dot_dimension_numbers<[1], [0], [0], [1], [0, 0, 1, 1], [], []>} : vector<5x32xbf16>, vector<32x96xbf16>, vector<5x96xf32> -> vector<5x96xf32>
    %44 = vector.broadcast %37 : vector<1x96xf32> to vector<5x96xf32>
    %45 = arith.addf %43, %44 : vector<5x96xf32>
    %46 = vector.extract_strided_slice %45 {offsets = [0, 0], sizes = [5, 32], strides = [1, 1]} : vector<5x96xf32> to vector<5x32xf32>
    %47 = vector.extract_strided_slice %45 {offsets = [0, 32], sizes = [5, 32], strides = [1, 1]} : vector<5x96xf32> to vector<5x32xf32>
    %48 = vector.extract_strided_slice %45 {offsets = [0, 64], sizes = [5, 32], strides = [1, 1]} : vector<5x96xf32> to vector<5x32xf32>
    %49 = tpu.iota {dimensions = array<i32: 1>} : vector<5x5xi32>
    %50 = vector.broadcast %1 : i32 to vector<5x5xi32>
    %51 = arith.cmpi slt, %49, %50 : vector<5x5xi32>
    %cst_29 = arith.constant 0.000000e+00 : f32
    %cst_30 = arith.constant -1.000000e+09 : f32
    %52 = vector.broadcast %cst_29 : f32 to vector<5x5xf32>
    %53 = vector.broadcast %cst_30 : f32 to vector<5x5xf32>
    %54 = arith.select %51, %52, %53 : vector<5x5xi1>, vector<5x5xf32>
    %55 = vector.extract_strided_slice %46 {offsets = [0, 0], sizes = [5, 8], strides = [1, 1]} : vector<5x32xf32> to vector<5x8xf32>
    %56 = vector.extract_strided_slice %47 {offsets = [0, 0], sizes = [5, 8], strides = [1, 1]} : vector<5x32xf32> to vector<5x8xf32>
    %cst_31 = arith.constant dense<0.000000e+00> : vector<5x5xf32>
    %57 = tpu.matmul %55, %56, %cst_31 {dimension_numbers = #tpu.dot_dimension_numbers<[1], [1], [0], [0], [0, 0, 1, 0], [], []>} : vector<5x8xf32>, vector<5x8xf32>, vector<5x5xf32> -> vector<5x5xf32>
    %cst_32 = arith.constant 0.353553385 : f32
    %58 = vector.broadcast %cst_32 : f32 to vector<5x5xf32>
    %59 = arith.mulf %57, %58 : vector<5x5xf32>
    %60 = arith.addf %59, %54 : vector<5x5xf32>
    %cst_33 = arith.constant dense<0xFF800000> : vector<5xf32>
    %61 = vector.multi_reduction <maximumf>, %60, %cst_33 [1] : vector<5x5xf32> to vector<5xf32>
    %62 = vector.shape_cast %61 : vector<5xf32> to vector<5x1xf32>
    %63 = vector.broadcast %62 : vector<5x1xf32> to vector<5x5xf32>
    %64 = arith.subf %60, %63 : vector<5x5xf32>
    %65 = math.exp %64 : vector<5x5xf32>
    %cst_34 = arith.constant dense<0.000000e+00> : vector<5xf32>
    %66 = vector.multi_reduction <add>, %65, %cst_34 [1] : vector<5x5xf32> to vector<5xf32>
    %67 = vector.shape_cast %66 : vector<5xf32> to vector<5x1xf32>
    %68 = vector.broadcast %67 : vector<5x1xf32> to vector<5x5xf32>
    %69 = arith.divf %65, %68 : vector<5x5xf32>
    %70 = vector.extract_strided_slice %48 {offsets = [0, 0], sizes = [5, 8], strides = [1, 1]} : vector<5x32xf32> to vector<5x8xf32>
    %cst_35 = arith.constant dense<0.000000e+00> : vector<5x8xf32>
    %71 = tpu.matmul %69, %70, %cst_35 {dimension_numbers = #tpu.dot_dimension_numbers<[1], [0], [0], [1], [0, 0, 1, 1], [], []>} : vector<5x5xf32>, vector<5x8xf32>, vector<5x8xf32> -> vector<5x8xf32>
    %72 = vector.extract_strided_slice %46 {offsets = [0, 8], sizes = [5, 8], strides = [1, 1]} : vector<5x32xf32> to vector<5x8xf32>
    %73 = vector.extract_strided_slice %47 {offsets = [0, 8], sizes = [5, 8], strides = [1, 1]} : vector<5x32xf32> to vector<5x8xf32>
    %cst_36 = arith.constant dense<0.000000e+00> : vector<5x5xf32>
    %74 = tpu.matmul %72, %73, %cst_36 {dimension_numbers = #tpu.dot_dimension_numbers<[1], [1], [0], [0], [0, 0, 1, 0], [], []>} : vector<5x8xf32>, vector<5x8xf32>, vector<5x5xf32> -> vector<5x5xf32>
    %cst_37 = arith.constant 0.353553385 : f32
    %75 = vector.broadcast %cst_37 : f32 to vector<5x5xf32>
    %76 = arith.mulf %74, %75 : vector<5x5xf32>
    %77 = arith.addf %76, %54 : vector<5x5xf32>
    %cst_38 = arith.constant dense<0xFF800000> : vector<5xf32>
    %78 = vector.multi_reduction <maximumf>, %77, %cst_38 [1] : vector<5x5xf32> to vector<5xf32>
    %79 = vector.shape_cast %78 : vector<5xf32> to vector<5x1xf32>
    %80 = vector.broadcast %79 : vector<5x1xf32> to vector<5x5xf32>
    %81 = arith.subf %77, %80 : vector<5x5xf32>
    %82 = math.exp %81 : vector<5x5xf32>
    %cst_39 = arith.constant dense<0.000000e+00> : vector<5xf32>
    %83 = vector.multi_reduction <add>, %82, %cst_39 [1] : vector<5x5xf32> to vector<5xf32>
    %84 = vector.shape_cast %83 : vector<5xf32> to vector<5x1xf32>
    %85 = vector.broadcast %84 : vector<5x1xf32> to vector<5x5xf32>
    %86 = arith.divf %82, %85 : vector<5x5xf32>
    %87 = vector.extract_strided_slice %48 {offsets = [0, 8], sizes = [5, 8], strides = [1, 1]} : vector<5x32xf32> to vector<5x8xf32>
    %cst_40 = arith.constant dense<0.000000e+00> : vector<5x8xf32>
    %88 = tpu.matmul %86, %87, %cst_40 {dimension_numbers = #tpu.dot_dimension_numbers<[1], [0], [0], [1], [0, 0, 1, 1], [], []>} : vector<5x5xf32>, vector<5x8xf32>, vector<5x8xf32> -> vector<5x8xf32>
    %89 = vector.extract_strided_slice %46 {offsets = [0, 16], sizes = [5, 8], strides = [1, 1]} : vector<5x32xf32> to vector<5x8xf32>
    %90 = vector.extract_strided_slice %47 {offsets = [0, 16], sizes = [5, 8], strides = [1, 1]} : vector<5x32xf32> to vector<5x8xf32>
    %cst_41 = arith.constant dense<0.000000e+00> : vector<5x5xf32>
    %91 = tpu.matmul %89, %90, %cst_41 {dimension_numbers = #tpu.dot_dimension_numbers<[1], [1], [0], [0], [0, 0, 1, 0], [], []>} : vector<5x8xf32>, vector<5x8xf32>, vector<5x5xf32> -> vector<5x5xf32>
    %cst_42 = arith.constant 0.353553385 : f32
    %92 = vector.broadcast %cst_42 : f32 to vector<5x5xf32>
    %93 = arith.mulf %91, %92 : vector<5x5xf32>
    %94 = arith.addf %93, %54 : vector<5x5xf32>
    %cst_43 = arith.constant dense<0xFF800000> : vector<5xf32>
    %95 = vector.multi_reduction <maximumf>, %94, %cst_43 [1] : vector<5x5xf32> to vector<5xf32>
    %96 = vector.shape_cast %95 : vector<5xf32> to vector<5x1xf32>
    %97 = vector.broadcast %96 : vector<5x1xf32> to vector<5x5xf32>
    %98 = arith.subf %94, %97 : vector<5x5xf32>
    %99 = math.exp %98 : vector<5x5xf32>
    %cst_44 = arith.constant dense<0.000000e+00> : vector<5xf32>
    %100 = vector.multi_reduction <add>, %99, %cst_44 [1] : vector<5x5xf32> to vector<5xf32>
    %101 = vector.shape_cast %100 : vector<5xf32> to vector<5x1xf32>
    %102 = vector.broadcast %101 : vector<5x1xf32> to vector<5x5xf32>
    %103 = arith.divf %99, %102 : vector<5x5xf32>
    %104 = vector.extract_strided_slice %48 {offsets = [0, 16], sizes = [5, 8], strides = [1, 1]} : vector<5x32xf32> to vector<5x8xf32>
    %cst_45 = arith.constant dense<0.000000e+00> : vector<5x8xf32>
    %105 = tpu.matmul %103, %104, %cst_45 {dimension_numbers = #tpu.dot_dimension_numbers<[1], [0], [0], [1], [0, 0, 1, 1], [], []>} : vector<5x5xf32>, vector<5x8xf32>, vector<5x8xf32> -> vector<5x8xf32>
    %106 = vector.extract_strided_slice %46 {offsets = [0, 24], sizes = [5, 8], strides = [1, 1]} : vector<5x32xf32> to vector<5x8xf32>
    %107 = vector.extract_strided_slice %47 {offsets = [0, 24], sizes = [5, 8], strides = [1, 1]} : vector<5x32xf32> to vector<5x8xf32>
    %cst_46 = arith.constant dense<0.000000e+00> : vector<5x5xf32>
    %108 = tpu.matmul %106, %107, %cst_46 {dimension_numbers = #tpu.dot_dimension_numbers<[1], [1], [0], [0], [0, 0, 1, 0], [], []>} : vector<5x8xf32>, vector<5x8xf32>, vector<5x5xf32> -> vector<5x5xf32>
    %cst_47 = arith.constant 0.353553385 : f32
    %109 = vector.broadcast %cst_47 : f32 to vector<5x5xf32>
    %110 = arith.mulf %108, %109 : vector<5x5xf32>
    %111 = arith.addf %110, %54 : vector<5x5xf32>
    %cst_48 = arith.constant dense<0xFF800000> : vector<5xf32>
    %112 = vector.multi_reduction <maximumf>, %111, %cst_48 [1] : vector<5x5xf32> to vector<5xf32>
    %113 = vector.shape_cast %112 : vector<5xf32> to vector<5x1xf32>
    %114 = vector.broadcast %113 : vector<5x1xf32> to vector<5x5xf32>
    %115 = arith.subf %111, %114 : vector<5x5xf32>
    %116 = math.exp %115 : vector<5x5xf32>
    %cst_49 = arith.constant dense<0.000000e+00> : vector<5xf32>
    %117 = vector.multi_reduction <add>, %116, %cst_49 [1] : vector<5x5xf32> to vector<5xf32>
    %118 = vector.shape_cast %117 : vector<5xf32> to vector<5x1xf32>
    %119 = vector.broadcast %118 : vector<5x1xf32> to vector<5x5xf32>
    %120 = arith.divf %116, %119 : vector<5x5xf32>
    %121 = vector.extract_strided_slice %48 {offsets = [0, 24], sizes = [5, 8], strides = [1, 1]} : vector<5x32xf32> to vector<5x8xf32>
    %cst_50 = arith.constant dense<0.000000e+00> : vector<5x8xf32>
    %122 = tpu.matmul %120, %121, %cst_50 {dimension_numbers = #tpu.dot_dimension_numbers<[1], [0], [0], [1], [0, 0, 1, 1], [], []>} : vector<5x5xf32>, vector<5x8xf32>, vector<5x8xf32> -> vector<5x8xf32>
    %123 = tpu.concatenate %71, %88, %105, %122 in 1 : vector<5x8xf32>, vector<5x8xf32>, vector<5x8xf32>, vector<5x8xf32> -> vector<5x32xf32>
    %124 = arith.truncf %123 : vector<5x32xf32> to vector<5x32xbf16>
    %cst_51 = arith.constant dense<0.000000e+00> : vector<5x32xf32>
    %125 = tpu.matmul %124, %39, %cst_51 {dimension_numbers = #tpu.dot_dimension_numbers<[1], [0], [0], [1], [0, 0, 1, 1], [], []>} : vector<5x32xbf16>, vector<32x32xbf16>, vector<5x32xf32> -> vector<5x32xf32>
    %126 = vector.broadcast %41 : vector<1x32xf32> to vector<5x32xf32>
    %127 = arith.addf %125, %126 : vector<5x32xf32>
    %128 = arith.addf %5, %127 : vector<5x32xf32>
    %c0_52 = arith.constant 0 : index
    %c2 = arith.constant 2 : index
    %c0_53 = arith.constant 0 : index
    %c0_54 = arith.constant 0 : index
    %129 = vector.load %arg19[%c0_52, %c2, %c0_53, %c0_54] : memref<2x6x1x32xf32, #tpu.memory_space<vmem>>, vector<1x1x1x32xf32>
    %130 = vector.shape_cast %129 : vector<1x1x1x32xf32> to vector<1x32xf32>
    %c0_55 = arith.constant 0 : index
    %c3 = arith.constant 3 : index
    %c0_56 = arith.constant 0 : index
    %c0_57 = arith.constant 0 : index
    %131 = vector.load %arg19[%c0_55, %c3, %c0_56, %c0_57] : memref<2x6x1x32xf32, #tpu.memory_space<vmem>>, vector<1x1x1x32xf32>
    %132 = vector.shape_cast %131 : vector<1x1x1x32xf32> to vector<1x32xf32>
    %cst_58 = arith.constant dense<0.000000e+00> : vector<5xf32>
    %133 = vector.multi_reduction <add>, %128, %cst_58 [1] : vector<5x32xf32> to vector<5xf32>
    %134 = vector.shape_cast %133 : vector<5xf32> to vector<5x1xf32>
    %cst_59 = arith.constant 3.200000e+01 : f32
    %135 = vector.broadcast %cst_59 : f32 to vector<5x1xf32>
    %136 = arith.divf %134, %135 : vector<5x1xf32>
    %137 = vector.broadcast %136 : vector<5x1xf32> to vector<5x32xf32>
    %138 = arith.subf %128, %137 : vector<5x32xf32>
    %139 = arith.mulf %138, %138 : vector<5x32xf32>
    %cst_60 = arith.constant dense<0.000000e+00> : vector<5xf32>
    %140 = vector.multi_reduction <add>, %139, %cst_60 [1] : vector<5x32xf32> to vector<5xf32>
    %141 = vector.shape_cast %140 : vector<5xf32> to vector<5x1xf32>
    %cst_61 = arith.constant 3.200000e+01 : f32
    %142 = vector.broadcast %cst_61 : f32 to vector<5x1xf32>
    %143 = arith.divf %141, %142 : vector<5x1xf32>
    %144 = vector.broadcast %136 : vector<5x1xf32> to vector<5x32xf32>
    %145 = arith.subf %128, %144 : vector<5x32xf32>
    %cst_62 = arith.constant 9.99999974E-6 : f32
    %146 = vector.broadcast %cst_62 : f32 to vector<5x1xf32>
    %147 = arith.addf %143, %146 : vector<5x1xf32>
    %148 = math.rsqrt %147 : vector<5x1xf32>
    %149 = vector.broadcast %148 : vector<5x1xf32> to vector<5x32xf32>
    %150 = arith.mulf %145, %149 : vector<5x32xf32>
    %151 = vector.broadcast %130 : vector<1x32xf32> to vector<5x32xf32>
    %152 = arith.mulf %150, %151 : vector<5x32xf32>
    %153 = vector.broadcast %132 : vector<1x32xf32> to vector<5x32xf32>
    %154 = arith.addf %152, %153 : vector<5x32xf32>
    %c0_63 = arith.constant 0 : index
    %c0_64 = arith.constant 0 : index
    %c0_65 = arith.constant 0 : index
    %155 = vector.load %arg9[%c0_63, %c0_64, %c0_65] : memref<2x32x32xbf16, #tpu.memory_space<vmem>>, vector<1x32x32xbf16>
    %156 = vector.shape_cast %155 : vector<1x32x32xbf16> to vector<32x32xbf16>
    %c0_66 = arith.constant 0 : index
    %c0_67 = arith.constant 0 : index
    %c0_68 = arith.constant 0 : index
    %157 = vector.load %arg10[%c0_66, %c0_67, %c0_68] : memref<2x1x32xf32, #tpu.memory_space<vmem>>, vector<1x1x32xf32>
    %158 = vector.shape_cast %157 : vector<1x1x32xf32> to vector<1x32xf32>
    %c0_69 = arith.constant 0 : index
    %c0_70 = arith.constant 0 : index
    %c0_71 = arith.constant 0 : index
    %159 = vector.load %arg11[%c0_69, %c0_70, %c0_71] : memref<2x32x64xbf16, #tpu.memory_space<vmem>>, vector<1x32x64xbf16>
    %160 = vector.shape_cast %159 : vector<1x32x64xbf16> to vector<32x64xbf16>
    %c0_72 = arith.constant 0 : index
    %c0_73 = arith.constant 0 : index
    %c0_74 = arith.constant 0 : index
    %161 = vector.load %arg12[%c0_72, %c0_73, %c0_74] : memref<2x1x64xf32, #tpu.memory_space<vmem>>, vector<1x1x64xf32>
    %162 = vector.shape_cast %161 : vector<1x1x64xf32> to vector<1x64xf32>
    %c0_75 = arith.constant 0 : index
    %c0_76 = arith.constant 0 : index
    %c0_77 = arith.constant 0 : index
    %163 = vector.load %arg13[%c0_75, %c0_76, %c0_77] : memref<2x32x32xbf16, #tpu.memory_space<vmem>>, vector<1x32x32xbf16>
    %164 = vector.shape_cast %163 : vector<1x32x32xbf16> to vector<32x32xbf16>
    %c0_78 = arith.constant 0 : index
    %c0_79 = arith.constant 0 : index
    %c0_80 = arith.constant 0 : index
    %165 = vector.load %arg14[%c0_78, %c0_79, %c0_80] : memref<2x1x32xf32, #tpu.memory_space<vmem>>, vector<1x1x32xf32>
    %166 = vector.shape_cast %165 : vector<1x1x32xf32> to vector<1x32xf32>
    %167 = arith.truncf %154 : vector<5x32xf32> to vector<5x32xbf16>
    %cst_81 = arith.constant dense<0.000000e+00> : vector<5x32xf32>
    %168 = tpu.matmul %167, %156, %cst_81 {dimension_numbers = #tpu.dot_dimension_numbers<[1], [0], [0], [1], [0, 0, 1, 1], [], []>} : vector<5x32xbf16>, vector<32x32xbf16>, vector<5x32xf32> -> vector<5x32xf32>
    %169 = vector.broadcast %158 : vector<1x32xf32> to vector<5x32xf32>
    %170 = arith.addf %168, %169 : vector<5x32xf32>
    %171 = arith.truncf %7 : vector<8x32xf32> to vector<8x32xbf16>
    %cst_82 = arith.constant dense<0.000000e+00> : vector<8x64xf32>
    %172 = tpu.matmul %171, %160, %cst_82 {dimension_numbers = #tpu.dot_dimension_numbers<[1], [0], [0], [1], [0, 0, 1, 1], [], []>} : vector<8x32xbf16>, vector<32x64xbf16>, vector<8x64xf32> -> vector<8x64xf32>
    %173 = vector.broadcast %162 : vector<1x64xf32> to vector<8x64xf32>
    %174 = arith.addf %172, %173 : vector<8x64xf32>
    %175 = vector.extract_strided_slice %174 {offsets = [0, 0], sizes = [8, 32], strides = [1, 1]} : vector<8x64xf32> to vector<8x32xf32>
    %176 = vector.extract_strided_slice %174 {offsets = [0, 32], sizes = [8, 32], strides = [1, 1]} : vector<8x64xf32> to vector<8x32xf32>
    %177 = tpu.iota {dimensions = array<i32: 1>} : vector<5x8xi32>
    %178 = vector.broadcast %3 : i32 to vector<5x8xi32>
    %179 = arith.cmpi slt, %177, %178 : vector<5x8xi32>
    %cst_83 = arith.constant 0.000000e+00 : f32
    %cst_84 = arith.constant -1.000000e+09 : f32
    %180 = vector.broadcast %cst_83 : f32 to vector<5x8xf32>
    %181 = vector.broadcast %cst_84 : f32 to vector<5x8xf32>
    %182 = arith.select %179, %180, %181 : vector<5x8xi1>, vector<5x8xf32>
    %183 = vector.extract_strided_slice %170 {offsets = [0, 0], sizes = [5, 8], strides = [1, 1]} : vector<5x32xf32> to vector<5x8xf32>
    %184 = vector.extract_strided_slice %175 {offsets = [0, 0], sizes = [8, 8], strides = [1, 1]} : vector<8x32xf32> to vector<8x8xf32>
    %cst_85 = arith.constant dense<0.000000e+00> : vector<5x8xf32>
    %185 = tpu.matmul %183, %184, %cst_85 {dimension_numbers = #tpu.dot_dimension_numbers<[1], [1], [0], [0], [0, 0, 1, 0], [], []>} : vector<5x8xf32>, vector<8x8xf32>, vector<5x8xf32> -> vector<5x8xf32>
    %cst_86 = arith.constant 0.353553385 : f32
    %186 = vector.broadcast %cst_86 : f32 to vector<5x8xf32>
    %187 = arith.mulf %185, %186 : vector<5x8xf32>
    %188 = arith.addf %187, %182 : vector<5x8xf32>
    %cst_87 = arith.constant dense<0xFF800000> : vector<5xf32>
    %189 = vector.multi_reduction <maximumf>, %188, %cst_87 [1] : vector<5x8xf32> to vector<5xf32>
    %190 = vector.shape_cast %189 : vector<5xf32> to vector<5x1xf32>
    %191 = vector.broadcast %190 : vector<5x1xf32> to vector<5x8xf32>
    %192 = arith.subf %188, %191 : vector<5x8xf32>
    %193 = math.exp %192 : vector<5x8xf32>
    %cst_88 = arith.constant dense<0.000000e+00> : vector<5xf32>
    %194 = vector.multi_reduction <add>, %193, %cst_88 [1] : vector<5x8xf32> to vector<5xf32>
    %195 = vector.shape_cast %194 : vector<5xf32> to vector<5x1xf32>
    %196 = vector.broadcast %195 : vector<5x1xf32> to vector<5x8xf32>
    %197 = arith.divf %193, %196 : vector<5x8xf32>
    %198 = vector.extract_strided_slice %176 {offsets = [0, 0], sizes = [8, 8], strides = [1, 1]} : vector<8x32xf32> to vector<8x8xf32>
    %cst_89 = arith.constant dense<0.000000e+00> : vector<5x8xf32>
    %199 = tpu.matmul %197, %198, %cst_89 {dimension_numbers = #tpu.dot_dimension_numbers<[1], [0], [0], [1], [0, 0, 1, 1], [], []>} : vector<5x8xf32>, vector<8x8xf32>, vector<5x8xf32> -> vector<5x8xf32>
    %200 = vector.extract_strided_slice %170 {offsets = [0, 8], sizes = [5, 8], strides = [1, 1]} : vector<5x32xf32> to vector<5x8xf32>
    %201 = vector.extract_strided_slice %175 {offsets = [0, 8], sizes = [8, 8], strides = [1, 1]} : vector<8x32xf32> to vector<8x8xf32>
    %cst_90 = arith.constant dense<0.000000e+00> : vector<5x8xf32>
    %202 = tpu.matmul %200, %201, %cst_90 {dimension_numbers = #tpu.dot_dimension_numbers<[1], [1], [0], [0], [0, 0, 1, 0], [], []>} : vector<5x8xf32>, vector<8x8xf32>, vector<5x8xf32> -> vector<5x8xf32>
    %cst_91 = arith.constant 0.353553385 : f32
    %203 = vector.broadcast %cst_91 : f32 to vector<5x8xf32>
    %204 = arith.mulf %202, %203 : vector<5x8xf32>
    %205 = arith.addf %204, %182 : vector<5x8xf32>
    %cst_92 = arith.constant dense<0xFF800000> : vector<5xf32>
    %206 = vector.multi_reduction <maximumf>, %205, %cst_92 [1] : vector<5x8xf32> to vector<5xf32>
    %207 = vector.shape_cast %206 : vector<5xf32> to vector<5x1xf32>
    %208 = vector.broadcast %207 : vector<5x1xf32> to vector<5x8xf32>
    %209 = arith.subf %205, %208 : vector<5x8xf32>
    %210 = math.exp %209 : vector<5x8xf32>
    %cst_93 = arith.constant dense<0.000000e+00> : vector<5xf32>
    %211 = vector.multi_reduction <add>, %210, %cst_93 [1] : vector<5x8xf32> to vector<5xf32>
    %212 = vector.shape_cast %211 : vector<5xf32> to vector<5x1xf32>
    %213 = vector.broadcast %212 : vector<5x1xf32> to vector<5x8xf32>
    %214 = arith.divf %210, %213 : vector<5x8xf32>
    %215 = vector.extract_strided_slice %176 {offsets = [0, 8], sizes = [8, 8], strides = [1, 1]} : vector<8x32xf32> to vector<8x8xf32>
    %cst_94 = arith.constant dense<0.000000e+00> : vector<5x8xf32>
    %216 = tpu.matmul %214, %215, %cst_94 {dimension_numbers = #tpu.dot_dimension_numbers<[1], [0], [0], [1], [0, 0, 1, 1], [], []>} : vector<5x8xf32>, vector<8x8xf32>, vector<5x8xf32> -> vector<5x8xf32>
    %217 = vector.extract_strided_slice %170 {offsets = [0, 16], sizes = [5, 8], strides = [1, 1]} : vector<5x32xf32> to vector<5x8xf32>
    %218 = vector.extract_strided_slice %175 {offsets = [0, 16], sizes = [8, 8], strides = [1, 1]} : vector<8x32xf32> to vector<8x8xf32>
    %cst_95 = arith.constant dense<0.000000e+00> : vector<5x8xf32>
    %219 = tpu.matmul %217, %218, %cst_95 {dimension_numbers = #tpu.dot_dimension_numbers<[1], [1], [0], [0], [0, 0, 1, 0], [], []>} : vector<5x8xf32>, vector<8x8xf32>, vector<5x8xf32> -> vector<5x8xf32>
    %cst_96 = arith.constant 0.353553385 : f32
    %220 = vector.broadcast %cst_96 : f32 to vector<5x8xf32>
    %221 = arith.mulf %219, %220 : vector<5x8xf32>
    %222 = arith.addf %221, %182 : vector<5x8xf32>
    %cst_97 = arith.constant dense<0xFF800000> : vector<5xf32>
    %223 = vector.multi_reduction <maximumf>, %222, %cst_97 [1] : vector<5x8xf32> to vector<5xf32>
    %224 = vector.shape_cast %223 : vector<5xf32> to vector<5x1xf32>
    %225 = vector.broadcast %224 : vector<5x1xf32> to vector<5x8xf32>
    %226 = arith.subf %222, %225 : vector<5x8xf32>
    %227 = math.exp %226 : vector<5x8xf32>
    %cst_98 = arith.constant dense<0.000000e+00> : vector<5xf32>
    %228 = vector.multi_reduction <add>, %227, %cst_98 [1] : vector<5x8xf32> to vector<5xf32>
    %229 = vector.shape_cast %228 : vector<5xf32> to vector<5x1xf32>
    %230 = vector.broadcast %229 : vector<5x1xf32> to vector<5x8xf32>
    %231 = arith.divf %227, %230 : vector<5x8xf32>
    %232 = vector.extract_strided_slice %176 {offsets = [0, 16], sizes = [8, 8], strides = [1, 1]} : vector<8x32xf32> to vector<8x8xf32>
    %cst_99 = arith.constant dense<0.000000e+00> : vector<5x8xf32>
    %233 = tpu.matmul %231, %232, %cst_99 {dimension_numbers = #tpu.dot_dimension_numbers<[1], [0], [0], [1], [0, 0, 1, 1], [], []>} : vector<5x8xf32>, vector<8x8xf32>, vector<5x8xf32> -> vector<5x8xf32>
    %234 = vector.extract_strided_slice %170 {offsets = [0, 24], sizes = [5, 8], strides = [1, 1]} : vector<5x32xf32> to vector<5x8xf32>
    %235 = vector.extract_strided_slice %175 {offsets = [0, 24], sizes = [8, 8], strides = [1, 1]} : vector<8x32xf32> to vector<8x8xf32>
    %cst_100 = arith.constant dense<0.000000e+00> : vector<5x8xf32>
    %236 = tpu.matmul %234, %235, %cst_100 {dimension_numbers = #tpu.dot_dimension_numbers<[1], [1], [0], [0], [0, 0, 1, 0], [], []>} : vector<5x8xf32>, vector<8x8xf32>, vector<5x8xf32> -> vector<5x8xf32>
    %cst_101 = arith.constant 0.353553385 : f32
    %237 = vector.broadcast %cst_101 : f32 to vector<5x8xf32>
    %238 = arith.mulf %236, %237 : vector<5x8xf32>
    %239 = arith.addf %238, %182 : vector<5x8xf32>
    %cst_102 = arith.constant dense<0xFF800000> : vector<5xf32>
    %240 = vector.multi_reduction <maximumf>, %239, %cst_102 [1] : vector<5x8xf32> to vector<5xf32>
    %241 = vector.shape_cast %240 : vector<5xf32> to vector<5x1xf32>
    %242 = vector.broadcast %241 : vector<5x1xf32> to vector<5x8xf32>
    %243 = arith.subf %239, %242 : vector<5x8xf32>
    %244 = math.exp %243 : vector<5x8xf32>
    %cst_103 = arith.constant dense<0.000000e+00> : vector<5xf32>
    %245 = vector.multi_reduction <add>, %244, %cst_103 [1] : vector<5x8xf32> to vector<5xf32>
    %246 = vector.shape_cast %245 : vector<5xf32> to vector<5x1xf32>
    %247 = vector.broadcast %246 : vector<5x1xf32> to vector<5x8xf32>
    %248 = arith.divf %244, %247 : vector<5x8xf32>
    %249 = vector.extract_strided_slice %176 {offsets = [0, 24], sizes = [8, 8], strides = [1, 1]} : vector<8x32xf32> to vector<8x8xf32>
    %cst_104 = arith.constant dense<0.000000e+00> : vector<5x8xf32>
    %250 = tpu.matmul %248, %249, %cst_104 {dimension_numbers = #tpu.dot_dimension_numbers<[1], [0], [0], [1], [0, 0, 1, 1], [], []>} : vector<5x8xf32>, vector<8x8xf32>, vector<5x8xf32> -> vector<5x8xf32>
    %251 = tpu.concatenate %199, %216, %233, %250 in 1 : vector<5x8xf32>, vector<5x8xf32>, vector<5x8xf32>, vector<5x8xf32> -> vector<5x32xf32>
    %252 = arith.truncf %251 : vector<5x32xf32> to vector<5x32xbf16>
    %cst_105 = arith.constant dense<0.000000e+00> : vector<5x32xf32>
    %253 = tpu.matmul %252, %164, %cst_105 {dimension_numbers = #tpu.dot_dimension_numbers<[1], [0], [0], [1], [0, 0, 1, 1], [], []>} : vector<5x32xbf16>, vector<32x32xbf16>, vector<5x32xf32> -> vector<5x32xf32>
    %254 = vector.broadcast %166 : vector<1x32xf32> to vector<5x32xf32>
    %255 = arith.addf %253, %254 : vector<5x32xf32>
    %256 = arith.addf %128, %255 : vector<5x32xf32>
    %c0_106 = arith.constant 0 : index
    %c4 = arith.constant 4 : index
    %c0_107 = arith.constant 0 : index
    %c0_108 = arith.constant 0 : index
    %257 = vector.load %arg19[%c0_106, %c4, %c0_107, %c0_108] : memref<2x6x1x32xf32, #tpu.memory_space<vmem>>, vector<1x1x1x32xf32>
    %258 = vector.shape_cast %257 : vector<1x1x1x32xf32> to vector<1x32xf32>
    %c0_109 = arith.constant 0 : index
    %c5 = arith.constant 5 : index
    %c0_110 = arith.constant 0 : index
    %c0_111 = arith.constant 0 : index
    %259 = vector.load %arg19[%c0_109, %c5, %c0_110, %c0_111] : memref<2x6x1x32xf32, #tpu.memory_space<vmem>>, vector<1x1x1x32xf32>
    %260 = vector.shape_cast %259 : vector<1x1x1x32xf32> to vector<1x32xf32>
    %cst_112 = arith.constant dense<0.000000e+00> : vector<5xf32>
    %261 = vector.multi_reduction <add>, %256, %cst_112 [1] : vector<5x32xf32> to vector<5xf32>
    %262 = vector.shape_cast %261 : vector<5xf32> to vector<5x1xf32>
    %cst_113 = arith.constant 3.200000e+01 : f32
    %263 = vector.broadcast %cst_113 : f32 to vector<5x1xf32>
    %264 = arith.divf %262, %263 : vector<5x1xf32>
    %265 = vector.broadcast %264 : vector<5x1xf32> to vector<5x32xf32>
    %266 = arith.subf %256, %265 : vector<5x32xf32>
    %267 = arith.mulf %266, %266 : vector<5x32xf32>
    %cst_114 = arith.constant dense<0.000000e+00> : vector<5xf32>
    %268 = vector.multi_reduction <add>, %267, %cst_114 [1] : vector<5x32xf32> to vector<5xf32>
    %269 = vector.shape_cast %268 : vector<5xf32> to vector<5x1xf32>
    %cst_115 = arith.constant 3.200000e+01 : f32
    %270 = vector.broadcast %cst_115 : f32 to vector<5x1xf32>
    %271 = arith.divf %269, %270 : vector<5x1xf32>
    %272 = vector.broadcast %264 : vector<5x1xf32> to vector<5x32xf32>
    %273 = arith.subf %256, %272 : vector<5x32xf32>
    %cst_116 = arith.constant 9.99999974E-6 : f32
    %274 = vector.broadcast %cst_116 : f32 to vector<5x1xf32>
    %275 = arith.addf %271, %274 : vector<5x1xf32>
    %276 = math.rsqrt %275 : vector<5x1xf32>
    %277 = vector.broadcast %276 : vector<5x1xf32> to vector<5x32xf32>
    %278 = arith.mulf %273, %277 : vector<5x32xf32>
    %279 = vector.broadcast %258 : vector<1x32xf32> to vector<5x32xf32>
    %280 = arith.mulf %278, %279 : vector<5x32xf32>
    %281 = vector.broadcast %260 : vector<1x32xf32> to vector<5x32xf32>
    %282 = arith.addf %280, %281 : vector<5x32xf32>
    %c0_117 = arith.constant 0 : index
    %c0_118 = arith.constant 0 : index
    %c0_119 = arith.constant 0 : index
    %283 = vector.load %arg15[%c0_117, %c0_118, %c0_119] : memref<2x32x64xbf16, #tpu.memory_space<vmem>>, vector<1x32x64xbf16>
    %284 = vector.shape_cast %283 : vector<1x32x64xbf16> to vector<32x64xbf16>
    %c0_120 = arith.constant 0 : index
    %c0_121 = arith.constant 0 : index
    %c0_122 = arith.constant 0 : index
    %285 = vector.load %arg16[%c0_120, %c0_121, %c0_122] : memref<2x1x64xf32, #tpu.memory_space<vmem>>, vector<1x1x64xf32>
    %286 = vector.shape_cast %285 : vector<1x1x64xf32> to vector<1x64xf32>
    %c0_123 = arith.constant 0 : index
    %c0_124 = arith.constant 0 : index
    %c0_125 = arith.constant 0 : index
    %287 = vector.load %arg17[%c0_123, %c0_124, %c0_125] : memref<2x64x32xbf16, #tpu.memory_space<vmem>>, vector<1x64x32xbf16>
    %288 = vector.shape_cast %287 : vector<1x64x32xbf16> to vector<64x32xbf16>
    %c0_126 = arith.constant 0 : index
    %c0_127 = arith.constant 0 : index
    %c0_128 = arith.constant 0 : index
    %289 = vector.load %arg18[%c0_126, %c0_127, %c0_128] : memref<2x1x32xf32, #tpu.memory_space<vmem>>, vector<1x1x32xf32>
    %290 = vector.shape_cast %289 : vector<1x1x32xf32> to vector<1x32xf32>
    %291 = arith.truncf %282 : vector<5x32xf32> to vector<5x32xbf16>
    %cst_129 = arith.constant dense<0.000000e+00> : vector<5x64xf32>
    %292 = tpu.matmul %291, %284, %cst_129 {dimension_numbers = #tpu.dot_dimension_numbers<[1], [0], [0], [1], [0, 0, 1, 1], [], []>} : vector<5x32xbf16>, vector<32x64xbf16>, vector<5x64xf32> -> vector<5x64xf32>
    %293 = vector.broadcast %286 : vector<1x64xf32> to vector<5x64xf32>
    %294 = arith.addf %292, %293 : vector<5x64xf32>
    %cst_130 = arith.constant 0.000000e+00 : f32
    %295 = vector.broadcast %cst_130 : f32 to vector<5x64xf32>
    %296 = arith.maximumf %294, %295 : vector<5x64xf32>
    %297 = arith.truncf %296 : vector<5x64xf32> to vector<5x64xbf16>
    %cst_131 = arith.constant dense<0.000000e+00> : vector<5x32xf32>
    %298 = tpu.matmul %297, %288, %cst_131 {dimension_numbers = #tpu.dot_dimension_numbers<[1], [0], [0], [1], [0, 0, 1, 1], [], []>} : vector<5x64xbf16>, vector<64x32xbf16>, vector<5x32xf32> -> vector<5x32xf32>
    %299 = vector.broadcast %290 : vector<1x32xf32> to vector<5x32xf32>
    %300 = arith.addf %298, %299 : vector<5x32xf32>
    %301 = arith.addf %256, %300 : vector<5x32xf32>
    %c1_132 = arith.constant 1 : index
    %c0_133 = arith.constant 0 : index
    %c0_134 = arith.constant 0 : index
    %c0_135 = arith.constant 0 : index
    %302 = vector.load %arg19[%c1_132, %c0_133, %c0_134, %c0_135] : memref<2x6x1x32xf32, #tpu.memory_space<vmem>>, vector<1x1x1x32xf32>
    %303 = vector.shape_cast %302 : vector<1x1x1x32xf32> to vector<1x32xf32>
    %c1_136 = arith.constant 1 : index
    %c1_137 = arith.constant 1 : index
    %c0_138 = arith.constant 0 : index
    %c0_139 = arith.constant 0 : index
    %304 = vector.load %arg19[%c1_136, %c1_137, %c0_138, %c0_139] : memref<2x6x1x32xf32, #tpu.memory_space<vmem>>, vector<1x1x1x32xf32>
    %305 = vector.shape_cast %304 : vector<1x1x1x32xf32> to vector<1x32xf32>
    %cst_140 = arith.constant dense<0.000000e+00> : vector<5xf32>
    %306 = vector.multi_reduction <add>, %301, %cst_140 [1] : vector<5x32xf32> to vector<5xf32>
    %307 = vector.shape_cast %306 : vector<5xf32> to vector<5x1xf32>
    %cst_141 = arith.constant 3.200000e+01 : f32
    %308 = vector.broadcast %cst_141 : f32 to vector<5x1xf32>
    %309 = arith.divf %307, %308 : vector<5x1xf32>
    %310 = vector.broadcast %309 : vector<5x1xf32> to vector<5x32xf32>
    %311 = arith.subf %301, %310 : vector<5x32xf32>
    %312 = arith.mulf %311, %311 : vector<5x32xf32>
    %cst_142 = arith.constant dense<0.000000e+00> : vector<5xf32>
    %313 = vector.multi_reduction <add>, %312, %cst_142 [1] : vector<5x32xf32> to vector<5xf32>
    %314 = vector.shape_cast %313 : vector<5xf32> to vector<5x1xf32>
    %cst_143 = arith.constant 3.200000e+01 : f32
    %315 = vector.broadcast %cst_143 : f32 to vector<5x1xf32>
    %316 = arith.divf %314, %315 : vector<5x1xf32>
    %317 = vector.broadcast %309 : vector<5x1xf32> to vector<5x32xf32>
    %318 = arith.subf %301, %317 : vector<5x32xf32>
    %cst_144 = arith.constant 9.99999974E-6 : f32
    %319 = vector.broadcast %cst_144 : f32 to vector<5x1xf32>
    %320 = arith.addf %316, %319 : vector<5x1xf32>
    %321 = math.rsqrt %320 : vector<5x1xf32>
    %322 = vector.broadcast %321 : vector<5x1xf32> to vector<5x32xf32>
    %323 = arith.mulf %318, %322 : vector<5x32xf32>
    %324 = vector.broadcast %303 : vector<1x32xf32> to vector<5x32xf32>
    %325 = arith.mulf %323, %324 : vector<5x32xf32>
    %326 = vector.broadcast %305 : vector<1x32xf32> to vector<5x32xf32>
    %327 = arith.addf %325, %326 : vector<5x32xf32>
    %c1_145 = arith.constant 1 : index
    %c0_146 = arith.constant 0 : index
    %c0_147 = arith.constant 0 : index
    %328 = vector.load %arg5[%c1_145, %c0_146, %c0_147] : memref<2x32x96xbf16, #tpu.memory_space<vmem>>, vector<1x32x96xbf16>
    %329 = vector.shape_cast %328 : vector<1x32x96xbf16> to vector<32x96xbf16>
    %c1_148 = arith.constant 1 : index
    %c0_149 = arith.constant 0 : index
    %c0_150 = arith.constant 0 : index
    %330 = vector.load %arg6[%c1_148, %c0_149, %c0_150] : memref<2x1x96xf32, #tpu.memory_space<vmem>>, vector<1x1x96xf32>
    %331 = vector.shape_cast %330 : vector<1x1x96xf32> to vector<1x96xf32>
    %c1_151 = arith.constant 1 : index
    %c0_152 = arith.constant 0 : index
    %c0_153 = arith.constant 0 : index
    %332 = vector.load %arg7[%c1_151, %c0_152, %c0_153] : memref<2x32x32xbf16, #tpu.memory_space<vmem>>, vector<1x32x32xbf16>
    %333 = vector.shape_cast %332 : vector<1x32x32xbf16> to vector<32x32xbf16>
    %c1_154 = arith.constant 1 : index
    %c0_155 = arith.constant 0 : index
    %c0_156 = arith.constant 0 : index
    %334 = vector.load %arg8[%c1_154, %c0_155, %c0_156] : memref<2x1x32xf32, #tpu.memory_space<vmem>>, vector<1x1x32xf32>
    %335 = vector.shape_cast %334 : vector<1x1x32xf32> to vector<1x32xf32>
    %336 = arith.truncf %327 : vector<5x32xf32> to vector<5x32xbf16>
    %cst_157 = arith.constant dense<0.000000e+00> : vector<5x96xf32>
    %337 = tpu.matmul %336, %329, %cst_157 {dimension_numbers = #tpu.dot_dimension_numbers<[1], [0], [0], [1], [0, 0, 1, 1], [], []>} : vector<5x32xbf16>, vector<32x96xbf16>, vector<5x96xf32> -> vector<5x96xf32>
    %338 = vector.broadcast %331 : vector<1x96xf32> to vector<5x96xf32>
    %339 = arith.addf %337, %338 : vector<5x96xf32>
    %340 = vector.extract_strided_slice %339 {offsets = [0, 0], sizes = [5, 32], strides = [1, 1]} : vector<5x96xf32> to vector<5x32xf32>
    %341 = vector.extract_strided_slice %339 {offsets = [0, 32], sizes = [5, 32], strides = [1, 1]} : vector<5x96xf32> to vector<5x32xf32>
    %342 = vector.extract_strided_slice %339 {offsets = [0, 64], sizes = [5, 32], strides = [1, 1]} : vector<5x96xf32> to vector<5x32xf32>
    %343 = tpu.iota {dimensions = array<i32: 1>} : vector<5x5xi32>
    %344 = vector.broadcast %1 : i32 to vector<5x5xi32>
    %345 = arith.cmpi slt, %343, %344 : vector<5x5xi32>
    %cst_158 = arith.constant 0.000000e+00 : f32
    %cst_159 = arith.constant -1.000000e+09 : f32
    %346 = vector.broadcast %cst_158 : f32 to vector<5x5xf32>
    %347 = vector.broadcast %cst_159 : f32 to vector<5x5xf32>
    %348 = arith.select %345, %346, %347 : vector<5x5xi1>, vector<5x5xf32>
    %349 = vector.extract_strided_slice %340 {offsets = [0, 0], sizes = [5, 8], strides = [1, 1]} : vector<5x32xf32> to vector<5x8xf32>
    %350 = vector.extract_strided_slice %341 {offsets = [0, 0], sizes = [5, 8], strides = [1, 1]} : vector<5x32xf32> to vector<5x8xf32>
    %cst_160 = arith.constant dense<0.000000e+00> : vector<5x5xf32>
    %351 = tpu.matmul %349, %350, %cst_160 {dimension_numbers = #tpu.dot_dimension_numbers<[1], [1], [0], [0], [0, 0, 1, 0], [], []>} : vector<5x8xf32>, vector<5x8xf32>, vector<5x5xf32> -> vector<5x5xf32>
    %cst_161 = arith.constant 0.353553385 : f32
    %352 = vector.broadcast %cst_161 : f32 to vector<5x5xf32>
    %353 = arith.mulf %351, %352 : vector<5x5xf32>
    %354 = arith.addf %353, %348 : vector<5x5xf32>
    %cst_162 = arith.constant dense<0xFF800000> : vector<5xf32>
    %355 = vector.multi_reduction <maximumf>, %354, %cst_162 [1] : vector<5x5xf32> to vector<5xf32>
    %356 = vector.shape_cast %355 : vector<5xf32> to vector<5x1xf32>
    %357 = vector.broadcast %356 : vector<5x1xf32> to vector<5x5xf32>
    %358 = arith.subf %354, %357 : vector<5x5xf32>
    %359 = math.exp %358 : vector<5x5xf32>
    %cst_163 = arith.constant dense<0.000000e+00> : vector<5xf32>
    %360 = vector.multi_reduction <add>, %359, %cst_163 [1] : vector<5x5xf32> to vector<5xf32>
    %361 = vector.shape_cast %360 : vector<5xf32> to vector<5x1xf32>
    %362 = vector.broadcast %361 : vector<5x1xf32> to vector<5x5xf32>
    %363 = arith.divf %359, %362 : vector<5x5xf32>
    %364 = vector.extract_strided_slice %342 {offsets = [0, 0], sizes = [5, 8], strides = [1, 1]} : vector<5x32xf32> to vector<5x8xf32>
    %cst_164 = arith.constant dense<0.000000e+00> : vector<5x8xf32>
    %365 = tpu.matmul %363, %364, %cst_164 {dimension_numbers = #tpu.dot_dimension_numbers<[1], [0], [0], [1], [0, 0, 1, 1], [], []>} : vector<5x5xf32>, vector<5x8xf32>, vector<5x8xf32> -> vector<5x8xf32>
    %366 = vector.extract_strided_slice %340 {offsets = [0, 8], sizes = [5, 8], strides = [1, 1]} : vector<5x32xf32> to vector<5x8xf32>
    %367 = vector.extract_strided_slice %341 {offsets = [0, 8], sizes = [5, 8], strides = [1, 1]} : vector<5x32xf32> to vector<5x8xf32>
    %cst_165 = arith.constant dense<0.000000e+00> : vector<5x5xf32>
    %368 = tpu.matmul %366, %367, %cst_165 {dimension_numbers = #tpu.dot_dimension_numbers<[1], [1], [0], [0], [0, 0, 1, 0], [], []>} : vector<5x8xf32>, vector<5x8xf32>, vector<5x5xf32> -> vector<5x5xf32>
    %cst_166 = arith.constant 0.353553385 : f32
    %369 = vector.broadcast %cst_166 : f32 to vector<5x5xf32>
    %370 = arith.mulf %368, %369 : vector<5x5xf32>
    %371 = arith.addf %370, %348 : vector<5x5xf32>
    %cst_167 = arith.constant dense<0xFF800000> : vector<5xf32>
    %372 = vector.multi_reduction <maximumf>, %371, %cst_167 [1] : vector<5x5xf32> to vector<5xf32>
    %373 = vector.shape_cast %372 : vector<5xf32> to vector<5x1xf32>
    %374 = vector.broadcast %373 : vector<5x1xf32> to vector<5x5xf32>
    %375 = arith.subf %371, %374 : vector<5x5xf32>
    %376 = math.exp %375 : vector<5x5xf32>
    %cst_168 = arith.constant dense<0.000000e+00> : vector<5xf32>
    %377 = vector.multi_reduction <add>, %376, %cst_168 [1] : vector<5x5xf32> to vector<5xf32>
    %378 = vector.shape_cast %377 : vector<5xf32> to vector<5x1xf32>
    %379 = vector.broadcast %378 : vector<5x1xf32> to vector<5x5xf32>
    %380 = arith.divf %376, %379 : vector<5x5xf32>
    %381 = vector.extract_strided_slice %342 {offsets = [0, 8], sizes = [5, 8], strides = [1, 1]} : vector<5x32xf32> to vector<5x8xf32>
    %cst_169 = arith.constant dense<0.000000e+00> : vector<5x8xf32>
    %382 = tpu.matmul %380, %381, %cst_169 {dimension_numbers = #tpu.dot_dimension_numbers<[1], [0], [0], [1], [0, 0, 1, 1], [], []>} : vector<5x5xf32>, vector<5x8xf32>, vector<5x8xf32> -> vector<5x8xf32>
    %383 = vector.extract_strided_slice %340 {offsets = [0, 16], sizes = [5, 8], strides = [1, 1]} : vector<5x32xf32> to vector<5x8xf32>
    %384 = vector.extract_strided_slice %341 {offsets = [0, 16], sizes = [5, 8], strides = [1, 1]} : vector<5x32xf32> to vector<5x8xf32>
    %cst_170 = arith.constant dense<0.000000e+00> : vector<5x5xf32>
    %385 = tpu.matmul %383, %384, %cst_170 {dimension_numbers = #tpu.dot_dimension_numbers<[1], [1], [0], [0], [0, 0, 1, 0], [], []>} : vector<5x8xf32>, vector<5x8xf32>, vector<5x5xf32> -> vector<5x5xf32>
    %cst_171 = arith.constant 0.353553385 : f32
    %386 = vector.broadcast %cst_171 : f32 to vector<5x5xf32>
    %387 = arith.mulf %385, %386 : vector<5x5xf32>
    %388 = arith.addf %387, %348 : vector<5x5xf32>
    %cst_172 = arith.constant dense<0xFF800000> : vector<5xf32>
    %389 = vector.multi_reduction <maximumf>, %388, %cst_172 [1] : vector<5x5xf32> to vector<5xf32>
    %390 = vector.shape_cast %389 : vector<5xf32> to vector<5x1xf32>
    %391 = vector.broadcast %390 : vector<5x1xf32> to vector<5x5xf32>
    %392 = arith.subf %388, %391 : vector<5x5xf32>
    %393 = math.exp %392 : vector<5x5xf32>
    %cst_173 = arith.constant dense<0.000000e+00> : vector<5xf32>
    %394 = vector.multi_reduction <add>, %393, %cst_173 [1] : vector<5x5xf32> to vector<5xf32>
    %395 = vector.shape_cast %394 : vector<5xf32> to vector<5x1xf32>
    %396 = vector.broadcast %395 : vector<5x1xf32> to vector<5x5xf32>
    %397 = arith.divf %393, %396 : vector<5x5xf32>
    %398 = vector.extract_strided_slice %342 {offsets = [0, 16], sizes = [5, 8], strides = [1, 1]} : vector<5x32xf32> to vector<5x8xf32>
    %cst_174 = arith.constant dense<0.000000e+00> : vector<5x8xf32>
    %399 = tpu.matmul %397, %398, %cst_174 {dimension_numbers = #tpu.dot_dimension_numbers<[1], [0], [0], [1], [0, 0, 1, 1], [], []>} : vector<5x5xf32>, vector<5x8xf32>, vector<5x8xf32> -> vector<5x8xf32>
    %400 = vector.extract_strided_slice %340 {offsets = [0, 24], sizes = [5, 8], strides = [1, 1]} : vector<5x32xf32> to vector<5x8xf32>
    %401 = vector.extract_strided_slice %341 {offsets = [0, 24], sizes = [5, 8], strides = [1, 1]} : vector<5x32xf32> to vector<5x8xf32>
    %cst_175 = arith.constant dense<0.000000e+00> : vector<5x5xf32>
    %402 = tpu.matmul %400, %401, %cst_175 {dimension_numbers = #tpu.dot_dimension_numbers<[1], [1], [0], [0], [0, 0, 1, 0], [], []>} : vector<5x8xf32>, vector<5x8xf32>, vector<5x5xf32> -> vector<5x5xf32>
    %cst_176 = arith.constant 0.353553385 : f32
    %403 = vector.broadcast %cst_176 : f32 to vector<5x5xf32>
    %404 = arith.mulf %402, %403 : vector<5x5xf32>
    %405 = arith.addf %404, %348 : vector<5x5xf32>
    %cst_177 = arith.constant dense<0xFF800000> : vector<5xf32>
    %406 = vector.multi_reduction <maximumf>, %405, %cst_177 [1] : vector<5x5xf32> to vector<5xf32>
    %407 = vector.shape_cast %406 : vector<5xf32> to vector<5x1xf32>
    %408 = vector.broadcast %407 : vector<5x1xf32> to vector<5x5xf32>
    %409 = arith.subf %405, %408 : vector<5x5xf32>
    %410 = math.exp %409 : vector<5x5xf32>
    %cst_178 = arith.constant dense<0.000000e+00> : vector<5xf32>
    %411 = vector.multi_reduction <add>, %410, %cst_178 [1] : vector<5x5xf32> to vector<5xf32>
    %412 = vector.shape_cast %411 : vector<5xf32> to vector<5x1xf32>
    %413 = vector.broadcast %412 : vector<5x1xf32> to vector<5x5xf32>
    %414 = arith.divf %410, %413 : vector<5x5xf32>
    %415 = vector.extract_strided_slice %342 {offsets = [0, 24], sizes = [5, 8], strides = [1, 1]} : vector<5x32xf32> to vector<5x8xf32>
    %cst_179 = arith.constant dense<0.000000e+00> : vector<5x8xf32>
    %416 = tpu.matmul %414, %415, %cst_179 {dimension_numbers = #tpu.dot_dimension_numbers<[1], [0], [0], [1], [0, 0, 1, 1], [], []>} : vector<5x5xf32>, vector<5x8xf32>, vector<5x8xf32> -> vector<5x8xf32>
    %417 = tpu.concatenate %365, %382, %399, %416 in 1 : vector<5x8xf32>, vector<5x8xf32>, vector<5x8xf32>, vector<5x8xf32> -> vector<5x32xf32>
    %418 = arith.truncf %417 : vector<5x32xf32> to vector<5x32xbf16>
    %cst_180 = arith.constant dense<0.000000e+00> : vector<5x32xf32>
    %419 = tpu.matmul %418, %333, %cst_180 {dimension_numbers = #tpu.dot_dimension_numbers<[1], [0], [0], [1], [0, 0, 1, 1], [], []>} : vector<5x32xbf16>, vector<32x32xbf16>, vector<5x32xf32> -> vector<5x32xf32>
    %420 = vector.broadcast %335 : vector<1x32xf32> to vector<5x32xf32>
    %421 = arith.addf %419, %420 : vector<5x32xf32>
    %422 = arith.addf %301, %421 : vector<5x32xf32>
    %c1_181 = arith.constant 1 : index
    %c2_182 = arith.constant 2 : index
    %c0_183 = arith.constant 0 : index
    %c0_184 = arith.constant 0 : index
    %423 = vector.load %arg19[%c1_181, %c2_182, %c0_183, %c0_184] : memref<2x6x1x32xf32, #tpu.memory_space<vmem>>, vector<1x1x1x32xf32>
    %424 = vector.shape_cast %423 : vector<1x1x1x32xf32> to vector<1x32xf32>
    %c1_185 = arith.constant 1 : index
    %c3_186 = arith.constant 3 : index
    %c0_187 = arith.constant 0 : index
    %c0_188 = arith.constant 0 : index
    %425 = vector.load %arg19[%c1_185, %c3_186, %c0_187, %c0_188] : memref<2x6x1x32xf32, #tpu.memory_space<vmem>>, vector<1x1x1x32xf32>
    %426 = vector.shape_cast %425 : vector<1x1x1x32xf32> to vector<1x32xf32>
    %cst_189 = arith.constant dense<0.000000e+00> : vector<5xf32>
    %427 = vector.multi_reduction <add>, %422, %cst_189 [1] : vector<5x32xf32> to vector<5xf32>
    %428 = vector.shape_cast %427 : vector<5xf32> to vector<5x1xf32>
    %cst_190 = arith.constant 3.200000e+01 : f32
    %429 = vector.broadcast %cst_190 : f32 to vector<5x1xf32>
    %430 = arith.divf %428, %429 : vector<5x1xf32>
    %431 = vector.broadcast %430 : vector<5x1xf32> to vector<5x32xf32>
    %432 = arith.subf %422, %431 : vector<5x32xf32>
    %433 = arith.mulf %432, %432 : vector<5x32xf32>
    %cst_191 = arith.constant dense<0.000000e+00> : vector<5xf32>
    %434 = vector.multi_reduction <add>, %433, %cst_191 [1] : vector<5x32xf32> to vector<5xf32>
    %435 = vector.shape_cast %434 : vector<5xf32> to vector<5x1xf32>
    %cst_192 = arith.constant 3.200000e+01 : f32
    %436 = vector.broadcast %cst_192 : f32 to vector<5x1xf32>
    %437 = arith.divf %435, %436 : vector<5x1xf32>
    %438 = vector.broadcast %430 : vector<5x1xf32> to vector<5x32xf32>
    %439 = arith.subf %422, %438 : vector<5x32xf32>
    %cst_193 = arith.constant 9.99999974E-6 : f32
    %440 = vector.broadcast %cst_193 : f32 to vector<5x1xf32>
    %441 = arith.addf %437, %440 : vector<5x1xf32>
    %442 = math.rsqrt %441 : vector<5x1xf32>
    %443 = vector.broadcast %442 : vector<5x1xf32> to vector<5x32xf32>
    %444 = arith.mulf %439, %443 : vector<5x32xf32>
    %445 = vector.broadcast %424 : vector<1x32xf32> to vector<5x32xf32>
    %446 = arith.mulf %444, %445 : vector<5x32xf32>
    %447 = vector.broadcast %426 : vector<1x32xf32> to vector<5x32xf32>
    %448 = arith.addf %446, %447 : vector<5x32xf32>
    %c1_194 = arith.constant 1 : index
    %c0_195 = arith.constant 0 : index
    %c0_196 = arith.constant 0 : index
    %449 = vector.load %arg9[%c1_194, %c0_195, %c0_196] : memref<2x32x32xbf16, #tpu.memory_space<vmem>>, vector<1x32x32xbf16>
    %450 = vector.shape_cast %449 : vector<1x32x32xbf16> to vector<32x32xbf16>
    %c1_197 = arith.constant 1 : index
    %c0_198 = arith.constant 0 : index
    %c0_199 = arith.constant 0 : index
    %451 = vector.load %arg10[%c1_197, %c0_198, %c0_199] : memref<2x1x32xf32, #tpu.memory_space<vmem>>, vector<1x1x32xf32>
    %452 = vector.shape_cast %451 : vector<1x1x32xf32> to vector<1x32xf32>
    %c1_200 = arith.constant 1 : index
    %c0_201 = arith.constant 0 : index
    %c0_202 = arith.constant 0 : index
    %453 = vector.load %arg11[%c1_200, %c0_201, %c0_202] : memref<2x32x64xbf16, #tpu.memory_space<vmem>>, vector<1x32x64xbf16>
    %454 = vector.shape_cast %453 : vector<1x32x64xbf16> to vector<32x64xbf16>
    %c1_203 = arith.constant 1 : index
    %c0_204 = arith.constant 0 : index
    %c0_205 = arith.constant 0 : index
    %455 = vector.load %arg12[%c1_203, %c0_204, %c0_205] : memref<2x1x64xf32, #tpu.memory_space<vmem>>, vector<1x1x64xf32>
    %456 = vector.shape_cast %455 : vector<1x1x64xf32> to vector<1x64xf32>
    %c1_206 = arith.constant 1 : index
    %c0_207 = arith.constant 0 : index
    %c0_208 = arith.constant 0 : index
    %457 = vector.load %arg13[%c1_206, %c0_207, %c0_208] : memref<2x32x32xbf16, #tpu.memory_space<vmem>>, vector<1x32x32xbf16>
    %458 = vector.shape_cast %457 : vector<1x32x32xbf16> to vector<32x32xbf16>
    %c1_209 = arith.constant 1 : index
    %c0_210 = arith.constant 0 : index
    %c0_211 = arith.constant 0 : index
    %459 = vector.load %arg14[%c1_209, %c0_210, %c0_211] : memref<2x1x32xf32, #tpu.memory_space<vmem>>, vector<1x1x32xf32>
    %460 = vector.shape_cast %459 : vector<1x1x32xf32> to vector<1x32xf32>
    %461 = arith.truncf %448 : vector<5x32xf32> to vector<5x32xbf16>
    %cst_212 = arith.constant dense<0.000000e+00> : vector<5x32xf32>
    %462 = tpu.matmul %461, %450, %cst_212 {dimension_numbers = #tpu.dot_dimension_numbers<[1], [0], [0], [1], [0, 0, 1, 1], [], []>} : vector<5x32xbf16>, vector<32x32xbf16>, vector<5x32xf32> -> vector<5x32xf32>
    %463 = vector.broadcast %452 : vector<1x32xf32> to vector<5x32xf32>
    %464 = arith.addf %462, %463 : vector<5x32xf32>
    %465 = arith.truncf %7 : vector<8x32xf32> to vector<8x32xbf16>
    %cst_213 = arith.constant dense<0.000000e+00> : vector<8x64xf32>
    %466 = tpu.matmul %465, %454, %cst_213 {dimension_numbers = #tpu.dot_dimension_numbers<[1], [0], [0], [1], [0, 0, 1, 1], [], []>} : vector<8x32xbf16>, vector<32x64xbf16>, vector<8x64xf32> -> vector<8x64xf32>
    %467 = vector.broadcast %456 : vector<1x64xf32> to vector<8x64xf32>
    %468 = arith.addf %466, %467 : vector<8x64xf32>
    %469 = vector.extract_strided_slice %468 {offsets = [0, 0], sizes = [8, 32], strides = [1, 1]} : vector<8x64xf32> to vector<8x32xf32>
    %470 = vector.extract_strided_slice %468 {offsets = [0, 32], sizes = [8, 32], strides = [1, 1]} : vector<8x64xf32> to vector<8x32xf32>
    %471 = tpu.iota {dimensions = array<i32: 1>} : vector<5x8xi32>
    %472 = vector.broadcast %3 : i32 to vector<5x8xi32>
    %473 = arith.cmpi slt, %471, %472 : vector<5x8xi32>
    %cst_214 = arith.constant 0.000000e+00 : f32
    %cst_215 = arith.constant -1.000000e+09 : f32
    %474 = vector.broadcast %cst_214 : f32 to vector<5x8xf32>
    %475 = vector.broadcast %cst_215 : f32 to vector<5x8xf32>
    %476 = arith.select %473, %474, %475 : vector<5x8xi1>, vector<5x8xf32>
    %477 = vector.extract_strided_slice %464 {offsets = [0, 0], sizes = [5, 8], strides = [1, 1]} : vector<5x32xf32> to vector<5x8xf32>
    %478 = vector.extract_strided_slice %469 {offsets = [0, 0], sizes = [8, 8], strides = [1, 1]} : vector<8x32xf32> to vector<8x8xf32>
    %cst_216 = arith.constant dense<0.000000e+00> : vector<5x8xf32>
    %479 = tpu.matmul %477, %478, %cst_216 {dimension_numbers = #tpu.dot_dimension_numbers<[1], [1], [0], [0], [0, 0, 1, 0], [], []>} : vector<5x8xf32>, vector<8x8xf32>, vector<5x8xf32> -> vector<5x8xf32>
    %cst_217 = arith.constant 0.353553385 : f32
    %480 = vector.broadcast %cst_217 : f32 to vector<5x8xf32>
    %481 = arith.mulf %479, %480 : vector<5x8xf32>
    %482 = arith.addf %481, %476 : vector<5x8xf32>
    %cst_218 = arith.constant dense<0xFF800000> : vector<5xf32>
    %483 = vector.multi_reduction <maximumf>, %482, %cst_218 [1] : vector<5x8xf32> to vector<5xf32>
    %484 = vector.shape_cast %483 : vector<5xf32> to vector<5x1xf32>
    %485 = vector.broadcast %484 : vector<5x1xf32> to vector<5x8xf32>
    %486 = arith.subf %482, %485 : vector<5x8xf32>
    %487 = math.exp %486 : vector<5x8xf32>
    %cst_219 = arith.constant dense<0.000000e+00> : vector<5xf32>
    %488 = vector.multi_reduction <add>, %487, %cst_219 [1] : vector<5x8xf32> to vector<5xf32>
    %489 = vector.shape_cast %488 : vector<5xf32> to vector<5x1xf32>
    %490 = vector.broadcast %489 : vector<5x1xf32> to vector<5x8xf32>
    %491 = arith.divf %487, %490 : vector<5x8xf32>
    %492 = vector.extract_strided_slice %470 {offsets = [0, 0], sizes = [8, 8], strides = [1, 1]} : vector<8x32xf32> to vector<8x8xf32>
    %cst_220 = arith.constant dense<0.000000e+00> : vector<5x8xf32>
    %493 = tpu.matmul %491, %492, %cst_220 {dimension_numbers = #tpu.dot_dimension_numbers<[1], [0], [0], [1], [0, 0, 1, 1], [], []>} : vector<5x8xf32>, vector<8x8xf32>, vector<5x8xf32> -> vector<5x8xf32>
    %494 = vector.extract_strided_slice %464 {offsets = [0, 8], sizes = [5, 8], strides = [1, 1]} : vector<5x32xf32> to vector<5x8xf32>
    %495 = vector.extract_strided_slice %469 {offsets = [0, 8], sizes = [8, 8], strides = [1, 1]} : vector<8x32xf32> to vector<8x8xf32>
    %cst_221 = arith.constant dense<0.000000e+00> : vector<5x8xf32>
    %496 = tpu.matmul %494, %495, %cst_221 {dimension_numbers = #tpu.dot_dimension_numbers<[1], [1], [0], [0], [0, 0, 1, 0], [], []>} : vector<5x8xf32>, vector<8x8xf32>, vector<5x8xf32> -> vector<5x8xf32>
    %cst_222 = arith.constant 0.353553385 : f32
    %497 = vector.broadcast %cst_222 : f32 to vector<5x8xf32>
    %498 = arith.mulf %496, %497 : vector<5x8xf32>
    %499 = arith.addf %498, %476 : vector<5x8xf32>
    %cst_223 = arith.constant dense<0xFF800000> : vector<5xf32>
    %500 = vector.multi_reduction <maximumf>, %499, %cst_223 [1] : vector<5x8xf32> to vector<5xf32>
    %501 = vector.shape_cast %500 : vector<5xf32> to vector<5x1xf32>
    %502 = vector.broadcast %501 : vector<5x1xf32> to vector<5x8xf32>
    %503 = arith.subf %499, %502 : vector<5x8xf32>
    %504 = math.exp %503 : vector<5x8xf32>
    %cst_224 = arith.constant dense<0.000000e+00> : vector<5xf32>
    %505 = vector.multi_reduction <add>, %504, %cst_224 [1] : vector<5x8xf32> to vector<5xf32>
    %506 = vector.shape_cast %505 : vector<5xf32> to vector<5x1xf32>
    %507 = vector.broadcast %506 : vector<5x1xf32> to vector<5x8xf32>
    %508 = arith.divf %504, %507 : vector<5x8xf32>
    %509 = vector.extract_strided_slice %470 {offsets = [0, 8], sizes = [8, 8], strides = [1, 1]} : vector<8x32xf32> to vector<8x8xf32>
    %cst_225 = arith.constant dense<0.000000e+00> : vector<5x8xf32>
    %510 = tpu.matmul %508, %509, %cst_225 {dimension_numbers = #tpu.dot_dimension_numbers<[1], [0], [0], [1], [0, 0, 1, 1], [], []>} : vector<5x8xf32>, vector<8x8xf32>, vector<5x8xf32> -> vector<5x8xf32>
    %511 = vector.extract_strided_slice %464 {offsets = [0, 16], sizes = [5, 8], strides = [1, 1]} : vector<5x32xf32> to vector<5x8xf32>
    %512 = vector.extract_strided_slice %469 {offsets = [0, 16], sizes = [8, 8], strides = [1, 1]} : vector<8x32xf32> to vector<8x8xf32>
    %cst_226 = arith.constant dense<0.000000e+00> : vector<5x8xf32>
    %513 = tpu.matmul %511, %512, %cst_226 {dimension_numbers = #tpu.dot_dimension_numbers<[1], [1], [0], [0], [0, 0, 1, 0], [], []>} : vector<5x8xf32>, vector<8x8xf32>, vector<5x8xf32> -> vector<5x8xf32>
    %cst_227 = arith.constant 0.353553385 : f32
    %514 = vector.broadcast %cst_227 : f32 to vector<5x8xf32>
    %515 = arith.mulf %513, %514 : vector<5x8xf32>
    %516 = arith.addf %515, %476 : vector<5x8xf32>
    %cst_228 = arith.constant dense<0xFF800000> : vector<5xf32>
    %517 = vector.multi_reduction <maximumf>, %516, %cst_228 [1] : vector<5x8xf32> to vector<5xf32>
    %518 = vector.shape_cast %517 : vector<5xf32> to vector<5x1xf32>
    %519 = vector.broadcast %518 : vector<5x1xf32> to vector<5x8xf32>
    %520 = arith.subf %516, %519 : vector<5x8xf32>
    %521 = math.exp %520 : vector<5x8xf32>
    %cst_229 = arith.constant dense<0.000000e+00> : vector<5xf32>
    %522 = vector.multi_reduction <add>, %521, %cst_229 [1] : vector<5x8xf32> to vector<5xf32>
    %523 = vector.shape_cast %522 : vector<5xf32> to vector<5x1xf32>
    %524 = vector.broadcast %523 : vector<5x1xf32> to vector<5x8xf32>
    %525 = arith.divf %521, %524 : vector<5x8xf32>
    %526 = vector.extract_strided_slice %470 {offsets = [0, 16], sizes = [8, 8], strides = [1, 1]} : vector<8x32xf32> to vector<8x8xf32>
    %cst_230 = arith.constant dense<0.000000e+00> : vector<5x8xf32>
    %527 = tpu.matmul %525, %526, %cst_230 {dimension_numbers = #tpu.dot_dimension_numbers<[1], [0], [0], [1], [0, 0, 1, 1], [], []>} : vector<5x8xf32>, vector<8x8xf32>, vector<5x8xf32> -> vector<5x8xf32>
    %528 = vector.extract_strided_slice %464 {offsets = [0, 24], sizes = [5, 8], strides = [1, 1]} : vector<5x32xf32> to vector<5x8xf32>
    %529 = vector.extract_strided_slice %469 {offsets = [0, 24], sizes = [8, 8], strides = [1, 1]} : vector<8x32xf32> to vector<8x8xf32>
    %cst_231 = arith.constant dense<0.000000e+00> : vector<5x8xf32>
    %530 = tpu.matmul %528, %529, %cst_231 {dimension_numbers = #tpu.dot_dimension_numbers<[1], [1], [0], [0], [0, 0, 1, 0], [], []>} : vector<5x8xf32>, vector<8x8xf32>, vector<5x8xf32> -> vector<5x8xf32>
    %cst_232 = arith.constant 0.353553385 : f32
    %531 = vector.broadcast %cst_232 : f32 to vector<5x8xf32>
    %532 = arith.mulf %530, %531 : vector<5x8xf32>
    %533 = arith.addf %532, %476 : vector<5x8xf32>
    %cst_233 = arith.constant dense<0xFF800000> : vector<5xf32>
    %534 = vector.multi_reduction <maximumf>, %533, %cst_233 [1] : vector<5x8xf32> to vector<5xf32>
    %535 = vector.shape_cast %534 : vector<5xf32> to vector<5x1xf32>
    %536 = vector.broadcast %535 : vector<5x1xf32> to vector<5x8xf32>
    %537 = arith.subf %533, %536 : vector<5x8xf32>
    %538 = math.exp %537 : vector<5x8xf32>
    %cst_234 = arith.constant dense<0.000000e+00> : vector<5xf32>
    %539 = vector.multi_reduction <add>, %538, %cst_234 [1] : vector<5x8xf32> to vector<5xf32>
    %540 = vector.shape_cast %539 : vector<5xf32> to vector<5x1xf32>
    %541 = vector.broadcast %540 : vector<5x1xf32> to vector<5x8xf32>
    %542 = arith.divf %538, %541 : vector<5x8xf32>
    %543 = vector.extract_strided_slice %470 {offsets = [0, 24], sizes = [8, 8], strides = [1, 1]} : vector<8x32xf32> to vector<8x8xf32>
    %cst_235 = arith.constant dense<0.000000e+00> : vector<5x8xf32>
    %544 = tpu.matmul %542, %543, %cst_235 {dimension_numbers = #tpu.dot_dimension_numbers<[1], [0], [0], [1], [0, 0, 1, 1], [], []>} : vector<5x8xf32>, vector<8x8xf32>, vector<5x8xf32> -> vector<5x8xf32>
    %545 = tpu.concatenate %493, %510, %527, %544 in 1 : vector<5x8xf32>, vector<5x8xf32>, vector<5x8xf32>, vector<5x8xf32> -> vector<5x32xf32>
    %546 = arith.truncf %545 : vector<5x32xf32> to vector<5x32xbf16>
    %cst_236 = arith.constant dense<0.000000e+00> : vector<5x32xf32>
    %547 = tpu.matmul %546, %458, %cst_236 {dimension_numbers = #tpu.dot_dimension_numbers<[1], [0], [0], [1], [0, 0, 1, 1], [], []>} : vector<5x32xbf16>, vector<32x32xbf16>, vector<5x32xf32> -> vector<5x32xf32>
    %548 = vector.broadcast %460 : vector<1x32xf32> to vector<5x32xf32>
    %549 = arith.addf %547, %548 : vector<5x32xf32>
    %550 = arith.addf %422, %549 : vector<5x32xf32>
    %c1_237 = arith.constant 1 : index
    %c4_238 = arith.constant 4 : index
    %c0_239 = arith.constant 0 : index
    %c0_240 = arith.constant 0 : index
    %551 = vector.load %arg19[%c1_237, %c4_238, %c0_239, %c0_240] : memref<2x6x1x32xf32, #tpu.memory_space<vmem>>, vector<1x1x1x32xf32>
    %552 = vector.shape_cast %551 : vector<1x1x1x32xf32> to vector<1x32xf32>
    %c1_241 = arith.constant 1 : index
    %c5_242 = arith.constant 5 : index
    %c0_243 = arith.constant 0 : index
    %c0_244 = arith.constant 0 : index
    %553 = vector.load %arg19[%c1_241, %c5_242, %c0_243, %c0_244] : memref<2x6x1x32xf32, #tpu.memory_space<vmem>>, vector<1x1x1x32xf32>
    %554 = vector.shape_cast %553 : vector<1x1x1x32xf32> to vector<1x32xf32>
    %cst_245 = arith.constant dense<0.000000e+00> : vector<5xf32>
    %555 = vector.multi_reduction <add>, %550, %cst_245 [1] : vector<5x32xf32> to vector<5xf32>
    %556 = vector.shape_cast %555 : vector<5xf32> to vector<5x1xf32>
    %cst_246 = arith.constant 3.200000e+01 : f32
    %557 = vector.broadcast %cst_246 : f32 to vector<5x1xf32>
    %558 = arith.divf %556, %557 : vector<5x1xf32>
    %559 = vector.broadcast %558 : vector<5x1xf32> to vector<5x32xf32>
    %560 = arith.subf %550, %559 : vector<5x32xf32>
    %561 = arith.mulf %560, %560 : vector<5x32xf32>
    %cst_247 = arith.constant dense<0.000000e+00> : vector<5xf32>
    %562 = vector.multi_reduction <add>, %561, %cst_247 [1] : vector<5x32xf32> to vector<5xf32>
    %563 = vector.shape_cast %562 : vector<5xf32> to vector<5x1xf32>
    %cst_248 = arith.constant 3.200000e+01 : f32
    %564 = vector.broadcast %cst_248 : f32 to vector<5x1xf32>
    %565 = arith.divf %563, %564 : vector<5x1xf32>
    %566 = vector.broadcast %558 : vector<5x1xf32> to vector<5x32xf32>
    %567 = arith.subf %550, %566 : vector<5x32xf32>
    %cst_249 = arith.constant 9.99999974E-6 : f32
    %568 = vector.broadcast %cst_249 : f32 to vector<5x1xf32>
    %569 = arith.addf %565, %568 : vector<5x1xf32>
    %570 = math.rsqrt %569 : vector<5x1xf32>
    %571 = vector.broadcast %570 : vector<5x1xf32> to vector<5x32xf32>
    %572 = arith.mulf %567, %571 : vector<5x32xf32>
    %573 = vector.broadcast %552 : vector<1x32xf32> to vector<5x32xf32>
    %574 = arith.mulf %572, %573 : vector<5x32xf32>
    %575 = vector.broadcast %554 : vector<1x32xf32> to vector<5x32xf32>
    %576 = arith.addf %574, %575 : vector<5x32xf32>
    %c1_250 = arith.constant 1 : index
    %c0_251 = arith.constant 0 : index
    %c0_252 = arith.constant 0 : index
    %577 = vector.load %arg15[%c1_250, %c0_251, %c0_252] : memref<2x32x64xbf16, #tpu.memory_space<vmem>>, vector<1x32x64xbf16>
    %578 = vector.shape_cast %577 : vector<1x32x64xbf16> to vector<32x64xbf16>
    %c1_253 = arith.constant 1 : index
    %c0_254 = arith.constant 0 : index
    %c0_255 = arith.constant 0 : index
    %579 = vector.load %arg16[%c1_253, %c0_254, %c0_255] : memref<2x1x64xf32, #tpu.memory_space<vmem>>, vector<1x1x64xf32>
    %580 = vector.shape_cast %579 : vector<1x1x64xf32> to vector<1x64xf32>
    %c1_256 = arith.constant 1 : index
    %c0_257 = arith.constant 0 : index
    %c0_258 = arith.constant 0 : index
    %581 = vector.load %arg17[%c1_256, %c0_257, %c0_258] : memref<2x64x32xbf16, #tpu.memory_space<vmem>>, vector<1x64x32xbf16>
    %582 = vector.shape_cast %581 : vector<1x64x32xbf16> to vector<64x32xbf16>
    %c1_259 = arith.constant 1 : index
    %c0_260 = arith.constant 0 : index
    %c0_261 = arith.constant 0 : index
    %583 = vector.load %arg18[%c1_259, %c0_260, %c0_261] : memref<2x1x32xf32, #tpu.memory_space<vmem>>, vector<1x1x32xf32>
    %584 = vector.shape_cast %583 : vector<1x1x32xf32> to vector<1x32xf32>
    %585 = arith.truncf %576 : vector<5x32xf32> to vector<5x32xbf16>
    %cst_262 = arith.constant dense<0.000000e+00> : vector<5x64xf32>
    %586 = tpu.matmul %585, %578, %cst_262 {dimension_numbers = #tpu.dot_dimension_numbers<[1], [0], [0], [1], [0, 0, 1, 1], [], []>} : vector<5x32xbf16>, vector<32x64xbf16>, vector<5x64xf32> -> vector<5x64xf32>
    %587 = vector.broadcast %580 : vector<1x64xf32> to vector<5x64xf32>
    %588 = arith.addf %586, %587 : vector<5x64xf32>
    %cst_263 = arith.constant 0.000000e+00 : f32
    %589 = vector.broadcast %cst_263 : f32 to vector<5x64xf32>
    %590 = arith.maximumf %588, %589 : vector<5x64xf32>
    %591 = arith.truncf %590 : vector<5x64xf32> to vector<5x64xbf16>
    %cst_264 = arith.constant dense<0.000000e+00> : vector<5x32xf32>
    %592 = tpu.matmul %591, %582, %cst_264 {dimension_numbers = #tpu.dot_dimension_numbers<[1], [0], [0], [1], [0, 0, 1, 1], [], []>} : vector<5x64xbf16>, vector<64x32xbf16>, vector<5x32xf32> -> vector<5x32xf32>
    %593 = vector.broadcast %584 : vector<1x32xf32> to vector<5x32xf32>
    %594 = arith.addf %592, %593 : vector<5x32xf32>
    %595 = arith.addf %550, %594 : vector<5x32xf32>
    %c0_265 = arith.constant 0 : index
    %c0_266 = arith.constant 0 : index
    %596 = vector.load %arg20[%c0_265, %c0_266] : memref<1x32xf32, #tpu.memory_space<vmem>>, vector<1x32xf32>
    %c0_267 = arith.constant 0 : index
    %c0_268 = arith.constant 0 : index
    %597 = vector.load %arg21[%c0_267, %c0_268] : memref<1x32xf32, #tpu.memory_space<vmem>>, vector<1x32xf32>
    %cst_269 = arith.constant dense<0.000000e+00> : vector<5xf32>
    %598 = vector.multi_reduction <add>, %595, %cst_269 [1] : vector<5x32xf32> to vector<5xf32>
    %599 = vector.shape_cast %598 : vector<5xf32> to vector<5x1xf32>
    %cst_270 = arith.constant 3.200000e+01 : f32
    %600 = vector.broadcast %cst_270 : f32 to vector<5x1xf32>
    %601 = arith.divf %599, %600 : vector<5x1xf32>
    %602 = vector.broadcast %601 : vector<5x1xf32> to vector<5x32xf32>
    %603 = arith.subf %595, %602 : vector<5x32xf32>
    %604 = arith.mulf %603, %603 : vector<5x32xf32>
    %cst_271 = arith.constant dense<0.000000e+00> : vector<5xf32>
    %605 = vector.multi_reduction <add>, %604, %cst_271 [1] : vector<5x32xf32> to vector<5xf32>
    %606 = vector.shape_cast %605 : vector<5xf32> to vector<5x1xf32>
    %cst_272 = arith.constant 3.200000e+01 : f32
    %607 = vector.broadcast %cst_272 : f32 to vector<5x1xf32>
    %608 = arith.divf %606, %607 : vector<5x1xf32>
    %609 = vector.broadcast %601 : vector<5x1xf32> to vector<5x32xf32>
    %610 = arith.subf %595, %609 : vector<5x32xf32>
    %cst_273 = arith.constant 9.99999974E-6 : f32
    %611 = vector.broadcast %cst_273 : f32 to vector<5x1xf32>
    %612 = arith.addf %608, %611 : vector<5x1xf32>
    %613 = math.rsqrt %612 : vector<5x1xf32>
    %614 = vector.broadcast %613 : vector<5x1xf32> to vector<5x32xf32>
    %615 = arith.mulf %610, %614 : vector<5x32xf32>
    %616 = vector.broadcast %596 : vector<1x32xf32> to vector<5x32xf32>
    %617 = arith.mulf %615, %616 : vector<5x32xf32>
    %618 = vector.broadcast %597 : vector<1x32xf32> to vector<5x32xf32>
    %619 = arith.addf %617, %618 : vector<5x32xf32>
    %620 = arith.truncf %619 : vector<5x32xf32> to vector<5x32xbf16>
    %c0_274 = arith.constant 0 : index
    %c0_275 = arith.constant 0 : index
    %621 = vector.load %arg22[%c0_274, %c0_275] : memref<32x64xbf16, #tpu.memory_space<vmem>>, vector<32x64xbf16>
    %cst_276 = arith.constant dense<0.000000e+00> : vector<5x64xf32>
    %622 = tpu.matmul %620, %621, %cst_276 {dimension_numbers = #tpu.dot_dimension_numbers<[1], [0], [0], [1], [0, 0, 1, 1], [], []>} : vector<5x32xbf16>, vector<32x64xbf16>, vector<5x64xf32> -> vector<5x64xf32>
    %c0_277 = arith.constant 0 : index
    %c0_278 = arith.constant 0 : index
    %623 = vector.load %arg23[%c0_277, %c0_278] : memref<1x64xf32, #tpu.memory_space<vmem>>, vector<1x64xf32>
    %624 = vector.broadcast %623 : vector<1x64xf32> to vector<5x64xf32>
    %625 = arith.addf %622, %624 : vector<5x64xf32>
    %cst_279 = arith.constant dense<0xFF800000> : vector<5xf32>
    %626 = vector.multi_reduction <maximumf>, %625, %cst_279 [1] : vector<5x64xf32> to vector<5xf32>
    %627 = vector.shape_cast %626 : vector<5xf32> to vector<5x1xf32>
    %628 = tpu.iota {dimensions = array<i32: 1>} : vector<5x64xi32>
    %629 = vector.broadcast %627 : vector<5x1xf32> to vector<5x64xf32>
    %630 = arith.cmpf oeq, %625, %629 : vector<5x64xf32>
    %c64_i32 = arith.constant 64 : i32
    %631 = vector.broadcast %c64_i32 : i32 to vector<5x64xi32>
    %632 = arith.select %630, %628, %631 : vector<5x64xi1>, vector<5x64xi32>
    %cst_280 = arith.constant dense<2147483647> : vector<5xi32>
    %633 = vector.multi_reduction <minsi>, %632, %cst_280 [1] : vector<5x64xi32> to vector<5xi32>
    %634 = vector.shape_cast %633 : vector<5xi32> to vector<5x1xi32>
    %c0_281 = arith.constant 0 : index
    %c0_282 = arith.constant 0 : index
    %c0_283 = arith.constant 0 : index
    %635 = vector.load %arg24[%c0_281, %c0_282, %c0_283] : memref<1x5x1xi32, #tpu.memory_space<vmem>>, vector<1x5x1xi32>
    %636 = vector.shape_cast %635 : vector<1x5x1xi32> to vector<5x1xi32>
    %637 = vector.shape_cast %634 : vector<5x1xi32> to vector<1x5x1xi32>
    tpu.vector_store %arg24[%c0_281, %c0_282, %c0_283], %637 {strides = array<i32>} : memref<1x5x1xi32, #tpu.memory_space<vmem>>, vector<1x5x1xi32>,
    return
  }
  func.func @transform_0(%arg0: i32, %arg1: memref<2xi32, #tpu.memory_space<smem>>, %arg2: memref<2xi32, #tpu.memory_space<smem>>) -> (i32, i32, i32) {
    %c0_i32 = arith.constant 0 : i32
    %c0_i32_0 = arith.constant 0 : i32
    %c0_i32_1 = arith.constant 0 : i32
    return %arg0, %c0_i32, %c0_i32_0 : i32, i32, i32
  }
  func.func @transform_1(%arg0: i32, %arg1: memref<2xi32, #tpu.memory_space<smem>>, %arg2: memref<2xi32, #tpu.memory_space<smem>>) -> (i32, i32, i32) {
    %c0_i32 = arith.constant 0 : i32
    %c0_i32_0 = arith.constant 0 : i32
    %c0_i32_1 = arith.constant 0 : i32
    return %arg0, %c0_i32, %c0_i32_0 : i32, i32, i32
  }
  func.func @transform_2(%arg0: i32, %arg1: memref<2xi32, #tpu.memory_space<smem>>, %arg2: memref<2xi32, #tpu.memory_space<smem>>) -> (i32, i32, i32) {
    %c0_i32 = arith.constant 0 : i32
    %c0_i32_0 = arith.constant 0 : i32
    %c0_i32_1 = arith.constant 0 : i32
    %c0_i32_2 = arith.constant 0 : i32
    return %c0_i32, %c0_i32_0, %c0_i32_1 : i32, i32, i32
  }
  func.func @transform_3(%arg0: i32, %arg1: memref<2xi32, #tpu.memory_space<smem>>, %arg2: memref<2xi32, #tpu.memory_space<smem>>) -> (i32, i32, i32) {
    %c0_i32 = arith.constant 0 : i32
    %c0_i32_0 = arith.constant 0 : i32
    %c0_i32_1 = arith.constant 0 : i32
    %c0_i32_2 = arith.constant 0 : i32
    return %c0_i32, %c0_i32_0, %c0_i32_1 : i32, i32, i32
  }
  func.func @transform_4(%arg0: i32, %arg1: memref<2xi32, #tpu.memory_space<smem>>, %arg2: memref<2xi32, #tpu.memory_space<smem>>) -> (i32, i32, i32) {
    %c0_i32 = arith.constant 0 : i32
    %c0_i32_0 = arith.constant 0 : i32
    %c0_i32_1 = arith.constant 0 : i32
    %c0_i32_2 = arith.constant 0 : i32
    return %c0_i32, %c0_i32_0, %c0_i32_1 : i32, i32, i32
  }
  func.func @transform_5(%arg0: i32, %arg1: memref<2xi32, #tpu.memory_space<smem>>, %arg2: memref<2xi32, #tpu.memory_space<smem>>) -> (i32, i32, i32) {
    %c0_i32 = arith.constant 0 : i32
    %c0_i32_0 = arith.constant 0 : i32
    %c0_i32_1 = arith.constant 0 : i32
    %c0_i32_2 = arith.constant 0 : i32
    return %c0_i32, %c0_i32_0, %c0_i32_1 : i32, i32, i32
  }
  func.func @transform_6(%arg0: i32, %arg1: memref<2xi32, #tpu.memory_space<smem>>, %arg2: memref<2xi32, #tpu.memory_space<smem>>) -> (i32, i32, i32) {
    %c0_i32 = arith.constant 0 : i32
    %c0_i32_0 = arith.constant 0 : i32
    %c0_i32_1 = arith.constant 0 : i32
    %c0_i32_2 = arith.constant 0 : i32
    return %c0_i32, %c0_i32_0, %c0_i32_1 : i32, i32, i32
  }
  func.func @transform_7(%arg0: i32, %arg1: memref<2xi32, #tpu.memory_space<smem>>, %arg2: memref<2xi32, #tpu.memory_space<smem>>) -> (i32, i32, i32) {
    %c0_i32 = arith.constant 0 : i32
    %c0_i32_0 = arith.constant 0 : i32
    %c0_i32_1 = arith.constant 0 : i32
    %c0_i32_2 = arith.constant 0 : i32
    return %c0_i32, %c0_i32_0, %c0_i32_1 : i32, i32, i32
  }
  func.func @transform_8(%arg0: i32, %arg1: memref<2xi32, #tpu.memory_space<smem>>, %arg2: memref<2xi32, #tpu.memory_space<smem>>) -> (i32, i32, i32) {
    %c0_i32 = arith.constant 0 : i32
    %c0_i32_0 = arith.constant 0 : i32
    %c0_i32_1 = arith.constant 0 : i32
    %c0_i32_2 = arith.constant 0 : i32
    return %c0_i32, %c0_i32_0, %c0_i32_1 : i32, i32, i32
  }
  func.func @transform_9(%arg0: i32, %arg1: memref<2xi32, #tpu.memory_space<smem>>, %arg2: memref<2xi32, #tpu.memory_space<smem>>) -> (i32, i32, i32) {
    %c0_i32 = arith.constant 0 : i32
    %c0_i32_0 = arith.constant 0 : i32
    %c0_i32_1 = arith.constant 0 : i32
    %c0_i32_2 = arith.constant 0 : i32
    return %c0_i32, %c0_i32_0, %c0_i32_1 : i32, i32, i32
  }
  func.func @transform_10(%arg0: i32, %arg1: memref<2xi32, #tpu.memory_space<smem>>, %arg2: memref<2xi32, #tpu.memory_space<smem>>) -> (i32, i32, i32) {
    %c0_i32 = arith.constant 0 : i32
    %c0_i32_0 = arith.constant 0 : i32
    %c0_i32_1 = arith.constant 0 : i32
    %c0_i32_2 = arith.constant 0 : i32
    return %c0_i32, %c0_i32_0, %c0_i32_1 : i32, i32, i32
  }
  func.func @transform_11(%arg0: i32, %arg1: memref<2xi32, #tpu.memory_space<smem>>, %arg2: memref<2xi32, #tpu.memory_space<smem>>) -> (i32, i32, i32) {
    %c0_i32 = arith.constant 0 : i32
    %c0_i32_0 = arith.constant 0 : i32
    %c0_i32_1 = arith.constant 0 : i32
    %c0_i32_2 = arith.constant 0 : i32
    return %c0_i32, %c0_i32_0, %c0_i32_1 : i32, i32, i32
  }
  func.func @transform_12(%arg0: i32, %arg1: memref<2xi32, #tpu.memory_space<smem>>, %arg2: memref<2xi32, #tpu.memory_space<smem>>) -> (i32, i32, i32) {
    %c0_i32 = arith.constant 0 : i32
    %c0_i32_0 = arith.constant 0 : i32
    %c0_i32_1 = arith.constant 0 : i32
    %c0_i32_2 = arith.constant 0 : i32
    return %c0_i32, %c0_i32_0, %c0_i32_1 : i32, i32, i32
  }
  func.func @transform_13(%arg0: i32, %arg1: memref<2xi32, #tpu.memory_space<smem>>, %arg2: memref<2xi32, #tpu.memory_space<smem>>) -> (i32, i32, i32) {
    %c0_i32 = arith.constant 0 : i32
    %c0_i32_0 = arith.constant 0 : i32
    %c0_i32_1 = arith.constant 0 : i32
    %c0_i32_2 = arith.constant 0 : i32
    return %c0_i32, %c0_i32_0, %c0_i32_1 : i32, i32, i32
  }
  func.func @transform_14(%arg0: i32, %arg1: memref<2xi32, #tpu.memory_space<smem>>, %arg2: memref<2xi32, #tpu.memory_space<smem>>) -> (i32, i32, i32) {
    %c0_i32 = arith.constant 0 : i32
    %c0_i32_0 = arith.constant 0 : i32
    %c0_i32_1 = arith.constant 0 : i32
    %c0_i32_2 = arith.constant 0 : i32
    return %c0_i32, %c0_i32_0, %c0_i32_1 : i32, i32, i32
  }
  func.func @transform_15(%arg0: i32, %arg1: memref<2xi32, #tpu.memory_space<smem>>, %arg2: memref<2xi32, #tpu.memory_space<smem>>) -> (i32, i32, i32) {
    %c0_i32 = arith.constant 0 : i32
    %c0_i32_0 = arith.constant 0 : i32
    %c0_i32_1 = arith.constant 0 : i32
    %c0_i32_2 = arith.constant 0 : i32
    return %c0_i32, %c0_i32_0, %c0_i32_1 : i32, i32, i32
  }
  func.func @transform_16(%arg0: i32, %arg1: memref<2xi32, #tpu.memory_space<smem>>, %arg2: memref<2xi32, #tpu.memory_space<smem>>) -> (i32, i32, i32, i32) {
    %c0_i32 = arith.constant 0 : i32
    %c0_i32_0 = arith.constant 0 : i32
    %c0_i32_1 = arith.constant 0 : i32
    %c0_i32_2 = arith.constant 0 : i32
    %c0_i32_3 = arith.constant 0 : i32
    return %c0_i32, %c0_i32_0, %c0_i32_1, %c0_i32_2 : i32, i32, i32, i32
  }
  func.func @transform_17(%arg0: i32, %arg1: memref<2xi32, #tpu.memory_space<smem>>, %arg2: memref<2xi32, #tpu.memory_space<smem>>) -> (i32, i32) {
    %c0_i32 = arith.constant 0 : i32
    %c0_i32_0 = arith.constant 0 : i32
    %c0_i32_1 = arith.constant 0 : i32
    return %c0_i32, %c0_i32_0 : i32, i32
  }
  func.func @transform_18(%arg0: i32, %arg1: memref<2xi32, #tpu.memory_space<smem>>, %arg2: memref<2xi32, #tpu.memory_space<smem>>) -> (i32, i32) {
    %c0_i32 = arith.constant 0 : i32
    %c0_i32_0 = arith.constant 0 : i32
    %c0_i32_1 = arith.constant 0 : i32
    return %c0_i32, %c0_i32_0 : i32, i32
  }
  func.func @transform_19(%arg0: i32, %arg1: memref<2xi32, #tpu.memory_space<smem>>, %arg2: memref<2xi32, #tpu.memory_space<smem>>) -> (i32, i32) {
    %c0_i32 = arith.constant 0 : i32
    %c0_i32_0 = arith.constant 0 : i32
    %c0_i32_1 = arith.constant 0 : i32
    return %c0_i32, %c0_i32_0 : i32, i32
  }
  func.func @transform_20(%arg0: i32, %arg1: memref<2xi32, #tpu.memory_space<smem>>, %arg2: memref<2xi32, #tpu.memory_space<smem>>) -> (i32, i32) {
    %c0_i32 = arith.constant 0 : i32
    %c0_i32_0 = arith.constant 0 : i32
    %c0_i32_1 = arith.constant 0 : i32
    return %c0_i32, %c0_i32_0 : i32, i32
  }
  func.func @transform_21(%arg0: i32, %arg1: memref<2xi32, #tpu.memory_space<smem>>, %arg2: memref<2xi32, #tpu.memory_space<smem>>) -> (i32, i32, i32) {
    %c0_i32 = arith.constant 0 : i32
    %c0_i32_0 = arith.constant 0 : i32
    %c0_i32_1 = arith.constant 0 : i32
    return %arg0, %c0_i32, %c0_i32_0 : i32, i32, i32
  }
}

module attributes {stable_mosaic.version = 11 : i64} {
  func.func @_decoder_kernel(%arg0: i32, %arg1: memref<2xi32, #tpu.memory_space<smem>>, %arg2: memref<2xi32, #tpu.memory_space<smem>>, %arg3: memref<1x5x32xf32, #tpu.memory_space<vmem>>, %arg4: memref<1x8x32xf32, #tpu.memory_space<vmem>>, %arg5: memref<2x32x96xbf16, #tpu.memory_space<vmem>>, %arg6: memref<2x1x96xf32, #tpu.memory_space<vmem>>, %arg7: memref<2x32x32xbf16, #tpu.memory_space<vmem>>, %arg8: memref<2x1x32xf32, #tpu.memory_space<vmem>>, %arg9: memref<2x32x32xbf16, #tpu.memory_space<vmem>>, %arg10: memref<2x1x32xf32, #tpu.memory_space<vmem>>, %arg11: memref<2x32x64xbf16, #tpu.memory_space<vmem>>, %arg12: memref<2x1x64xf32, #tpu.memory_space<vmem>>, %arg13: memref<2x32x32xbf16, #tpu.memory_space<vmem>>, %arg14: memref<2x1x32xf32, #tpu.memory_space<vmem>>, %arg15: memref<2x32x64xbf16, #tpu.memory_space<vmem>>, %arg16: memref<2x1x64xf32, #tpu.memory_space<vmem>>, %arg17: memref<2x64x32xbf16, #tpu.memory_space<vmem>>, %arg18: memref<2x1x32xf32, #tpu.memory_space<vmem>>, %arg19: memref<2x6x1x32xf32, #tpu.memory_space<vmem>>, %arg20: memref<1x32xf32, #tpu.memory_space<vmem>>, %arg21: memref<1x32xf32, #tpu.memory_space<vmem>>, %arg22: memref<32x64xbf16, #tpu.memory_space<vmem>>, %arg23: memref<1x64xf32, #tpu.memory_space<vmem>>, %arg24: memref<1x5x1xi32, #tpu.memory_space<vmem>>, %arg25: memref<1x1x1xf32, #tpu.memory_space<vmem>>) attributes {dimension_semantics = [#tpu.dimension_semantics<parallel>], iteration_bounds = array<i64: 2>, scalar_prefetch = 2 : i64, scratch_operands = 0 : i64, tpu.core_type = #tpu.core_type<tc>, window_params = [{transform_indices = @transform_0, window_bounds = array<i64: 1, 5, 32>}, {transform_indices = @transform_1, window_bounds = array<i64: 1, 8, 32>}, {pipeline_mode = #tpu.pipeline_mode<synchronous>, transform_indices = @transform_2, window_bounds = array<i64: 2, 32, 96>}, {pipeline_mode = #tpu.pipeline_mode<synchronous>, transform_indices = @transform_3, window_bounds = array<i64: 2, 1, 96>}, {pipeline_mode = #tpu.pipeline_mode<synchronous>, transform_indices = @transform_4, window_bounds = array<i64: 2, 32, 32>}, {pipeline_mode = #tpu.pipeline_mode<synchronous>, transform_indices = @transform_5, window_bounds = array<i64: 2, 1, 32>}, {pipeline_mode = #tpu.pipeline_mode<synchronous>, transform_indices = @transform_6, window_bounds = array<i64: 2, 32, 32>}, {pipeline_mode = #tpu.pipeline_mode<synchronous>, transform_indices = @transform_7, window_bounds = array<i64: 2, 1, 32>}, {pipeline_mode = #tpu.pipeline_mode<synchronous>, transform_indices = @transform_8, window_bounds = array<i64: 2, 32, 64>}, {pipeline_mode = #tpu.pipeline_mode<synchronous>, transform_indices = @transform_9, window_bounds = array<i64: 2, 1, 64>}, {pipeline_mode = #tpu.pipeline_mode<synchronous>, transform_indices = @transform_10, window_bounds = array<i64: 2, 32, 32>}, {pipeline_mode = #tpu.pipeline_mode<synchronous>, transform_indices = @transform_11, window_bounds = array<i64: 2, 1, 32>}, {pipeline_mode = #tpu.pipeline_mode<synchronous>, transform_indices = @transform_12, window_bounds = array<i64: 2, 32, 64>}, {pipeline_mode = #tpu.pipeline_mode<synchronous>, transform_indices = @transform_13, window_bounds = array<i64: 2, 1, 64>}, {pipeline_mode = #tpu.pipeline_mode<synchronous>, transform_indices = @transform_14, window_bounds = array<i64: 2, 64, 32>}, {pipeline_mode = #tpu.pipeline_mode<synchronous>, transform_indices = @transform_15, window_bounds = array<i64: 2, 1, 32>}, {pipeline_mode = #tpu.pipeline_mode<synchronous>, transform_indices = @transform_16, window_bounds = array<i64: 2, 6, 1, 32>}, {pipeline_mode = #tpu.pipeline_mode<synchronous>, transform_indices = @transform_17, window_bounds = array<i64: 1, 32>}, {pipeline_mode = #tpu.pipeline_mode<synchronous>, transform_indices = @transform_18, window_bounds = array<i64: 1, 32>}, {pipeline_mode = #tpu.pipeline_mode<synchronous>, transform_indices = @transform_19, window_bounds = array<i64: 32, 64>}, {pipeline_mode = #tpu.pipeline_mode<synchronous>, transform_indices = @transform_20, window_bounds = array<i64: 1, 64>}, {transform_indices = @transform_21, window_bounds = array<i64: 1, 5, 1>}, {transform_indices = @transform_22, window_bounds = array<i64: 1, 1, 1>}]} {
    %0 = arith.index_cast %arg0 : i32 to index
    %1 = memref.load %arg1[%0] : memref<2xi32, #tpu.memory_space<smem>>
    %2 = arith.index_cast %arg0 : i32 to index
    %3 = memref.load %arg2[%2] : memref<2xi32, #tpu.memory_space<smem>>
    %c0 = arith.constant 0 : index
    %c0_0 = arith.constant 0 : index
    %c0_1 = arith.constant 0 : index
    %4 = vector.load %arg3[%c0, %c0_0, %c0_1] : memref<1x5x32xf32, #tpu.memory_space<vmem>>, vector<1x5x32xf32>
    %5 = vector.shape_cast %4 : vector<1x5x32xf32> to vector<5x32xf32>
    %c0_2 = arith.constant 0 : index
    %c0_3 = arith.constant 0 : index
    %c0_4 = arith.constant 0 : index
    %6 = vector.load %arg4[%c0_2, %c0_3, %c0_4] : memref<1x8x32xf32, #tpu.memory_space<vmem>>, vector<1x8x32xf32>
    %7 = vector.shape_cast %6 : vector<1x8x32xf32> to vector<8x32xf32>
    %c0_5 = arith.constant 0 : index
    %c0_6 = arith.constant 0 : index
    %c0_7 = arith.constant 0 : index
    %c0_8 = arith.constant 0 : index
    %8 = vector.load %arg19[%c0_5, %c0_6, %c0_7, %c0_8] : memref<2x6x1x32xf32, #tpu.memory_space<vmem>>, vector<1x1x1x32xf32>
    %9 = vector.shape_cast %8 : vector<1x1x1x32xf32> to vector<1x32xf32>
    %c0_9 = arith.constant 0 : index
    %c1 = arith.constant 1 : index
    %c0_10 = arith.constant 0 : index
    %c0_11 = arith.constant 0 : index
    %10 = vector.load %arg19[%c0_9, %c1, %c0_10, %c0_11] : memref<2x6x1x32xf32, #tpu.memory_space<vmem>>, vector<1x1x1x32xf32>
    %11 = vector.shape_cast %10 : vector<1x1x1x32xf32> to vector<1x32xf32>
    %cst = arith.constant dense<0.000000e+00> : vector<5xf32>
    %12 = vector.multi_reduction <add>, %5, %cst [1] : vector<5x32xf32> to vector<5xf32>
    %13 = vector.shape_cast %12 : vector<5xf32> to vector<5x1xf32>
    %cst_12 = arith.constant 3.200000e+01 : f32
    %14 = vector.broadcast %cst_12 : f32 to vector<5x1xf32>
    %15 = arith.divf %13, %14 : vector<5x1xf32>
    %16 = vector.broadcast %15 : vector<5x1xf32> to vector<5x32xf32>
    %17 = arith.subf %5, %16 : vector<5x32xf32>
    %18 = arith.mulf %17, %17 : vector<5x32xf32>
    %cst_13 = arith.constant dense<0.000000e+00> : vector<5xf32>
    %19 = vector.multi_reduction <add>, %18, %cst_13 [1] : vector<5x32xf32> to vector<5xf32>
    %20 = vector.shape_cast %19 : vector<5xf32> to vector<5x1xf32>
    %cst_14 = arith.constant 3.200000e+01 : f32
    %21 = vector.broadcast %cst_14 : f32 to vector<5x1xf32>
    %22 = arith.divf %20, %21 : vector<5x1xf32>
    %23 = vector.broadcast %15 : vector<5x1xf32> to vector<5x32xf32>
    %24 = arith.subf %5, %23 : vector<5x32xf32>
    %cst_15 = arith.constant 9.99999974E-6 : f32
    %25 = vector.broadcast %cst_15 : f32 to vector<5x1xf32>
    %26 = arith.addf %22, %25 : vector<5x1xf32>
    %27 = math.rsqrt %26 : vector<5x1xf32>
    %28 = vector.broadcast %27 : vector<5x1xf32> to vector<5x32xf32>
    %29 = arith.mulf %24, %28 : vector<5x32xf32>
    %30 = vector.broadcast %9 : vector<1x32xf32> to vector<5x32xf32>
    %31 = arith.mulf %29, %30 : vector<5x32xf32>
    %32 = vector.broadcast %11 : vector<1x32xf32> to vector<5x32xf32>
    %33 = arith.addf %31, %32 : vector<5x32xf32>
    %c0_16 = arith.constant 0 : index
    %c0_17 = arith.constant 0 : index
    %c0_18 = arith.constant 0 : index
    %34 = vector.load %arg5[%c0_16, %c0_17, %c0_18] : memref<2x32x96xbf16, #tpu.memory_space<vmem>>, vector<1x32x96xbf16>
    %35 = vector.shape_cast %34 : vector<1x32x96xbf16> to vector<32x96xbf16>
    %c0_19 = arith.constant 0 : index
    %c0_20 = arith.constant 0 : index
    %c0_21 = arith.constant 0 : index
    %36 = vector.load %arg6[%c0_19, %c0_20, %c0_21] : memref<2x1x96xf32, #tpu.memory_space<vmem>>, vector<1x1x96xf32>
    %37 = vector.shape_cast %36 : vector<1x1x96xf32> to vector<1x96xf32>
    %c0_22 = arith.constant 0 : index
    %c0_23 = arith.constant 0 : index
    %c0_24 = arith.constant 0 : index
    %38 = vector.load %arg7[%c0_22, %c0_23, %c0_24] : memref<2x32x32xbf16, #tpu.memory_space<vmem>>, vector<1x32x32xbf16>
    %39 = vector.shape_cast %38 : vector<1x32x32xbf16> to vector<32x32xbf16>
    %c0_25 = arith.constant 0 : index
    %c0_26 = arith.constant 0 : index
    %c0_27 = arith.constant 0 : index
    %40 = vector.load %arg8[%c0_25, %c0_26, %c0_27] : memref<2x1x32xf32, #tpu.memory_space<vmem>>, vector<1x1x32xf32>
    %41 = vector.shape_cast %40 : vector<1x1x32xf32> to vector<1x32xf32>
    %42 = arith.truncf %33 : vector<5x32xf32> to vector<5x32xbf16>
    %cst_28 = arith.constant dense<0.000000e+00> : vector<5x96xf32>
    %43 = tpu.matmul %42, %35, %cst_28 {dimension_numbers = #tpu.dot_dimension_numbers<[1], [0], [0], [1], [0, 0, 1, 1], [], []>} : vector<5x32xbf16>, vector<32x96xbf16>, vector<5x96xf32> -> vector<5x96xf32>
    %44 = vector.broadcast %37 : vector<1x96xf32> to vector<5x96xf32>
    %45 = arith.addf %43, %44 : vector<5x96xf32>
    %46 = vector.extract_strided_slice %45 {offsets = [0, 0], sizes = [5, 32], strides = [1, 1]} : vector<5x96xf32> to vector<5x32xf32>
    %47 = vector.extract_strided_slice %45 {offsets = [0, 32], sizes = [5, 32], strides = [1, 1]} : vector<5x96xf32> to vector<5x32xf32>
    %48 = vector.extract_strided_slice %45 {offsets = [0, 64], sizes = [5, 32], strides = [1, 1]} : vector<5x96xf32> to vector<5x32xf32>
    %49 = tpu.iota {dimensions = array<i32: 1>} : vector<5x5xi32>
    %50 = vector.broadcast %1 : i32 to vector<5x5xi32>
    %51 = arith.cmpi slt, %49, %50 : vector<5x5xi32>
    %cst_29 = arith.constant 0.000000e+00 : f32
    %cst_30 = arith.constant -1.000000e+09 : f32
    %52 = vector.broadcast %cst_29 : f32 to vector<5x5xf32>
    %53 = vector.broadcast %cst_30 : f32 to vector<5x5xf32>
    %54 = arith.select %51, %52, %53 : vector<5x5xi1>, vector<5x5xf32>
    %55 = vector.extract_strided_slice %46 {offsets = [0, 0], sizes = [5, 8], strides = [1, 1]} : vector<5x32xf32> to vector<5x8xf32>
    %56 = vector.extract_strided_slice %47 {offsets = [0, 0], sizes = [5, 8], strides = [1, 1]} : vector<5x32xf32> to vector<5x8xf32>
    %cst_31 = arith.constant dense<0.000000e+00> : vector<5x5xf32>
    %57 = tpu.matmul %55, %56, %cst_31 {dimension_numbers = #tpu.dot_dimension_numbers<[1], [1], [0], [0], [0, 0, 1, 0], [], []>} : vector<5x8xf32>, vector<5x8xf32>, vector<5x5xf32> -> vector<5x5xf32>
    %cst_32 = arith.constant 0.353553385 : f32
    %58 = vector.broadcast %cst_32 : f32 to vector<5x5xf32>
    %59 = arith.mulf %57, %58 : vector<5x5xf32>
    %60 = arith.addf %59, %54 : vector<5x5xf32>
    %cst_33 = arith.constant dense<0xFF800000> : vector<5xf32>
    %61 = vector.multi_reduction <maximumf>, %60, %cst_33 [1] : vector<5x5xf32> to vector<5xf32>
    %62 = vector.shape_cast %61 : vector<5xf32> to vector<5x1xf32>
    %63 = vector.broadcast %62 : vector<5x1xf32> to vector<5x5xf32>
    %64 = arith.subf %60, %63 : vector<5x5xf32>
    %65 = math.exp %64 : vector<5x5xf32>
    %cst_34 = arith.constant dense<0.000000e+00> : vector<5xf32>
    %66 = vector.multi_reduction <add>, %65, %cst_34 [1] : vector<5x5xf32> to vector<5xf32>
    %67 = vector.shape_cast %66 : vector<5xf32> to vector<5x1xf32>
    %68 = vector.broadcast %67 : vector<5x1xf32> to vector<5x5xf32>
    %69 = arith.divf %65, %68 : vector<5x5xf32>
    %70 = vector.extract_strided_slice %48 {offsets = [0, 0], sizes = [5, 8], strides = [1, 1]} : vector<5x32xf32> to vector<5x8xf32>
    %cst_35 = arith.constant dense<0.000000e+00> : vector<5x8xf32>
    %71 = tpu.matmul %69, %70, %cst_35 {dimension_numbers = #tpu.dot_dimension_numbers<[1], [0], [0], [1], [0, 0, 1, 1], [], []>} : vector<5x5xf32>, vector<5x8xf32>, vector<5x8xf32> -> vector<5x8xf32>
    %72 = vector.extract_strided_slice %46 {offsets = [0, 8], sizes = [5, 8], strides = [1, 1]} : vector<5x32xf32> to vector<5x8xf32>
    %73 = vector.extract_strided_slice %47 {offsets = [0, 8], sizes = [5, 8], strides = [1, 1]} : vector<5x32xf32> to vector<5x8xf32>
    %cst_36 = arith.constant dense<0.000000e+00> : vector<5x5xf32>
    %74 = tpu.matmul %72, %73, %cst_36 {dimension_numbers = #tpu.dot_dimension_numbers<[1], [1], [0], [0], [0, 0, 1, 0], [], []>} : vector<5x8xf32>, vector<5x8xf32>, vector<5x5xf32> -> vector<5x5xf32>
    %cst_37 = arith.constant 0.353553385 : f32
    %75 = vector.broadcast %cst_37 : f32 to vector<5x5xf32>
    %76 = arith.mulf %74, %75 : vector<5x5xf32>
    %77 = arith.addf %76, %54 : vector<5x5xf32>
    %cst_38 = arith.constant dense<0xFF800000> : vector<5xf32>
    %78 = vector.multi_reduction <maximumf>, %77, %cst_38 [1] : vector<5x5xf32> to vector<5xf32>
    %79 = vector.shape_cast %78 : vector<5xf32> to vector<5x1xf32>
    %80 = vector.broadcast %79 : vector<5x1xf32> to vector<5x5xf32>
    %81 = arith.subf %77, %80 : vector<5x5xf32>
    %82 = math.exp %81 : vector<5x5xf32>
    %cst_39 = arith.constant dense<0.000000e+00> : vector<5xf32>
    %83 = vector.multi_reduction <add>, %82, %cst_39 [1] : vector<5x5xf32> to vector<5xf32>
    %84 = vector.shape_cast %83 : vector<5xf32> to vector<5x1xf32>
    %85 = vector.broadcast %84 : vector<5x1xf32> to vector<5x5xf32>
    %86 = arith.divf %82, %85 : vector<5x5xf32>
    %87 = vector.extract_strided_slice %48 {offsets = [0, 8], sizes = [5, 8], strides = [1, 1]} : vector<5x32xf32> to vector<5x8xf32>
    %cst_40 = arith.constant dense<0.000000e+00> : vector<5x8xf32>
    %88 = tpu.matmul %86, %87, %cst_40 {dimension_numbers = #tpu.dot_dimension_numbers<[1], [0], [0], [1], [0, 0, 1, 1], [], []>} : vector<5x5xf32>, vector<5x8xf32>, vector<5x8xf32> -> vector<5x8xf32>
    %89 = vector.extract_strided_slice %46 {offsets = [0, 16], sizes = [5, 8], strides = [1, 1]} : vector<5x32xf32> to vector<5x8xf32>
    %90 = vector.extract_strided_slice %47 {offsets = [0, 16], sizes = [5, 8], strides = [1, 1]} : vector<5x32xf32> to vector<5x8xf32>
    %cst_41 = arith.constant dense<0.000000e+00> : vector<5x5xf32>
    %91 = tpu.matmul %89, %90, %cst_41 {dimension_numbers = #tpu.dot_dimension_numbers<[1], [1], [0], [0], [0, 0, 1, 0], [], []>} : vector<5x8xf32>, vector<5x8xf32>, vector<5x5xf32> -> vector<5x5xf32>
    %cst_42 = arith.constant 0.353553385 : f32
    %92 = vector.broadcast %cst_42 : f32 to vector<5x5xf32>
    %93 = arith.mulf %91, %92 : vector<5x5xf32>
    %94 = arith.addf %93, %54 : vector<5x5xf32>
    %cst_43 = arith.constant dense<0xFF800000> : vector<5xf32>
    %95 = vector.multi_reduction <maximumf>, %94, %cst_43 [1] : vector<5x5xf32> to vector<5xf32>
    %96 = vector.shape_cast %95 : vector<5xf32> to vector<5x1xf32>
    %97 = vector.broadcast %96 : vector<5x1xf32> to vector<5x5xf32>
    %98 = arith.subf %94, %97 : vector<5x5xf32>
    %99 = math.exp %98 : vector<5x5xf32>
    %cst_44 = arith.constant dense<0.000000e+00> : vector<5xf32>
    %100 = vector.multi_reduction <add>, %99, %cst_44 [1] : vector<5x5xf32> to vector<5xf32>
    %101 = vector.shape_cast %100 : vector<5xf32> to vector<5x1xf32>
    %102 = vector.broadcast %101 : vector<5x1xf32> to vector<5x5xf32>
    %103 = arith.divf %99, %102 : vector<5x5xf32>
    %104 = vector.extract_strided_slice %48 {offsets = [0, 16], sizes = [5, 8], strides = [1, 1]} : vector<5x32xf32> to vector<5x8xf32>
    %cst_45 = arith.constant dense<0.000000e+00> : vector<5x8xf32>
    %105 = tpu.matmul %103, %104, %cst_45 {dimension_numbers = #tpu.dot_dimension_numbers<[1], [0], [0], [1], [0, 0, 1, 1], [], []>} : vector<5x5xf32>, vector<5x8xf32>, vector<5x8xf32> -> vector<5x8xf32>
    %106 = vector.extract_strided_slice %46 {offsets = [0, 24], sizes = [5, 8], strides = [1, 1]} : vector<5x32xf32> to vector<5x8xf32>
    %107 = vector.extract_strided_slice %47 {offsets = [0, 24], sizes = [5, 8], strides = [1, 1]} : vector<5x32xf32> to vector<5x8xf32>
    %cst_46 = arith.constant dense<0.000000e+00> : vector<5x5xf32>
    %108 = tpu.matmul %106, %107, %cst_46 {dimension_numbers = #tpu.dot_dimension_numbers<[1], [1], [0], [0], [0, 0, 1, 0], [], []>} : vector<5x8xf32>, vector<5x8xf32>, vector<5x5xf32> -> vector<5x5xf32>
    %cst_47 = arith.constant 0.353553385 : f32
    %109 = vector.broadcast %cst_47 : f32 to vector<5x5xf32>
    %110 = arith.mulf %108, %109 : vector<5x5xf32>
    %111 = arith.addf %110, %54 : vector<5x5xf32>
    %cst_48 = arith.constant dense<0xFF800000> : vector<5xf32>
    %112 = vector.multi_reduction <maximumf>, %111, %cst_48 [1] : vector<5x5xf32> to vector<5xf32>
    %113 = vector.shape_cast %112 : vector<5xf32> to vector<5x1xf32>
    %114 = vector.broadcast %113 : vector<5x1xf32> to vector<5x5xf32>
    %115 = arith.subf %111, %114 : vector<5x5xf32>
    %116 = math.exp %115 : vector<5x5xf32>
    %cst_49 = arith.constant dense<0.000000e+00> : vector<5xf32>
    %117 = vector.multi_reduction <add>, %116, %cst_49 [1] : vector<5x5xf32> to vector<5xf32>
    %118 = vector.shape_cast %117 : vector<5xf32> to vector<5x1xf32>
    %119 = vector.broadcast %118 : vector<5x1xf32> to vector<5x5xf32>
    %120 = arith.divf %116, %119 : vector<5x5xf32>
    %121 = vector.extract_strided_slice %48 {offsets = [0, 24], sizes = [5, 8], strides = [1, 1]} : vector<5x32xf32> to vector<5x8xf32>
    %cst_50 = arith.constant dense<0.000000e+00> : vector<5x8xf32>
    %122 = tpu.matmul %120, %121, %cst_50 {dimension_numbers = #tpu.dot_dimension_numbers<[1], [0], [0], [1], [0, 0, 1, 1], [], []>} : vector<5x5xf32>, vector<5x8xf32>, vector<5x8xf32> -> vector<5x8xf32>
    %123 = tpu.concatenate %71, %88, %105, %122 in 1 : vector<5x8xf32>, vector<5x8xf32>, vector<5x8xf32>, vector<5x8xf32> -> vector<5x32xf32>
    %124 = arith.truncf %123 : vector<5x32xf32> to vector<5x32xbf16>
    %cst_51 = arith.constant dense<0.000000e+00> : vector<5x32xf32>
    %125 = tpu.matmul %124, %39, %cst_51 {dimension_numbers = #tpu.dot_dimension_numbers<[1], [0], [0], [1], [0, 0, 1, 1], [], []>} : vector<5x32xbf16>, vector<32x32xbf16>, vector<5x32xf32> -> vector<5x32xf32>
    %126 = vector.broadcast %41 : vector<1x32xf32> to vector<5x32xf32>
    %127 = arith.addf %125, %126 : vector<5x32xf32>
    %128 = arith.addf %5, %127 : vector<5x32xf32>
    %c0_52 = arith.constant 0 : index
    %c2 = arith.constant 2 : index
    %c0_53 = arith.constant 0 : index
    %c0_54 = arith.constant 0 : index
    %129 = vector.load %arg19[%c0_52, %c2, %c0_53, %c0_54] : memref<2x6x1x32xf32, #tpu.memory_space<vmem>>, vector<1x1x1x32xf32>
    %130 = vector.shape_cast %129 : vector<1x1x1x32xf32> to vector<1x32xf32>
    %c0_55 = arith.constant 0 : index
    %c3 = arith.constant 3 : index
    %c0_56 = arith.constant 0 : index
    %c0_57 = arith.constant 0 : index
    %131 = vector.load %arg19[%c0_55, %c3, %c0_56, %c0_57] : memref<2x6x1x32xf32, #tpu.memory_space<vmem>>, vector<1x1x1x32xf32>
    %132 = vector.shape_cast %131 : vector<1x1x1x32xf32> to vector<1x32xf32>
    %cst_58 = arith.constant dense<0.000000e+00> : vector<5xf32>
    %133 = vector.multi_reduction <add>, %128, %cst_58 [1] : vector<5x32xf32> to vector<5xf32>
    %134 = vector.shape_cast %133 : vector<5xf32> to vector<5x1xf32>
    %cst_59 = arith.constant 3.200000e+01 : f32
    %135 = vector.broadcast %cst_59 : f32 to vector<5x1xf32>
    %136 = arith.divf %134, %135 : vector<5x1xf32>
    %137 = vector.broadcast %136 : vector<5x1xf32> to vector<5x32xf32>
    %138 = arith.subf %128, %137 : vector<5x32xf32>
    %139 = arith.mulf %138, %138 : vector<5x32xf32>
    %cst_60 = arith.constant dense<0.000000e+00> : vector<5xf32>
    %140 = vector.multi_reduction <add>, %139, %cst_60 [1] : vector<5x32xf32> to vector<5xf32>
    %141 = vector.shape_cast %140 : vector<5xf32> to vector<5x1xf32>
    %cst_61 = arith.constant 3.200000e+01 : f32
    %142 = vector.broadcast %cst_61 : f32 to vector<5x1xf32>
    %143 = arith.divf %141, %142 : vector<5x1xf32>
    %144 = vector.broadcast %136 : vector<5x1xf32> to vector<5x32xf32>
    %145 = arith.subf %128, %144 : vector<5x32xf32>
    %cst_62 = arith.constant 9.99999974E-6 : f32
    %146 = vector.broadcast %cst_62 : f32 to vector<5x1xf32>
    %147 = arith.addf %143, %146 : vector<5x1xf32>
    %148 = math.rsqrt %147 : vector<5x1xf32>
    %149 = vector.broadcast %148 : vector<5x1xf32> to vector<5x32xf32>
    %150 = arith.mulf %145, %149 : vector<5x32xf32>
    %151 = vector.broadcast %130 : vector<1x32xf32> to vector<5x32xf32>
    %152 = arith.mulf %150, %151 : vector<5x32xf32>
    %153 = vector.broadcast %132 : vector<1x32xf32> to vector<5x32xf32>
    %154 = arith.addf %152, %153 : vector<5x32xf32>
    %c0_63 = arith.constant 0 : index
    %c0_64 = arith.constant 0 : index
    %c0_65 = arith.constant 0 : index
    %155 = vector.load %arg9[%c0_63, %c0_64, %c0_65] : memref<2x32x32xbf16, #tpu.memory_space<vmem>>, vector<1x32x32xbf16>
    %156 = vector.shape_cast %155 : vector<1x32x32xbf16> to vector<32x32xbf16>
    %c0_66 = arith.constant 0 : index
    %c0_67 = arith.constant 0 : index
    %c0_68 = arith.constant 0 : index
    %157 = vector.load %arg10[%c0_66, %c0_67, %c0_68] : memref<2x1x32xf32, #tpu.memory_space<vmem>>, vector<1x1x32xf32>
    %158 = vector.shape_cast %157 : vector<1x1x32xf32> to vector<1x32xf32>
    %c0_69 = arith.constant 0 : index
    %c0_70 = arith.constant 0 : index
    %c0_71 = arith.constant 0 : index
    %159 = vector.load %arg11[%c0_69, %c0_70, %c0_71] : memref<2x32x64xbf16, #tpu.memory_space<vmem>>, vector<1x32x64xbf16>
    %160 = vector.shape_cast %159 : vector<1x32x64xbf16> to vector<32x64xbf16>
    %c0_72 = arith.constant 0 : index
    %c0_73 = arith.constant 0 : index
    %c0_74 = arith.constant 0 : index
    %161 = vector.load %arg12[%c0_72, %c0_73, %c0_74] : memref<2x1x64xf32, #tpu.memory_space<vmem>>, vector<1x1x64xf32>
    %162 = vector.shape_cast %161 : vector<1x1x64xf32> to vector<1x64xf32>
    %c0_75 = arith.constant 0 : index
    %c0_76 = arith.constant 0 : index
    %c0_77 = arith.constant 0 : index
    %163 = vector.load %arg13[%c0_75, %c0_76, %c0_77] : memref<2x32x32xbf16, #tpu.memory_space<vmem>>, vector<1x32x32xbf16>
    %164 = vector.shape_cast %163 : vector<1x32x32xbf16> to vector<32x32xbf16>
    %c0_78 = arith.constant 0 : index
    %c0_79 = arith.constant 0 : index
    %c0_80 = arith.constant 0 : index
    %165 = vector.load %arg14[%c0_78, %c0_79, %c0_80] : memref<2x1x32xf32, #tpu.memory_space<vmem>>, vector<1x1x32xf32>
    %166 = vector.shape_cast %165 : vector<1x1x32xf32> to vector<1x32xf32>
    %167 = arith.truncf %154 : vector<5x32xf32> to vector<5x32xbf16>
    %cst_81 = arith.constant dense<0.000000e+00> : vector<5x32xf32>
    %168 = tpu.matmul %167, %156, %cst_81 {dimension_numbers = #tpu.dot_dimension_numbers<[1], [0], [0], [1], [0, 0, 1, 1], [], []>} : vector<5x32xbf16>, vector<32x32xbf16>, vector<5x32xf32> -> vector<5x32xf32>
    %169 = vector.broadcast %158 : vector<1x32xf32> to vector<5x32xf32>
    %170 = arith.addf %168, %169 : vector<5x32xf32>
    %171 = arith.truncf %7 : vector<8x32xf32> to vector<8x32xbf16>
    %cst_82 = arith.constant dense<0.000000e+00> : vector<8x64xf32>
    %172 = tpu.matmul %171, %160, %cst_82 {dimension_numbers = #tpu.dot_dimension_numbers<[1], [0], [0], [1], [0, 0, 1, 1], [], []>} : vector<8x32xbf16>, vector<32x64xbf16>, vector<8x64xf32> -> vector<8x64xf32>
    %173 = vector.broadcast %162 : vector<1x64xf32> to vector<8x64xf32>
    %174 = arith.addf %172, %173 : vector<8x64xf32>
    %175 = vector.extract_strided_slice %174 {offsets = [0, 0], sizes = [8, 32], strides = [1, 1]} : vector<8x64xf32> to vector<8x32xf32>
    %176 = vector.extract_strided_slice %174 {offsets = [0, 32], sizes = [8, 32], strides = [1, 1]} : vector<8x64xf32> to vector<8x32xf32>
    %177 = tpu.iota {dimensions = array<i32: 1>} : vector<5x8xi32>
    %178 = vector.broadcast %3 : i32 to vector<5x8xi32>
    %179 = arith.cmpi slt, %177, %178 : vector<5x8xi32>
    %cst_83 = arith.constant 0.000000e+00 : f32
    %cst_84 = arith.constant -1.000000e+09 : f32
    %180 = vector.broadcast %cst_83 : f32 to vector<5x8xf32>
    %181 = vector.broadcast %cst_84 : f32 to vector<5x8xf32>
    %182 = arith.select %179, %180, %181 : vector<5x8xi1>, vector<5x8xf32>
    %183 = vector.extract_strided_slice %170 {offsets = [0, 0], sizes = [5, 8], strides = [1, 1]} : vector<5x32xf32> to vector<5x8xf32>
    %184 = vector.extract_strided_slice %175 {offsets = [0, 0], sizes = [8, 8], strides = [1, 1]} : vector<8x32xf32> to vector<8x8xf32>
    %cst_85 = arith.constant dense<0.000000e+00> : vector<5x8xf32>
    %185 = tpu.matmul %183, %184, %cst_85 {dimension_numbers = #tpu.dot_dimension_numbers<[1], [1], [0], [0], [0, 0, 1, 0], [], []>} : vector<5x8xf32>, vector<8x8xf32>, vector<5x8xf32> -> vector<5x8xf32>
    %cst_86 = arith.constant 0.353553385 : f32
    %186 = vector.broadcast %cst_86 : f32 to vector<5x8xf32>
    %187 = arith.mulf %185, %186 : vector<5x8xf32>
    %188 = arith.addf %187, %182 : vector<5x8xf32>
    %cst_87 = arith.constant dense<0xFF800000> : vector<5xf32>
    %189 = vector.multi_reduction <maximumf>, %188, %cst_87 [1] : vector<5x8xf32> to vector<5xf32>
    %190 = vector.shape_cast %189 : vector<5xf32> to vector<5x1xf32>
    %191 = vector.broadcast %190 : vector<5x1xf32> to vector<5x8xf32>
    %192 = arith.subf %188, %191 : vector<5x8xf32>
    %193 = math.exp %192 : vector<5x8xf32>
    %cst_88 = arith.constant dense<0.000000e+00> : vector<5xf32>
    %194 = vector.multi_reduction <add>, %193, %cst_88 [1] : vector<5x8xf32> to vector<5xf32>
    %195 = vector.shape_cast %194 : vector<5xf32> to vector<5x1xf32>
    %196 = vector.broadcast %195 : vector<5x1xf32> to vector<5x8xf32>
    %197 = arith.divf %193, %196 : vector<5x8xf32>
    %198 = vector.extract_strided_slice %176 {offsets = [0, 0], sizes = [8, 8], strides = [1, 1]} : vector<8x32xf32> to vector<8x8xf32>
    %cst_89 = arith.constant dense<0.000000e+00> : vector<5x8xf32>
    %199 = tpu.matmul %197, %198, %cst_89 {dimension_numbers = #tpu.dot_dimension_numbers<[1], [0], [0], [1], [0, 0, 1, 1], [], []>} : vector<5x8xf32>, vector<8x8xf32>, vector<5x8xf32> -> vector<5x8xf32>
    %200 = vector.extract_strided_slice %170 {offsets = [0, 8], sizes = [5, 8], strides = [1, 1]} : vector<5x32xf32> to vector<5x8xf32>
    %201 = vector.extract_strided_slice %175 {offsets = [0, 8], sizes = [8, 8], strides = [1, 1]} : vector<8x32xf32> to vector<8x8xf32>
    %cst_90 = arith.constant dense<0.000000e+00> : vector<5x8xf32>
    %202 = tpu.matmul %200, %201, %cst_90 {dimension_numbers = #tpu.dot_dimension_numbers<[1], [1], [0], [0], [0, 0, 1, 0], [], []>} : vector<5x8xf32>, vector<8x8xf32>, vector<5x8xf32> -> vector<5x8xf32>
    %cst_91 = arith.constant 0.353553385 : f32
    %203 = vector.broadcast %cst_91 : f32 to vector<5x8xf32>
    %204 = arith.mulf %202, %203 : vector<5x8xf32>
    %205 = arith.addf %204, %182 : vector<5x8xf32>
    %cst_92 = arith.constant dense<0xFF800000> : vector<5xf32>
    %206 = vector.multi_reduction <maximumf>, %205, %cst_92 [1] : vector<5x8xf32> to vector<5xf32>
    %207 = vector.shape_cast %206 : vector<5xf32> to vector<5x1xf32>
    %208 = vector.broadcast %207 : vector<5x1xf32> to vector<5x8xf32>
    %209 = arith.subf %205, %208 : vector<5x8xf32>
    %210 = math.exp %209 : vector<5x8xf32>
    %cst_93 = arith.constant dense<0.000000e+00> : vector<5xf32>
    %211 = vector.multi_reduction <add>, %210, %cst_93 [1] : vector<5x8xf32> to vector<5xf32>
    %212 = vector.shape_cast %211 : vector<5xf32> to vector<5x1xf32>
    %213 = vector.broadcast %212 : vector<5x1xf32> to vector<5x8xf32>
    %214 = arith.divf %210, %213 : vector<5x8xf32>
    %215 = vector.extract_strided_slice %176 {offsets = [0, 8], sizes = [8, 8], strides = [1, 1]} : vector<8x32xf32> to vector<8x8xf32>
    %cst_94 = arith.constant dense<0.000000e+00> : vector<5x8xf32>
    %216 = tpu.matmul %214, %215, %cst_94 {dimension_numbers = #tpu.dot_dimension_numbers<[1], [0], [0], [1], [0, 0, 1, 1], [], []>} : vector<5x8xf32>, vector<8x8xf32>, vector<5x8xf32> -> vector<5x8xf32>
    %217 = vector.extract_strided_slice %170 {offsets = [0, 16], sizes = [5, 8], strides = [1, 1]} : vector<5x32xf32> to vector<5x8xf32>
    %218 = vector.extract_strided_slice %175 {offsets = [0, 16], sizes = [8, 8], strides = [1, 1]} : vector<8x32xf32> to vector<8x8xf32>
    %cst_95 = arith.constant dense<0.000000e+00> : vector<5x8xf32>
    %219 = tpu.matmul %217, %218, %cst_95 {dimension_numbers = #tpu.dot_dimension_numbers<[1], [1], [0], [0], [0, 0, 1, 0], [], []>} : vector<5x8xf32>, vector<8x8xf32>, vector<5x8xf32> -> vector<5x8xf32>
    %cst_96 = arith.constant 0.353553385 : f32
    %220 = vector.broadcast %cst_96 : f32 to vector<5x8xf32>
    %221 = arith.mulf %219, %220 : vector<5x8xf32>
    %222 = arith.addf %221, %182 : vector<5x8xf32>
    %cst_97 = arith.constant dense<0xFF800000> : vector<5xf32>
    %223 = vector.multi_reduction <maximumf>, %222, %cst_97 [1] : vector<5x8xf32> to vector<5xf32>
    %224 = vector.shape_cast %223 : vector<5xf32> to vector<5x1xf32>
    %225 = vector.broadcast %224 : vector<5x1xf32> to vector<5x8xf32>
    %226 = arith.subf %222, %225 : vector<5x8xf32>
    %227 = math.exp %226 : vector<5x8xf32>
    %cst_98 = arith.constant dense<0.000000e+00> : vector<5xf32>
    %228 = vector.multi_reduction <add>, %227, %cst_98 [1] : vector<5x8xf32> to vector<5xf32>
    %229 = vector.shape_cast %228 : vector<5xf32> to vector<5x1xf32>
    %230 = vector.broadcast %229 : vector<5x1xf32> to vector<5x8xf32>
    %231 = arith.divf %227, %230 : vector<5x8xf32>
    %232 = vector.extract_strided_slice %176 {offsets = [0, 16], sizes = [8, 8], strides = [1, 1]} : vector<8x32xf32> to vector<8x8xf32>
    %cst_99 = arith.constant dense<0.000000e+00> : vector<5x8xf32>
    %233 = tpu.matmul %231, %232, %cst_99 {dimension_numbers = #tpu.dot_dimension_numbers<[1], [0], [0], [1], [0, 0, 1, 1], [], []>} : vector<5x8xf32>, vector<8x8xf32>, vector<5x8xf32> -> vector<5x8xf32>
    %234 = vector.extract_strided_slice %170 {offsets = [0, 24], sizes = [5, 8], strides = [1, 1]} : vector<5x32xf32> to vector<5x8xf32>
    %235 = vector.extract_strided_slice %175 {offsets = [0, 24], sizes = [8, 8], strides = [1, 1]} : vector<8x32xf32> to vector<8x8xf32>
    %cst_100 = arith.constant dense<0.000000e+00> : vector<5x8xf32>
    %236 = tpu.matmul %234, %235, %cst_100 {dimension_numbers = #tpu.dot_dimension_numbers<[1], [1], [0], [0], [0, 0, 1, 0], [], []>} : vector<5x8xf32>, vector<8x8xf32>, vector<5x8xf32> -> vector<5x8xf32>
    %cst_101 = arith.constant 0.353553385 : f32
    %237 = vector.broadcast %cst_101 : f32 to vector<5x8xf32>
    %238 = arith.mulf %236, %237 : vector<5x8xf32>
    %239 = arith.addf %238, %182 : vector<5x8xf32>
    %cst_102 = arith.constant dense<0xFF800000> : vector<5xf32>
    %240 = vector.multi_reduction <maximumf>, %239, %cst_102 [1] : vector<5x8xf32> to vector<5xf32>
    %241 = vector.shape_cast %240 : vector<5xf32> to vector<5x1xf32>
    %242 = vector.broadcast %241 : vector<5x1xf32> to vector<5x8xf32>
    %243 = arith.subf %239, %242 : vector<5x8xf32>
    %244 = math.exp %243 : vector<5x8xf32>
    %cst_103 = arith.constant dense<0.000000e+00> : vector<5xf32>
    %245 = vector.multi_reduction <add>, %244, %cst_103 [1] : vector<5x8xf32> to vector<5xf32>
    %246 = vector.shape_cast %245 : vector<5xf32> to vector<5x1xf32>
    %247 = vector.broadcast %246 : vector<5x1xf32> to vector<5x8xf32>
    %248 = arith.divf %244, %247 : vector<5x8xf32>
    %249 = vector.extract_strided_slice %176 {offsets = [0, 24], sizes = [8, 8], strides = [1, 1]} : vector<8x32xf32> to vector<8x8xf32>
    %cst_104 = arith.constant dense<0.000000e+00> : vector<5x8xf32>
    %250 = tpu.matmul %248, %249, %cst_104 {dimension_numbers = #tpu.dot_dimension_numbers<[1], [0], [0], [1], [0, 0, 1, 1], [], []>} : vector<5x8xf32>, vector<8x8xf32>, vector<5x8xf32> -> vector<5x8xf32>
    %251 = tpu.concatenate %199, %216, %233, %250 in 1 : vector<5x8xf32>, vector<5x8xf32>, vector<5x8xf32>, vector<5x8xf32> -> vector<5x32xf32>
    %252 = arith.truncf %251 : vector<5x32xf32> to vector<5x32xbf16>
    %cst_105 = arith.constant dense<0.000000e+00> : vector<5x32xf32>
    %253 = tpu.matmul %252, %164, %cst_105 {dimension_numbers = #tpu.dot_dimension_numbers<[1], [0], [0], [1], [0, 0, 1, 1], [], []>} : vector<5x32xbf16>, vector<32x32xbf16>, vector<5x32xf32> -> vector<5x32xf32>
    %254 = vector.broadcast %166 : vector<1x32xf32> to vector<5x32xf32>
    %255 = arith.addf %253, %254 : vector<5x32xf32>
    %256 = arith.addf %128, %255 : vector<5x32xf32>
    %c0_106 = arith.constant 0 : index
    %c4 = arith.constant 4 : index
    %c0_107 = arith.constant 0 : index
    %c0_108 = arith.constant 0 : index
    %257 = vector.load %arg19[%c0_106, %c4, %c0_107, %c0_108] : memref<2x6x1x32xf32, #tpu.memory_space<vmem>>, vector<1x1x1x32xf32>
    %258 = vector.shape_cast %257 : vector<1x1x1x32xf32> to vector<1x32xf32>
    %c0_109 = arith.constant 0 : index
    %c5 = arith.constant 5 : index
    %c0_110 = arith.constant 0 : index
    %c0_111 = arith.constant 0 : index
    %259 = vector.load %arg19[%c0_109, %c5, %c0_110, %c0_111] : memref<2x6x1x32xf32, #tpu.memory_space<vmem>>, vector<1x1x1x32xf32>
    %260 = vector.shape_cast %259 : vector<1x1x1x32xf32> to vector<1x32xf32>
    %cst_112 = arith.constant dense<0.000000e+00> : vector<5xf32>
    %261 = vector.multi_reduction <add>, %256, %cst_112 [1] : vector<5x32xf32> to vector<5xf32>
    %262 = vector.shape_cast %261 : vector<5xf32> to vector<5x1xf32>
    %cst_113 = arith.constant 3.200000e+01 : f32
    %263 = vector.broadcast %cst_113 : f32 to vector<5x1xf32>
    %264 = arith.divf %262, %263 : vector<5x1xf32>
    %265 = vector.broadcast %264 : vector<5x1xf32> to vector<5x32xf32>
    %266 = arith.subf %256, %265 : vector<5x32xf32>
    %267 = arith.mulf %266, %266 : vector<5x32xf32>
    %cst_114 = arith.constant dense<0.000000e+00> : vector<5xf32>
    %268 = vector.multi_reduction <add>, %267, %cst_114 [1] : vector<5x32xf32> to vector<5xf32>
    %269 = vector.shape_cast %268 : vector<5xf32> to vector<5x1xf32>
    %cst_115 = arith.constant 3.200000e+01 : f32
    %270 = vector.broadcast %cst_115 : f32 to vector<5x1xf32>
    %271 = arith.divf %269, %270 : vector<5x1xf32>
    %272 = vector.broadcast %264 : vector<5x1xf32> to vector<5x32xf32>
    %273 = arith.subf %256, %272 : vector<5x32xf32>
    %cst_116 = arith.constant 9.99999974E-6 : f32
    %274 = vector.broadcast %cst_116 : f32 to vector<5x1xf32>
    %275 = arith.addf %271, %274 : vector<5x1xf32>
    %276 = math.rsqrt %275 : vector<5x1xf32>
    %277 = vector.broadcast %276 : vector<5x1xf32> to vector<5x32xf32>
    %278 = arith.mulf %273, %277 : vector<5x32xf32>
    %279 = vector.broadcast %258 : vector<1x32xf32> to vector<5x32xf32>
    %280 = arith.mulf %278, %279 : vector<5x32xf32>
    %281 = vector.broadcast %260 : vector<1x32xf32> to vector<5x32xf32>
    %282 = arith.addf %280, %281 : vector<5x32xf32>
    %c0_117 = arith.constant 0 : index
    %c0_118 = arith.constant 0 : index
    %c0_119 = arith.constant 0 : index
    %283 = vector.load %arg15[%c0_117, %c0_118, %c0_119] : memref<2x32x64xbf16, #tpu.memory_space<vmem>>, vector<1x32x64xbf16>
    %284 = vector.shape_cast %283 : vector<1x32x64xbf16> to vector<32x64xbf16>
    %c0_120 = arith.constant 0 : index
    %c0_121 = arith.constant 0 : index
    %c0_122 = arith.constant 0 : index
    %285 = vector.load %arg16[%c0_120, %c0_121, %c0_122] : memref<2x1x64xf32, #tpu.memory_space<vmem>>, vector<1x1x64xf32>
    %286 = vector.shape_cast %285 : vector<1x1x64xf32> to vector<1x64xf32>
    %c0_123 = arith.constant 0 : index
    %c0_124 = arith.constant 0 : index
    %c0_125 = arith.constant 0 : index
    %287 = vector.load %arg17[%c0_123, %c0_124, %c0_125] : memref<2x64x32xbf16, #tpu.memory_space<vmem>>, vector<1x64x32xbf16>
    %288 = vector.shape_cast %287 : vector<1x64x32xbf16> to vector<64x32xbf16>
    %c0_126 = arith.constant 0 : index
    %c0_127 = arith.constant 0 : index
    %c0_128 = arith.constant 0 : index
    %289 = vector.load %arg18[%c0_126, %c0_127, %c0_128] : memref<2x1x32xf32, #tpu.memory_space<vmem>>, vector<1x1x32xf32>
    %290 = vector.shape_cast %289 : vector<1x1x32xf32> to vector<1x32xf32>
    %291 = arith.truncf %282 : vector<5x32xf32> to vector<5x32xbf16>
    %cst_129 = arith.constant dense<0.000000e+00> : vector<5x64xf32>
    %292 = tpu.matmul %291, %284, %cst_129 {dimension_numbers = #tpu.dot_dimension_numbers<[1], [0], [0], [1], [0, 0, 1, 1], [], []>} : vector<5x32xbf16>, vector<32x64xbf16>, vector<5x64xf32> -> vector<5x64xf32>
    %293 = vector.broadcast %286 : vector<1x64xf32> to vector<5x64xf32>
    %294 = arith.addf %292, %293 : vector<5x64xf32>
    %cst_130 = arith.constant 0.000000e+00 : f32
    %295 = vector.broadcast %cst_130 : f32 to vector<5x64xf32>
    %296 = arith.maximumf %294, %295 : vector<5x64xf32>
    %297 = arith.truncf %296 : vector<5x64xf32> to vector<5x64xbf16>
    %cst_131 = arith.constant dense<0.000000e+00> : vector<5x32xf32>
    %298 = tpu.matmul %297, %288, %cst_131 {dimension_numbers = #tpu.dot_dimension_numbers<[1], [0], [0], [1], [0, 0, 1, 1], [], []>} : vector<5x64xbf16>, vector<64x32xbf16>, vector<5x32xf32> -> vector<5x32xf32>
    %299 = vector.broadcast %290 : vector<1x32xf32> to vector<5x32xf32>
    %300 = arith.addf %298, %299 : vector<5x32xf32>
    %301 = arith.addf %256, %300 : vector<5x32xf32>
    %c1_132 = arith.constant 1 : index
    %c0_133 = arith.constant 0 : index
    %c0_134 = arith.constant 0 : index
    %c0_135 = arith.constant 0 : index
    %302 = vector.load %arg19[%c1_132, %c0_133, %c0_134, %c0_135] : memref<2x6x1x32xf32, #tpu.memory_space<vmem>>, vector<1x1x1x32xf32>
    %303 = vector.shape_cast %302 : vector<1x1x1x32xf32> to vector<1x32xf32>
    %c1_136 = arith.constant 1 : index
    %c1_137 = arith.constant 1 : index
    %c0_138 = arith.constant 0 : index
    %c0_139 = arith.constant 0 : index
    %304 = vector.load %arg19[%c1_136, %c1_137, %c0_138, %c0_139] : memref<2x6x1x32xf32, #tpu.memory_space<vmem>>, vector<1x1x1x32xf32>
    %305 = vector.shape_cast %304 : vector<1x1x1x32xf32> to vector<1x32xf32>
    %cst_140 = arith.constant dense<0.000000e+00> : vector<5xf32>
    %306 = vector.multi_reduction <add>, %301, %cst_140 [1] : vector<5x32xf32> to vector<5xf32>
    %307 = vector.shape_cast %306 : vector<5xf32> to vector<5x1xf32>
    %cst_141 = arith.constant 3.200000e+01 : f32
    %308 = vector.broadcast %cst_141 : f32 to vector<5x1xf32>
    %309 = arith.divf %307, %308 : vector<5x1xf32>
    %310 = vector.broadcast %309 : vector<5x1xf32> to vector<5x32xf32>
    %311 = arith.subf %301, %310 : vector<5x32xf32>
    %312 = arith.mulf %311, %311 : vector<5x32xf32>
    %cst_142 = arith.constant dense<0.000000e+00> : vector<5xf32>
    %313 = vector.multi_reduction <add>, %312, %cst_142 [1] : vector<5x32xf32> to vector<5xf32>
    %314 = vector.shape_cast %313 : vector<5xf32> to vector<5x1xf32>
    %cst_143 = arith.constant 3.200000e+01 : f32
    %315 = vector.broadcast %cst_143 : f32 to vector<5x1xf32>
    %316 = arith.divf %314, %315 : vector<5x1xf32>
    %317 = vector.broadcast %309 : vector<5x1xf32> to vector<5x32xf32>
    %318 = arith.subf %301, %317 : vector<5x32xf32>
    %cst_144 = arith.constant 9.99999974E-6 : f32
    %319 = vector.broadcast %cst_144 : f32 to vector<5x1xf32>
    %320 = arith.addf %316, %319 : vector<5x1xf32>
    %321 = math.rsqrt %320 : vector<5x1xf32>
    %322 = vector.broadcast %321 : vector<5x1xf32> to vector<5x32xf32>
    %323 = arith.mulf %318, %322 : vector<5x32xf32>
    %324 = vector.broadcast %303 : vector<1x32xf32> to vector<5x32xf32>
    %325 = arith.mulf %323, %324 : vector<5x32xf32>
    %326 = vector.broadcast %305 : vector<1x32xf32> to vector<5x32xf32>
    %327 = arith.addf %325, %326 : vector<5x32xf32>
    %c1_145 = arith.constant 1 : index
    %c0_146 = arith.constant 0 : index
    %c0_147 = arith.constant 0 : index
    %328 = vector.load %arg5[%c1_145, %c0_146, %c0_147] : memref<2x32x96xbf16, #tpu.memory_space<vmem>>, vector<1x32x96xbf16>
    %329 = vector.shape_cast %328 : vector<1x32x96xbf16> to vector<32x96xbf16>
    %c1_148 = arith.constant 1 : index
    %c0_149 = arith.constant 0 : index
    %c0_150 = arith.constant 0 : index
    %330 = vector.load %arg6[%c1_148, %c0_149, %c0_150] : memref<2x1x96xf32, #tpu.memory_space<vmem>>, vector<1x1x96xf32>
    %331 = vector.shape_cast %330 : vector<1x1x96xf32> to vector<1x96xf32>
    %c1_151 = arith.constant 1 : index
    %c0_152 = arith.constant 0 : index
    %c0_153 = arith.constant 0 : index
    %332 = vector.load %arg7[%c1_151, %c0_152, %c0_153] : memref<2x32x32xbf16, #tpu.memory_space<vmem>>, vector<1x32x32xbf16>
    %333 = vector.shape_cast %332 : vector<1x32x32xbf16> to vector<32x32xbf16>
    %c1_154 = arith.constant 1 : index
    %c0_155 = arith.constant 0 : index
    %c0_156 = arith.constant 0 : index
    %334 = vector.load %arg8[%c1_154, %c0_155, %c0_156] : memref<2x1x32xf32, #tpu.memory_space<vmem>>, vector<1x1x32xf32>
    %335 = vector.shape_cast %334 : vector<1x1x32xf32> to vector<1x32xf32>
    %336 = arith.truncf %327 : vector<5x32xf32> to vector<5x32xbf16>
    %cst_157 = arith.constant dense<0.000000e+00> : vector<5x96xf32>
    %337 = tpu.matmul %336, %329, %cst_157 {dimension_numbers = #tpu.dot_dimension_numbers<[1], [0], [0], [1], [0, 0, 1, 1], [], []>} : vector<5x32xbf16>, vector<32x96xbf16>, vector<5x96xf32> -> vector<5x96xf32>
    %338 = vector.broadcast %331 : vector<1x96xf32> to vector<5x96xf32>
    %339 = arith.addf %337, %338 : vector<5x96xf32>
    %340 = vector.extract_strided_slice %339 {offsets = [0, 0], sizes = [5, 32], strides = [1, 1]} : vector<5x96xf32> to vector<5x32xf32>
    %341 = vector.extract_strided_slice %339 {offsets = [0, 32], sizes = [5, 32], strides = [1, 1]} : vector<5x96xf32> to vector<5x32xf32>
    %342 = vector.extract_strided_slice %339 {offsets = [0, 64], sizes = [5, 32], strides = [1, 1]} : vector<5x96xf32> to vector<5x32xf32>
    %343 = tpu.iota {dimensions = array<i32: 1>} : vector<5x5xi32>
    %344 = vector.broadcast %1 : i32 to vector<5x5xi32>
    %345 = arith.cmpi slt, %343, %344 : vector<5x5xi32>
    %cst_158 = arith.constant 0.000000e+00 : f32
    %cst_159 = arith.constant -1.000000e+09 : f32
    %346 = vector.broadcast %cst_158 : f32 to vector<5x5xf32>
    %347 = vector.broadcast %cst_159 : f32 to vector<5x5xf32>
    %348 = arith.select %345, %346, %347 : vector<5x5xi1>, vector<5x5xf32>
    %349 = vector.extract_strided_slice %340 {offsets = [0, 0], sizes = [5, 8], strides = [1, 1]} : vector<5x32xf32> to vector<5x8xf32>
    %350 = vector.extract_strided_slice %341 {offsets = [0, 0], sizes = [5, 8], strides = [1, 1]} : vector<5x32xf32> to vector<5x8xf32>
    %cst_160 = arith.constant dense<0.000000e+00> : vector<5x5xf32>
    %351 = tpu.matmul %349, %350, %cst_160 {dimension_numbers = #tpu.dot_dimension_numbers<[1], [1], [0], [0], [0, 0, 1, 0], [], []>} : vector<5x8xf32>, vector<5x8xf32>, vector<5x5xf32> -> vector<5x5xf32>
    %cst_161 = arith.constant 0.353553385 : f32
    %352 = vector.broadcast %cst_161 : f32 to vector<5x5xf32>
    %353 = arith.mulf %351, %352 : vector<5x5xf32>
    %354 = arith.addf %353, %348 : vector<5x5xf32>
    %cst_162 = arith.constant dense<0xFF800000> : vector<5xf32>
    %355 = vector.multi_reduction <maximumf>, %354, %cst_162 [1] : vector<5x5xf32> to vector<5xf32>
    %356 = vector.shape_cast %355 : vector<5xf32> to vector<5x1xf32>
    %357 = vector.broadcast %356 : vector<5x1xf32> to vector<5x5xf32>
    %358 = arith.subf %354, %357 : vector<5x5xf32>
    %359 = math.exp %358 : vector<5x5xf32>
    %cst_163 = arith.constant dense<0.000000e+00> : vector<5xf32>
    %360 = vector.multi_reduction <add>, %359, %cst_163 [1] : vector<5x5xf32> to vector<5xf32>
    %361 = vector.shape_cast %360 : vector<5xf32> to vector<5x1xf32>
    %362 = vector.broadcast %361 : vector<5x1xf32> to vector<5x5xf32>
    %363 = arith.divf %359, %362 : vector<5x5xf32>
    %364 = vector.extract_strided_slice %342 {offsets = [0, 0], sizes = [5, 8], strides = [1, 1]} : vector<5x32xf32> to vector<5x8xf32>
    %cst_164 = arith.constant dense<0.000000e+00> : vector<5x8xf32>
    %365 = tpu.matmul %363, %364, %cst_164 {dimension_numbers = #tpu.dot_dimension_numbers<[1], [0], [0], [1], [0, 0, 1, 1], [], []>} : vector<5x5xf32>, vector<5x8xf32>, vector<5x8xf32> -> vector<5x8xf32>
    %366 = vector.extract_strided_slice %340 {offsets = [0, 8], sizes = [5, 8], strides = [1, 1]} : vector<5x32xf32> to vector<5x8xf32>
    %367 = vector.extract_strided_slice %341 {offsets = [0, 8], sizes = [5, 8], strides = [1, 1]} : vector<5x32xf32> to vector<5x8xf32>
    %cst_165 = arith.constant dense<0.000000e+00> : vector<5x5xf32>
    %368 = tpu.matmul %366, %367, %cst_165 {dimension_numbers = #tpu.dot_dimension_numbers<[1], [1], [0], [0], [0, 0, 1, 0], [], []>} : vector<5x8xf32>, vector<5x8xf32>, vector<5x5xf32> -> vector<5x5xf32>
    %cst_166 = arith.constant 0.353553385 : f32
    %369 = vector.broadcast %cst_166 : f32 to vector<5x5xf32>
    %370 = arith.mulf %368, %369 : vector<5x5xf32>
    %371 = arith.addf %370, %348 : vector<5x5xf32>
    %cst_167 = arith.constant dense<0xFF800000> : vector<5xf32>
    %372 = vector.multi_reduction <maximumf>, %371, %cst_167 [1] : vector<5x5xf32> to vector<5xf32>
    %373 = vector.shape_cast %372 : vector<5xf32> to vector<5x1xf32>
    %374 = vector.broadcast %373 : vector<5x1xf32> to vector<5x5xf32>
    %375 = arith.subf %371, %374 : vector<5x5xf32>
    %376 = math.exp %375 : vector<5x5xf32>
    %cst_168 = arith.constant dense<0.000000e+00> : vector<5xf32>
    %377 = vector.multi_reduction <add>, %376, %cst_168 [1] : vector<5x5xf32> to vector<5xf32>
    %378 = vector.shape_cast %377 : vector<5xf32> to vector<5x1xf32>
    %379 = vector.broadcast %378 : vector<5x1xf32> to vector<5x5xf32>
    %380 = arith.divf %376, %379 : vector<5x5xf32>
    %381 = vector.extract_strided_slice %342 {offsets = [0, 8], sizes = [5, 8], strides = [1, 1]} : vector<5x32xf32> to vector<5x8xf32>
    %cst_169 = arith.constant dense<0.000000e+00> : vector<5x8xf32>
    %382 = tpu.matmul %380, %381, %cst_169 {dimension_numbers = #tpu.dot_dimension_numbers<[1], [0], [0], [1], [0, 0, 1, 1], [], []>} : vector<5x5xf32>, vector<5x8xf32>, vector<5x8xf32> -> vector<5x8xf32>
    %383 = vector.extract_strided_slice %340 {offsets = [0, 16], sizes = [5, 8], strides = [1, 1]} : vector<5x32xf32> to vector<5x8xf32>
    %384 = vector.extract_strided_slice %341 {offsets = [0, 16], sizes = [5, 8], strides = [1, 1]} : vector<5x32xf32> to vector<5x8xf32>
    %cst_170 = arith.constant dense<0.000000e+00> : vector<5x5xf32>
    %385 = tpu.matmul %383, %384, %cst_170 {dimension_numbers = #tpu.dot_dimension_numbers<[1], [1], [0], [0], [0, 0, 1, 0], [], []>} : vector<5x8xf32>, vector<5x8xf32>, vector<5x5xf32> -> vector<5x5xf32>
    %cst_171 = arith.constant 0.353553385 : f32
    %386 = vector.broadcast %cst_171 : f32 to vector<5x5xf32>
    %387 = arith.mulf %385, %386 : vector<5x5xf32>
    %388 = arith.addf %387, %348 : vector<5x5xf32>
    %cst_172 = arith.constant dense<0xFF800000> : vector<5xf32>
    %389 = vector.multi_reduction <maximumf>, %388, %cst_172 [1] : vector<5x5xf32> to vector<5xf32>
    %390 = vector.shape_cast %389 : vector<5xf32> to vector<5x1xf32>
    %391 = vector.broadcast %390 : vector<5x1xf32> to vector<5x5xf32>
    %392 = arith.subf %388, %391 : vector<5x5xf32>
    %393 = math.exp %392 : vector<5x5xf32>
    %cst_173 = arith.constant dense<0.000000e+00> : vector<5xf32>
    %394 = vector.multi_reduction <add>, %393, %cst_173 [1] : vector<5x5xf32> to vector<5xf32>
    %395 = vector.shape_cast %394 : vector<5xf32> to vector<5x1xf32>
    %396 = vector.broadcast %395 : vector<5x1xf32> to vector<5x5xf32>
    %397 = arith.divf %393, %396 : vector<5x5xf32>
    %398 = vector.extract_strided_slice %342 {offsets = [0, 16], sizes = [5, 8], strides = [1, 1]} : vector<5x32xf32> to vector<5x8xf32>
    %cst_174 = arith.constant dense<0.000000e+00> : vector<5x8xf32>
    %399 = tpu.matmul %397, %398, %cst_174 {dimension_numbers = #tpu.dot_dimension_numbers<[1], [0], [0], [1], [0, 0, 1, 1], [], []>} : vector<5x5xf32>, vector<5x8xf32>, vector<5x8xf32> -> vector<5x8xf32>
    %400 = vector.extract_strided_slice %340 {offsets = [0, 24], sizes = [5, 8], strides = [1, 1]} : vector<5x32xf32> to vector<5x8xf32>
    %401 = vector.extract_strided_slice %341 {offsets = [0, 24], sizes = [5, 8], strides = [1, 1]} : vector<5x32xf32> to vector<5x8xf32>
    %cst_175 = arith.constant dense<0.000000e+00> : vector<5x5xf32>
    %402 = tpu.matmul %400, %401, %cst_175 {dimension_numbers = #tpu.dot_dimension_numbers<[1], [1], [0], [0], [0, 0, 1, 0], [], []>} : vector<5x8xf32>, vector<5x8xf32>, vector<5x5xf32> -> vector<5x5xf32>
    %cst_176 = arith.constant 0.353553385 : f32
    %403 = vector.broadcast %cst_176 : f32 to vector<5x5xf32>
    %404 = arith.mulf %402, %403 : vector<5x5xf32>
    %405 = arith.addf %404, %348 : vector<5x5xf32>
    %cst_177 = arith.constant dense<0xFF800000> : vector<5xf32>
    %406 = vector.multi_reduction <maximumf>, %405, %cst_177 [1] : vector<5x5xf32> to vector<5xf32>
    %407 = vector.shape_cast %406 : vector<5xf32> to vector<5x1xf32>
    %408 = vector.broadcast %407 : vector<5x1xf32> to vector<5x5xf32>
    %409 = arith.subf %405, %408 : vector<5x5xf32>
    %410 = math.exp %409 : vector<5x5xf32>
    %cst_178 = arith.constant dense<0.000000e+00> : vector<5xf32>
    %411 = vector.multi_reduction <add>, %410, %cst_178 [1] : vector<5x5xf32> to vector<5xf32>
    %412 = vector.shape_cast %411 : vector<5xf32> to vector<5x1xf32>
    %413 = vector.broadcast %412 : vector<5x1xf32> to vector<5x5xf32>
    %414 = arith.divf %410, %413 : vector<5x5xf32>
    %415 = vector.extract_strided_slice %342 {offsets = [0, 24], sizes = [5, 8], strides = [1, 1]} : vector<5x32xf32> to vector<5x8xf32>
    %cst_179 = arith.constant dense<0.000000e+00> : vector<5x8xf32>
    %416 = tpu.matmul %414, %415, %cst_179 {dimension_numbers = #tpu.dot_dimension_numbers<[1], [0], [0], [1], [0, 0, 1, 1], [], []>} : vector<5x5xf32>, vector<5x8xf32>, vector<5x8xf32> -> vector<5x8xf32>
    %417 = tpu.concatenate %365, %382, %399, %416 in 1 : vector<5x8xf32>, vector<5x8xf32>, vector<5x8xf32>, vector<5x8xf32> -> vector<5x32xf32>
    %418 = arith.truncf %417 : vector<5x32xf32> to vector<5x32xbf16>
    %cst_180 = arith.constant dense<0.000000e+00> : vector<5x32xf32>
    %419 = tpu.matmul %418, %333, %cst_180 {dimension_numbers = #tpu.dot_dimension_numbers<[1], [0], [0], [1], [0, 0, 1, 1], [], []>} : vector<5x32xbf16>, vector<32x32xbf16>, vector<5x32xf32> -> vector<5x32xf32>
    %420 = vector.broadcast %335 : vector<1x32xf32> to vector<5x32xf32>
    %421 = arith.addf %419, %420 : vector<5x32xf32>
    %422 = arith.addf %301, %421 : vector<5x32xf32>
    %c1_181 = arith.constant 1 : index
    %c2_182 = arith.constant 2 : index
    %c0_183 = arith.constant 0 : index
    %c0_184 = arith.constant 0 : index
    %423 = vector.load %arg19[%c1_181, %c2_182, %c0_183, %c0_184] : memref<2x6x1x32xf32, #tpu.memory_space<vmem>>, vector<1x1x1x32xf32>
    %424 = vector.shape_cast %423 : vector<1x1x1x32xf32> to vector<1x32xf32>
    %c1_185 = arith.constant 1 : index
    %c3_186 = arith.constant 3 : index
    %c0_187 = arith.constant 0 : index
    %c0_188 = arith.constant 0 : index
    %425 = vector.load %arg19[%c1_185, %c3_186, %c0_187, %c0_188] : memref<2x6x1x32xf32, #tpu.memory_space<vmem>>, vector<1x1x1x32xf32>
    %426 = vector.shape_cast %425 : vector<1x1x1x32xf32> to vector<1x32xf32>
    %cst_189 = arith.constant dense<0.000000e+00> : vector<5xf32>
    %427 = vector.multi_reduction <add>, %422, %cst_189 [1] : vector<5x32xf32> to vector<5xf32>
    %428 = vector.shape_cast %427 : vector<5xf32> to vector<5x1xf32>
    %cst_190 = arith.constant 3.200000e+01 : f32
    %429 = vector.broadcast %cst_190 : f32 to vector<5x1xf32>
    %430 = arith.divf %428, %429 : vector<5x1xf32>
    %431 = vector.broadcast %430 : vector<5x1xf32> to vector<5x32xf32>
    %432 = arith.subf %422, %431 : vector<5x32xf32>
    %433 = arith.mulf %432, %432 : vector<5x32xf32>
    %cst_191 = arith.constant dense<0.000000e+00> : vector<5xf32>
    %434 = vector.multi_reduction <add>, %433, %cst_191 [1] : vector<5x32xf32> to vector<5xf32>
    %435 = vector.shape_cast %434 : vector<5xf32> to vector<5x1xf32>
    %cst_192 = arith.constant 3.200000e+01 : f32
    %436 = vector.broadcast %cst_192 : f32 to vector<5x1xf32>
    %437 = arith.divf %435, %436 : vector<5x1xf32>
    %438 = vector.broadcast %430 : vector<5x1xf32> to vector<5x32xf32>
    %439 = arith.subf %422, %438 : vector<5x32xf32>
    %cst_193 = arith.constant 9.99999974E-6 : f32
    %440 = vector.broadcast %cst_193 : f32 to vector<5x1xf32>
    %441 = arith.addf %437, %440 : vector<5x1xf32>
    %442 = math.rsqrt %441 : vector<5x1xf32>
    %443 = vector.broadcast %442 : vector<5x1xf32> to vector<5x32xf32>
    %444 = arith.mulf %439, %443 : vector<5x32xf32>
    %445 = vector.broadcast %424 : vector<1x32xf32> to vector<5x32xf32>
    %446 = arith.mulf %444, %445 : vector<5x32xf32>
    %447 = vector.broadcast %426 : vector<1x32xf32> to vector<5x32xf32>
    %448 = arith.addf %446, %447 : vector<5x32xf32>
    %c1_194 = arith.constant 1 : index
    %c0_195 = arith.constant 0 : index
    %c0_196 = arith.constant 0 : index
    %449 = vector.load %arg9[%c1_194, %c0_195, %c0_196] : memref<2x32x32xbf16, #tpu.memory_space<vmem>>, vector<1x32x32xbf16>
    %450 = vector.shape_cast %449 : vector<1x32x32xbf16> to vector<32x32xbf16>
    %c1_197 = arith.constant 1 : index
    %c0_198 = arith.constant 0 : index
    %c0_199 = arith.constant 0 : index
    %451 = vector.load %arg10[%c1_197, %c0_198, %c0_199] : memref<2x1x32xf32, #tpu.memory_space<vmem>>, vector<1x1x32xf32>
    %452 = vector.shape_cast %451 : vector<1x1x32xf32> to vector<1x32xf32>
    %c1_200 = arith.constant 1 : index
    %c0_201 = arith.constant 0 : index
    %c0_202 = arith.constant 0 : index
    %453 = vector.load %arg11[%c1_200, %c0_201, %c0_202] : memref<2x32x64xbf16, #tpu.memory_space<vmem>>, vector<1x32x64xbf16>
    %454 = vector.shape_cast %453 : vector<1x32x64xbf16> to vector<32x64xbf16>
    %c1_203 = arith.constant 1 : index
    %c0_204 = arith.constant 0 : index
    %c0_205 = arith.constant 0 : index
    %455 = vector.load %arg12[%c1_203, %c0_204, %c0_205] : memref<2x1x64xf32, #tpu.memory_space<vmem>>, vector<1x1x64xf32>
    %456 = vector.shape_cast %455 : vector<1x1x64xf32> to vector<1x64xf32>
    %c1_206 = arith.constant 1 : index
    %c0_207 = arith.constant 0 : index
    %c0_208 = arith.constant 0 : index
    %457 = vector.load %arg13[%c1_206, %c0_207, %c0_208] : memref<2x32x32xbf16, #tpu.memory_space<vmem>>, vector<1x32x32xbf16>
    %458 = vector.shape_cast %457 : vector<1x32x32xbf16> to vector<32x32xbf16>
    %c1_209 = arith.constant 1 : index
    %c0_210 = arith.constant 0 : index
    %c0_211 = arith.constant 0 : index
    %459 = vector.load %arg14[%c1_209, %c0_210, %c0_211] : memref<2x1x32xf32, #tpu.memory_space<vmem>>, vector<1x1x32xf32>
    %460 = vector.shape_cast %459 : vector<1x1x32xf32> to vector<1x32xf32>
    %461 = arith.truncf %448 : vector<5x32xf32> to vector<5x32xbf16>
    %cst_212 = arith.constant dense<0.000000e+00> : vector<5x32xf32>
    %462 = tpu.matmul %461, %450, %cst_212 {dimension_numbers = #tpu.dot_dimension_numbers<[1], [0], [0], [1], [0, 0, 1, 1], [], []>} : vector<5x32xbf16>, vector<32x32xbf16>, vector<5x32xf32> -> vector<5x32xf32>
    %463 = vector.broadcast %452 : vector<1x32xf32> to vector<5x32xf32>
    %464 = arith.addf %462, %463 : vector<5x32xf32>
    %465 = arith.truncf %7 : vector<8x32xf32> to vector<8x32xbf16>
    %cst_213 = arith.constant dense<0.000000e+00> : vector<8x64xf32>
    %466 = tpu.matmul %465, %454, %cst_213 {dimension_numbers = #tpu.dot_dimension_numbers<[1], [0], [0], [1], [0, 0, 1, 1], [], []>} : vector<8x32xbf16>, vector<32x64xbf16>, vector<8x64xf32> -> vector<8x64xf32>
    %467 = vector.broadcast %456 : vector<1x64xf32> to vector<8x64xf32>
    %468 = arith.addf %466, %467 : vector<8x64xf32>
    %469 = vector.extract_strided_slice %468 {offsets = [0, 0], sizes = [8, 32], strides = [1, 1]} : vector<8x64xf32> to vector<8x32xf32>
    %470 = vector.extract_strided_slice %468 {offsets = [0, 32], sizes = [8, 32], strides = [1, 1]} : vector<8x64xf32> to vector<8x32xf32>
    %471 = tpu.iota {dimensions = array<i32: 1>} : vector<5x8xi32>
    %472 = vector.broadcast %3 : i32 to vector<5x8xi32>
    %473 = arith.cmpi slt, %471, %472 : vector<5x8xi32>
    %cst_214 = arith.constant 0.000000e+00 : f32
    %cst_215 = arith.constant -1.000000e+09 : f32
    %474 = vector.broadcast %cst_214 : f32 to vector<5x8xf32>
    %475 = vector.broadcast %cst_215 : f32 to vector<5x8xf32>
    %476 = arith.select %473, %474, %475 : vector<5x8xi1>, vector<5x8xf32>
    %477 = vector.extract_strided_slice %464 {offsets = [0, 0], sizes = [5, 8], strides = [1, 1]} : vector<5x32xf32> to vector<5x8xf32>
    %478 = vector.extract_strided_slice %469 {offsets = [0, 0], sizes = [8, 8], strides = [1, 1]} : vector<8x32xf32> to vector<8x8xf32>
    %cst_216 = arith.constant dense<0.000000e+00> : vector<5x8xf32>
    %479 = tpu.matmul %477, %478, %cst_216 {dimension_numbers = #tpu.dot_dimension_numbers<[1], [1], [0], [0], [0, 0, 1, 0], [], []>} : vector<5x8xf32>, vector<8x8xf32>, vector<5x8xf32> -> vector<5x8xf32>
    %cst_217 = arith.constant 0.353553385 : f32
    %480 = vector.broadcast %cst_217 : f32 to vector<5x8xf32>
    %481 = arith.mulf %479, %480 : vector<5x8xf32>
    %482 = arith.addf %481, %476 : vector<5x8xf32>
    %cst_218 = arith.constant dense<0xFF800000> : vector<5xf32>
    %483 = vector.multi_reduction <maximumf>, %482, %cst_218 [1] : vector<5x8xf32> to vector<5xf32>
    %484 = vector.shape_cast %483 : vector<5xf32> to vector<5x1xf32>
    %485 = vector.broadcast %484 : vector<5x1xf32> to vector<5x8xf32>
    %486 = arith.subf %482, %485 : vector<5x8xf32>
    %487 = math.exp %486 : vector<5x8xf32>
    %cst_219 = arith.constant dense<0.000000e+00> : vector<5xf32>
    %488 = vector.multi_reduction <add>, %487, %cst_219 [1] : vector<5x8xf32> to vector<5xf32>
    %489 = vector.shape_cast %488 : vector<5xf32> to vector<5x1xf32>
    %490 = vector.broadcast %489 : vector<5x1xf32> to vector<5x8xf32>
    %491 = arith.divf %487, %490 : vector<5x8xf32>
    %492 = vector.extract_strided_slice %470 {offsets = [0, 0], sizes = [8, 8], strides = [1, 1]} : vector<8x32xf32> to vector<8x8xf32>
    %cst_220 = arith.constant dense<0.000000e+00> : vector<5x8xf32>
    %493 = tpu.matmul %491, %492, %cst_220 {dimension_numbers = #tpu.dot_dimension_numbers<[1], [0], [0], [1], [0, 0, 1, 1], [], []>} : vector<5x8xf32>, vector<8x8xf32>, vector<5x8xf32> -> vector<5x8xf32>
    %494 = vector.extract_strided_slice %464 {offsets = [0, 8], sizes = [5, 8], strides = [1, 1]} : vector<5x32xf32> to vector<5x8xf32>
    %495 = vector.extract_strided_slice %469 {offsets = [0, 8], sizes = [8, 8], strides = [1, 1]} : vector<8x32xf32> to vector<8x8xf32>
    %cst_221 = arith.constant dense<0.000000e+00> : vector<5x8xf32>
    %496 = tpu.matmul %494, %495, %cst_221 {dimension_numbers = #tpu.dot_dimension_numbers<[1], [1], [0], [0], [0, 0, 1, 0], [], []>} : vector<5x8xf32>, vector<8x8xf32>, vector<5x8xf32> -> vector<5x8xf32>
    %cst_222 = arith.constant 0.353553385 : f32
    %497 = vector.broadcast %cst_222 : f32 to vector<5x8xf32>
    %498 = arith.mulf %496, %497 : vector<5x8xf32>
    %499 = arith.addf %498, %476 : vector<5x8xf32>
    %cst_223 = arith.constant dense<0xFF800000> : vector<5xf32>
    %500 = vector.multi_reduction <maximumf>, %499, %cst_223 [1] : vector<5x8xf32> to vector<5xf32>
    %501 = vector.shape_cast %500 : vector<5xf32> to vector<5x1xf32>
    %502 = vector.broadcast %501 : vector<5x1xf32> to vector<5x8xf32>
    %503 = arith.subf %499, %502 : vector<5x8xf32>
    %504 = math.exp %503 : vector<5x8xf32>
    %cst_224 = arith.constant dense<0.000000e+00> : vector<5xf32>
    %505 = vector.multi_reduction <add>, %504, %cst_224 [1] : vector<5x8xf32> to vector<5xf32>
    %506 = vector.shape_cast %505 : vector<5xf32> to vector<5x1xf32>
    %507 = vector.broadcast %506 : vector<5x1xf32> to vector<5x8xf32>
    %508 = arith.divf %504, %507 : vector<5x8xf32>
    %509 = vector.extract_strided_slice %470 {offsets = [0, 8], sizes = [8, 8], strides = [1, 1]} : vector<8x32xf32> to vector<8x8xf32>
    %cst_225 = arith.constant dense<0.000000e+00> : vector<5x8xf32>
    %510 = tpu.matmul %508, %509, %cst_225 {dimension_numbers = #tpu.dot_dimension_numbers<[1], [0], [0], [1], [0, 0, 1, 1], [], []>} : vector<5x8xf32>, vector<8x8xf32>, vector<5x8xf32> -> vector<5x8xf32>
    %511 = vector.extract_strided_slice %464 {offsets = [0, 16], sizes = [5, 8], strides = [1, 1]} : vector<5x32xf32> to vector<5x8xf32>
    %512 = vector.extract_strided_slice %469 {offsets = [0, 16], sizes = [8, 8], strides = [1, 1]} : vector<8x32xf32> to vector<8x8xf32>
    %cst_226 = arith.constant dense<0.000000e+00> : vector<5x8xf32>
    %513 = tpu.matmul %511, %512, %cst_226 {dimension_numbers = #tpu.dot_dimension_numbers<[1], [1], [0], [0], [0, 0, 1, 0], [], []>} : vector<5x8xf32>, vector<8x8xf32>, vector<5x8xf32> -> vector<5x8xf32>
    %cst_227 = arith.constant 0.353553385 : f32
    %514 = vector.broadcast %cst_227 : f32 to vector<5x8xf32>
    %515 = arith.mulf %513, %514 : vector<5x8xf32>
    %516 = arith.addf %515, %476 : vector<5x8xf32>
    %cst_228 = arith.constant dense<0xFF800000> : vector<5xf32>
    %517 = vector.multi_reduction <maximumf>, %516, %cst_228 [1] : vector<5x8xf32> to vector<5xf32>
    %518 = vector.shape_cast %517 : vector<5xf32> to vector<5x1xf32>
    %519 = vector.broadcast %518 : vector<5x1xf32> to vector<5x8xf32>
    %520 = arith.subf %516, %519 : vector<5x8xf32>
    %521 = math.exp %520 : vector<5x8xf32>
    %cst_229 = arith.constant dense<0.000000e+00> : vector<5xf32>
    %522 = vector.multi_reduction <add>, %521, %cst_229 [1] : vector<5x8xf32> to vector<5xf32>
    %523 = vector.shape_cast %522 : vector<5xf32> to vector<5x1xf32>
    %524 = vector.broadcast %523 : vector<5x1xf32> to vector<5x8xf32>
    %525 = arith.divf %521, %524 : vector<5x8xf32>
    %526 = vector.extract_strided_slice %470 {offsets = [0, 16], sizes = [8, 8], strides = [1, 1]} : vector<8x32xf32> to vector<8x8xf32>
    %cst_230 = arith.constant dense<0.000000e+00> : vector<5x8xf32>
    %527 = tpu.matmul %525, %526, %cst_230 {dimension_numbers = #tpu.dot_dimension_numbers<[1], [0], [0], [1], [0, 0, 1, 1], [], []>} : vector<5x8xf32>, vector<8x8xf32>, vector<5x8xf32> -> vector<5x8xf32>
    %528 = vector.extract_strided_slice %464 {offsets = [0, 24], sizes = [5, 8], strides = [1, 1]} : vector<5x32xf32> to vector<5x8xf32>
    %529 = vector.extract_strided_slice %469 {offsets = [0, 24], sizes = [8, 8], strides = [1, 1]} : vector<8x32xf32> to vector<8x8xf32>
    %cst_231 = arith.constant dense<0.000000e+00> : vector<5x8xf32>
    %530 = tpu.matmul %528, %529, %cst_231 {dimension_numbers = #tpu.dot_dimension_numbers<[1], [1], [0], [0], [0, 0, 1, 0], [], []>} : vector<5x8xf32>, vector<8x8xf32>, vector<5x8xf32> -> vector<5x8xf32>
    %cst_232 = arith.constant 0.353553385 : f32
    %531 = vector.broadcast %cst_232 : f32 to vector<5x8xf32>
    %532 = arith.mulf %530, %531 : vector<5x8xf32>
    %533 = arith.addf %532, %476 : vector<5x8xf32>
    %cst_233 = arith.constant dense<0xFF800000> : vector<5xf32>
    %534 = vector.multi_reduction <maximumf>, %533, %cst_233 [1] : vector<5x8xf32> to vector<5xf32>
    %535 = vector.shape_cast %534 : vector<5xf32> to vector<5x1xf32>
    %536 = vector.broadcast %535 : vector<5x1xf32> to vector<5x8xf32>
    %537 = arith.subf %533, %536 : vector<5x8xf32>
    %538 = math.exp %537 : vector<5x8xf32>
    %cst_234 = arith.constant dense<0.000000e+00> : vector<5xf32>
    %539 = vector.multi_reduction <add>, %538, %cst_234 [1] : vector<5x8xf32> to vector<5xf32>
    %540 = vector.shape_cast %539 : vector<5xf32> to vector<5x1xf32>
    %541 = vector.broadcast %540 : vector<5x1xf32> to vector<5x8xf32>
    %542 = arith.divf %538, %541 : vector<5x8xf32>
    %543 = vector.extract_strided_slice %470 {offsets = [0, 24], sizes = [8, 8], strides = [1, 1]} : vector<8x32xf32> to vector<8x8xf32>
    %cst_235 = arith.constant dense<0.000000e+00> : vector<5x8xf32>
    %544 = tpu.matmul %542, %543, %cst_235 {dimension_numbers = #tpu.dot_dimension_numbers<[1], [0], [0], [1], [0, 0, 1, 1], [], []>} : vector<5x8xf32>, vector<8x8xf32>, vector<5x8xf32> -> vector<5x8xf32>
    %545 = tpu.concatenate %493, %510, %527, %544 in 1 : vector<5x8xf32>, vector<5x8xf32>, vector<5x8xf32>, vector<5x8xf32> -> vector<5x32xf32>
    %546 = arith.truncf %545 : vector<5x32xf32> to vector<5x32xbf16>
    %cst_236 = arith.constant dense<0.000000e+00> : vector<5x32xf32>
    %547 = tpu.matmul %546, %458, %cst_236 {dimension_numbers = #tpu.dot_dimension_numbers<[1], [0], [0], [1], [0, 0, 1, 1], [], []>} : vector<5x32xbf16>, vector<32x32xbf16>, vector<5x32xf32> -> vector<5x32xf32>
    %548 = vector.broadcast %460 : vector<1x32xf32> to vector<5x32xf32>
    %549 = arith.addf %547, %548 : vector<5x32xf32>
    %550 = arith.addf %422, %549 : vector<5x32xf32>
    %c1_237 = arith.constant 1 : index
    %c4_238 = arith.constant 4 : index
    %c0_239 = arith.constant 0 : index
    %c0_240 = arith.constant 0 : index
    %551 = vector.load %arg19[%c1_237, %c4_238, %c0_239, %c0_240] : memref<2x6x1x32xf32, #tpu.memory_space<vmem>>, vector<1x1x1x32xf32>
    %552 = vector.shape_cast %551 : vector<1x1x1x32xf32> to vector<1x32xf32>
    %c1_241 = arith.constant 1 : index
    %c5_242 = arith.constant 5 : index
    %c0_243 = arith.constant 0 : index
    %c0_244 = arith.constant 0 : index
    %553 = vector.load %arg19[%c1_241, %c5_242, %c0_243, %c0_244] : memref<2x6x1x32xf32, #tpu.memory_space<vmem>>, vector<1x1x1x32xf32>
    %554 = vector.shape_cast %553 : vector<1x1x1x32xf32> to vector<1x32xf32>
    %cst_245 = arith.constant dense<0.000000e+00> : vector<5xf32>
    %555 = vector.multi_reduction <add>, %550, %cst_245 [1] : vector<5x32xf32> to vector<5xf32>
    %556 = vector.shape_cast %555 : vector<5xf32> to vector<5x1xf32>
    %cst_246 = arith.constant 3.200000e+01 : f32
    %557 = vector.broadcast %cst_246 : f32 to vector<5x1xf32>
    %558 = arith.divf %556, %557 : vector<5x1xf32>
    %559 = vector.broadcast %558 : vector<5x1xf32> to vector<5x32xf32>
    %560 = arith.subf %550, %559 : vector<5x32xf32>
    %561 = arith.mulf %560, %560 : vector<5x32xf32>
    %cst_247 = arith.constant dense<0.000000e+00> : vector<5xf32>
    %562 = vector.multi_reduction <add>, %561, %cst_247 [1] : vector<5x32xf32> to vector<5xf32>
    %563 = vector.shape_cast %562 : vector<5xf32> to vector<5x1xf32>
    %cst_248 = arith.constant 3.200000e+01 : f32
    %564 = vector.broadcast %cst_248 : f32 to vector<5x1xf32>
    %565 = arith.divf %563, %564 : vector<5x1xf32>
    %566 = vector.broadcast %558 : vector<5x1xf32> to vector<5x32xf32>
    %567 = arith.subf %550, %566 : vector<5x32xf32>
    %cst_249 = arith.constant 9.99999974E-6 : f32
    %568 = vector.broadcast %cst_249 : f32 to vector<5x1xf32>
    %569 = arith.addf %565, %568 : vector<5x1xf32>
    %570 = math.rsqrt %569 : vector<5x1xf32>
    %571 = vector.broadcast %570 : vector<5x1xf32> to vector<5x32xf32>
    %572 = arith.mulf %567, %571 : vector<5x32xf32>
    %573 = vector.broadcast %552 : vector<1x32xf32> to vector<5x32xf32>
    %574 = arith.mulf %572, %573 : vector<5x32xf32>
    %575 = vector.broadcast %554 : vector<1x32xf32> to vector<5x32xf32>
    %576 = arith.addf %574, %575 : vector<5x32xf32>
    %c1_250 = arith.constant 1 : index
    %c0_251 = arith.constant 0 : index
    %c0_252 = arith.constant 0 : index
    %577 = vector.load %arg15[%c1_250, %c0_251, %c0_252] : memref<2x32x64xbf16, #tpu.memory_space<vmem>>, vector<1x32x64xbf16>
    %578 = vector.shape_cast %577 : vector<1x32x64xbf16> to vector<32x64xbf16>
    %c1_253 = arith.constant 1 : index
    %c0_254 = arith.constant 0 : index
    %c0_255 = arith.constant 0 : index
    %579 = vector.load %arg16[%c1_253, %c0_254, %c0_255] : memref<2x1x64xf32, #tpu.memory_space<vmem>>, vector<1x1x64xf32>
    %580 = vector.shape_cast %579 : vector<1x1x64xf32> to vector<1x64xf32>
    %c1_256 = arith.constant 1 : index
    %c0_257 = arith.constant 0 : index
    %c0_258 = arith.constant 0 : index
    %581 = vector.load %arg17[%c1_256, %c0_257, %c0_258] : memref<2x64x32xbf16, #tpu.memory_space<vmem>>, vector<1x64x32xbf16>
    %582 = vector.shape_cast %581 : vector<1x64x32xbf16> to vector<64x32xbf16>
    %c1_259 = arith.constant 1 : index
    %c0_260 = arith.constant 0 : index
    %c0_261 = arith.constant 0 : index
    %583 = vector.load %arg18[%c1_259, %c0_260, %c0_261] : memref<2x1x32xf32, #tpu.memory_space<vmem>>, vector<1x1x32xf32>
    %584 = vector.shape_cast %583 : vector<1x1x32xf32> to vector<1x32xf32>
    %585 = arith.truncf %576 : vector<5x32xf32> to vector<5x32xbf16>
    %cst_262 = arith.constant dense<0.000000e+00> : vector<5x64xf32>
    %586 = tpu.matmul %585, %578, %cst_262 {dimension_numbers = #tpu.dot_dimension_numbers<[1], [0], [0], [1], [0, 0, 1, 1], [], []>} : vector<5x32xbf16>, vector<32x64xbf16>, vector<5x64xf32> -> vector<5x64xf32>
    %587 = vector.broadcast %580 : vector<1x64xf32> to vector<5x64xf32>
    %588 = arith.addf %586, %587 : vector<5x64xf32>
    %cst_263 = arith.constant 0.000000e+00 : f32
    %589 = vector.broadcast %cst_263 : f32 to vector<5x64xf32>
    %590 = arith.maximumf %588, %589 : vector<5x64xf32>
    %591 = arith.truncf %590 : vector<5x64xf32> to vector<5x64xbf16>
    %cst_264 = arith.constant dense<0.000000e+00> : vector<5x32xf32>
    %592 = tpu.matmul %591, %582, %cst_264 {dimension_numbers = #tpu.dot_dimension_numbers<[1], [0], [0], [1], [0, 0, 1, 1], [], []>} : vector<5x64xbf16>, vector<64x32xbf16>, vector<5x32xf32> -> vector<5x32xf32>
    %593 = vector.broadcast %584 : vector<1x32xf32> to vector<5x32xf32>
    %594 = arith.addf %592, %593 : vector<5x32xf32>
    %595 = arith.addf %550, %594 : vector<5x32xf32>
    %c0_265 = arith.constant 0 : index
    %c0_266 = arith.constant 0 : index
    %596 = vector.load %arg20[%c0_265, %c0_266] : memref<1x32xf32, #tpu.memory_space<vmem>>, vector<1x32xf32>
    %c0_267 = arith.constant 0 : index
    %c0_268 = arith.constant 0 : index
    %597 = vector.load %arg21[%c0_267, %c0_268] : memref<1x32xf32, #tpu.memory_space<vmem>>, vector<1x32xf32>
    %cst_269 = arith.constant dense<0.000000e+00> : vector<5xf32>
    %598 = vector.multi_reduction <add>, %595, %cst_269 [1] : vector<5x32xf32> to vector<5xf32>
    %599 = vector.shape_cast %598 : vector<5xf32> to vector<5x1xf32>
    %cst_270 = arith.constant 3.200000e+01 : f32
    %600 = vector.broadcast %cst_270 : f32 to vector<5x1xf32>
    %601 = arith.divf %599, %600 : vector<5x1xf32>
    %602 = vector.broadcast %601 : vector<5x1xf32> to vector<5x32xf32>
    %603 = arith.subf %595, %602 : vector<5x32xf32>
    %604 = arith.mulf %603, %603 : vector<5x32xf32>
    %cst_271 = arith.constant dense<0.000000e+00> : vector<5xf32>
    %605 = vector.multi_reduction <add>, %604, %cst_271 [1] : vector<5x32xf32> to vector<5xf32>
    %606 = vector.shape_cast %605 : vector<5xf32> to vector<5x1xf32>
    %cst_272 = arith.constant 3.200000e+01 : f32
    %607 = vector.broadcast %cst_272 : f32 to vector<5x1xf32>
    %608 = arith.divf %606, %607 : vector<5x1xf32>
    %609 = vector.broadcast %601 : vector<5x1xf32> to vector<5x32xf32>
    %610 = arith.subf %595, %609 : vector<5x32xf32>
    %cst_273 = arith.constant 9.99999974E-6 : f32
    %611 = vector.broadcast %cst_273 : f32 to vector<5x1xf32>
    %612 = arith.addf %608, %611 : vector<5x1xf32>
    %613 = math.rsqrt %612 : vector<5x1xf32>
    %614 = vector.broadcast %613 : vector<5x1xf32> to vector<5x32xf32>
    %615 = arith.mulf %610, %614 : vector<5x32xf32>
    %616 = vector.broadcast %596 : vector<1x32xf32> to vector<5x32xf32>
    %617 = arith.mulf %615, %616 : vector<5x32xf32>
    %618 = vector.broadcast %597 : vector<1x32xf32> to vector<5x32xf32>
    %619 = arith.addf %617, %618 : vector<5x32xf32>
    %620 = arith.truncf %619 : vector<5x32xf32> to vector<5x32xbf16>
    %c0_274 = arith.constant 0 : index
    %c0_275 = arith.constant 0 : index
    %621 = vector.load %arg22[%c0_274, %c0_275] : memref<32x64xbf16, #tpu.memory_space<vmem>>, vector<32x64xbf16>
    %cst_276 = arith.constant dense<0.000000e+00> : vector<5x64xf32>
    %622 = tpu.matmul %620, %621, %cst_276 {dimension_numbers = #tpu.dot_dimension_numbers<[1], [0], [0], [1], [0, 0, 1, 1], [], []>} : vector<5x32xbf16>, vector<32x64xbf16>, vector<5x64xf32> -> vector<5x64xf32>
    %c0_277 = arith.constant 0 : index
    %c0_278 = arith.constant 0 : index
    %623 = vector.load %arg23[%c0_277, %c0_278] : memref<1x64xf32, #tpu.memory_space<vmem>>, vector<1x64xf32>
    %624 = vector.broadcast %623 : vector<1x64xf32> to vector<5x64xf32>
    %625 = arith.addf %622, %624 : vector<5x64xf32>
    %c0_279 = arith.constant 0 : index
    %c0_280 = arith.constant 0 : index
    %c0_281 = arith.constant 0 : index
    %626 = vector.load %arg24[%c0_279, %c0_280, %c0_281] : memref<1x5x1xi32, #tpu.memory_space<vmem>>, vector<1x5x1xi32>
    %627 = vector.shape_cast %626 : vector<1x5x1xi32> to vector<5x1xi32>
    %cst_282 = arith.constant dense<0xFF800000> : vector<5xf32>
    %628 = vector.multi_reduction <maximumf>, %625, %cst_282 [1] : vector<5x64xf32> to vector<5xf32>
    %629 = vector.shape_cast %628 : vector<5xf32> to vector<5x1xf32>
    %630 = vector.broadcast %629 : vector<5x1xf32> to vector<5x64xf32>
    %631 = arith.subf %625, %630 : vector<5x64xf32>
    %632 = math.exp %631 : vector<5x64xf32>
    %cst_283 = arith.constant dense<0.000000e+00> : vector<5xf32>
    %633 = vector.multi_reduction <add>, %632, %cst_283 [1] : vector<5x64xf32> to vector<5xf32>
    %634 = vector.shape_cast %633 : vector<5xf32> to vector<5x1xf32>
    %635 = math.log %634 : vector<5x1xf32>
    %636 = vector.broadcast %635 : vector<5x1xf32> to vector<5x64xf32>
    %637 = arith.subf %631, %636 : vector<5x64xf32>
    %638 = tpu.iota {dimensions = array<i32: 1>} : vector<5x64xi32>
    %639 = vector.broadcast %627 : vector<5x1xi32> to vector<5x64xi32>
    %640 = arith.cmpi eq, %638, %639 : vector<5x64xi32>
    %cst_284 = arith.constant 0.000000e+00 : f32
    %641 = vector.broadcast %cst_284 : f32 to vector<5x64xf32>
    %642 = arith.select %640, %637, %641 : vector<5x64xi1>, vector<5x64xf32>
    %cst_285 = arith.constant dense<0.000000e+00> : vector<5xf32>
    %643 = vector.multi_reduction <add>, %642, %cst_285 [1] : vector<5x64xf32> to vector<5xf32>
    %644 = vector.shape_cast %643 : vector<5xf32> to vector<5x1xf32>
    %cst_286 = arith.constant dense<0.000000e+00> : vector<5xf32>
    %645 = vector.multi_reduction <add>, %637, %cst_286 [1] : vector<5x64xf32> to vector<5xf32>
    %646 = vector.shape_cast %645 : vector<5xf32> to vector<5x1xf32>
    %cst_287 = arith.constant 0.899999976 : f32
    %647 = vector.broadcast %cst_287 : f32 to vector<5x1xf32>
    %648 = arith.mulf %647, %644 : vector<5x1xf32>
    %cst_288 = arith.constant -0.739396453 : f32
    %649 = vector.broadcast %cst_288 : f32 to vector<5x1xf32>
    %650 = arith.subf %649, %648 : vector<5x1xf32>
    %651 = arith.subf %646, %644 : vector<5x1xf32>
    %cst_289 = arith.constant 0.00158730161 : f32
    %652 = vector.broadcast %cst_289 : f32 to vector<5x1xf32>
    %653 = arith.mulf %652, %651 : vector<5x1xf32>
    %654 = arith.subf %650, %653 : vector<5x1xf32>
    %c-1_i32 = arith.constant -1 : i32
    %655 = vector.broadcast %c-1_i32 : i32 to vector<5x1xi32>
    %656 = arith.cmpi ne, %627, %655 : vector<5x1xi32>
    %cst_290 = arith.constant 0.000000e+00 : f32
    %657 = vector.broadcast %cst_290 : f32 to vector<5x1xf32>
    %658 = arith.select %656, %654, %657 : vector<5x1xi1>, vector<5x1xf32>
    %cst_291 = arith.constant dense<0.000000e+00> : vector<1xf32>
    %659 = vector.multi_reduction <add>, %658, %cst_291 [0] : vector<5x1xf32> to vector<1xf32>
    %660 = vector.shape_cast %659 : vector<1xf32> to vector<1x1xf32>
    %c0_292 = arith.constant 0 : index
    %c0_293 = arith.constant 0 : index
    %c0_294 = arith.constant 0 : index
    %661 = vector.load %arg25[%c0_292, %c0_293, %c0_294] : memref<1x1x1xf32, #tpu.memory_space<vmem>>, vector<1x1x1xf32>
    %662 = vector.shape_cast %661 : vector<1x1x1xf32> to vector<1x1xf32>
    %663 = vector.shape_cast %660 : vector<1x1xf32> to vector<1x1x1xf32>
    tpu.vector_store %arg25[%c0_292, %c0_293, %c0_294], %663 {strides = array<i32>} : memref<1x1x1xf32, #tpu.memory_space<vmem>>, vector<1x1x1xf32>,
    return
  }
  func.func @transform_0(%arg0: i32, %arg1: memref<2xi32, #tpu.memory_space<smem>>, %arg2: memref<2xi32, #tpu.memory_space<smem>>) -> (i32, i32, i32) {
    %c0_i32 = arith.constant 0 : i32
    %c0_i32_0 = arith.constant 0 : i32
    %c0_i32_1 = arith.constant 0 : i32
    return %arg0, %c0_i32, %c0_i32_0 : i32, i32, i32
  }
  func.func @transform_1(%arg0: i32, %arg1: memref<2xi32, #tpu.memory_space<smem>>, %arg2: memref<2xi32, #tpu.memory_space<smem>>) -> (i32, i32, i32) {
    %c0_i32 = arith.constant 0 : i32
    %c0_i32_0 = arith.constant 0 : i32
    %c0_i32_1 = arith.constant 0 : i32
    return %arg0, %c0_i32, %c0_i32_0 : i32, i32, i32
  }
  func.func @transform_2(%arg0: i32, %arg1: memref<2xi32, #tpu.memory_space<smem>>, %arg2: memref<2xi32, #tpu.memory_space<smem>>) -> (i32, i32, i32) {
    %c0_i32 = arith.constant 0 : i32
    %c0_i32_0 = arith.constant 0 : i32
    %c0_i32_1 = arith.constant 0 : i32
    %c0_i32_2 = arith.constant 0 : i32
    return %c0_i32, %c0_i32_0, %c0_i32_1 : i32, i32, i32
  }
  func.func @transform_3(%arg0: i32, %arg1: memref<2xi32, #tpu.memory_space<smem>>, %arg2: memref<2xi32, #tpu.memory_space<smem>>) -> (i32, i32, i32) {
    %c0_i32 = arith.constant 0 : i32
    %c0_i32_0 = arith.constant 0 : i32
    %c0_i32_1 = arith.constant 0 : i32
    %c0_i32_2 = arith.constant 0 : i32
    return %c0_i32, %c0_i32_0, %c0_i32_1 : i32, i32, i32
  }
  func.func @transform_4(%arg0: i32, %arg1: memref<2xi32, #tpu.memory_space<smem>>, %arg2: memref<2xi32, #tpu.memory_space<smem>>) -> (i32, i32, i32) {
    %c0_i32 = arith.constant 0 : i32
    %c0_i32_0 = arith.constant 0 : i32
    %c0_i32_1 = arith.constant 0 : i32
    %c0_i32_2 = arith.constant 0 : i32
    return %c0_i32, %c0_i32_0, %c0_i32_1 : i32, i32, i32
  }
  func.func @transform_5(%arg0: i32, %arg1: memref<2xi32, #tpu.memory_space<smem>>, %arg2: memref<2xi32, #tpu.memory_space<smem>>) -> (i32, i32, i32) {
    %c0_i32 = arith.constant 0 : i32
    %c0_i32_0 = arith.constant 0 : i32
    %c0_i32_1 = arith.constant 0 : i32
    %c0_i32_2 = arith.constant 0 : i32
    return %c0_i32, %c0_i32_0, %c0_i32_1 : i32, i32, i32
  }
  func.func @transform_6(%arg0: i32, %arg1: memref<2xi32, #tpu.memory_space<smem>>, %arg2: memref<2xi32, #tpu.memory_space<smem>>) -> (i32, i32, i32) {
    %c0_i32 = arith.constant 0 : i32
    %c0_i32_0 = arith.constant 0 : i32
    %c0_i32_1 = arith.constant 0 : i32
    %c0_i32_2 = arith.constant 0 : i32
    return %c0_i32, %c0_i32_0, %c0_i32_1 : i32, i32, i32
  }
  func.func @transform_7(%arg0: i32, %arg1: memref<2xi32, #tpu.memory_space<smem>>, %arg2: memref<2xi32, #tpu.memory_space<smem>>) -> (i32, i32, i32) {
    %c0_i32 = arith.constant 0 : i32
    %c0_i32_0 = arith.constant 0 : i32
    %c0_i32_1 = arith.constant 0 : i32
    %c0_i32_2 = arith.constant 0 : i32
    return %c0_i32, %c0_i32_0, %c0_i32_1 : i32, i32, i32
  }
  func.func @transform_8(%arg0: i32, %arg1: memref<2xi32, #tpu.memory_space<smem>>, %arg2: memref<2xi32, #tpu.memory_space<smem>>) -> (i32, i32, i32) {
    %c0_i32 = arith.constant 0 : i32
    %c0_i32_0 = arith.constant 0 : i32
    %c0_i32_1 = arith.constant 0 : i32
    %c0_i32_2 = arith.constant 0 : i32
    return %c0_i32, %c0_i32_0, %c0_i32_1 : i32, i32, i32
  }
  func.func @transform_9(%arg0: i32, %arg1: memref<2xi32, #tpu.memory_space<smem>>, %arg2: memref<2xi32, #tpu.memory_space<smem>>) -> (i32, i32, i32) {
    %c0_i32 = arith.constant 0 : i32
    %c0_i32_0 = arith.constant 0 : i32
    %c0_i32_1 = arith.constant 0 : i32
    %c0_i32_2 = arith.constant 0 : i32
    return %c0_i32, %c0_i32_0, %c0_i32_1 : i32, i32, i32
  }
  func.func @transform_10(%arg0: i32, %arg1: memref<2xi32, #tpu.memory_space<smem>>, %arg2: memref<2xi32, #tpu.memory_space<smem>>) -> (i32, i32, i32) {
    %c0_i32 = arith.constant 0 : i32
    %c0_i32_0 = arith.constant 0 : i32
    %c0_i32_1 = arith.constant 0 : i32
    %c0_i32_2 = arith.constant 0 : i32
    return %c0_i32, %c0_i32_0, %c0_i32_1 : i32, i32, i32
  }
  func.func @transform_11(%arg0: i32, %arg1: memref<2xi32, #tpu.memory_space<smem>>, %arg2: memref<2xi32, #tpu.memory_space<smem>>) -> (i32, i32, i32) {
    %c0_i32 = arith.constant 0 : i32
    %c0_i32_0 = arith.constant 0 : i32
    %c0_i32_1 = arith.constant 0 : i32
    %c0_i32_2 = arith.constant 0 : i32
    return %c0_i32, %c0_i32_0, %c0_i32_1 : i32, i32, i32
  }
  func.func @transform_12(%arg0: i32, %arg1: memref<2xi32, #tpu.memory_space<smem>>, %arg2: memref<2xi32, #tpu.memory_space<smem>>) -> (i32, i32, i32) {
    %c0_i32 = arith.constant 0 : i32
    %c0_i32_0 = arith.constant 0 : i32
    %c0_i32_1 = arith.constant 0 : i32
    %c0_i32_2 = arith.constant 0 : i32
    return %c0_i32, %c0_i32_0, %c0_i32_1 : i32, i32, i32
  }
  func.func @transform_13(%arg0: i32, %arg1: memref<2xi32, #tpu.memory_space<smem>>, %arg2: memref<2xi32, #tpu.memory_space<smem>>) -> (i32, i32, i32) {
    %c0_i32 = arith.constant 0 : i32
    %c0_i32_0 = arith.constant 0 : i32
    %c0_i32_1 = arith.constant 0 : i32
    %c0_i32_2 = arith.constant 0 : i32
    return %c0_i32, %c0_i32_0, %c0_i32_1 : i32, i32, i32
  }
  func.func @transform_14(%arg0: i32, %arg1: memref<2xi32, #tpu.memory_space<smem>>, %arg2: memref<2xi32, #tpu.memory_space<smem>>) -> (i32, i32, i32) {
    %c0_i32 = arith.constant 0 : i32
    %c0_i32_0 = arith.constant 0 : i32
    %c0_i32_1 = arith.constant 0 : i32
    %c0_i32_2 = arith.constant 0 : i32
    return %c0_i32, %c0_i32_0, %c0_i32_1 : i32, i32, i32
  }
  func.func @transform_15(%arg0: i32, %arg1: memref<2xi32, #tpu.memory_space<smem>>, %arg2: memref<2xi32, #tpu.memory_space<smem>>) -> (i32, i32, i32) {
    %c0_i32 = arith.constant 0 : i32
    %c0_i32_0 = arith.constant 0 : i32
    %c0_i32_1 = arith.constant 0 : i32
    %c0_i32_2 = arith.constant 0 : i32
    return %c0_i32, %c0_i32_0, %c0_i32_1 : i32, i32, i32
  }
  func.func @transform_16(%arg0: i32, %arg1: memref<2xi32, #tpu.memory_space<smem>>, %arg2: memref<2xi32, #tpu.memory_space<smem>>) -> (i32, i32, i32, i32) {
    %c0_i32 = arith.constant 0 : i32
    %c0_i32_0 = arith.constant 0 : i32
    %c0_i32_1 = arith.constant 0 : i32
    %c0_i32_2 = arith.constant 0 : i32
    %c0_i32_3 = arith.constant 0 : i32
    return %c0_i32, %c0_i32_0, %c0_i32_1, %c0_i32_2 : i32, i32, i32, i32
  }
  func.func @transform_17(%arg0: i32, %arg1: memref<2xi32, #tpu.memory_space<smem>>, %arg2: memref<2xi32, #tpu.memory_space<smem>>) -> (i32, i32) {
    %c0_i32 = arith.constant 0 : i32
    %c0_i32_0 = arith.constant 0 : i32
    %c0_i32_1 = arith.constant 0 : i32
    return %c0_i32, %c0_i32_0 : i32, i32
  }
  func.func @transform_18(%arg0: i32, %arg1: memref<2xi32, #tpu.memory_space<smem>>, %arg2: memref<2xi32, #tpu.memory_space<smem>>) -> (i32, i32) {
    %c0_i32 = arith.constant 0 : i32
    %c0_i32_0 = arith.constant 0 : i32
    %c0_i32_1 = arith.constant 0 : i32
    return %c0_i32, %c0_i32_0 : i32, i32
  }
  func.func @transform_19(%arg0: i32, %arg1: memref<2xi32, #tpu.memory_space<smem>>, %arg2: memref<2xi32, #tpu.memory_space<smem>>) -> (i32, i32) {
    %c0_i32 = arith.constant 0 : i32
    %c0_i32_0 = arith.constant 0 : i32
    %c0_i32_1 = arith.constant 0 : i32
    return %c0_i32, %c0_i32_0 : i32, i32
  }
  func.func @transform_20(%arg0: i32, %arg1: memref<2xi32, #tpu.memory_space<smem>>, %arg2: memref<2xi32, #tpu.memory_space<smem>>) -> (i32, i32) {
    %c0_i32 = arith.constant 0 : i32
    %c0_i32_0 = arith.constant 0 : i32
    %c0_i32_1 = arith.constant 0 : i32
    return %c0_i32, %c0_i32_0 : i32, i32
  }
  func.func @transform_21(%arg0: i32, %arg1: memref<2xi32, #tpu.memory_space<smem>>, %arg2: memref<2xi32, #tpu.memory_space<smem>>) -> (i32, i32, i32) {
    %c0_i32 = arith.constant 0 : i32
    %c0_i32_0 = arith.constant 0 : i32
    %c0_i32_1 = arith.constant 0 : i32
    return %arg0, %c0_i32, %c0_i32_0 : i32, i32, i32
  }
  func.func @transform_22(%arg0: i32, %arg1: memref<2xi32, #tpu.memory_space<smem>>, %arg2: memref<2xi32, #tpu.memory_space<smem>>) -> (i32, i32, i32) {
    %c0_i32 = arith.constant 0 : i32
    %c0_i32_0 = arith.constant 0 : i32
    %c0_i32_1 = arith.constant 0 : i32
    return %arg0, %c0_i32, %c0_i32_0 : i32, i32, i32
  }
}

</mosaic_0001>

<bundles_post_ra>
// kernel: custom-call.6
= control target key start
LH: loop header
LB: loop body
LE: loop exit
PB: predicated region body
PF: predicated region fallthrough
CT: control target
= control target key end

     0   :  { %s6_s0 = inlined_call_operand.vmem [shape: f32[8,2,32], index: 0, kind: output, shape index: {}]  }

// kernel: custom-call.3
= control target key start
LH: loop header
LB: loop body
LE: loop exit
PB: predicated region body
PF: predicated region fallthrough
CT: control target
= control target key end

     0   :  { %s6_s0 = inlined_call_operand.vmem [shape: f32[2,32], index: 0, kind: output, shape index: {}]  }

// kernel: custom-call.7
= control target key start
LH: loop header
LB: loop body
LE: loop exit
PB: predicated region body
PF: predicated region fallthrough
CT: control target
= control target key end

     0   :  { %s6_s0 = inlined_call_operand.vmem [shape: pred[8,2], index: 0, kind: output, shape index: {}]  }

// kernel: custom-call.2
= control target key start
LH: loop header
LB: loop body
LE: loop exit
PB: predicated region body
PF: predicated region fallthrough
CT: control target
= control target key end

     0   :  { %s6_s0 = inlined_call_operand.vmem [shape: f32[2], index: 0, kind: output, shape index: {}]  }

// kernel: paraformer_forward.3
= control target key start
LH: loop header
LB: loop body
LE: loop exit
PB: predicated region body
PF: predicated region fallthrough
CT: control target
= control target key end

     0   :  { %s4136_s0 = inlined_call_operand.vmem [shape: s32[2], index: 0, kind: input, shape index: {}]   ;;  %s4137_s1 = inlined_call_operand.vmem [shape: f32[2,8,24], index: 1, kind: input, shape index: {}]   ;;  %s4138_s2 = inlined_call_operand.vmem [shape: bf16[24,32], index: 2, kind: input, shape index: {}]   ;;  %s4139_s3 = inlined_call_operand.vmem [shape: f32[1,32], index: 3, kind: input, shape index: {}]   ;;  %s4140_s4 = inlined_call_operand.vmem [shape: bf16[2,32,96], index: 4, kind: input, shape index: {}]   ;;  %s4141_s5 = inlined_call_operand.vmem [shape: f32[2,1,96], index: 5, kind: input, shape index: {}]   ;;  %s4142_s6 = inlined_call_operand.vmem [shape: bf16[2,32,32], index: 6, kind: input, shape index: {}]   ;;  %s4143_s7 = inlined_call_operand.vmem [shape: f32[2,1,32], index: 7, kind: input, shape index: {}]   ;;  %s4144_s8 = inlined_call_operand.vmem [shape: bf16[2,32,64], index: 8, kind: input, shape index: {}]   ;;  %s4145_s9 = inlined_call_operand.vmem [shape: f32[2,1,64], index: 9, kind: input, shape index: {}]   ;;  %s4146_s10 = inlined_call_operand.vmem [shape: bf16[2,64,32], index: 10, kind: input, shape index: {}]   ;;  %s4147_s11 = inlined_call_operand.vmem [shape: f32[2,1,32], index: 11, kind: input, shape index: {}]   ;;  %s4148_s12 = inlined_call_operand.vmem [shape: f32[2,4,1,32], index: 12, kind: input, shape index: {}]   ;;  %s4149_s13 = inlined_call_operand.vmem [shape: f32[1,32], index: 13, kind: input, shape index: {}]   ;;  %s4150_s14 = inlined_call_operand.vmem [shape: f32[1,32], index: 14, kind: input, shape index: {}]   ;;  %s4151_s15 = inlined_call_operand.vmem [shape: bf16[96,32], index: 15, kind: input, shape index: {}]   ;;  %s4152_s16 = inlined_call_operand.vmem [shape: f32[1,32], index: 16, kind: input, shape index: {}]   ;;  %s4153_s17 = inlined_call_operand.vmem [shape: bf16[1,32], index: 17, kind: input, shape index: {}]   ;;  %s4154_s19 = inlined_call_operand.vmem [shape: f32[2,8,32], index: 19, kind: output, shape index: {0}]   ;;  %s4155_s20 = inlined_call_operand.vmem [shape: f32[2,1,8], index: 20, kind: output, shape index: {1}]   ;;  %s4156_s18 = inlined_call_operand.<no memory space> [shape: f32[1,1], index: 18, kind: input, shape index: {}]  }
   0x1   :  { %4170 = sst [smem:[#allocation6_spill]] %s4136_s0  ;;  %v30_v0 = vstv %s4156_s18 }
   0x2   :  { %4171 = sst [smem:[#allocation7_spill]] %s4137_s1  ;;  %31 = vst [vmem:[#allocation4] sm:$0x1] %v30_v0 }
   0x3   :  { %4172 = sst [smem:[#allocation8_spill]] %s4138_s2 }
   0x4   :  { %4173 = sst [smem:[#allocation9_spill]] %s4139_s3 }
   0x5   :  { %4174 = sst [smem:[#allocation10_spill]] %s4140_s4 }
   0x6   :  { %4175 = sst [smem:[#allocation11_spill]] %s4150_s14 }
   0x7   :  { %s4176_s23 = sld [smem:[#allocation6_spill]] }
   0xd   :  { %s26_s14 = sshll.u32 %s4176_s23, 4  ;;  %s27_s14 = int_to_ptr.vmem [resolvable:$true] %s26_s14 }
   0xe   :  { %s3547_s25 = scalar_lea.vmem %s27_s14, 16  ;;  %p3552_p1 = scmp.lt.s32.totalorder %s27_s14, %s27_s14 }
   0xf   :  { %p3548_p0 = scmp.ne.s32.totalorder %s27_s14, %s3547_s25  ;;  %p3553_p2 = scmp.lt.s32.totalorder %s3547_s25, %s3547_s25 }
  0x11   :  { %p3554_p3 = por %p3553_p2, %p3552_p1 }
  0x13   :  { %p3555_p4 = pnand %p3554_p3, %p3548_p0 }
  0x15   :  { %3558 = shalt.err (!%p3555_p4)  }
  0x16   :  { %s3569_s3 = smov [#allocation3]  }
  0x17   :  { %29 = dma.vmem_to_smem %s27_s14, 16, %s3569_s3, [#allocation2] }
  0x18   :  { %3563 = dma.done.wait [#allocation2], 16 }
  0x19   :  { %3564 = vsyncadd [#allocation2], 4294967280 }
  0x1a   :  { %33 = sfence }
  0x1b   :  { %s3700_s26 = smov 0  }
  0x1c LB: > { %s3706_s18 = sadd.s32 4294967295, %s3567_s26   ;;  %p3069_p5 = scmp.ge.s32.totalorder %s3567_s26, 1  ;;  %s3567_s26 = sphi %s3700_s26, %s39_s26  }
  0x1d   : > { %p548_p6 = scmp.lt.s32.totalorder %s3567_s26, 3 }
  0x1f   : > { %p549_p7 = pnand %p3069_p5, %p548_p6 }
  0x20   : > { %s4177_s28 = sld [smem:[#allocation8_spill]] (!%p549_p7)  ;;  %p605_p8 = scmp.lt.s32.totalorder (!%p549_p7), %s3706_s18, 1 }
  0x21   : > { %552 = sbr.rel (%p549_p7) target bundleno = 5831 (0x16c7), region = 92  ;;  %s4178_s22 = sld [smem:[#allocation7_spill]] (!%p549_p7) }
  0x22   : > { %s4179_s25 = sld [smem:[#allocation9_spill]] (!%p549_p7)  ;;  %s3573_s3 = smov (!%p549_p7), 96  }
  0x23   : > { %s4180_s27 = sld [smem:[#allocation10_spill]] (!%p549_p7)  ;;  %s3574_s14 = smov (!%p549_p7), 88  }
  0x24   : > { %s3575_s4 = smov (!%p549_p7), 80   ;;  %s3576_s29 = smov (!%p549_p7), 112  }
  0x25   : > { %s4169_s21 = smov (!%p549_p7), 72   ;;  %s4168_s1 = smov (!%p549_p7), 104  }
  0x26   : > { %v3473_v1 = vld [vmem:[%s4177_s28 + $0x8] ss:$0 sps:$4 sm:$0xff]   ;;  %vm643_vm0 = vcmask 1043456   ;;  %v3570_v2 = vmov 0.0   ;;  %v3474_v4 = vld [vmem:[%s4177_s28] sm:$0xff]   ;;  %vm3571_vm1 = vmmov 0   ;;  %v791_v44 = vlaneseq }
  0x27   : > { %3261 = vmatprep.subr.bf16.mxu0 %v3570_v2  ;;  %3269 = vmatprep.subr.bf16.mxu1 %v3570_v2  ;;  %v645_v3 = vsel %vm643_vm0, %v3473_v1, 0  ;;  %s3725_s30 = scalar_select %p605_p8, %s3706_s18, 1  ;;  %vm639_vm2 = vcmask 195584   ;;  %vm690_vm3 = vcmask 261120   ;;  %v3077_v25 = vld [vmem:[%s4148_s12] ss:$0 sm:$0xff] }
  0x28   : > { %3265 = vmatprep.mubr.msk.bf16.mxu0 %vm3571_vm1, %v3570_v2  ;;  %3273 = vmatprep.mubr.msk.bf16.mxu1 %vm3571_vm1, %v3570_v2  ;;  %v3072_v7 = vld [vmem:[%s4179_s25] ss:$0 sm:$0xff]  ;;  %v3078_v27 = vld [vmem:[%s4148_s12 + $0x1] ss:$0 sm:$0xff]  ;;  %s3572_s25 = smov 120   ;;  %vm799_vm4 = vcmask 64512  }
  0x29   : > { %3262 = vmatpush3.bf16.msra.mxu0 %v645_v3  ;;  %s4159_s0 = sshll.u32 %s3725_s30, 3  ;;  %v3475_v19 = vld [vmem:[%s4180_s27 + $0x8] sm:$0xff]   ;;  %v3476_v20 = vld [vmem:[%s4180_s27] sm:$0xff]   ;;  %v792_v45 = vand.u32 127, %v791_v44  ;;  %v3579_v49 = vmov -1e+09  }
  0x2a   : > { %3263 = vmatprep.subr.bf16.mxu0 %v3570_v2  ;;  %s608_s23 = scalar_lea.vmem %s4178_s22, %s4159_s0  ;;  %3270 = vmatpush3.bf16.msra.mxu1 %v3475_v19  ;;  %v3079_v31 = vld [vmem:[%s4141_s5] ss:$0 sm:$0xff]  ;;  %s617_s22 = sld [smem:[#allocation3 + %s3706_s18]]  ;;  %vm1477_vm6 = vcmask 130048   ;;  %vm1682_vm7 = vcmask 523264   ;;  %vm2874_vm10 = vcmask 785408  }
  0x2b   : > { %v618_v5 = vld [vmem:[%s608_s23] sm:$0xff]  ;;  %3271 = vmatprep.subr.bf16.mxu1 %v3570_v2  ;;  %s4166_s18 = smov 64   ;;  %s4162_s23 = smov 48   ;;  %vm2985_vm11 = vcmask 57344  }
  0x2c   : > { %v619_v6 = vpack.c.bf16 %v618_v5, %v618_v5  ;;  %s4161_s24 = smov 40   ;;  %s4160_s2 = smov 56  }
  0x2d   : > { %3264 = vmatpush3.bf16.msra.mxu0 %v3474_v4  ;;  %s4164_s0 = smov 16  }
  0x2e   : > { %3277 = vmatprep.subr.mxu0 %v3570_v2  ;;  %3272 = vmatpush3.bf16.msra.mxu1 %v3476_v20 }
  0x2f   : > { %3282 = vmatprep.subr.mxu1 %v3570_v2 }
  0x30   : > { %3266 = vmatmul.mubr.msk.bf16.vlgmr.msra.gmra.mxu0 %vm639_vm2, %v619_v6  ;;  %v793_v46 = vstv %s617_s22  ;;  %s4163_s22 = smov 24  }
  0x31   : > { %3279 = vmatprep.mubr.msk.f32.mxu0 %vm3571_vm1, %v3570_v2  ;;  %vm3805_vm5 = vcmp.lt.s32.totalorder %v792_v45, %v793_v46  ;;  %v3477_v45 = vld [vmem:[%s4142_s6 + $0x8] sm:$0xff]  }
  0x32   : > { %v3811_v50 = vsel %vm3805_vm5, 0.0, %v3579_v49  ;;  %v3478_v49 = vld [vmem:[%s4142_s6] sm:$0xff]  }
  0xf0   : > { %v681_v8 = vpop.f32.mrf.mxu0 }
  0xf1   : > { %v3740_v9 = vadd.f32 %v3072_v7, %v681_v8 }
  0xf2   : > { %v3267_v10 = vpop.f32.mrf.mxu0 }
  0xf3   : > { %v691_v11 = vsel %vm690_vm3, %v3740_v9, 0.0 }
  0xf4   : > { %692 = vadd.xlane.f32.xlu0 %v691_v11  ;;  %v684_v12 = vpop.f32.mrf.mxu0 }
  0xf6   : > { %v3268_v13 = vpop.f32.mrf.mxu0 }
 0x17d   : > { %v693_v14 = vpop.xlane.xlu0 %692 }
 0x17e   : > { %v695_v15 = vmul.f32 0.03125, %v693_v14 }
 0x180   : > { %v696_v16 = vsub.f32 %v3740_v9, %v695_v15 }
 0x182   : > { %v697_v17 = vmul.f32 %v696_v16, %v696_v16 }
 0x184   : > { %v698_v18 = vsel %vm690_vm3, %v697_v17, 0.0 }
 0x185   : > { %699 = vadd.xlane.f32.xlu0 %v698_v18 }
 0x20e   : > { %v700_v21 = vpop.xlane.xlu0 %699 }
 0x20f   : > { %v701_v22 = vmul.f32 0.03125, %v700_v21 }
 0x211   : > { %v702_v23 = vadd.f32 1e-05, %v701_v22 }
 0x213   : > { %3501 = vrsqrt.f32 %v702_v23 }
 0x220   : > { %v3502_v24 = vpop.eup %3501 }
 0x221   : > { %v704_v26 = vmul.f32 %v3502_v24, %v696_v16 }
 0x223   : > { %v711_v28 = vmul.f32 %v3077_v25, %v704_v26 }
 0x225   : > { %v718_v29 = vadd.f32 %v3078_v27, %v711_v28 }
 0x227   : > { %v729_v30 = vpack.c.bf16 %v718_v29, %v718_v29 }
 0x229   : > { %3274 = vmatmul.mubr.msk.bf16.vlgmr.msra.gmra.mxu1 %vm690_vm3, %v729_v30 }
 0x22a   : > { %3284 = vmatprep.mubr.msk.f32.mxu1 %vm3571_vm1, %v3570_v2 }
 0x2e9   : > { %v785_v32 = vpop.f32.mrf.mxu1 }
 0x2ea   : > { %v3766_v33 = vadd.f32 %v3079_v31, %v785_v32 }
 0x2eb   : > { %v3275_v34 = vpop.f32.mrf.mxu1 }
 0x2ec   : > { %963 = vrot.lane.b32.xlu0 %v3766_v33, %s3572_s25  ;;  %797 = vrot.lane.b32.xlu1 %v3766_v33, %s3573_s3 }
 0x2ed   : > { %v788_v35 = vpop.f32.mrf.mxu1 }
 0x2ef   : > { %v3276_v36 = vpop.f32.mrf.mxu1 }
 0x2f0   : > { %965 = vrot.lane.b32.xlu1 %v3766_v33, %s3574_s14 }
 0x2f4   : > { %1132 = vrot.lane.b32.xlu1 %v3766_v33, %s3575_s4 }
 0x2f8   : > { %1130 = vrot.lane.b32.xlu1 %v3766_v33, %s3576_s29 }
 0x2fc   : > { %1299 = vrot.lane.b32.xlu1 %v3766_v33, %s4169_s21  ;;  %s4190_s21 = smov 16  }
 0x300   : > { %1297 = vrot.lane.b32.xlu1 %v3766_v33, %s4168_s1  ;;  %s4191_s1 = smov 24  }
 0x35e   : > { %v798_v37 = vpop.permute.xlu1 %797  ;;  %v964_v39 = vpop.permute.xlu0 %963 }
 0x35f   : > { %3278 = vmatpush3.xpose.msk.msra.mxu0 %vm799_vm4, %v798_v37 }
 0x360   : > { %3287 = vmatprep.subr.mxu0 %v3570_v2 }
 0x362   : > { %3280 = vmatmul.mubr.msk.f32.vlgmr.msra.gmra.mxu0 %vm799_vm4, %v3766_v33  ;;  %v966_v38 = vpop.permute.xlu1 %965 }
 0x363   : > { %3288 = vmatpush3.xpose.msk.msra.mxu0 %vm799_vm4, %v966_v38  ;;  %3289 = vmatprep.mubr.msk.f32.mxu0 %vm3571_vm1, %v3570_v2 }
 0x364   : > { %3297 = vmatprep.subr.mxu0 %v3570_v2 }
 0x366   : > { %3290 = vmatmul.mubr.msk.f32.vlgmr.msra.gmra.mxu0 %vm799_vm4, %v964_v39  ;;  %v1133_v40 = vpop.permute.xlu1 %1132 }
 0x367   : > { %3298 = vmatpush3.xpose.msk.msra.mxu0 %vm799_vm4, %v1133_v40  ;;  %3299 = vmatprep.mubr.msk.f32.mxu0 %vm3571_vm1, %v3570_v2 }
 0x368   : > { %3307 = vmatprep.subr.mxu0 %v3570_v2 }
 0x36a   : > { %v1131_v41 = vpop.permute.xlu1 %1130 }
 0x36b   : > { %3300 = vmatmul.mubr.msk.f32.vlgmr.msra.gmra.mxu0 %vm799_vm4, %v1131_v41 }
 0x36c   : > { %3309 = vmatprep.mubr.msk.f32.mxu0 %vm3571_vm1, %v3570_v2 }
 0x36e   : > { %v1300_v42 = vpop.permute.xlu1 %1299 }
 0x36f   : > { %3308 = vmatpush3.xpose.msk.msra.mxu0 %vm799_vm4, %v1300_v42 }
 0x370   : > { %3317 = vmatprep.subr.bf16.mxu0 %v3570_v2 }
 0x372   : > { %v1298_v43 = vpop.permute.xlu1 %1297 }
 0x373   : > { %3310 = vmatmul.mubr.msk.f32.vlgmr.msra.gmra.mxu0 %vm799_vm4, %v1298_v43 }
 0x374   : > { %3321 = vmatprep.mubr.msk.bf16.mxu0 %vm3571_vm1, %v3570_v2  ;;  %3318 = vmatpush3.bf16.msra.mxu0 %v3477_v45 }
 0x375   : > { %3319 = vmatprep.subr.bf16.mxu0 %v3570_v2 }
 0x378   : > { %3320 = vmatpush3.bf16.msra.mxu0 %v3478_v49 }
 0x379   : > { %3333 = vmatprep.subr.bf16.mxu0 %v3570_v2 }
 0x422   : > { %v870_v48 = vpop.f32.mrf.mxu0 }
 0x423   : > { %v874_v51 = vmul.f32 0.35355338, %v870_v48 }
 0x424   : > { %v3281_v52 = vpop.f32.mrf.mxu0 }
 0x425   : > { %v875_v53 = vadd.f32 %v874_v51, %v3811_v50 }
 0x426   : > { %v1037_v54 = vpop.f32.mrf.mxu0 }
 0x427   : > { %v1041_v55 = vmul.f32 0.35355338, %v1037_v54  ;;  %v876_v56 = vsel %vm799_vm4, %v875_v53, -inf }
 0x428   : > { %877 = vmax.xlane.f32.xlu1 %v876_v56  ;;  %v3291_v57 = vpop.f32.mrf.mxu0 }
 0x429   : > { %v1042_v58 = vadd.f32 %v1041_v55, %v3811_v50 }
 0x42b   : > { %v1204_v59 = vpop.f32.mrf.mxu0  ;;  %v1043_v60 = vsel %vm799_vm4, %v1042_v58, -inf }
 0x42c   : > { %v1208_v61 = vmul.f32 0.35355338, %v1204_v59  ;;  %1044 = vmax.xlane.f32.xlu0 %v1043_v60 }
 0x42d   : > { %v3301_v62 = vpop.f32.mrf.mxu0 }
 0x42e   : > { %v1209_v63 = vadd.f32 %v1208_v61, %v3811_v50 }
 0x430   : > { %v1210_v0 = vsel %vm799_vm4, %v1209_v63, -inf }
 0x431   : > { %1211 = vmax.xlane.f32.xlu1 %v1210_v0  ;;  %v3095_v0 = vld [vmem:[%s4143_s7] ss:$0 sm:$0xff] }
 0x433   : > { %v1371_v1 = vpop.f32.mrf.mxu0 }
 0x434   : > { %v1375_v3 = vmul.f32 0.35355338, %v1371_v1 }
 0x435   : > { %v3311_v4 = vpop.f32.mrf.mxu0 }
 0x436   : > { %v1376_v5 = vadd.f32 %v1375_v3, %v3811_v50 }
 0x438   : > { %v1377_v6 = vsel %vm799_vm4, %v1376_v5, -inf }
 0x439   : > { %1378 = vmax.xlane.f32.xlu0 %v1377_v6 }
 0x442   : > { %887 = vrot.lane.b32.xlu1 %v3766_v33, %s4166_s18 }
 0x4b1   : > { %v878_v7 = vpop.xlane.xlu1 %877 }
 0x4b2   : > { %v879_v8 = vsub.f32 %v875_v53, %v878_v7 }
 0x4b4   : > { %v880_v10 = vmul.f32 1.442695, %v879_v8 }
 0x4b5   : > { %v1045_v11 = vpop.xlane.xlu0 %1044 }
 0x4b6   : > { %3503 = vpow2.f32 %v880_v10  ;;  %v1046_v12 = vsub.f32 %v1042_v58, %v1045_v11 }
 0x4b8   : > { %v1047_v13 = vmul.f32 1.442695, %v1046_v12 }
 0x4ba   : > { %3505 = vpow2.f32 %v1047_v13  ;;  %v1212_v14 = vpop.xlane.xlu1 %1211 }
 0x4bb   : > { %v1213_v15 = vsub.f32 %v1209_v63, %v1212_v14 }
 0x4bd   : > { %v1214_v16 = vmul.f32 1.442695, %v1213_v15  ;;  %v3479_v15 = vld [vmem:[%s4144_s8 + $0x8] sm:$0xff]  }
 0x4be   : > { %v888_v17 = vpop.permute.xlu1 %887 }
 0x4bf   : > { %3507 = vpow2.f32 %v1214_v16  ;;  %3283 = vmatpush3.msra.mxu1 %v888_v17  ;;  %v3481_v16 = vld [vmem:[%s4146_s10 + $0x18] sm:$0xff]   ;;  %v3482_v17 = vld [vmem:[%s4146_s10 + $0x10] sm:$0xff]  }
 0x4c0   : > { %3292 = vmatprep.subr.mxu1 %v3570_v2 }
 0x4c2   : > { %v1379_v18 = vpop.xlane.xlu0 %1378 }
 0x4c3   : > { %v3504_v19 = vpop.eup %3503  ;;  %v1380_v20 = vsub.f32 %v1376_v5, %v1379_v18 }
 0x4c4   : > { %v882_v21 = vsel %vm799_vm4, %v3504_v19, 0.0 }
 0x4c5   : > { %v1381_v22 = vmul.f32 1.442695, %v1380_v20  ;;  %883 = vadd.xlane.f32.xlu1 %v882_v21 }
 0x4c7   : > { %v3506_v23 = vpop.eup %3505  ;;  %3509 = vpow2.f32 %v1381_v22  ;;  %v3101_v22 = vld [vmem:[%s4148_s12 + $0x2] ss:$0 sm:$0xff] }
 0x4c8   : > { %v1049_v24 = vsel %vm799_vm4, %v3506_v23, 0.0 }
 0x4c9   : > { %1050 = vadd.xlane.f32.xlu0 %v1049_v24  ;;  %v3102_v24 = vld [vmem:[%s4148_s12 + $0x3] ss:$0 sm:$0xff] }
 0x4cc   : > { %v3508_v25 = vpop.eup %3507 }
 0x4cd   : > { %v1216_v26 = vsel %vm799_vm4, %v3508_v25, 0.0 }
 0x4ce   : > { %1217 = vadd.xlane.f32.xlu1 %v1216_v26 }
 0x4d4   : > { %v3510_v27 = vpop.eup %3509 }
 0x4d5   : > { %v1383_v28 = vsel %vm799_vm4, %v3510_v27, 0.0 }
 0x4d6   : > { %1384 = vadd.xlane.f32.xlu0 %v1383_v28  ;;  %v3483_v28 = vld [vmem:[%s4146_s10 + $0x8] sm:$0xff]  }
 0x4df   : > { %1221 = vrot.lane.b32.xlu1 %v3766_v33, %s4162_s23  ;;  %s4165_s23 = smov 8  }
 0x4e3   : > { %1388 = vrot.lane.b32.xlu1 %v3766_v33, %s4161_s24  ;;  %s4183_s24 = smov 72  }
 0x4ec   : > { %1054 = vrot.lane.b32.xlu0 %v3766_v33, %s4160_s2  ;;  %s4184_s2 = smov 104  }
 0x54e   : > { %v884_v29 = vpop.xlane.xlu1 %883 }
 0x54f   : > { %3511 = vrcp.f32 %v884_v29  ;;  %v3484_v29 = vld [vmem:[%s4146_s10] sm:$0xff]  }
 0x552   : > { %v1051_v30 = vpop.xlane.xlu0 %1050 }
 0x553   : > { %3513 = vrcp.f32 %v1051_v30  ;;  %v3103_v30 = vld [vmem:[%s4145_s9] ss:$0 sm:$0xff] }
 0x557   : > { %v1218_v31 = vpop.xlane.xlu1 %1217 }
 0x558   : > { %3515 = vrcp.f32 %v1218_v31 }
 0x55b   : > { %v1222_v37 = vpop.permute.xlu1 %1221 }
 0x55c   : > { %v3512_v32 = vpop.eup %3511 }
 0x55d   : > { %v886_v34 = vmul.f32 %v3512_v32, %v3504_v19 }
 0x55f   : > { %3285 = vmatmul.mubr.msk.f32.vlgmr.msra.gmra.mxu1 %vm799_vm4, %v886_v34  ;;  %v1385_v35 = vpop.xlane.xlu0 %1384  ;;  %v1389_v41 = vpop.permute.xlu1 %1388 }
 0x560   : > { %v3514_v36 = vpop.eup %3513  ;;  %3517 = vrcp.f32 %v1385_v35  ;;  %3294 = vmatprep.mubr.msk.f32.mxu1 %vm3571_vm1, %v3570_v2 }
 0x561   : > { %v1053_v39 = vmul.f32 %v3514_v36, %v3506_v23 }
 0x563   : > { %v1055_v38 = vpop.permute.xlu0 %1054 }
 0x564   : > { %3293 = vmatpush3.msra.mxu1 %v1055_v38 }
 0x565   : > { %v3516_v33 = vpop.eup %3515  ;;  %3295 = vmatmul.mubr.msk.f32.vlgmr.msra.gmra.mxu1 %vm799_vm4, %v1053_v39  ;;  %3302 = vmatprep.subr.mxu1 %v3570_v2  ;;  %v3107_v39 = vld [vmem:[%s4147_s11] ss:$0 sm:$0xff] }
 0x566   : > { %3303 = vmatpush3.msra.mxu1 %v1222_v37  ;;  %3304 = vmatprep.mubr.msk.f32.mxu1 %vm3571_vm1, %v3570_v2  ;;  %v1220_v40 = vmul.f32 %v3516_v33, %v3508_v25 }
 0x567   : > { %3312 = vmatprep.subr.mxu1 %v3570_v2 }
 0x569   : > { %3305 = vmatmul.mubr.msk.f32.vlgmr.msra.gmra.mxu1 %vm799_vm4, %v1220_v40 }
 0x56a   : > { %3313 = vmatpush3.msra.mxu1 %v1389_v41  ;;  %3314 = vmatprep.mubr.msk.f32.mxu1 %vm3571_vm1, %v3570_v2 }
 0x56b   : > { %3325 = vmatprep.subr.bf16.mxu1 %v3570_v2 }
 0x56d   : > { %v3518_v42 = vpop.eup %3517 }
 0x56e   : > { %v1387_v43 = vmul.f32 %v3518_v42, %v3510_v27 }
 0x570   : > { %3315 = vmatmul.mubr.msk.f32.vlgmr.msra.gmra.mxu1 %vm799_vm4, %v1387_v43 }
 0x571   : > { %3329 = vmatprep.mubr.msk.bf16.mxu1 %vm3571_vm1, %v3570_v2  ;;  %3326 = vmatpush3.bf16.msra.mxu1 %v3479_v15 }
 0x572   : > { %3327 = vmatprep.subr.bf16.mxu1 %v3570_v2 }
 0x61f   : > { %v959_v46 = vpop.f32.mrf.mxu1 }
 0x621   : > { %v3286_v48 = vpop.f32.mrf.mxu1 }
 0x625   : > { %v1126_v51 = vpop.f32.mrf.mxu1 }
 0x626   : > { %1465 = vrot.lane.b32.xlu0 %v1126_v51, %s4165_s23  ;;  %s4189_s23 = smov 8  }
 0x627   : > { %v3296_v52 = vpop.f32.mrf.mxu1 }
 0x629   : > { %v1293_v53 = vpop.f32.mrf.mxu1 }
 0x62a   : > { %1469 = vrot.lane.b32.xlu1 %v1293_v53, %s4164_s0 }
 0x62b   : > { %v3306_v54 = vpop.f32.mrf.mxu1 }
 0x62c   : > { %v3485_v54 = vld [vmem:[%s4180_s27 + $0x18] sm:$0xff]  }
 0x630   : > { %v1460_v55 = vpop.f32.mrf.mxu1 }
 0x631   : > { %1473 = vrot.lane.b32.xlu0 %v1460_v55, %s4163_s22  ;;  %v3486_v55 = vld [vmem:[%s4180_s27 + $0x10] sm:$0xff]   ;;  %s3587_s22 = smov 32  }
 0x632   : > { %v3316_v56 = vpop.f32.mrf.mxu1 }
 0x698   : > { %v1466_v57 = vpop.permute.xlu0 %1465 }
 0x699   : > { %v1476_v59 = vsel %vm799_vm4, %v959_v46, %v1466_v57 }
 0x69c   : > { %v1470_v58 = vpop.permute.xlu1 %1469 }
 0x69d   : > { %v1478_v60 = vsel %vm1477_vm6, %v1476_v59, %v1470_v58 }
 0x6a3   : > { %v1474_v61 = vpop.permute.xlu0 %1473 }
 0x6a4   : > { %v1479_v62 = vsel %vm639_vm2, %v1478_v60, %v1474_v61  ;;  %v3115_v60 = vld [vmem:[%s4148_s12 + $0x4] ss:$0 sm:$0xff] }
 0x6a5   : > { %v1480_v63 = vpack.c.bf16 %v1479_v62, %v1479_v62  ;;  %v3116_v62 = vld [vmem:[%s4148_s12 + $0x5] ss:$0 sm:$0xff] }
 0x6a7   : > { %3322 = vmatmul.mubr.msk.bf16.vlgmr.msra.gmra.mxu0 %vm690_vm3, %v1480_v63 }
 0x6a8   : > { %3341 = vmatprep.mubr.msk.bf16.mxu0 %vm3571_vm1, %v3570_v2  ;;  %3334 = vmatpush3.bf16.msra.mxu0 %v3481_v16 }
 0x6a9   : > { %3335 = vmatprep.subr.bf16.mxu0 %v3570_v2 }
 0x6ac   : > { %3336 = vmatpush3.bf16.msra.mxu0 %v3482_v17 }
 0x6ad   : > { %3337 = vmatprep.subr.bf16.mxu0 %v3570_v2 }
 0x6b0   : > { %3338 = vmatpush3.bf16.msra.mxu0 %v3483_v28 }
 0x6b1   : > { %3339 = vmatprep.subr.bf16.mxu0 %v3570_v2 }
 0x6b4   : > { %3340 = vmatpush3.bf16.msra.mxu0 %v3484_v29 }
 0x6b5   : > { %3363 = vmatprep.subr.mxu0 %v3570_v2 }
 0x767   : > { %v1536_v1 = vpop.f32.mrf.mxu0 }
 0x768   : > { %v1537_v3 = vadd.f32 %v3095_v0, %v1536_v1 }
 0x769   : > { %v3323_v4 = vpop.f32.mrf.mxu0 }
 0x76a   : > { %v1542_v5 = vadd.f32 %v1537_v3, %v3740_v9  ;;  %v3480_v9 = vld [vmem:[%s4144_s8] sm:$0xff]  }
 0x76b   : > { %v1539_v6 = vpop.f32.mrf.mxu0  ;;  %3328 = vmatpush3.bf16.msra.mxu1 %v3480_v9  ;;  %v3127_v3 = vld [vmem:[%s4141_s5 + $0x1] ss:$0 sm:$0xff] }
 0x76c   : > { %v1547_v7 = vsel %vm690_vm3, %v1542_v5, 0.0  ;;  %3345 = vmatprep.subr.bf16.mxu1 %v3570_v2 }
 0x76d   : > { %1548 = vadd.xlane.f32.xlu1 %v1547_v7  ;;  %v3324_v8 = vpop.f32.mrf.mxu0 }
 0x7f6   : > { %v1549_v10 = vpop.xlane.xlu1 %1548 }
 0x7f7   : > { %v1550_v11 = vmul.f32 0.03125, %v1549_v10 }
 0x7f9   : > { %v1551_v12 = vsub.f32 %v1542_v5, %v1550_v11 }
 0x7fb   : > { %v1552_v13 = vmul.f32 %v1551_v12, %v1551_v12 }
 0x7fd   : > { %v1553_v14 = vsel %vm690_vm3, %v1552_v13, 0.0 }
 0x7fe   : > { %1554 = vadd.xlane.f32.xlu0 %v1553_v14 }
 0x887   : > { %v1555_v18 = vpop.xlane.xlu0 %1554 }
 0x888   : > { %v1556_v19 = vmul.f32 0.03125, %v1555_v18 }
 0x88a   : > { %v1557_v20 = vadd.f32 1e-05, %v1556_v19 }
 0x88c   : > { %3519 = vrsqrt.f32 %v1557_v20 }
 0x899   : > { %v3520_v21 = vpop.eup %3519 }
 0x89a   : > { %v1559_v23 = vmul.f32 %v3520_v21, %v1551_v12 }
 0x89c   : > { %v1566_v25 = vmul.f32 %v3101_v22, %v1559_v23 }
 0x89e   : > { %v1573_v26 = vadd.f32 %v3102_v24, %v1566_v25 }
 0x8a0   : > { %v1588_v27 = vpack.c.bf16 %v1573_v26, %v1573_v26 }
 0x8a2   : > { %3330 = vmatmul.mubr.msk.bf16.vlgmr.msra.gmra.mxu1 %vm690_vm3, %v1588_v27 }
 0x8a3   : > { %3349 = vmatprep.mubr.msk.bf16.mxu1 %vm3571_vm1, %v3570_v2  ;;  %3346 = vmatpush3.bf16.msra.mxu1 %v3485_v54 }
 0x8a4   : > { %3347 = vmatprep.subr.bf16.mxu1 %v3570_v2 }
 0x8a7   : > { %3348 = vmatpush3.bf16.msra.mxu1 %v3486_v55 }
 0x8a8   : > { %3353 = vmatprep.subr.mxu1 %v3570_v2 }
 0x962   : > { %v1644_v31 = vpop.f32.mrf.mxu1 }
 0x963   : > { %v1645_v32 = vadd.f32 %v3103_v30, %v1644_v31 }
 0x964   : > { %v3331_v34 = vpop.f32.mrf.mxu1 }
 0x965   : > { %v1650_v35 = vmax.f32 %v1645_v32, 0.0 }
 0x966   : > { %v1647_v36 = vpop.f32.mrf.mxu1 }
 0x967   : > { %v1651_v37 = vpack.c.bf16 %v1650_v35, %v1650_v35 }
 0x968   : > { %v3332_v38 = vpop.f32.mrf.mxu1 }
 0x969   : > { %3342 = vmatmul.mubr.msk.bf16.vlgmr.msra.gmra.mxu0 %vm1682_vm7, %v1651_v37 }
 0x96a   : > { %3365 = vmatprep.mubr.msk.f32.mxu0 %vm3571_vm1, %v3570_v2 }
 0xa29   : > { %v1720_v33 = vpop.f32.mrf.mxu0 }
 0xa2a   : > { %v1721_v40 = vadd.f32 %v3107_v39, %v1720_v33 }
 0xa2b   : > { %v3343_v41 = vpop.f32.mrf.mxu0 }
 0xa2c   : > { %v3914_v42 = vadd.f32 %v1721_v40, %v1542_v5 }
 0xa2d   : > { %v1723_v43 = vpop.f32.mrf.mxu0 }
 0xa2e   : > { %v1731_v45 = vsel %vm690_vm3, %v3914_v42, 0.0 }
 0xa2f   : > { %1732 = vadd.xlane.f32.xlu0 %v1731_v45  ;;  %v3344_v46 = vpop.f32.mrf.mxu0 }
 0xab8   : > { %v1733_v48 = vpop.xlane.xlu0 %1732 }
 0xab9   : > { %v1734_v49 = vmul.f32 0.03125, %v1733_v48 }
 0xabb   : > { %v1735_v51 = vsub.f32 %v3914_v42, %v1734_v49 }
 0xabd   : > { %v1736_v52 = vmul.f32 %v1735_v51, %v1735_v51 }
 0xabf   : > { %v1737_v53 = vsel %vm690_vm3, %v1736_v52, 0.0 }
 0xac0   : > { %1738 = vadd.xlane.f32.xlu1 %v1737_v53 }
 0xb49   : > { %v1739_v56 = vpop.xlane.xlu1 %1738 }
 0xb4a   : > { %v1740_v57 = vmul.f32 0.03125, %v1739_v56 }
 0xb4c   : > { %v1741_v58 = vadd.f32 1e-05, %v1740_v57 }
 0xb4e   : > { %3521 = vrsqrt.f32 %v1741_v58 }
 0xb5b   : > { %v3522_v59 = vpop.eup %3521 }
 0xb5c   : > { %v1743_v61 = vmul.f32 %v3522_v59, %v1735_v51 }
 0xb5e   : > { %v1750_v63 = vmul.f32 %v3115_v60, %v1743_v61 }
 0xb60   : > { %v1757_v0 = vadd.f32 %v3116_v62, %v1750_v63 }
 0xb62   : > { %v1772_v1 = vpack.c.bf16 %v1757_v0, %v1757_v0 }
 0xb64   : > { %3350 = vmatmul.mubr.msk.bf16.vlgmr.msra.gmra.mxu1 %vm690_vm3, %v1772_v1 }
 0xb65   : > { %3355 = vmatprep.mubr.msk.f32.mxu1 %vm3571_vm1, %v3570_v2 }
 0xc24   : > { %v1828_v4 = vpop.f32.mrf.mxu1 }
 0xc25   : > { %v3940_v5 = vadd.f32 %v3127_v3, %v1828_v4 }
 0xc26   : > { %v3351_v6 = vpop.f32.mrf.mxu1 }
 0xc27   : > { %2002 = vrot.lane.b32.xlu1 %v3940_v5, %s3574_s14  ;;  %1835 = vrot.lane.b32.xlu0 %v3940_v5, %s3573_s3  ;;  %s4186_s3 = smov 48   ;;  %s4187_s14 = smov 40  }
 0xc28   : > { %v1831_v7 = vpop.f32.mrf.mxu1 }
 0xc2a   : > { %v3352_v8 = vpop.f32.mrf.mxu1 }
 0xc2b   : > { %2000 = vrot.lane.b32.xlu1 %v3940_v5, %s3572_s25  ;;  %2169 = vrot.lane.b32.xlu0 %v3940_v5, %s3575_s4  ;;  %s4185_s25 = smov 64   ;;  %s4188_s4 = smov 56  }
 0xc2f   : > { %2167 = vrot.lane.b32.xlu1 %v3940_v5, %s3576_s29  ;;  %2336 = vrot.lane.b32.xlu0 %v3940_v5, %s4183_s24 }
 0xc33   : > { %2334 = vrot.lane.b32.xlu1 %v3940_v5, %s4184_s2  ;;  %s615_s2 = scalar_lea.vmem %s4155_s20, %s3725_s30 }
 0xc99   : > { %v2003_v10 = vpop.permute.xlu1 %2002  ;;  %v1836_v11 = vpop.permute.xlu0 %1835 }
 0xc9a   : > { %3354 = vmatpush3.xpose.msk.msra.mxu1 %vm799_vm4, %v1836_v11  ;;  %3364 = vmatpush3.xpose.msk.msra.mxu0 %vm799_vm4, %v2003_v10 }
 0xc9b   : > { %3373 = vmatprep.subr.mxu0 %v3570_v2  ;;  %3358 = vmatprep.subr.mxu1 %v3570_v2 }
 0xc9d   : > { %v2001_v12 = vpop.permute.xlu1 %2000  ;;  %3356 = vmatmul.mubr.msk.f32.vlgmr.msra.gmra.mxu1 %vm799_vm4, %v3940_v5  ;;  %v2170_v13 = vpop.permute.xlu0 %2169 }
 0xc9e   : > { %3366 = vmatmul.mubr.msk.f32.vlgmr.msra.gmra.mxu0 %vm799_vm4, %v2001_v12  ;;  %3360 = vmatprep.mubr.msk.f32.mxu1 %vm3571_vm1, %v3570_v2 }
 0xc9f   : > { %3374 = vmatpush3.xpose.msk.msra.mxu0 %vm799_vm4, %v2170_v13  ;;  %3375 = vmatprep.mubr.msk.f32.mxu0 %vm3571_vm1, %v3570_v2  ;;  %v3487_v13 = vld [vmem:[%s4142_s6 + $0x18] sm:$0xff]  }
 0xca0   : > { %3383 = vmatprep.subr.mxu0 %v3570_v2 }
 0xca1   : > { %v2168_v14 = vpop.permute.xlu1 %2167  ;;  %v2337_v15 = vpop.permute.xlu0 %2336 }
 0xca2   : > { %3376 = vmatmul.mubr.msk.f32.vlgmr.msra.gmra.mxu0 %vm799_vm4, %v2168_v14  ;;  %v3488_v14 = vld [vmem:[%s4142_s6 + $0x10] sm:$0xff]  }
 0xca3   : > { %3384 = vmatpush3.xpose.msk.msra.mxu0 %vm799_vm4, %v2337_v15  ;;  %3385 = vmatprep.mubr.msk.f32.mxu0 %vm3571_vm1, %v3570_v2 }
 0xca4   : > { %3393 = vmatprep.subr.bf16.mxu0 %v3570_v2 }
 0xca5   : > { %v2335_v9 = vpop.permute.xlu1 %2334 }
 0xca6   : > { %3386 = vmatmul.mubr.msk.f32.vlgmr.msra.gmra.mxu0 %vm799_vm4, %v2335_v9 }
 0xca7   : > { %3397 = vmatprep.mubr.msk.bf16.mxu0 %vm3571_vm1, %v3570_v2  ;;  %3394 = vmatpush3.bf16.msra.mxu0 %v3487_v13 }
 0xca8   : > { %3395 = vmatprep.subr.bf16.mxu0 %v3570_v2 }
 0xcab   : > { %3396 = vmatpush3.bf16.msra.mxu0 %v3488_v14 }
 0xcac   : > { %3409 = vmatprep.subr.bf16.mxu0 %v3570_v2 }
 0xd5d   : > { %v1907_v16 = vpop.f32.mrf.mxu1 }
 0xd5e   : > { %v1911_v17 = vmul.f32 0.35355338, %v1907_v16  ;;  %v2074_v18 = vpop.f32.mrf.mxu0 }
 0xd5f   : > { %v2078_v19 = vmul.f32 0.35355338, %v2074_v18  ;;  %v3357_v20 = vpop.f32.mrf.mxu1 }
 0xd60   : > { %v3367_v21 = vpop.f32.mrf.mxu0  ;;  %v1912_v22 = vadd.f32 %v1911_v17, %v3811_v50 }
 0xd61   : > { %v2079_v23 = vadd.f32 %v2078_v19, %v3811_v50 }
 0xd62   : > { %v2241_v24 = vpop.f32.mrf.mxu0  ;;  %v1913_v25 = vsel %vm799_vm4, %v1912_v22, -inf }
 0xd63   : > { %v2245_v26 = vmul.f32 0.35355338, %v2241_v24  ;;  %1914 = vmax.xlane.f32.xlu0 %v1913_v25  ;;  %v2080_v27 = vsel %vm799_vm4, %v2079_v23, -inf }
 0xd64   : > { %2081 = vmax.xlane.f32.xlu1 %v2080_v27  ;;  %v3377_v28 = vpop.f32.mrf.mxu0 }
 0xd65   : > { %v2246_v29 = vadd.f32 %v2245_v26, %v3811_v50 }
 0xd66   : > { %v2408_v30 = vpop.f32.mrf.mxu0 }
 0xd67   : > { %v2412_v31 = vmul.f32 0.35355338, %v2408_v30  ;;  %v2247_v32 = vsel %vm799_vm4, %v2246_v29, -inf }
 0xd68   : > { %2248 = vmax.xlane.f32.xlu0 %v2247_v32  ;;  %v3387_v34 = vpop.f32.mrf.mxu0 }
 0xd69   : > { %v2413_v35 = vadd.f32 %v2412_v31, %v3811_v50 }
 0xd6b   : > { %v2414_v36 = vsel %vm799_vm4, %v2413_v35, -inf }
 0xd6c   : > { %2415 = vmax.xlane.f32.xlu0 %v2414_v36 }
 0xd75   : > { %1924 = vrot.lane.b32.xlu1 %v3940_v5, %s4185_s25 }
 0xdec   : > { %v1915_v37 = vpop.xlane.xlu0 %1914 }
 0xded   : > { %v1916_v38 = vsub.f32 %v1912_v22, %v1915_v37  ;;  %v2082_v39 = vpop.xlane.xlu1 %2081 }
 0xdee   : > { %v2083_v33 = vsub.f32 %v2079_v23, %v2082_v39 }
 0xdef   : > { %v1917_v40 = vmul.f32 1.442695, %v1916_v38 }
 0xdf0   : > { %v2084_v41 = vmul.f32 1.442695, %v2083_v33 }
 0xdf1   : > { %3523 = vpow2.f32 %v1917_v40  ;;  %v1925_v43 = vpop.permute.xlu1 %1924  ;;  %v2249_v45 = vpop.xlane.xlu0 %2248 }
 0xdf2   : > { %3525 = vpow2.f32 %v2084_v41  ;;  %v2250_v46 = vsub.f32 %v2246_v29, %v2249_v45  ;;  %3359 = vmatpush3.msra.mxu1 %v1925_v43  ;;  %v3143_v29 = vld [vmem:[%s4143_s7 + $0x1] ss:$0 sm:$0xff]  ;;  %v3489_v43 = vld [vmem:[%s4144_s8 + $0x18] sm:$0xff]  }
 0xdf3   : > { %3368 = vmatprep.subr.mxu1 %v3570_v2  ;;  %v3491_v45 = vld [vmem:[%s4146_s10 + $0x38] sm:$0xff]  }
 0xdf4   : > { %v2251_v50 = vmul.f32 1.442695, %v2250_v46  ;;  %v3492_v46 = vld [vmem:[%s4146_s10 + $0x30] sm:$0xff]  }
 0xdf5   : > { %v2416_v48 = vpop.xlane.xlu0 %2415 }
 0xdf6   : > { %3527 = vpow2.f32 %v2251_v50  ;;  %v2417_v49 = vsub.f32 %v2413_v35, %v2416_v48 }
 0xdf8   : > { %v2418_v51 = vmul.f32 1.442695, %v2417_v49 }
 0xdfa   : > { %3529 = vpow2.f32 %v2418_v51 }
 0xdfe   : > { %v3524_v52 = vpop.eup %3523 }
 0xdff   : > { %v3526_v53 = vpop.eup %3525  ;;  %v1919_v54 = vsel %vm799_vm4, %v3524_v52, 0.0 }
 0xe00   : > { %1920 = vadd.xlane.f32.xlu1 %v1919_v54  ;;  %v2086_v55 = vsel %vm799_vm4, %v3526_v53, 0.0  ;;  %v3150_v54 = vld [vmem:[%s4148_s12 + $0x7] ss:$0 sm:$0xff] }
 0xe01   : > { %2087 = vadd.xlane.f32.xlu0 %v2086_v55 }
 0xe03   : > { %v3528_v56 = vpop.eup %3527 }
 0xe04   : > { %v2253_v57 = vsel %vm799_vm4, %v3528_v56, 0.0 }
 0xe05   : > { %2254 = vadd.xlane.f32.xlu1 %v2253_v57 }
 0xe07   : > { %v3530_v58 = vpop.eup %3529 }
 0xe08   : > { %v2420_v59 = vsel %vm799_vm4, %v3530_v58, 0.0 }
 0xe09   : > { %2421 = vadd.xlane.f32.xlu0 %v2420_v59  ;;  %v3494_v59 = vld [vmem:[%s4146_s10 + $0x20] sm:$0xff]  }
 0xe16   : > { %2258 = vrot.lane.b32.xlu1 %v3940_v5, %s4186_s3  ;;  %s4192_s3 = sld [smem:[#allocation11_spill]] }
 0xe1a   : > { %2425 = vrot.lane.b32.xlu1 %v3940_v5, %s4187_s14  ;;  %s4193_s14 = sshll.u32 %s3725_s30, 3 }
 0xe1b   : > { %s612_s0 = scalar_lea.vmem %s4154_s19, %s4193_s14 }
 0xe1f   : > { %2091 = vrot.lane.b32.xlu0 %v3940_v5, %s4188_s4 }
 0xe89   : > { %v1921_v60 = vpop.xlane.xlu1 %1920 }
 0xe8a   : > { %3531 = vrcp.f32 %v1921_v60  ;;  %v2088_v61 = vpop.xlane.xlu0 %2087  ;;  %v3165_v60 = vld [vmem:[%s4145_s9 + $0x1] ss:$0 sm:$0xff] }
 0xe8b   : > { %3533 = vrcp.f32 %v2088_v61 }
 0xe8e   : > { %v2255_v62 = vpop.xlane.xlu1 %2254 }
 0xe8f   : > { %3535 = vrcp.f32 %v2255_v62 }
 0xe92   : > { %v2422_v63 = vpop.xlane.xlu0 %2421  ;;  %v2259_v6 = vpop.permute.xlu1 %2258 }
 0xe93   : > { %3537 = vrcp.f32 %v2422_v63 }
 0xe96   : > { %v2092_v4 = vpop.permute.xlu0 %2091  ;;  %v2426_v11 = vpop.permute.xlu1 %2425 }
 0xe97   : > { %v3532_v0 = vpop.eup %3531 }
 0xe98   : > { %v1923_v1 = vmul.f32 %v3532_v0, %v3524_v52  ;;  %v3534_v3 = vpop.eup %3533  ;;  %v3149_v52 = vld [vmem:[%s4148_s12 + $0x6] ss:$0 sm:$0xff] }
 0xe99   : > { %v2090_v5 = vmul.f32 %v3534_v3, %v3526_v53 }
 0xe9a   : > { %3361 = vmatmul.mubr.msk.f32.vlgmr.msra.gmra.mxu1 %vm799_vm4, %v1923_v1 }
 0xe9b   : > { %3369 = vmatpush3.msra.mxu1 %v2092_v4  ;;  %3370 = vmatprep.mubr.msk.f32.mxu1 %vm3571_vm1, %v3570_v2 }
 0xe9c   : > { %3378 = vmatprep.subr.mxu1 %v3570_v2  ;;  %v3536_v7 = vpop.eup %3535 }
 0xe9d   : > { %v2257_v8 = vmul.f32 %v3536_v7, %v3528_v56 }
 0xe9e   : > { %3371 = vmatmul.mubr.msk.f32.vlgmr.msra.gmra.mxu1 %vm799_vm4, %v2090_v5 }
 0xe9f   : > { %3379 = vmatpush3.msra.mxu1 %v2259_v6  ;;  %3380 = vmatprep.mubr.msk.f32.mxu1 %vm3571_vm1, %v3570_v2  ;;  %v3169_v6 = vld [vmem:[%s4147_s11 + $0x1] ss:$0 sm:$0xff] }
 0xea0   : > { %3388 = vmatprep.subr.mxu1 %v3570_v2  ;;  %v3538_v10 = vpop.eup %3537 }
 0xea1   : > { %v2424_v12 = vmul.f32 %v3538_v10, %v3530_v58  ;;  %v3493_v58 = vld [vmem:[%s4146_s10 + $0x28] sm:$0xff]  }
 0xea2   : > { %3381 = vmatmul.mubr.msk.f32.vlgmr.msra.gmra.mxu1 %vm799_vm4, %v2257_v8 }
 0xea3   : > { %3389 = vmatpush3.msra.mxu1 %v2426_v11  ;;  %3390 = vmatprep.mubr.msk.f32.mxu1 %vm3571_vm1, %v3570_v2 }
 0xea4   : > { %3401 = vmatprep.subr.bf16.mxu1 %v3570_v2 }
 0xea6   : > { %3391 = vmatmul.mubr.msk.f32.vlgmr.msra.gmra.mxu1 %vm799_vm4, %v2424_v12 }
 0xea7   : > { %3405 = vmatprep.mubr.msk.bf16.mxu1 %vm3571_vm1, %v3570_v2  ;;  %3402 = vmatpush3.bf16.msra.mxu1 %v3489_v43  ;;  %v3588_v43 = vmov 0  }
 0xea8   : > { %3403 = vmatprep.subr.bf16.mxu1 %v3570_v2  ;;  %3471 = vset.pattern.permute.xlu1 %v3588_v43 }
 0xea9   : > { %3472 = vset.pattern.permute.xlu0 %v3588_v43 }
 0xf5a   : > { %v1996_v15 = vpop.f32.mrf.mxu1 }
 0xf5c   : > { %v3362_v9 = vpop.f32.mrf.mxu1 }
 0xf5e   : > { %v2163_v16 = vpop.f32.mrf.mxu1 }
 0xf5f   : > { %2502 = vrot.lane.b32.xlu0 %v2163_v16, %s4189_s23 }
 0xf60   : > { %v3372_v17 = vpop.f32.mrf.mxu1 }
 0xf62   : > { %v2330_v18 = vpop.f32.mrf.mxu1 }
 0xf63   : > { %2506 = vrot.lane.b32.xlu1 %v2330_v18, %s4190_s21  ;;  %v3495_v18 = vld [vmem:[%s4151_s15 + $0x28] sm:$0xff]  }
 0xf64   : > { %v3382_v19 = vpop.f32.mrf.mxu1 }
 0xf65   : > { %v3496_v19 = vld [vmem:[%s4151_s15 + $0x20] sm:$0xff]  }
 0xf66   : > { %v2497_v20 = vpop.f32.mrf.mxu1 }
 0xf67   : > { %2510 = vrot.lane.b32.xlu0 %v2497_v20, %s4191_s1  ;;  %v3497_v20 = vld [vmem:[%s4151_s15 + $0x18] sm:$0xff]  }
 0xf68   : > { %v3392_v21 = vpop.f32.mrf.mxu1 }
 0xf69   : > { %v3498_v21 = vld [vmem:[%s4151_s15 + $0x10] sm:$0xff]  }
 0xfd1   : > { %v2503_v22 = vpop.permute.xlu0 %2502 }
 0xfd2   : > { %v2513_v24 = vsel %vm799_vm4, %v1996_v15, %v2503_v22  ;;  %v3499_v22 = vld [vmem:[%s4151_s15 + $0x8] sm:$0xff]  }
 0xfd5   : > { %v2507_v23 = vpop.permute.xlu1 %2506 }
 0xfd6   : > { %v2514_v25 = vsel %vm1477_vm6, %v2513_v24, %v2507_v23 }
 0xfd9   : > { %v2511_v26 = vpop.permute.xlu0 %2510 }
 0xfda   : > { %v2515_v27 = vsel %vm639_vm2, %v2514_v25, %v2511_v26  ;;  %v3500_v26 = vld [vmem:[%s4151_s15] sm:$0xff]  }
 0xfdb   : > { %v2516_v28 = vpack.c.bf16 %v2515_v27, %v2515_v27 }
 0xfdd   : > { %3398 = vmatmul.mubr.msk.bf16.vlgmr.msra.gmra.mxu0 %vm690_vm3, %v2516_v28  ;;  %v3175_v28 = vld [vmem:[%s4149_s13] ss:$0 sm:$0xff] }
 0xfde   : > { %3417 = vmatprep.mubr.msk.bf16.mxu0 %vm3571_vm1, %v3570_v2  ;;  %3410 = vmatpush3.bf16.msra.mxu0 %v3491_v45 }
 0xfdf   : > { %3411 = vmatprep.subr.bf16.mxu0 %v3570_v2 }
 0xfe2   : > { %3412 = vmatpush3.bf16.msra.mxu0 %v3492_v46 }
 0xfe3   : > { %3413 = vmatprep.subr.bf16.mxu0 %v3570_v2 }
 0xfe6   : > { %3414 = vmatpush3.bf16.msra.mxu0 %v3493_v58 }
 0xfe7   : > { %3415 = vmatprep.subr.bf16.mxu0 %v3570_v2 }
 0xfea   : > { %3416 = vmatpush3.bf16.msra.mxu0 %v3494_v59 }
 0xfeb   : > { %3437 = vmatprep.subr.bf16.mxu0 %v3570_v2 }
0x109d   : > { %v2572_v30 = vpop.f32.mrf.mxu0 }
0x109e   : > { %v2573_v31 = vadd.f32 %v3143_v29, %v2572_v30  ;;  %v3176_v30 = vld [vmem:[%s4192_s3] ss:$0 sm:$0xff] }
0x109f   : > { %v3399_v32 = vpop.f32.mrf.mxu0 }
0x10a0   : > { %v2578_v34 = vadd.f32 %v2573_v31, %v3914_v42  ;;  %v3490_v42 = vld [vmem:[%s4144_s8 + $0x10] sm:$0xff]  }
0x10a1   : > { %v2575_v35 = vpop.f32.mrf.mxu0  ;;  %3404 = vmatpush3.bf16.msra.mxu1 %v3490_v42  ;;  %v3177_v42 = vld [vmem:[%s4152_s16] ss:$0 sm:$0xff] }
0x10a2   : > { %v2583_v36 = vsel %vm690_vm3, %v2578_v34, 0.0  ;;  %3421 = vmatprep.subr.bf16.mxu1 %v3570_v2 }
0x10a3   : > { %2584 = vadd.xlane.f32.xlu1 %v2583_v36  ;;  %v3400_v37 = vpop.f32.mrf.mxu0 }
0x112c   : > { %v2585_v38 = vpop.xlane.xlu1 %2584 }
0x112d   : > { %v2586_v39 = vmul.f32 0.03125, %v2585_v38 }
0x112f   : > { %v2587_v33 = vsub.f32 %v2578_v34, %v2586_v39 }
0x1131   : > { %v2588_v40 = vmul.f32 %v2587_v33, %v2587_v33 }
0x1133   : > { %v2589_v41 = vsel %vm690_vm3, %v2588_v40, 0.0 }
0x1134   : > { %2590 = vadd.xlane.f32.xlu0 %v2589_v41  ;;  %v2922_v41 = vld [vmem:[#allocation4] sm:$0x1] }
0x11bd   : > { %v2591_v50 = vpop.xlane.xlu0 %2590 }
0x11be   : > { %v2592_v48 = vmul.f32 0.03125, %v2591_v50 }
0x11c0   : > { %v2593_v49 = vadd.f32 1e-05, %v2592_v48 }
0x11c2   : > { %3539 = vrsqrt.f32 %v2593_v49 }
0x11cf   : > { %v3540_v51 = vpop.eup %3539 }
0x11d0   : > { %v2595_v53 = vmul.f32 %v3540_v51, %v2587_v33 }
0x11d2   : > { %v2602_v55 = vmul.f32 %v3149_v52, %v2595_v53 }
0x11d4   : > { %v2609_v56 = vadd.f32 %v3150_v54, %v2602_v55  ;;  %v2920_v55 = vld [vmem:[%s4153_s17] sm:$0x1] }
0x11d6   : > { %v2628_v57 = vpack.c.bf16 %v2609_v56, %v2609_v56 }
0x11d8   : > { %3406 = vmatmul.mubr.msk.bf16.vlgmr.msra.gmra.mxu1 %vm690_vm3, %v2628_v57 }
0x11d9   : > { %3433 = vmatprep.mubr.msk.bf16.mxu1 %vm3571_vm1, %v3570_v2  ;;  %3422 = vmatpush3.bf16.msra.mxu1 %v3495_v18 }
0x11da   : > { %3423 = vmatprep.subr.bf16.mxu1 %v3570_v2 }
0x11dd   : > { %3424 = vmatpush3.bf16.msra.mxu1 %v3496_v19 }
0x11de   : > { %3425 = vmatprep.subr.bf16.mxu1 %v3570_v2 }
0x11e1   : > { %3426 = vmatpush3.bf16.msra.mxu1 %v3497_v20 }
0x11e2   : > { %3427 = vmatprep.subr.bf16.mxu1 %v3570_v2 }
0x11e5   : > { %3428 = vmatpush3.bf16.msra.mxu1 %v3498_v21 }
0x11e6   : > { %3429 = vmatprep.subr.bf16.mxu1 %v3570_v2 }
0x11e9   : > { %3430 = vmatpush3.bf16.msra.mxu1 %v3499_v22 }
0x11ea   : > { %3431 = vmatprep.subr.bf16.mxu1 %v3570_v2 }
0x11ed   : > { %3432 = vmatpush3.bf16.msra.mxu1 %v3500_v26 }
0x1298   : > { %v2684_v61 = vpop.f32.mrf.mxu1 }
0x1299   : > { %v2685_v62 = vadd.f32 %v3165_v60, %v2684_v61 }
0x129a   : > { %v3407_v63 = vpop.f32.mrf.mxu1 }
0x129b   : > { %v2690_v0 = vmax.f32 %v2685_v62, 0.0 }
0x129c   : > { %v2687_v1 = vpop.f32.mrf.mxu1 }
0x129d   : > { %v2691_v3 = vpack.c.bf16 %v2690_v0, %v2690_v0 }
0x129e   : > { %v3408_v4 = vpop.f32.mrf.mxu1 }
0x129f   : > { %3418 = vmatmul.mubr.msk.bf16.vlgmr.msra.gmra.mxu0 %vm1682_vm7, %v2691_v3 }
0x12a0   : > { %3439 = vmatprep.mubr.msk.bf16.mxu0 %vm3571_vm1, %v3570_v2  ;;  %v2797_v2 = vshrl.u32 %v791_v44, 7 }
0x12a2   : > { %vm2803_vm8 = vcmp.eq.s32.totalorder %v2797_v2, 7  ;;  %vm2798_vm9 = vcmp.eq.s32.totalorder %v2797_v2, 0  ;;  %v2930_v56 = vsub.s32 0, %v2797_v2 }
0x135f   : > { %v2759_v5 = vpop.f32.mrf.mxu0 }
0x1360   : > { %v2760_v7 = vadd.f32 %v3169_v6, %v2759_v5 }
0x1361   : > { %v3419_v8 = vpop.f32.mrf.mxu0 }
0x1362   : > { %v2765_v10 = vadd.f32 %v2760_v7, %v2578_v34 }
0x1363   : > { %v2762_v11 = vpop.f32.mrf.mxu0 }
0x1364   : > { %v2768_v12 = vsel %vm690_vm3, %v2765_v10, 0.0 }
0x1365   : > { %2769 = vadd.xlane.f32.xlu0 %v2768_v12  ;;  %v3420_v13 = vpop.f32.mrf.mxu0 }
0x13ee   : > { %v2770_v14 = vpop.xlane.xlu0 %2769 }
0x13ef   : > { %v2771_v15 = vmul.f32 0.03125, %v2770_v14 }
0x13f1   : > { %v2772_v9 = vsub.f32 %v2765_v10, %v2771_v15 }
0x13f3   : > { %v2773_v16 = vmul.f32 %v2772_v9, %v2772_v9 }
0x13f5   : > { %v2774_v17 = vsel %vm690_vm3, %v2773_v16, 0.0 }
0x13f6   : > { %2775 = vadd.xlane.f32.xlu1 %v2774_v17 }
0x147f   : > { %v2776_v23 = vpop.xlane.xlu1 %2775 }
0x1480   : > { %v2777_v24 = vmul.f32 0.03125, %v2776_v23 }
0x1482   : > { %v2778_v25 = vadd.f32 1e-05, %v2777_v24 }
0x1484   : > { %3541 = vrsqrt.f32 %v2778_v25 }
0x1491   : > { %v3542_v27 = vpop.eup %3541 }
0x1492   : > { %v2780_v29 = vmul.f32 %v3542_v27, %v2772_v9 }
0x1494   : > { %v2787_v31 = vmul.f32 %v3175_v28, %v2780_v29 }
0x1496   : > { %v2794_v32 = vadd.f32 %v3176_v30, %v2787_v31 }
0x1498   : > { %2809 = vrot.lane.b32.xlu0 %v2794_v32, %s3587_s22  ;;  %2795 = vst.msk [vmem:[%s612_s0] sm:$0xff] %vm690_vm3, %v2794_v32  ;;  %v2804_v34 = vrot.slane %v2794_v32, 1  ;;  %v2799_v36 = vrot.slane %v2794_v32, 7 }
0x149a   : > { %v2807_v35 = vsel %vm2803_vm8, 0.0, %v2804_v34  ;;  %v2802_v44 = vsel %vm2798_vm9, 0.0, %v2799_v36 }
0x149b   : > { %2813 = vrot.lane.b32.xlu1 %v2807_v35, %s4185_s25 }
0x149f   : > { %2925 = vperm.xlu1 %3471, %v2922_v41  }
0x150a   : > { %v2810_v37 = vpop.permute.xlu0 %2809 }
0x150b   : > { %v2816_v38 = vsel %vm690_vm3, %v2802_v44, %v2810_v37 }
0x150d   : > { %v2814_v39 = vpop.permute.xlu1 %2813 }
0x150e   : > { %v2817_v33 = vsel %vm1682_vm7, %v2816_v38, %v2814_v39 }
0x150f   : > { %v2818_v40 = vpack.c.bf16 %v2817_v33, %v2817_v33 }
0x1511   : > { %3434 = vmatmul.mubr.msk.bf16.vlgmr.msra.gmra.mxu1 %vm2874_vm10, %v2818_v40 }
0x151a   : > { %v2926_v57 = vpop.permute.xlu1 %2925 }
0x151b   : > { %v2931_v58 = vrot.slane %v2926_v57, %v2930_v56 }
0x15d1   : > { %v2912_v45 = vpop.f32.mrf.mxu1 }
0x15d2   : > { %v2913_v46 = vadd.f32 %v3177_v42, %v2912_v45 }
0x15d3   : > { %v3435_v50 = vpop.f32.mrf.mxu1 }
0x15d4   : > { %v2918_v48 = vadd.f32 %v2913_v46, %v2794_v32 }
0x15d5   : > { %v2915_v49 = vpop.f32.mrf.mxu1 }
0x15d6   : > { %v2919_v51 = vmax.f32 %v2918_v48, 0.0 }
0x15d7   : > { %v3436_v52 = vpop.f32.mrf.mxu1 }
0x15d8   : > { %v2921_v53 = vpack.c.bf16 %v2919_v51, %v2919_v51 }
0x15da   : > { %v2936_v54 = vsel %vm690_vm3, %v2921_v53, 0 }
0x15db   : > { %3438 = vmatpush3.bf16.xpose.msra.mxu0 %v2936_v54 }
0x15e2   : > { %3440 = vmatmul.mubr.msk.bf16.vlgmr.msra.gmra.mxu0 %vm690_vm3, %v2920_v55 }
0x16a2   : > { %v2972_v59 = vpop.f32.mrf.mxu0 }
0x16a3   : > { %v2973_v60 = vadd.f32 %v2972_v59, %v2931_v58 }
0x16a4   : > { %v3441_v61 = vpop.f32.mrf.mxu0 }
0x16a5   : > { %v3186_v62 = vmul.f32 -1.442695, %v2973_v60 }
0x16a6   : > { %v2975_v63 = vpop.f32.mrf.mxu0 }
0x16a7   : > { %3543 = vpow2.f32 %v3186_v62 }
0x16a8   : > { %v3442_v0 = vpop.f32.mrf.mxu0 }
0x16b4   : > { %v3544_v1 = vpop.eup %3543 }
0x16b5   : > { %v2981_v3 = vadd.f32 1.0, %v3544_v1 }
0x16b7   : > { %3545 = vrcp.f32 %v2981_v3 }
0x16c4   : > { %v3546_v4 = vpop.eup %3545 }
0x16c5   : > { %v2984_v6 = vsel %vm3805_vm5, %v3546_v4, 0.0 }
0x16c6   : > { %2986 = vst.msk [vmem:[%s615_s2] sm:$0x1] %vm2985_vm11, %v2984_v6 }
0x16c7 PF: > { %s39_s26 = sadd.s32 1, %s3567_s26  }
0x16c8   : > { %p36_p9 = scmp.ge.s32.totalorder %s39_s26, 4  }
0x16ca   :  { %38 = sbr.rel (!%p36_p9) target bundleno = 28 (0x1c), region = 149 }

// kernel: paraformer_forward.4
= control target key start
LH: loop header
LB: loop body
LE: loop exit
PB: predicated region body
PF: predicated region fallthrough
CT: control target
= control target key end

     0   :  { %s6374_s0 = inlined_call_operand.vmem [shape: s32[2], index: 0, kind: input, shape index: {}]   ;;  %s6375_s2 = inlined_call_operand.vmem [shape: f32[2,5,32], index: 2, kind: input, shape index: {}]   ;;  %s6376_s3 = inlined_call_operand.vmem [shape: f32[2,8,32], index: 3, kind: input, shape index: {}]   ;;  %s6377_s4 = inlined_call_operand.vmem [shape: bf16[2,32,96], index: 4, kind: input, shape index: {}]   ;;  %s6378_s5 = inlined_call_operand.vmem [shape: f32[2,1,96], index: 5, kind: input, shape index: {}]   ;;  %s6379_s6 = inlined_call_operand.vmem [shape: bf16[2,32,32], index: 6, kind: input, shape index: {}]   ;;  %s6380_s7 = inlined_call_operand.vmem [shape: f32[2,1,32], index: 7, kind: input, shape index: {}]   ;;  %s6381_s8 = inlined_call_operand.vmem [shape: bf16[2,32,32], index: 8, kind: input, shape index: {}]   ;;  %s6382_s9 = inlined_call_operand.vmem [shape: f32[2,1,32], index: 9, kind: input, shape index: {}]   ;;  %s6383_s10 = inlined_call_operand.vmem [shape: bf16[2,32,64], index: 10, kind: input, shape index: {}]   ;;  %s6384_s11 = inlined_call_operand.vmem [shape: f32[2,1,64], index: 11, kind: input, shape index: {}]   ;;  %s6385_s12 = inlined_call_operand.vmem [shape: bf16[2,32,32], index: 12, kind: input, shape index: {}]   ;;  %s6386_s13 = inlined_call_operand.vmem [shape: f32[2,1,32], index: 13, kind: input, shape index: {}]   ;;  %s6387_s14 = inlined_call_operand.vmem [shape: bf16[2,32,64], index: 14, kind: input, shape index: {}]   ;;  %s6388_s15 = inlined_call_operand.vmem [shape: f32[2,1,64], index: 15, kind: input, shape index: {}]   ;;  %s6389_s16 = inlined_call_operand.vmem [shape: bf16[2,64,32], index: 16, kind: input, shape index: {}]   ;;  %s6390_s17 = inlined_call_operand.vmem [shape: f32[2,1,32], index: 17, kind: input, shape index: {}]   ;;  %s6391_s18 = inlined_call_operand.vmem [shape: f32[2,6,1,32], index: 18, kind: input, shape index: {}]   ;;  %s6392_s19 = inlined_call_operand.vmem [shape: f32[1,32], index: 19, kind: input, shape index: {}]   ;;  %s6393_s20 = inlined_call_operand.vmem [shape: f32[1,32], index: 20, kind: input, shape index: {}]   ;;  %s6394_s21 = inlined_call_operand.vmem [shape: bf16[32,64], index: 21, kind: input, shape index: {}]   ;;  %s6395_s22 = inlined_call_operand.vmem [shape: f32[1,64], index: 22, kind: input, shape index: {}]   ;;  %s6396_s23 = inlined_call_operand.vmem [shape: s32[2,5,1], index: 23, kind: output, shape index: {}]   ;;  %s6397_s1 = inlined_call_operand.vmem [shape: s32[2], index: 1, kind: input, shape index: {}]  }
   0x1   :  { %6433 = sst [smem:[#allocation8_spill]] %s6374_s0 }
   0x2   :  { %6434 = sst [smem:[#allocation9_spill]] %s6375_s2  ;;  %s32_s2 = sshll.u32 %s6397_s1, 4  ;;  %s33_s2 = int_to_ptr.vmem [resolvable:$true] %s32_s2 }
   0x3   :  { %6435 = sst [smem:[#allocation10_spill]] %s6376_s3 }
   0x4   :  { %6436 = sst [smem:[#allocation11_spill]] %s6377_s4 }
   0x5   :  { %6437 = sst [smem:[#allocation12_spill]] %s6378_s5 }
   0x6   :  { %6438 = sst [smem:[#allocation13_spill]] %s6379_s6 }
   0x7   :  { %6439 = sst [smem:[#allocation14_spill]] %s6380_s7 }
   0x8   :  { %6440 = sst [smem:[#allocation15_spill]] %s6381_s8 }
   0x9   :  { %6441 = sst [smem:[#allocation16_spill]] %s6390_s17 }
   0xa   :  { %6442 = sst [smem:[#allocation17_spill]] %s6392_s19 }
   0xb   :  { %6443 = sst [smem:[#allocation18_spill]] %s6393_s20 }
   0xc   :  { %6444 = sst [smem:[#allocation19_spill]] %s6395_s22 }
   0xd   :  { %6445 = sst [smem:[#allocation20_spill]] %s6396_s23 }
   0xe   :  { %s6446_s24 = sld [smem:[#allocation8_spill]] }
  0x14   :  { %s28_s17 = sshll.u32 %s6446_s24, 4  ;;  %s29_s17 = int_to_ptr.vmem [resolvable:$true] %s28_s17 }
  0x15   :  { %s5530_s26 = scalar_lea.vmem %s29_s17, 16  ;;  %p5535_p1 = scmp.lt.s32.totalorder %s29_s17, %s29_s17 }
  0x16   :  { %p5531_p0 = scmp.ne.s32.totalorder %s29_s17, %s5530_s26  ;;  %p5536_p2 = scmp.lt.s32.totalorder %s5530_s26, %s5530_s26 }
  0x18   :  { %p5537_p3 = por %p5536_p2, %p5535_p1 }
  0x1a   :  { %p5538_p4 = pnand %p5537_p3, %p5531_p0 }
  0x1c   :  { %5541 = shalt.err (!%p5538_p4)  }
  0x1d   :  { %s5564_s3 = smov [#allocation3]   ;;  %s5542_s7 = scalar_lea.vmem %s33_s2, 16 }
  0x1e   :  { %31 = dma.vmem_to_smem %s29_s17, 16, %s5564_s3, [#allocation2] }
  0x1f   :  { %p5543_p5 = scmp.ne.s32.totalorder %s33_s2, %s5542_s7  ;;  %p5547_p6 = scmp.lt.s32.totalorder %s33_s2, %s33_s2 }
  0x20   :  { %p5548_p7 = scmp.lt.s32.totalorder %s5542_s7, %s5542_s7 }
  0x22   :  { %p5549_p8 = por %p5548_p7, %p5547_p6 }
  0x24   :  { %p5550_p9 = pnand %p5549_p8, %p5543_p5 }
  0x26   :  { %5553 = shalt.err (!%p5550_p9)  }
  0x27   :  { %s5565_s27 = smov [#allocation4]  }
  0x28   :  { %35 = dma.vmem_to_smem %s33_s2, 16, %s5565_s27, [#allocation2] }
  0x29   :  { %5558 = dma.done.wait [#allocation2], 32 }
  0x2a   :  { %5559 = vsyncadd [#allocation2], 4294967264 }
  0x2b   :  { %37 = sfence }
  0x2c   :  { %s5709_s1 = smov 0  }
  0x2d LB: > { %6447 = sst [smem:[#allocation6_spill]] %s5562_s1  ;;  %s5715_s17 = sadd.s32 4294967295, %s5562_s1   ;;  %s5562_s1 = sphi %s5709_s1, %s43_s1  }
  0x2e   : > { %p4800_p10 = scmp.ge.s32.totalorder %s5562_s1, 1  ;;  %p607_p11 = scmp.lt.s32.totalorder %s5562_s1, 3 }
  0x30   : > { %p608_p12 = pnand %p4800_p10, %p607_p11 }
  0x32   : > { %611 = sbr.rel (%p608_p12) target bundleno = 9610 (0x258a), region = 104 }
  0x37   : > { %p669_p13 = scmp.lt.s32.totalorder %s5715_s17, 1  ;;  %vm689_vm0 = vcmask 258048   ;;  %s6449_s0 = sld [smem:[#allocation9_spill]]  ;;  %v5566_v8 = vmov 0.0   ;;  %vm5567_vm1 = vmmov 0   ;;  %vm747_vm2 = vcmask 261120  }
  0x38   : > { %s6450_s25 = sld [smem:[#allocation11_spill]]  ;;  %5103 = vmatprep.subr.bf16.mxu0 %v5566_v8  ;;  %5107 = vmatprep.mubr.msk.bf16.mxu0 %vm5567_vm1, %v5566_v8  ;;  %v4805_v14 = vld [vmem:[%s6391_s18] ss:$0 sm:$0xff]  ;;  %v4806_v16 = vld [vmem:[%s6391_s18 + $0x1] ss:$0 sm:$0xff]  ;;  %s6420_s30 = smov 88   ;;  %v791_v28 = vlaneseq }
  0x39   : > { %s670_s8 = scalar_select %p669_p13, %s5715_s17, 1  ;;  %5111 = vmatprep.subr.mxu1 %v5566_v8  ;;  %5113 = vmatprep.mubr.msk.f32.mxu1 %vm5567_vm1, %v5566_v8  ;;  %vm799_vm3 = vcmask 64512   ;;  %vm894_vm4 = vcmask 1044480   ;;  %v5571_v32 = vmov -1e+09   ;;  %vm876_vm6 = vcmask 36864  }
  0x3a   : > { %s6451_s4 = sld [smem:[#allocation12_spill]]  ;;  %v5776_v29 = vand.u32 127, %v791_v28  ;;  %s6418_s6 = smov 80   ;;  %vm890_vm7 = vcmask 39936   ;;  %vm1484_vm8 = vcmask 130048   ;;  %vm1486_vm9 = vcmask 195584  }
  0x3b   : > { %s5721_s28 = sshll.u32 %s670_s8, 3  ;;  %s682_s24 = sld [smem:[#allocation3 + %s5715_s17]]  ;;  %vm1802_vm11 = vcmask 61440   ;;  %vm2608_vm12 = vcmask 523264   ;;  %vm4708_vm13 = vcmask 520192  }
  0x3c   : > { %6448 = sst [smem:[#allocation7_spill]] %s5721_s28  ;;  %s6426_s2 = smov 120  }
  0x3d   : > { %s672_s5 = scalar_lea.vmem %s6449_s0, %s5721_s28  ;;  %s6405_s0 = smov 64  }
  0x3e   : > { %v5727_v0 = vld [vmem:[%s672_s5] sm:$0x1f]  ;;  %v5418_v7 = vld [vmem:[%s6450_s25 + $0x8] sm:$0xff]   ;;  %s6410_s5 = smov 96   ;;  %s6424_s26 = smov 112  }
  0x3f   : > { %v690_v1 = vsel %vm689_vm0, %v5727_v0, 0.0  ;;  %5104 = vmatpush3.bf16.msra.mxu0 %v5418_v7  ;;  %v5419_v9 = vld [vmem:[%s6450_s25] sm:$0xff]   ;;  %s6408_s3 = smov 72   ;;  %s6422_s7 = smov 104  }
  0x40   : > { %691 = vadd.xlane.f32.xlu0 %v690_v1  ;;  %5105 = vmatprep.subr.bf16.mxu0 %v5566_v8  ;;  %v4807_v20 = vld [vmem:[%s6451_s4] ss:$0 sm:$0xff]  ;;  %s6406_s27 = smov 48   ;;  %s6404_s8 = smov 40  }
  0x41   : > { %v793_v30 = vstv %s682_s24  ;;  %s6407_s29 = smov 56   ;;  %s6453_s24 = sld [smem:[#allocation14_spill]] }
  0x42   : > { %vm794_vm5 = vcmp.lt.s32.totalorder %v5776_v29, %v793_v30  ;;  %s6464_s19 = sld [smem:[#allocation16_spill]]  ;;  %s6465_s23 = smov 120  }
  0x43   : > { %5106 = vmatpush3.bf16.msra.mxu0 %v5419_v9  ;;  %v5780_v33 = vsel %vm794_vm5, 0.0, %v5571_v32  ;;  %s6467_s22 = smov 56   ;;  %s6469_s20 = smov 64  }
  0x44   : > { %5126 = vmatprep.subr.mxu0 %v5566_v8  ;;  %s6470_s1 = smov 40  }
  0xc9   : > { %v692_v2 = vpop.xlane.xlu0 %691 }
  0xca   : > { %v694_v3 = vmul.f32 0.03125, %v692_v2 }
  0xcc   : > { %v695_v4 = vsub.f32 %v5727_v0, %v694_v3 }
  0xce   : > { %v696_v5 = vmul.f32 %v695_v4, %v695_v4 }
  0xd0   : > { %v697_v6 = vsel %vm689_vm0, %v696_v5, 0.0 }
  0xd1   : > { %698 = vadd.xlane.f32.xlu0 %v697_v6 }
 0x15a   : > { %v699_v10 = vpop.xlane.xlu0 %698 }
 0x15b   : > { %v700_v11 = vmul.f32 0.03125, %v699_v10 }
 0x15d   : > { %v701_v12 = vadd.f32 1e-05, %v700_v11 }
 0x15f   : > { %5452 = vrsqrt.f32 %v701_v12 }
 0x16c   : > { %v5453_v13 = vpop.eup %5452 }
 0x16d   : > { %v703_v15 = vmul.f32 %v5453_v13, %v695_v4 }
 0x16f   : > { %v710_v17 = vmul.f32 %v4805_v14, %v703_v15 }
 0x171   : > { %v717_v18 = vadd.f32 %v4806_v16, %v710_v17 }
 0x173   : > { %v728_v19 = vpack.c.bf16 %v717_v18, %v717_v18 }
 0x175   : > { %5108 = vmatmul.mubr.msk.bf16.vlgmr.msra.gmra.mxu0 %vm747_vm2, %v728_v19 }
 0x176   : > { %5128 = vmatprep.mubr.msk.f32.mxu0 %vm5567_vm1, %v5566_v8 }
 0x235   : > { %v785_v21 = vpop.f32.mrf.mxu0 }
 0x236   : > { %v5759_v22 = vadd.f32 %v4807_v20, %v785_v21 }
 0x237   : > { %v5109_v23 = vpop.f32.mrf.mxu0 }
 0x238   : > { %888 = vrot.lane.b32.xlu0 %v5759_v22, %s6405_s0  ;;  %797 = vrot.lane.b32.xlu1 %v5759_v22, %s6410_s5  ;;  %s6452_s0 = sld [smem:[#allocation13_spill]]  ;;  %s6414_s5 = smov 16  }
 0x239   : > { %v788_v24 = vpop.f32.mrf.mxu0 }
 0x23b   : > { %v5110_v25 = vpop.f32.mrf.mxu0 }
 0x23c   : > { %969 = vrot.lane.b32.xlu0 %v5759_v22, %s6420_s30  ;;  %s6463_s30 = smov 24  }
 0x2aa   : > { %v798_v26 = vpop.permute.xlu1 %797  ;;  %v889_v27 = vpop.permute.xlu0 %888 }
 0x2ab   : > { %5112 = vmatpush3.xpose.msk.msra.mxu1 %vm799_vm3, %v798_v26 }
 0x2ac   : > { %5116 = vmatprep.subr.mxu1 %v5566_v8 }
 0x2ae   : > { %5114 = vmatmul.mubr.msk.f32.vlgmr.msra.gmra.mxu1 %vm799_vm3, %v5759_v22  ;;  %v970_v43 = vpop.permute.xlu0 %969 }
 0x2af   : > { %5117 = vmatpush3.msk.msra.mxu1 %vm894_vm4, %v889_v27  ;;  %5118 = vmatprep.mubr.msk.f32.mxu1 %vm5567_vm1, %v5566_v8 }
 0x2b0   : > { %5121 = vmatprep.subr.mxu1 %v5566_v8 }
 0x36e   : > { %v870_v31 = vpop.f32.mrf.mxu1 }
 0x36f   : > { %v874_v34 = vmul.f32 0.35355338, %v870_v31 }
 0x370   : > { %v5115_v35 = vpop.f32.mrf.mxu1 }
 0x371   : > { %v875_v36 = vadd.f32 %v874_v34, %v5780_v33 }
 0x373   : > { %v877_v37 = vsel %vm876_vm6, %v875_v36, -inf }
 0x374   : > { %878 = vmax.xlane.f32.xlu1 %v877_v37  ;;  %v5420_v37 = vld [vmem:[%s6452_s0 + $0x8] sm:$0xff]  }
 0x385   : > { %1137 = vrot.lane.b32.xlu1 %v5759_v22, %s6418_s6  ;;  %s6458_s6 = smov 80  }
 0x3fd   : > { %v879_v38 = vpop.xlane.xlu1 %878 }
 0x3fe   : > { %v880_v39 = vsub.f32 %v875_v36, %v879_v38  ;;  %v5421_v38 = vld [vmem:[%s6452_s0] sm:$0xff]  }
 0x400   : > { %v881_v40 = vmul.f32 1.442695, %v880_v39 }
 0x401   : > { %v1138_v49 = vpop.permute.xlu1 %1137 }
 0x402   : > { %5454 = vpow2.f32 %v881_v40 }
 0x40f   : > { %v5455_v41 = vpop.eup %5454 }
 0x410   : > { %v883_v42 = vsel %vm876_vm6, %v5455_v41, 0.0 }
 0x411   : > { %884 = vadd.xlane.f32.xlu0 %v883_v42 }
 0x427   : > { %967 = vrot.lane.b32.xlu0 %v5759_v22, %s6426_s2 }
 0x42b   : > { %1135 = vrot.lane.b32.xlu0 %v5759_v22, %s6424_s26 }
 0x42f   : > { %1305 = vrot.lane.b32.xlu0 %v5759_v22, %s6408_s3  ;;  %s6416_s3 = smov 8  }
 0x433   : > { %1303 = vrot.lane.b32.xlu0 %v5759_v22, %s6422_s7  ;;  %s6466_s7 = smov 112  }
 0x49a   : > { %v885_v44 = vpop.xlane.xlu0 %884 }
 0x49b   : > { %5456 = vrcp.f32 %v885_v44 }
 0x49e   : > { %v968_v45 = vpop.permute.xlu0 %967 }
 0x4a2   : > { %v1136_v48 = vpop.permute.xlu0 %1135 }
 0x4a6   : > { %v1306_v50 = vpop.permute.xlu0 %1305 }
 0x4a8   : > { %v5457_v46 = vpop.eup %5456 }
 0x4a9   : > { %v887_v47 = vmul.f32 %v5457_v46, %v5455_v41 }
 0x4aa   : > { %v1304_v51 = vpop.permute.xlu0 %1303 }
 0x4ab   : > { %5119 = vmatmul.mubr.msk.f32.vlgmr.msra.gmra.mxu1 %vm890_vm7, %v887_v47 }
 0x4ac   : > { %5122 = vmatpush3.xpose.msk.msra.mxu1 %vm799_vm3, %v970_v43  ;;  %5123 = vmatprep.mubr.msk.f32.mxu1 %vm5567_vm1, %v5566_v8 }
 0x4ad   : > { %5131 = vmatprep.subr.mxu1 %v5566_v8 }
 0x4af   : > { %5124 = vmatmul.mubr.msk.f32.vlgmr.msra.gmra.mxu1 %vm799_vm3, %v968_v45 }
 0x4b0   : > { %5132 = vmatpush3.xpose.msk.msra.mxu1 %vm799_vm3, %v1138_v49  ;;  %5133 = vmatprep.mubr.msk.f32.mxu1 %vm5567_vm1, %v5566_v8 }
 0x4b1   : > { %5141 = vmatprep.subr.mxu1 %v5566_v8 }
 0x4b3   : > { %5134 = vmatmul.mubr.msk.f32.vlgmr.msra.gmra.mxu1 %vm799_vm3, %v1136_v48 }
 0x4b4   : > { %5142 = vmatpush3.xpose.msk.msra.mxu1 %vm799_vm3, %v1306_v50  ;;  %5143 = vmatprep.mubr.msk.f32.mxu1 %vm5567_vm1, %v5566_v8 }
 0x4b5   : > { %5151 = vmatprep.subr.bf16.mxu1 %v5566_v8 }
 0x4b7   : > { %5144 = vmatmul.mubr.msk.f32.vlgmr.msra.gmra.mxu1 %vm799_vm3, %v1304_v51 }
 0x4b8   : > { %5155 = vmatprep.mubr.msk.bf16.mxu1 %vm5567_vm1, %v5566_v8  ;;  %5152 = vmatpush3.bf16.msra.mxu1 %v5420_v37 }
 0x4b9   : > { %5153 = vmatprep.subr.bf16.mxu1 %v5566_v8 }
 0x4bc   : > { %5154 = vmatpush3.bf16.msra.mxu1 %v5421_v38 }
 0x4bd   : > { %5167 = vmatprep.subr.bf16.mxu1 %v5566_v8 }
 0x56b   : > { %v5813_v52 = vpop.f32.mrf.mxu1 }
 0x56d   : > { %v5120_v53 = vpop.f32.mrf.mxu1 }
 0x56e   : > { %v4827_v53 = vld [vmem:[%s6453_s24] ss:$0 sm:$0xff] }
 0x56f   : > { %v1041_v54 = vpop.f32.mrf.mxu1 }
 0x570   : > { %v1045_v55 = vmul.f32 0.35355338, %v1041_v54 }
 0x571   : > { %v5125_v56 = vpop.f32.mrf.mxu1 }
 0x572   : > { %v1046_v57 = vadd.f32 %v1045_v55, %v5780_v33 }
 0x573   : > { %v1209_v58 = vpop.f32.mrf.mxu1 }
 0x574   : > { %v1213_v59 = vmul.f32 0.35355338, %v1209_v58  ;;  %v1047_v60 = vsel %vm876_vm6, %v1046_v57, -inf }
 0x575   : > { %1048 = vmax.xlane.f32.xlu0 %v1047_v60  ;;  %v5135_v61 = vpop.f32.mrf.mxu1 }
 0x576   : > { %v1214_v62 = vadd.f32 %v1213_v59, %v5780_v33 }
 0x577   : > { %v1377_v63 = vpop.f32.mrf.mxu1 }
 0x578   : > { %v1381_v1 = vmul.f32 0.35355338, %v1377_v63  ;;  %v1215_v2 = vsel %vm876_vm6, %v1214_v62, -inf }
 0x579   : > { %1216 = vmax.xlane.f32.xlu1 %v1215_v2  ;;  %v5145_v3 = vpop.f32.mrf.mxu1 }
 0x57a   : > { %v1382_v4 = vadd.f32 %v1381_v1, %v5780_v33  ;;  %v5423_v3 = vld [vmem:[%s6383_s10] sm:$0xff]  }
 0x57c   : > { %v1383_v5 = vsel %vm876_vm6, %v1382_v4, -inf }
 0x57d   : > { %1384 = vmax.xlane.f32.xlu0 %v1383_v5 }
 0x58a   : > { %1226 = vrot.lane.b32.xlu1 %v5759_v22, %s6406_s27  ;;  %s6456_s27 = smov 104  }
 0x5fe   : > { %v1049_v6 = vpop.xlane.xlu0 %1048 }
 0x5ff   : > { %v1050_v7 = vsub.f32 %v1046_v57, %v1049_v6 }
 0x601   : > { %v1051_v9 = vmul.f32 1.442695, %v1050_v7 }
 0x602   : > { %v1217_v10 = vpop.xlane.xlu1 %1216 }
 0x603   : > { %5458 = vpow2.f32 %v1051_v9  ;;  %v1218_v11 = vsub.f32 %v1214_v62, %v1217_v10 }
 0x605   : > { %v1219_v12 = vmul.f32 1.442695, %v1218_v11 }
 0x606   : > { %v1385_v13 = vpop.xlane.xlu0 %1384  ;;  %v1227_v24 = vpop.permute.xlu1 %1226 }
 0x607   : > { %5460 = vpow2.f32 %v1219_v12  ;;  %v1386_v14 = vsub.f32 %v1382_v4, %v1385_v13  ;;  %v4833_v12 = vld [vmem:[%s6391_s18 + $0x2] ss:$0 sm:$0xff] }
 0x609   : > { %v1387_v15 = vmul.f32 1.442695, %v1386_v14  ;;  %v4834_v14 = vld [vmem:[%s6391_s18 + $0x3] ss:$0 sm:$0xff] }
 0x60b   : > { %5462 = vpow2.f32 %v1387_v15 }
 0x610   : > { %v5459_v16 = vpop.eup %5458 }
 0x611   : > { %v1053_v17 = vsel %vm876_vm6, %v5459_v16, 0.0 }
 0x612   : > { %1054 = vadd.xlane.f32.xlu0 %v1053_v17 }
 0x614   : > { %v5461_v18 = vpop.eup %5460 }
 0x615   : > { %v1221_v19 = vsel %vm876_vm6, %v5461_v18, 0.0 }
 0x616   : > { %1222 = vadd.xlane.f32.xlu0 %v1221_v19 }
 0x618   : > { %v5463_v20 = vpop.eup %5462 }
 0x619   : > { %v1389_v21 = vsel %vm876_vm6, %v5463_v20, 0.0 }
 0x61a   : > { %1390 = vadd.xlane.f32.xlu1 %v1389_v21 }
 0x62b   : > { %1394 = vrot.lane.b32.xlu1 %v5759_v22, %s6404_s8  ;;  %s6412_s8 = smov 24  }
 0x62c   : > { %1058 = vrot.lane.b32.xlu0 %v5759_v22, %s6407_s29  ;;  %s683_s29 = sld [smem:[#allocation4 + %s5715_s17]]  ;;  %s6457_s17 = smov 88  }
 0x69b   : > { %v1055_v23 = vpop.xlane.xlu0 %1054 }
 0x69c   : > { %5464 = vrcp.f32 %v1055_v23 }
 0x69f   : > { %v1223_v25 = vpop.xlane.xlu0 %1222 }
 0x6a0   : > { %5466 = vrcp.f32 %v1223_v25 }
 0x6a3   : > { %v1391_v26 = vpop.xlane.xlu1 %1390  ;;  %v1059_v27 = vpop.permute.xlu0 %1058 }
 0x6a4   : > { %5468 = vrcp.f32 %v1391_v26  ;;  %5127 = vmatpush3.msk.msra.mxu0 %vm894_vm4, %v1059_v27  ;;  %v4835_v26 = vld [vmem:[%s6382_s9] ss:$0 sm:$0xff] }
 0x6a5   : > { %5136 = vmatprep.subr.mxu0 %v5566_v8 }
 0x6a7   : > { %v1395_v34 = vpop.permute.xlu1 %1394 }
 0x6a9   : > { %v5465_v28 = vpop.eup %5464 }
 0x6aa   : > { %v1057_v30 = vmul.f32 %v5465_v28, %v5459_v16 }
 0x6ac   : > { %5129 = vmatmul.mubr.msk.f32.vlgmr.msra.gmra.mxu0 %vm890_vm7, %v1057_v30 }
 0x6ad   : > { %v5467_v31 = vpop.eup %5466  ;;  %5137 = vmatpush3.msk.msra.mxu0 %vm894_vm4, %v1227_v24  ;;  %5138 = vmatprep.mubr.msk.f32.mxu0 %vm5567_vm1, %v5566_v8 }
 0x6ae   : > { %5146 = vmatprep.subr.mxu0 %v5566_v8  ;;  %v1225_v22 = vmul.f32 %v5467_v31, %v5461_v18  ;;  %v4839_v18 = vld [vmem:[%s6384_s11] ss:$0 sm:$0xff] }
 0x6b0   : > { %5139 = vmatmul.mubr.msk.f32.vlgmr.msra.gmra.mxu0 %vm890_vm7, %v1225_v22 }
 0x6b1   : > { %v5469_v35 = vpop.eup %5468  ;;  %5147 = vmatpush3.msk.msra.mxu0 %vm894_vm4, %v1395_v34  ;;  %5148 = vmatprep.mubr.msk.f32.mxu0 %vm5567_vm1, %v5566_v8 }
 0x6b2   : > { %v1393_v36 = vmul.f32 %v5469_v35, %v5463_v20  ;;  %5159 = vmatprep.subr.bf16.mxu0 %v5566_v8 }
 0x6b4   : > { %5149 = vmatmul.mubr.msk.f32.vlgmr.msra.gmra.mxu0 %vm890_vm7, %v1393_v36 }
 0x6b5   : > { %5163 = vmatprep.mubr.msk.bf16.mxu0 %vm5567_vm1, %v5566_v8 }
 0x76c   : > { %v1131_v39 = vpop.f32.mrf.mxu0 }
 0x76d   : > { %1472 = vrot.lane.b32.xlu1 %v1131_v39, %s6416_s3  ;;  %s6455_s3 = sld [smem:[#allocation15_spill]]  ;;  %v1721_v39 = vstv %s683_s29  ;;  %s6461_s29 = smov 8  }
 0x76e   : > { %v5130_v40 = vpop.f32.mrf.mxu0  ;;  %vm1722_vm10 = vcmp.lt.s32.totalorder %v5776_v29, %v1721_v39 }
 0x770   : > { %v1299_v41 = vpop.f32.mrf.mxu0 }
 0x771   : > { %1476 = vrot.lane.b32.xlu0 %v1299_v41, %s6414_s5  ;;  %v5949_v41 = vsel %vm1722_vm10, 0.0, %v5571_v32 }
 0x772   : > { %v5140_v42 = vpop.f32.mrf.mxu0 }
 0x773   : > { %v5424_v5 = vld [vmem:[%s6455_s3 + $0x8] sm:$0xff]   ;;  %v5425_v6 = vld [vmem:[%s6455_s3] sm:$0xff]  }
 0x774   : > { %v1467_v43 = vpop.f32.mrf.mxu0  ;;  %5160 = vmatpush3.bf16.msra.mxu0 %v5424_v5 }
 0x775   : > { %1480 = vrot.lane.b32.xlu1 %v1467_v43, %s6412_s8  ;;  %s6454_s8 = sld [smem:[#allocation10_spill]]  ;;  %5161 = vmatprep.subr.bf16.mxu0 %v5566_v8 }
 0x776   : > { %v5150_v44 = vpop.f32.mrf.mxu0 }
 0x778   : > { %5162 = vmatpush3.bf16.msra.mxu0 %v5425_v6 }
 0x779   : > { %5175 = vmatprep.subr.mxu0 %v5566_v8 }
 0x77b   : > { %s676_s5 = scalar_lea.vmem %s6454_s8, %s5721_s28  ;;  %s6460_s8 = smov 72  }
 0x77c   : > { %v685_v2 = vld [vmem:[%s676_s5] sm:$0xff]  ;;  %s6459_s5 = smov 96   ;;  %s6468_s28 = smov 48  }
 0x77d   : > { %v5884_v4 = vpack.c.bf16 %v685_v2, %v685_v2 }
 0x7df   : > { %v1473_v45 = vpop.permute.xlu1 %1472 }
 0x7e0   : > { %v1483_v47 = vsel %vm799_vm3, %v5813_v52, %v1473_v45 }
 0x7e3   : > { %v1477_v46 = vpop.permute.xlu0 %1476 }
 0x7e4   : > { %v1485_v48 = vsel %vm1484_vm8, %v1483_v47, %v1477_v46 }
 0x7e7   : > { %v1481_v49 = vpop.permute.xlu1 %1480 }
 0x7e8   : > { %v1487_v50 = vsel %vm1486_vm9, %v1485_v48, %v1481_v49 }
 0x7e9   : > { %v1488_v51 = vpack.c.bf16 %v1487_v50, %v1487_v50 }
 0x7eb   : > { %5156 = vmatmul.mubr.msk.bf16.vlgmr.msra.gmra.mxu1 %vm747_vm2, %v1488_v51 }
 0x7ec   : > { %5171 = vmatprep.mubr.msk.bf16.mxu1 %vm5567_vm1, %v5566_v8 }
 0x8ab   : > { %v1544_v54 = vpop.f32.mrf.mxu1 }
 0x8ac   : > { %v1545_v55 = vadd.f32 %v4827_v53, %v1544_v54 }
 0x8ad   : > { %v5157_v56 = vpop.f32.mrf.mxu1 }
 0x8ae   : > { %v5867_v52 = vadd.f32 %v1545_v55, %v5727_v0  ;;  %v5422_v0 = vld [vmem:[%s6383_s10 + $0x8] sm:$0xff]  }
 0x8af   : > { %v1547_v57 = vpop.f32.mrf.mxu1  ;;  %5168 = vmatpush3.bf16.msra.mxu1 %v5422_v0 }
 0x8b0   : > { %v1555_v58 = vsel %vm689_vm0, %v5867_v52, 0.0  ;;  %5169 = vmatprep.subr.bf16.mxu1 %v5566_v8 }
 0x8b1   : > { %1556 = vadd.xlane.f32.xlu0 %v1555_v58  ;;  %v5158_v59 = vpop.f32.mrf.mxu1 }
 0x8b3   : > { %5170 = vmatpush3.bf16.msra.mxu1 %v5423_v3 }
 0x8b4   : > { %5185 = vmatprep.subr.mxu1 %v5566_v8 }
 0x8b6   : > { %5172 = vmatmul.mubr.msk.bf16.vlgmr.msra.gmra.mxu1 %vm747_vm2, %v5884_v4 }
 0x8b7   : > { %5187 = vmatprep.mubr.msk.f32.mxu1 %vm5567_vm1, %v5566_v8 }
 0x93a   : > { %v1557_v60 = vpop.xlane.xlu0 %1556 }
 0x93b   : > { %v1558_v61 = vmul.f32 0.03125, %v1557_v60 }
 0x93d   : > { %v1559_v62 = vsub.f32 %v5867_v52, %v1558_v61 }
 0x93f   : > { %v1560_v63 = vmul.f32 %v1559_v62, %v1559_v62 }
 0x941   : > { %v1561_v1 = vsel %vm689_vm0, %v1560_v63, 0.0 }
 0x942   : > { %1562 = vadd.xlane.f32.xlu1 %v1561_v1 }
 0x976   : > { %v1715_v19 = vpop.f32.mrf.mxu1 }
 0x977   : > { %v5911_v20 = vadd.f32 %v4839_v18, %v1715_v19 }
 0x978   : > { %v5173_v21 = vpop.f32.mrf.mxu1 }
 0x979   : > { %1892 = vrot.lane.b32.xlu0 %v5911_v20, %s6426_s2 }
 0x97a   : > { %v1718_v23 = vpop.f32.mrf.mxu1 }
 0x97c   : > { %v5174_v24 = vpop.f32.mrf.mxu1 }
 0x97d   : > { %2059 = vrot.lane.b32.xlu0 %v5911_v20, %s6424_s26 }
 0x981   : > { %2226 = vrot.lane.b32.xlu0 %v5911_v20, %s6456_s27 }
 0x9cb   : > { %v1563_v7 = vpop.xlane.xlu1 %1562 }
 0x9cc   : > { %v1564_v9 = vmul.f32 0.03125, %v1563_v7 }
 0x9ce   : > { %v1565_v10 = vadd.f32 1e-05, %v1564_v9 }
 0x9d0   : > { %5470 = vrsqrt.f32 %v1565_v10 }
 0x9dd   : > { %v5471_v11 = vpop.eup %5470 }
 0x9de   : > { %v1567_v13 = vmul.f32 %v5471_v11, %v1559_v62 }
 0x9e0   : > { %v1574_v15 = vmul.f32 %v4833_v12, %v1567_v13 }
 0x9e2   : > { %v1581_v16 = vadd.f32 %v4834_v14, %v1574_v15 }
 0x9e4   : > { %v1597_v17 = vpack.c.bf16 %v1581_v16, %v1581_v16 }
 0x9e6   : > { %5164 = vmatmul.mubr.msk.bf16.vlgmr.msra.gmra.mxu0 %vm747_vm2, %v1597_v17 }
 0x9e7   : > { %5177 = vmatprep.mubr.msk.f32.mxu0 %vm5567_vm1, %v5566_v8  ;;  %5176 = vmatpush3.xpose.msk.msra.mxu0 %vm799_vm3, %v5911_v20 }
 0x9e8   : > { %5180 = vmatprep.subr.mxu0 %v5566_v8 }
 0x9eb   : > { %v1893_v25 = vpop.permute.xlu0 %1892 }
 0x9ec   : > { %5186 = vmatpush3.xpose.msk.msra.mxu1 %vm799_vm3, %v1893_v25 }
 0x9ed   : > { %5195 = vmatprep.subr.mxu1 %v5566_v8 }
 0x9ef   : > { %v2060_v34 = vpop.permute.xlu0 %2059 }
 0x9f3   : > { %v2227_v37 = vpop.permute.xlu0 %2226 }
 0xaa6   : > { %v1653_v27 = vpop.f32.mrf.mxu0 }
 0xaa7   : > { %v1654_v28 = vadd.f32 %v4835_v26, %v1653_v27 }
 0xaa8   : > { %v5165_v30 = vpop.f32.mrf.mxu0 }
 0xaa9   : > { %1890 = vrot.lane.b32.xlu1 %v1654_v28, %s6426_s2  ;;  %5178 = vmatmul.mubr.msk.f32.vlgmr.msra.gmra.mxu0 %vm799_vm3, %v1654_v28  ;;  %s6472_s2 = sld [smem:[#allocation18_spill]] }
 0xaaa   : > { %v1656_v31 = vpop.f32.mrf.mxu0  ;;  %5182 = vmatprep.mubr.msk.f32.mxu0 %vm5567_vm1, %v5566_v8 }
 0xaac   : > { %v5166_v22 = vpop.f32.mrf.mxu0 }
 0xaad   : > { %2057 = vrot.lane.b32.xlu1 %v1654_v28, %s6424_s26  ;;  %s6462_s26 = smov 16  }
 0xab1   : > { %2224 = vrot.lane.b32.xlu1 %v1654_v28, %s6456_s27 }
 0xb1b   : > { %v1891_v35 = vpop.permute.xlu1 %1890 }
 0xb1c   : > { %5188 = vmatmul.mubr.msk.f32.vlgmr.msra.gmra.mxu1 %vm799_vm3, %v1891_v35 }
 0xb1d   : > { %5196 = vmatpush3.xpose.msk.msra.mxu1 %vm799_vm3, %v2060_v34  ;;  %5197 = vmatprep.mubr.msk.f32.mxu1 %vm5567_vm1, %v5566_v8 }
 0xb1e   : > { %5205 = vmatprep.subr.mxu1 %v5566_v8 }
 0xb1f   : > { %v2058_v36 = vpop.permute.xlu1 %2057 }
 0xb20   : > { %5198 = vmatmul.mubr.msk.f32.vlgmr.msra.gmra.mxu1 %vm799_vm3, %v2058_v36 }
 0xb21   : > { %5206 = vmatpush3.xpose.msk.msra.mxu1 %vm799_vm3, %v2227_v37  ;;  %5207 = vmatprep.mubr.msk.f32.mxu1 %vm5567_vm1, %v5566_v8 }
 0xb22   : > { %5215 = vmatprep.subr.bf16.mxu1 %v5566_v8 }
 0xb23   : > { %v2225_v38 = vpop.permute.xlu1 %2224 }
 0xb24   : > { %5208 = vmatmul.mubr.msk.f32.vlgmr.msra.gmra.mxu1 %vm799_vm3, %v2225_v38  ;;  %v5426_v38 = vld [vmem:[%s6385_s12 + $0x8] sm:$0xff]  }
 0xb25   : > { %5219 = vmatprep.mubr.msk.bf16.mxu1 %vm5567_vm1, %v5566_v8  ;;  %5216 = vmatpush3.bf16.msra.mxu1 %v5426_v38 }
 0xb26   : > { %5217 = vmatprep.subr.bf16.mxu1 %v5566_v8 }
 0xb69   : > { %v1796_v40 = vpop.f32.mrf.mxu0 }
 0xb6a   : > { %v1800_v42 = vmul.f32 0.35355338, %v1796_v40 }
 0xb6b   : > { %v5179_v43 = vpop.f32.mrf.mxu0 }
 0xb6c   : > { %v1801_v44 = vadd.f32 %v1800_v42, %v5949_v41 }
 0xb6e   : > { %v1803_v45 = vsel %vm1802_vm11, %v1801_v44, -inf }
 0xb6f   : > { %1804 = vmax.xlane.f32.xlu0 %v1803_v45 }
 0xbdc   : > { %v1964_v46 = vpop.f32.mrf.mxu1 }
 0xbdd   : > { %v1968_v47 = vmul.f32 0.35355338, %v1964_v46  ;;  %v5427_v46 = vld [vmem:[%s6385_s12] sm:$0xff]  }
 0xbde   : > { %v5189_v48 = vpop.f32.mrf.mxu1  ;;  %5218 = vmatpush3.bf16.msra.mxu1 %v5427_v46 }
 0xbdf   : > { %v1969_v49 = vadd.f32 %v1968_v47, %v5949_v41  ;;  %5231 = vmatprep.subr.bf16.mxu1 %v5566_v8 }
 0xbe0   : > { %v2131_v50 = vpop.f32.mrf.mxu1 }
 0xbe1   : > { %v2135_v51 = vmul.f32 0.35355338, %v2131_v50  ;;  %v1970_v53 = vsel %vm1802_vm11, %v1969_v49, -inf }
 0xbe2   : > { %1971 = vmax.xlane.f32.xlu1 %v1970_v53  ;;  %v5199_v32 = vpop.f32.mrf.mxu1 }
 0xbe3   : > { %v2136_v54 = vadd.f32 %v2135_v51, %v5949_v41 }
 0xbe4   : > { %v2298_v55 = vpop.f32.mrf.mxu1 }
 0xbe5   : > { %v2302_v56 = vmul.f32 0.35355338, %v2298_v55  ;;  %v2137_v57 = vsel %vm1802_vm11, %v2136_v54, -inf }
 0xbe6   : > { %v5209_v58 = vpop.f32.mrf.mxu1  ;;  %2138 = vmax.xlane.f32.xlu0 %v2137_v57 }
 0xbe7   : > { %v2303_v59 = vadd.f32 %v2302_v56, %v5949_v41  ;;  %v4855_v56 = vld [vmem:[%s6386_s13] ss:$0 sm:$0xff] }
 0xbe9   : > { %v2304_v60 = vsel %vm1802_vm11, %v2303_v59, -inf }
 0xbea   : > { %2305 = vmax.xlane.f32.xlu0 %v2304_v60 }
 0xbf8   : > { %v1805_v61 = vpop.xlane.xlu0 %1804 }
 0xbf9   : > { %v1806_v62 = vsub.f32 %v1801_v44, %v1805_v61 }
 0xbfb   : > { %v1807_v63 = vmul.f32 1.442695, %v1806_v62 }
 0xbfd   : > { %5472 = vpow2.f32 %v1807_v63 }
 0xc0a   : > { %v5473_v1 = vpop.eup %5472 }
 0xc0b   : > { %v1809_v0 = vsel %vm1802_vm11, %v5473_v1, 0.0 }
 0xc0c   : > { %1810 = vadd.xlane.f32.xlu0 %v1809_v0 }
 0xc6b   : > { %v1972_v2 = vpop.xlane.xlu1 %1971 }
 0xc6c   : > { %v1973_v3 = vsub.f32 %v1969_v49, %v1972_v2 }
 0xc6e   : > { %v1974_v5 = vmul.f32 1.442695, %v1973_v3 }
 0xc6f   : > { %v2139_v6 = vpop.xlane.xlu0 %2138 }
 0xc70   : > { %5474 = vpow2.f32 %v1974_v5  ;;  %v2140_v7 = vsub.f32 %v2136_v54, %v2139_v6  ;;  %v5428_v6 = vld [vmem:[%s6387_s14 + $0x8] sm:$0xff]  }
 0xc72   : > { %v2141_v9 = vmul.f32 1.442695, %v2140_v7  ;;  %v5430_v7 = vld [vmem:[%s6389_s16 + $0x18] sm:$0xff]  }
 0xc73   : > { %v2306_v14 = vpop.xlane.xlu0 %2305 }
 0xc74   : > { %5476 = vpow2.f32 %v2141_v9  ;;  %v2307_v15 = vsub.f32 %v2303_v59, %v2306_v14  ;;  %v5431_v9 = vld [vmem:[%s6389_s16 + $0x10] sm:$0xff]   ;;  %v4861_v14 = vld [vmem:[%s6391_s18 + $0x4] ss:$0 sm:$0xff] }
 0xc76   : > { %v2308_v16 = vmul.f32 1.442695, %v2307_v15 }
 0xc78   : > { %5478 = vpow2.f32 %v2308_v16  ;;  %v4862_v16 = vld [vmem:[%s6391_s18 + $0x5] ss:$0 sm:$0xff] }
 0xc7d   : > { %v5475_v10 = vpop.eup %5474 }
 0xc7e   : > { %v1976_v11 = vsel %vm1802_vm11, %v5475_v10, 0.0 }
 0xc7f   : > { %1977 = vadd.xlane.f32.xlu1 %v1976_v11 }
 0xc81   : > { %v5477_v12 = vpop.eup %5476 }
 0xc82   : > { %v2143_v13 = vsel %vm1802_vm11, %v5477_v12, 0.0 }
 0xc83   : > { %2144 = vadd.xlane.f32.xlu0 %v2143_v13 }
 0xc85   : > { %v5479_v17 = vpop.eup %5478 }
 0xc86   : > { %v2310_v18 = vsel %vm1802_vm11, %v5479_v17, 0.0 }
 0xc90   : > { %1981 = vrot.lane.b32.xlu1 %v5911_v20, %s6457_s17 }
 0xc94   : > { %2148 = vrot.lane.b32.xlu1 %v5911_v20, %s6458_s6 }
 0xc95   : > { %v1811_v19 = vpop.xlane.xlu0 %1810 }
 0xc96   : > { %5480 = vrcp.f32 %v1811_v19 }
 0xc99   : > { %1814 = vrot.lane.b32.xlu0 %v5911_v20, %s6459_s5 }
 0xca3   : > { %v5481_v24 = vpop.eup %5480 }
 0xca4   : > { %v1813_v26 = vmul.f32 %v5481_v24, %v5473_v1  ;;  %v4863_v24 = vld [vmem:[%s6388_s15] ss:$0 sm:$0xff] }
 0xcb8   : > { %2311 = vadd.xlane.f32.xlu1 %v2310_v18 }
 0xcc9   : > { %2315 = vrot.lane.b32.xlu1 %v5911_v20, %s6460_s8 }
 0xd08   : > { %v1978_v21 = vpop.xlane.xlu1 %1977 }
 0xd09   : > { %5482 = vrcp.f32 %v1978_v21  ;;  %v5432_v21 = vld [vmem:[%s6389_s16 + $0x8] sm:$0xff]  }
 0xd0c   : > { %v2145_v23 = vpop.xlane.xlu0 %2144  ;;  %v1982_v27 = vpop.permute.xlu1 %1981 }
 0xd0d   : > { %5484 = vrcp.f32 %v2145_v23  ;;  %v5433_v23 = vld [vmem:[%s6389_s16] sm:$0xff]  }
 0xd10   : > { %v1815_v25 = vpop.permute.xlu0 %1814  ;;  %v2149_v30 = vpop.permute.xlu1 %2148 }
 0xd11   : > { %5181 = vmatpush3.msra.mxu0 %v1815_v25 }
 0xd12   : > { %5183 = vmatmul.mubr.msk.f32.vlgmr.msra.gmra.mxu0 %vm799_vm3, %v1813_v26  ;;  %5190 = vmatprep.subr.mxu0 %v5566_v8 }
 0xd13   : > { %5191 = vmatpush3.msra.mxu0 %v1982_v27  ;;  %5192 = vmatprep.mubr.msk.f32.mxu0 %vm5567_vm1, %v5566_v8 }
 0xd14   : > { %5200 = vmatprep.subr.mxu0 %v5566_v8 }
 0xd16   : > { %v5483_v20 = vpop.eup %5482 }
 0xd17   : > { %v1980_v28 = vmul.f32 %v5483_v20, %v5475_v10 }
 0xd19   : > { %5193 = vmatmul.mubr.msk.f32.vlgmr.msra.gmra.mxu0 %vm799_vm3, %v1980_v28 }
 0xd1a   : > { %v5485_v31 = vpop.eup %5484  ;;  %5201 = vmatpush3.msra.mxu0 %v2149_v30  ;;  %5202 = vmatprep.mubr.msk.f32.mxu0 %vm5567_vm1, %v5566_v8 }
 0xd1b   : > { %v2147_v22 = vmul.f32 %v5485_v31, %v5477_v12  ;;  %5210 = vmatprep.subr.mxu0 %v5566_v8 }
 0xd1d   : > { %5203 = vmatmul.mubr.msk.f32.vlgmr.msra.gmra.mxu0 %vm799_vm3, %v2147_v22  ;;  %v4867_v22 = vld [vmem:[%s6464_s19] ss:$0 sm:$0xff] }
 0xd1e   : > { %5212 = vmatprep.mubr.msk.f32.mxu0 %vm5567_vm1, %v5566_v8 }
 0xd41   : > { %v2312_v34 = vpop.xlane.xlu1 %2311 }
 0xd42   : > { %5486 = vrcp.f32 %v2312_v34 }
 0xd45   : > { %v2316_v35 = vpop.permute.xlu1 %2315 }
 0xd46   : > { %5211 = vmatpush3.msra.mxu0 %v2316_v35 }
 0xd47   : > { %5223 = vmatprep.subr.bf16.mxu0 %v5566_v8 }
 0xd4f   : > { %v5487_v36 = vpop.eup %5486 }
 0xd50   : > { %v2314_v37 = vmul.f32 %v5487_v36, %v5479_v17 }
 0xd52   : > { %5213 = vmatmul.mubr.msk.f32.vlgmr.msra.gmra.mxu0 %vm799_vm3, %v2314_v37 }
 0xd53   : > { %5227 = vmatprep.mubr.msk.bf16.mxu0 %vm5567_vm1, %v5566_v8  ;;  %5224 = vmatpush3.bf16.msra.mxu0 %v5428_v6 }
 0xd54   : > { %5225 = vmatprep.subr.bf16.mxu0 %v5566_v8 }
 0xdd2   : > { %v1886_v39 = vpop.f32.mrf.mxu0 }
 0xdd4   : > { %v5184_v40 = vpop.f32.mrf.mxu0 }
 0xdd9   : > { %v2053_v42 = vpop.f32.mrf.mxu0 }
 0xdda   : > { %2392 = vrot.lane.b32.xlu0 %v2053_v42, %s6461_s29 }
 0xddb   : > { %v5194_v43 = vpop.f32.mrf.mxu0 }
 0xddd   : > { %v2220_v44 = vpop.f32.mrf.mxu0 }
 0xdde   : > { %2396 = vrot.lane.b32.xlu1 %v2220_v44, %s6462_s26 }
 0xddf   : > { %v5204_v45 = vpop.f32.mrf.mxu0 }
 0xe12   : > { %v2387_v47 = vpop.f32.mrf.mxu0 }
 0xe13   : > { %2400 = vrot.lane.b32.xlu0 %v2387_v47, %s6463_s30  ;;  %v5434_v47 = vld [vmem:[%s6450_s25 + $0x18] sm:$0xff]  }
 0xe14   : > { %v5214_v48 = vpop.f32.mrf.mxu0 }
 0xe15   : > { %v5435_v48 = vld [vmem:[%s6450_s25 + $0x10] sm:$0xff]  }
 0xe4c   : > { %v2393_v49 = vpop.permute.xlu0 %2392 }
 0xe4d   : > { %v2403_v51 = vsel %vm799_vm3, %v1886_v39, %v2393_v49 }
 0xe50   : > { %v2397_v50 = vpop.permute.xlu1 %2396 }
 0xe51   : > { %v2404_v53 = vsel %vm1484_vm8, %v2403_v51, %v2397_v50 }
 0xe85   : > { %v2401_v32 = vpop.permute.xlu0 %2400 }
 0xe86   : > { %v2405_v54 = vsel %vm1486_vm9, %v2404_v53, %v2401_v32  ;;  %v4875_v32 = vld [vmem:[%s6391_s18 + $0x6] ss:$0 sm:$0xff] }
 0xe87   : > { %v2406_v55 = vpack.c.bf16 %v2405_v54, %v2405_v54 }
 0xe89   : > { %5220 = vmatmul.mubr.msk.bf16.vlgmr.msra.gmra.mxu1 %vm747_vm2, %v2406_v55  ;;  %v4876_v55 = vld [vmem:[%s6391_s18 + $0x7] ss:$0 sm:$0xff] }
 0xe8a   : > { %5239 = vmatprep.mubr.msk.bf16.mxu1 %vm5567_vm1, %v5566_v8  ;;  %5232 = vmatpush3.bf16.msra.mxu1 %v5430_v7 }
 0xe8b   : > { %5233 = vmatprep.subr.bf16.mxu1 %v5566_v8 }
 0xe8e   : > { %5234 = vmatpush3.bf16.msra.mxu1 %v5431_v9 }
 0xe8f   : > { %5235 = vmatprep.subr.bf16.mxu1 %v5566_v8 }
 0xe92   : > { %5236 = vmatpush3.bf16.msra.mxu1 %v5432_v21 }
 0xe93   : > { %5237 = vmatprep.subr.bf16.mxu1 %v5566_v8 }
 0xe96   : > { %5238 = vmatpush3.bf16.msra.mxu1 %v5433_v23 }
 0xe97   : > { %5261 = vmatprep.subr.mxu1 %v5566_v8 }
 0xf49   : > { %v2462_v57 = vpop.f32.mrf.mxu1 }
 0xf4a   : > { %v2463_v58 = vadd.f32 %v4855_v56, %v2462_v57 }
 0xf4b   : > { %v5221_v59 = vpop.f32.mrf.mxu1 }
 0xf4c   : > { %v2468_v60 = vadd.f32 %v2463_v58, %v5867_v52  ;;  %v5429_v52 = vld [vmem:[%s6387_s14] sm:$0xff]  }
 0xf4d   : > { %v2465_v61 = vpop.f32.mrf.mxu1  ;;  %5226 = vmatpush3.bf16.msra.mxu0 %v5429_v52  ;;  %v4887_v59 = vld [vmem:[%s6451_s4 + $0x1] ss:$0 sm:$0xff] }
 0xf4e   : > { %v2473_v62 = vsel %vm689_vm0, %v2468_v60, 0.0  ;;  %5243 = vmatprep.subr.bf16.mxu0 %v5566_v8 }
 0xf4f   : > { %2474 = vadd.xlane.f32.xlu1 %v2473_v62  ;;  %v5222_v63 = vpop.f32.mrf.mxu1 }
 0xfd8   : > { %v2475_v1 = vpop.xlane.xlu1 %2474 }
 0xfd9   : > { %v2476_v0 = vmul.f32 0.03125, %v2475_v1 }
 0xfdb   : > { %v2477_v2 = vsub.f32 %v2468_v60, %v2476_v0 }
 0xfdd   : > { %v2478_v3 = vmul.f32 %v2477_v2, %v2477_v2 }
 0xfdf   : > { %v2479_v5 = vsel %vm689_vm0, %v2478_v3, 0.0 }
 0xfe0   : > { %2480 = vadd.xlane.f32.xlu0 %v2479_v5 }
0x1069   : > { %v2481_v10 = vpop.xlane.xlu0 %2480 }
0x106a   : > { %v2482_v11 = vmul.f32 0.03125, %v2481_v10 }
0x106c   : > { %v2483_v12 = vadd.f32 1e-05, %v2482_v11 }
0x106e   : > { %5488 = vrsqrt.f32 %v2483_v12 }
0x107b   : > { %v5489_v13 = vpop.eup %5488 }
0x107c   : > { %v2485_v15 = vmul.f32 %v5489_v13, %v2477_v2 }
0x107e   : > { %v2492_v17 = vmul.f32 %v4861_v14, %v2485_v15 }
0x1080   : > { %v2499_v18 = vadd.f32 %v4862_v16, %v2492_v17 }
0x1082   : > { %v2514_v19 = vpack.c.bf16 %v2499_v18, %v2499_v18 }
0x1084   : > { %5228 = vmatmul.mubr.msk.bf16.vlgmr.msra.gmra.mxu0 %vm747_vm2, %v2514_v19 }
0x1085   : > { %5247 = vmatprep.mubr.msk.bf16.mxu0 %vm5567_vm1, %v5566_v8  ;;  %5244 = vmatpush3.bf16.msra.mxu0 %v5434_v47 }
0x1086   : > { %5245 = vmatprep.subr.bf16.mxu0 %v5566_v8 }
0x1089   : > { %5246 = vmatpush3.bf16.msra.mxu0 %v5435_v48 }
0x108a   : > { %5251 = vmatprep.subr.mxu0 %v5566_v8 }
0x1144   : > { %v2570_v25 = vpop.f32.mrf.mxu0 }
0x1145   : > { %v2571_v26 = vadd.f32 %v4863_v24, %v2570_v25 }
0x1146   : > { %v5229_v27 = vpop.f32.mrf.mxu0 }
0x1147   : > { %v2576_v20 = vmax.f32 %v2571_v26, 0.0 }
0x1148   : > { %v2573_v28 = vpop.f32.mrf.mxu0 }
0x1149   : > { %v2577_v30 = vpack.c.bf16 %v2576_v20, %v2576_v20 }
0x114a   : > { %v5230_v31 = vpop.f32.mrf.mxu0 }
0x114b   : > { %5240 = vmatmul.mubr.msk.bf16.vlgmr.msra.gmra.mxu1 %vm2608_vm12, %v2577_v30 }
0x114c   : > { %5263 = vmatprep.mubr.msk.f32.mxu1 %vm5567_vm1, %v5566_v8 }
0x120b   : > { %v2646_v34 = vpop.f32.mrf.mxu1 }
0x120c   : > { %v2647_v35 = vadd.f32 %v4867_v22, %v2646_v34 }
0x120d   : > { %v5241_v36 = vpop.f32.mrf.mxu1 }
0x120e   : > { %v6052_v37 = vadd.f32 %v2647_v35, %v2468_v60 }
0x120f   : > { %v2649_v38 = vpop.f32.mrf.mxu1 }
0x1210   : > { %v2657_v39 = vsel %vm689_vm0, %v6052_v37, 0.0 }
0x1211   : > { %2658 = vadd.xlane.f32.xlu0 %v2657_v39  ;;  %v5242_v40 = vpop.f32.mrf.mxu1 }
0x129a   : > { %v2659_v42 = vpop.xlane.xlu0 %2658 }
0x129b   : > { %v2660_v43 = vmul.f32 0.03125, %v2659_v42 }
0x129d   : > { %v2661_v44 = vsub.f32 %v6052_v37, %v2660_v43 }
0x129f   : > { %v2662_v45 = vmul.f32 %v2661_v44, %v2661_v44 }
0x12a1   : > { %v2663_v46 = vsel %vm689_vm0, %v2662_v45, 0.0 }
0x12a2   : > { %2664 = vadd.xlane.f32.xlu0 %v2663_v46 }
0x132b   : > { %v2665_v49 = vpop.xlane.xlu0 %2664 }
0x132c   : > { %v2666_v50 = vmul.f32 0.03125, %v2665_v49 }
0x132e   : > { %v2667_v51 = vadd.f32 1e-05, %v2666_v50 }
0x1330   : > { %5490 = vrsqrt.f32 %v2667_v51 }
0x133d   : > { %v5491_v53 = vpop.eup %5490 }
0x133e   : > { %v2669_v54 = vmul.f32 %v5491_v53, %v2661_v44 }
0x1340   : > { %v2676_v56 = vmul.f32 %v4875_v32, %v2669_v54 }
0x1342   : > { %v2683_v57 = vadd.f32 %v4876_v55, %v2676_v56 }
0x1344   : > { %v2698_v58 = vpack.c.bf16 %v2683_v57, %v2683_v57 }
0x1346   : > { %5248 = vmatmul.mubr.msk.bf16.vlgmr.msra.gmra.mxu0 %vm747_vm2, %v2698_v58 }
0x1347   : > { %5253 = vmatprep.mubr.msk.f32.mxu0 %vm5567_vm1, %v5566_v8 }
0x1406   : > { %v2754_v60 = vpop.f32.mrf.mxu0 }
0x1407   : > { %v6078_v61 = vadd.f32 %v4887_v59, %v2754_v60 }
0x1408   : > { %v5249_v62 = vpop.f32.mrf.mxu0 }
0x1409   : > { %2929 = vrot.lane.b32.xlu0 %v6078_v61, %s6457_s17  ;;  %2761 = vrot.lane.b32.xlu1 %v6078_v61, %s6459_s5 }
0x140a   : > { %v2757_v63 = vpop.f32.mrf.mxu0 }
0x140c   : > { %v5250_v1 = vpop.f32.mrf.mxu0 }
0x140d   : > { %3265 = vrot.lane.b32.xlu0 %v6078_v61, %s6460_s8  ;;  %2927 = vrot.lane.b32.xlu1 %v6078_v61, %s6465_s23 }
0x1411   : > { %3097 = vrot.lane.b32.xlu1 %v6078_v61, %s6458_s6 }
0x1415   : > { %3095 = vrot.lane.b32.xlu1 %v6078_v61, %s6466_s7 }
0x1419   : > { %3263 = vrot.lane.b32.xlu1 %v6078_v61, %s6456_s27 }
0x147b   : > { %v2930_v0 = vpop.permute.xlu0 %2929  ;;  %v2762_v2 = vpop.permute.xlu1 %2761 }
0x147c   : > { %5252 = vmatpush3.xpose.msk.msra.mxu0 %vm799_vm3, %v2762_v2  ;;  %5262 = vmatpush3.xpose.msk.msra.mxu1 %vm799_vm3, %v2930_v0 }
0x147d   : > { %5271 = vmatprep.subr.mxu1 %v5566_v8  ;;  %5256 = vmatprep.subr.mxu0 %v5566_v8 }
0x147f   : > { %5254 = vmatmul.mubr.msk.f32.vlgmr.msra.gmra.mxu0 %vm799_vm3, %v6078_v61  ;;  %v2928_v3 = vpop.permute.xlu1 %2927  ;;  %v3266_v52 = vpop.permute.xlu0 %3265 }
0x1480   : > { %5264 = vmatmul.mubr.msk.f32.vlgmr.msra.gmra.mxu1 %vm799_vm3, %v2928_v3  ;;  %5258 = vmatprep.mubr.msk.f32.mxu0 %vm5567_vm1, %v5566_v8 }
0x1481   : > { %5273 = vmatprep.mubr.msk.f32.mxu1 %vm5567_vm1, %v5566_v8 }
0x1483   : > { %v3098_v5 = vpop.permute.xlu1 %3097 }
0x1484   : > { %5272 = vmatpush3.xpose.msk.msra.mxu1 %vm799_vm3, %v3098_v5 }
0x1485   : > { %5281 = vmatprep.subr.mxu1 %v5566_v8 }
0x1487   : > { %v3096_v6 = vpop.permute.xlu1 %3095 }
0x1488   : > { %5274 = vmatmul.mubr.msk.f32.vlgmr.msra.gmra.mxu1 %vm799_vm3, %v3096_v6  ;;  %v5436_v6 = vld [vmem:[%s6452_s0 + $0x18] sm:$0xff]  }
0x1489   : > { %5282 = vmatpush3.xpose.msk.msra.mxu1 %vm799_vm3, %v3266_v52  ;;  %5283 = vmatprep.mubr.msk.f32.mxu1 %vm5567_vm1, %v5566_v8 }
0x148a   : > { %5291 = vmatprep.subr.bf16.mxu1 %v5566_v8 }
0x148b   : > { %v3264_v7 = vpop.permute.xlu1 %3263 }
0x148c   : > { %5284 = vmatmul.mubr.msk.f32.vlgmr.msra.gmra.mxu1 %vm799_vm3, %v3264_v7 }
0x148d   : > { %5295 = vmatprep.mubr.msk.bf16.mxu1 %vm5567_vm1, %v5566_v8  ;;  %5292 = vmatpush3.bf16.msra.mxu1 %v5436_v6 }
0x148e   : > { %5293 = vmatprep.subr.bf16.mxu1 %v5566_v8 }
0x153f   : > { %v2833_v9 = vpop.f32.mrf.mxu0 }
0x1540   : > { %v2837_v10 = vmul.f32 0.35355338, %v2833_v9  ;;  %v3001_v11 = vpop.f32.mrf.mxu1 }
0x1541   : > { %v3005_v12 = vmul.f32 0.35355338, %v3001_v11  ;;  %v5255_v13 = vpop.f32.mrf.mxu0 }
0x1542   : > { %v5265_v14 = vpop.f32.mrf.mxu1  ;;  %v2838_v15 = vadd.f32 %v2837_v10, %v5780_v33  ;;  %v5437_v13 = vld [vmem:[%s6452_s0 + $0x10] sm:$0xff]  }
0x1543   : > { %v3006_v16 = vadd.f32 %v3005_v12, %v5780_v33  ;;  %5294 = vmatpush3.bf16.msra.mxu1 %v5437_v13 }
0x1544   : > { %v2839_v17 = vsel %vm876_vm6, %v2838_v15, -inf  ;;  %5307 = vmatprep.subr.bf16.mxu1 %v5566_v8 }
0x1545   : > { %2840 = vmax.xlane.f32.xlu0 %v2839_v17  ;;  %v3007_v18 = vsel %vm876_vm6, %v3006_v16, -inf }
0x1546   : > { %3008 = vmax.xlane.f32.xlu1 %v3007_v18 }
0x1548   : > { %v3169_v19 = vpop.f32.mrf.mxu1 }
0x1549   : > { %v3173_v21 = vmul.f32 0.35355338, %v3169_v19 }
0x154a   : > { %v5275_v23 = vpop.f32.mrf.mxu1 }
0x154b   : > { %v3174_v24 = vadd.f32 %v3173_v21, %v5780_v33 }
0x154c   : > { %v3337_v25 = vpop.f32.mrf.mxu1 }
0x154d   : > { %v3341_v26 = vmul.f32 0.35355338, %v3337_v25  ;;  %v3175_v27 = vsel %vm876_vm6, %v3174_v24, -inf  ;;  %v4907_v25 = vld [vmem:[%s6453_s24 + $0x1] ss:$0 sm:$0xff] }
0x154e   : > { %v5285_v20 = vpop.f32.mrf.mxu1  ;;  %3176 = vmax.xlane.f32.xlu0 %v3175_v27 }
0x154f   : > { %v3342_v28 = vadd.f32 %v3341_v26, %v5780_v33 }
0x1551   : > { %v3343_v30 = vsel %vm876_vm6, %v3342_v28, -inf }
0x1552   : > { %3344 = vmax.xlane.f32.xlu0 %v3343_v30 }
0x15ce   : > { %v2841_v31 = vpop.xlane.xlu0 %2840 }
0x15cf   : > { %v2842_v22 = vsub.f32 %v2838_v15, %v2841_v31  ;;  %v3009_v34 = vpop.xlane.xlu1 %3008 }
0x15d0   : > { %v3010_v35 = vsub.f32 %v3006_v16, %v3009_v34 }
0x15d1   : > { %v2843_v36 = vmul.f32 1.442695, %v2842_v22 }
0x15d2   : > { %v3011_v38 = vmul.f32 1.442695, %v3010_v35 }
0x15d3   : > { %5492 = vpow2.f32 %v2843_v36 }
0x15d4   : > { %5494 = vpow2.f32 %v3011_v38 }
0x15d7   : > { %v3177_v39 = vpop.xlane.xlu0 %3176 }
0x15d8   : > { %v3178_v40 = vsub.f32 %v3174_v24, %v3177_v39 }
0x15da   : > { %v3179_v42 = vmul.f32 1.442695, %v3178_v40  ;;  %v5438_v40 = vld [vmem:[%s6383_s10 + $0x18] sm:$0xff]  }
0x15db   : > { %v3345_v48 = vpop.xlane.xlu0 %3344 }
0x15dc   : > { %5496 = vpow2.f32 %v3179_v42  ;;  %v3346_v49 = vsub.f32 %v3342_v28, %v3345_v48  ;;  %v5440_v42 = vld [vmem:[%s6455_s3 + $0x18] sm:$0xff]  }
0x15de   : > { %v3347_v50 = vmul.f32 1.442695, %v3346_v49 }
0x15e0   : > { %v5493_v43 = vpop.eup %5492  ;;  %5498 = vpow2.f32 %v3347_v50 }
0x15e1   : > { %v5495_v44 = vpop.eup %5494  ;;  %v2845_v45 = vsel %vm876_vm6, %v5493_v43, 0.0 }
0x15e2   : > { %2846 = vadd.xlane.f32.xlu0 %v2845_v45  ;;  %v3013_v33 = vsel %vm876_vm6, %v5495_v44, 0.0 }
0x15e3   : > { %3014 = vadd.xlane.f32.xlu1 %v3013_v33 }
0x15e9   : > { %v5497_v46 = vpop.eup %5496 }
0x15ea   : > { %v3181_v47 = vsel %vm876_vm6, %v5497_v46, 0.0 }
0x15eb   : > { %3182 = vadd.xlane.f32.xlu0 %v3181_v47  ;;  %v4913_v47 = vld [vmem:[%s6391_s18 + $0x8] ss:$0 sm:$0xff] }
0x15ed   : > { %v5499_v51 = vpop.eup %5498 }
0x15ee   : > { %v3349_v53 = vsel %vm876_vm6, %v5499_v51, 0.0 }
0x15f4   : > { %3018 = vrot.lane.b32.xlu1 %v6078_v61, %s6467_s22 }
0x15f8   : > { %3186 = vrot.lane.b32.xlu1 %v6078_v61, %s6468_s28  ;;  %s6471_s28 = sld [smem:[#allocation17_spill]] }
0x1601   : > { %2850 = vrot.lane.b32.xlu0 %v6078_v61, %s6469_s20 }
0x161c   : > { %3350 = vadd.xlane.f32.xlu1 %v3349_v53  ;;  %v4934_v53 = vld [vmem:[%s6384_s11 + $0x1] ss:$0 sm:$0xff] }
0x162d   : > { %3354 = vrot.lane.b32.xlu1 %v6078_v61, %s6470_s1 }
0x166b   : > { %v2847_v32 = vpop.xlane.xlu0 %2846 }
0x166c   : > { %5500 = vrcp.f32 %v2847_v32  ;;  %v3015_v54 = vpop.xlane.xlu1 %3014 }
0x166d   : > { %5502 = vrcp.f32 %v3015_v54 }
0x1670   : > { %v3019_v58 = vpop.permute.xlu1 %3018 }
0x1674   : > { %v3183_v55 = vpop.xlane.xlu0 %3182  ;;  %v3187_v62 = vpop.permute.xlu1 %3186 }
0x1675   : > { %5504 = vrcp.f32 %v3183_v55 }
0x1678   : > { %v2851_v56 = vpop.permute.xlu0 %2850 }
0x1679   : > { %v5501_v57 = vpop.eup %5500  ;;  %5257 = vmatpush3.msk.msra.mxu0 %vm894_vm4, %v2851_v56 }
0x167a   : > { %5266 = vmatprep.subr.mxu0 %v5566_v8  ;;  %v2849_v59 = vmul.f32 %v5501_v57, %v5493_v43  ;;  %v5503_v60 = vpop.eup %5502  ;;  %v5441_v43 = vld [vmem:[%s6455_s3 + $0x10] sm:$0xff]  }
0x167b   : > { %v3017_v61 = vmul.f32 %v5503_v60, %v5495_v44 }
0x167c   : > { %5259 = vmatmul.mubr.msk.f32.vlgmr.msra.gmra.mxu0 %vm890_vm7, %v2849_v59  ;;  %v4930_v59 = vld [vmem:[%s6382_s9 + $0x1] ss:$0 sm:$0xff] }
0x167d   : > { %5267 = vmatpush3.msk.msra.mxu0 %vm894_vm4, %v3019_v58  ;;  %5268 = vmatprep.mubr.msk.f32.mxu0 %vm5567_vm1, %v5566_v8 }
0x167e   : > { %5276 = vmatprep.subr.mxu0 %v5566_v8 }
0x1680   : > { %5269 = vmatmul.mubr.msk.f32.vlgmr.msra.gmra.mxu0 %vm890_vm7, %v3017_v61 }
0x1681   : > { %5277 = vmatpush3.msk.msra.mxu0 %vm894_vm4, %v3187_v62  ;;  %5278 = vmatprep.mubr.msk.f32.mxu0 %vm5567_vm1, %v5566_v8 }
0x1682   : > { %v5505_v63 = vpop.eup %5504  ;;  %5286 = vmatprep.subr.mxu0 %v5566_v8 }
0x1683   : > { %v3185_v1 = vmul.f32 %v5505_v63, %v5497_v46 }
0x1685   : > { %5279 = vmatmul.mubr.msk.f32.vlgmr.msra.gmra.mxu0 %vm890_vm7, %v3185_v1 }
0x1686   : > { %5288 = vmatprep.mubr.msk.f32.mxu0 %vm5567_vm1, %v5566_v8 }
0x16a5   : > { %v3351_v0 = vpop.xlane.xlu1 %3350 }
0x16a6   : > { %5506 = vrcp.f32 %v3351_v0 }
0x16a9   : > { %v3355_v2 = vpop.permute.xlu1 %3354 }
0x16aa   : > { %5287 = vmatpush3.msk.msra.mxu0 %vm894_vm4, %v3355_v2 }
0x16ab   : > { %5299 = vmatprep.subr.bf16.mxu0 %v5566_v8 }
0x16b3   : > { %v5507_v3 = vpop.eup %5506 }
0x16b4   : > { %v3353_v5 = vmul.f32 %v5507_v3, %v5499_v51 }
0x16b6   : > { %5289 = vmatmul.mubr.msk.f32.vlgmr.msra.gmra.mxu0 %vm890_vm7, %v3353_v5 }
0x16b7   : > { %5303 = vmatprep.mubr.msk.bf16.mxu0 %vm5567_vm1, %v5566_v8  ;;  %5300 = vmatpush3.bf16.msra.mxu0 %v5440_v42 }
0x16b8   : > { %5301 = vmatprep.subr.bf16.mxu0 %v5566_v8 }
0x16bb   : > { %5302 = vmatpush3.bf16.msra.mxu0 %v5441_v43 }
0x16bc   : > { %5315 = vmatprep.subr.mxu0 %v5566_v8 }
0x173c   : > { %v2923_v52 = vpop.f32.mrf.mxu0 }
0x173e   : > { %v5260_v7 = vpop.f32.mrf.mxu0 }
0x1740   : > { %v3091_v9 = vpop.f32.mrf.mxu0 }
0x1741   : > { %3432 = vrot.lane.b32.xlu0 %v3091_v9, %s6461_s29 }
0x1742   : > { %v5270_v10 = vpop.f32.mrf.mxu0 }
0x1745   : > { %v3259_v11 = vpop.f32.mrf.mxu0 }
0x1746   : > { %3436 = vrot.lane.b32.xlu1 %v3259_v11, %s6462_s26 }
0x1747   : > { %v5280_v12 = vpop.f32.mrf.mxu0 }
0x1776   : > { %v3427_v14 = vpop.f32.mrf.mxu0 }
0x1777   : > { %3440 = vrot.lane.b32.xlu0 %v3427_v14, %s6463_s30 }
0x1778   : > { %v5290_v15 = vpop.f32.mrf.mxu0 }
0x17b3   : > { %v3433_v16 = vpop.permute.xlu0 %3432 }
0x17b4   : > { %v3443_v18 = vsel %vm799_vm3, %v2923_v52, %v3433_v16 }
0x17b8   : > { %v3437_v17 = vpop.permute.xlu1 %3436 }
0x17b9   : > { %v3444_v19 = vsel %vm1484_vm8, %v3443_v18, %v3437_v17 }
0x17e9   : > { %v3441_v21 = vpop.permute.xlu0 %3440 }
0x17ea   : > { %v3445_v23 = vsel %vm1486_vm9, %v3444_v19, %v3441_v21 }
0x17eb   : > { %v3446_v24 = vpack.c.bf16 %v3445_v23, %v3445_v23 }
0x17ed   : > { %5296 = vmatmul.mubr.msk.bf16.vlgmr.msra.gmra.mxu1 %vm747_vm2, %v3446_v24 }
0x17ee   : > { %5311 = vmatprep.mubr.msk.bf16.mxu1 %vm5567_vm1, %v5566_v8  ;;  %5308 = vmatpush3.bf16.msra.mxu1 %v5438_v40 }
0x17ef   : > { %5309 = vmatprep.subr.bf16.mxu1 %v5566_v8 }
0x18ad   : > { %v3502_v26 = vpop.f32.mrf.mxu1 }
0x18ae   : > { %v3503_v27 = vadd.f32 %v4907_v25, %v3502_v26 }
0x18af   : > { %v5297_v20 = vpop.f32.mrf.mxu1 }
0x18b0   : > { %v6176_v28 = vadd.f32 %v3503_v27, %v6052_v37  ;;  %v5439_v37 = vld [vmem:[%s6383_s10 + $0x10] sm:$0xff]  }
0x18b1   : > { %v3505_v30 = vpop.f32.mrf.mxu1  ;;  %5310 = vmatpush3.bf16.msra.mxu1 %v5439_v37 }
0x18b2   : > { %v3513_v31 = vsel %vm689_vm0, %v6176_v28, 0.0  ;;  %5325 = vmatprep.subr.mxu1 %v5566_v8 }
0x18b3   : > { %3514 = vadd.xlane.f32.xlu1 %v3513_v31  ;;  %v5298_v22 = vpop.f32.mrf.mxu1 }
0x18b4   : > { %5312 = vmatmul.mubr.msk.bf16.vlgmr.msra.gmra.mxu1 %vm747_vm2, %v5884_v4  ;;  %v4914_v4 = vld [vmem:[%s6391_s18 + $0x9] ss:$0 sm:$0xff] }
0x18b5   : > { %5327 = vmatprep.mubr.msk.f32.mxu1 %vm5567_vm1, %v5566_v8 }
0x193c   : > { %v3515_v34 = vpop.xlane.xlu1 %3514 }
0x193d   : > { %v3516_v35 = vmul.f32 0.03125, %v3515_v34 }
0x193f   : > { %v3517_v36 = vsub.f32 %v6176_v28, %v3516_v35 }
0x1941   : > { %v3518_v38 = vmul.f32 %v3517_v36, %v3517_v36 }
0x1943   : > { %v3519_v39 = vsel %vm689_vm0, %v3518_v38, 0.0 }
0x1944   : > { %3520 = vadd.xlane.f32.xlu0 %v3519_v39 }
0x1974   : > { %v3675_v32 = vpop.f32.mrf.mxu1 }
0x1975   : > { %v6214_v54 = vadd.f32 %v4934_v53, %v3675_v32 }
0x1976   : > { %v5313_v55 = vpop.f32.mrf.mxu1 }
0x1977   : > { %3848 = vrot.lane.b32.xlu0 %v6214_v54, %s6465_s23 }
0x1978   : > { %v3678_v56 = vpop.f32.mrf.mxu1 }
0x197a   : > { %v5314_v57 = vpop.f32.mrf.mxu1 }
0x19cd   : > { %v3521_v44 = vpop.xlane.xlu0 %3520 }
0x19ce   : > { %v3522_v45 = vmul.f32 0.03125, %v3521_v44 }
0x19d0   : > { %v3523_v33 = vadd.f32 1e-05, %v3522_v45 }
0x19d2   : > { %5508 = vrsqrt.f32 %v3523_v33 }
0x19df   : > { %v5509_v46 = vpop.eup %5508 }
0x19e0   : > { %v3525_v48 = vmul.f32 %v5509_v46, %v3517_v36 }
0x19e2   : > { %v3532_v49 = vmul.f32 %v4913_v47, %v3525_v48 }
0x19e4   : > { %v3539_v50 = vadd.f32 %v4914_v4, %v3532_v49 }
0x19e6   : > { %v3561_v51 = vpack.c.bf16 %v3539_v50, %v3539_v50 }
0x19e8   : > { %5304 = vmatmul.mubr.msk.bf16.vlgmr.msra.gmra.mxu0 %vm747_vm2, %v3561_v51 }
0x19e9   : > { %5317 = vmatprep.mubr.msk.f32.mxu0 %vm5567_vm1, %v5566_v8  ;;  %5316 = vmatpush3.xpose.msk.msra.mxu0 %vm799_vm3, %v6214_v54  ;;  %v3849_v58 = vpop.permute.xlu0 %3848 }
0x19ea   : > { %5320 = vmatprep.subr.mxu0 %v5566_v8  ;;  %5326 = vmatpush3.xpose.msk.msra.mxu1 %vm799_vm3, %v3849_v58 }
0x19eb   : > { %5335 = vmatprep.subr.mxu1 %v5566_v8 }
0x1aa8   : > { %v3617_v60 = vpop.f32.mrf.mxu0 }
0x1aa9   : > { %v3618_v61 = vadd.f32 %v4930_v59, %v3617_v60 }
0x1aaa   : > { %v5305_v62 = vpop.f32.mrf.mxu0 }
0x1aab   : > { %4013 = vrot.lane.b32.xlu0 %v3618_v61, %s6466_s7  ;;  %3846 = vrot.lane.b32.xlu1 %v3618_v61, %s6465_s23 }
0x1aac   : > { %5318 = vmatmul.mubr.msk.f32.vlgmr.msra.gmra.mxu0 %vm799_vm3, %v3618_v61  ;;  %v3620_v63 = vpop.f32.mrf.mxu0 }
0x1aad   : > { %5322 = vmatprep.mubr.msk.f32.mxu0 %vm5567_vm1, %v5566_v8 }
0x1aae   : > { %v5306_v1 = vpop.f32.mrf.mxu0 }
0x1aaf   : > { %4180 = vrot.lane.b32.xlu0 %v3618_v61, %s6456_s27  ;;  %4015 = vrot.lane.b32.xlu1 %v6214_v54, %s6466_s7 }
0x1ab3   : > { %4182 = vrot.lane.b32.xlu1 %v6214_v54, %s6456_s27 }
0x1b1d   : > { %v3847_v0 = vpop.permute.xlu1 %3846  ;;  %v4014_v3 = vpop.permute.xlu0 %4013 }
0x1b1e   : > { %5328 = vmatmul.mubr.msk.f32.vlgmr.msra.gmra.mxu1 %vm799_vm3, %v3847_v0 }
0x1b1f   : > { %5337 = vmatprep.mubr.msk.f32.mxu1 %vm5567_vm1, %v5566_v8 }
0x1b21   : > { %v4016_v2 = vpop.permute.xlu1 %4015  ;;  %v4181_v6 = vpop.permute.xlu0 %4180 }
0x1b22   : > { %5336 = vmatpush3.xpose.msk.msra.mxu1 %vm799_vm3, %v4016_v2 }
0x1b23   : > { %5345 = vmatprep.subr.mxu1 %v5566_v8 }
0x1b25   : > { %5338 = vmatmul.mubr.msk.f32.vlgmr.msra.gmra.mxu1 %vm799_vm3, %v4014_v3  ;;  %v4183_v5 = vpop.permute.xlu1 %4182  ;;  %v5442_v3 = vld [vmem:[%s6385_s12 + $0x18] sm:$0xff]  }
0x1b26   : > { %5346 = vmatpush3.xpose.msk.msra.mxu1 %vm799_vm3, %v4183_v5  ;;  %5347 = vmatprep.mubr.msk.f32.mxu1 %vm5567_vm1, %v5566_v8  ;;  %v5443_v5 = vld [vmem:[%s6385_s12 + $0x10] sm:$0xff]  }
0x1b27   : > { %5355 = vmatprep.subr.bf16.mxu1 %v5566_v8 }
0x1b29   : > { %5348 = vmatmul.mubr.msk.f32.vlgmr.msra.gmra.mxu1 %vm799_vm3, %v4181_v6 }
0x1b2a   : > { %5359 = vmatprep.mubr.msk.bf16.mxu1 %vm5567_vm1, %v5566_v8  ;;  %5356 = vmatpush3.bf16.msra.mxu1 %v5442_v3 }
0x1b2b   : > { %5357 = vmatprep.subr.bf16.mxu1 %v5566_v8 }
0x1b2e   : > { %5358 = vmatpush3.bf16.msra.mxu1 %v5443_v5 }
0x1b2f   : > { %5371 = vmatprep.subr.bf16.mxu1 %v5566_v8 }
0x1b6c   : > { %v3753_v52 = vpop.f32.mrf.mxu0 }
0x1b6d   : > { %v3757_v7 = vmul.f32 0.35355338, %v3753_v52 }
0x1b6e   : > { %v5319_v9 = vpop.f32.mrf.mxu0 }
0x1b6f   : > { %v3758_v10 = vadd.f32 %v3757_v7, %v5949_v41 }
0x1b71   : > { %v3759_v11 = vsel %vm1802_vm11, %v3758_v10, -inf }
0x1b72   : > { %3760 = vmax.xlane.f32.xlu1 %v3759_v11 }
0x1b83   : > { %3770 = vrot.lane.b32.xlu1 %v6214_v54, %s6459_s5  ;;  %s6474_s5 = sld [smem:[#allocation7_spill]] }
0x1bde   : > { %v3920_v12 = vpop.f32.mrf.mxu1 }
0x1bdf   : > { %v3924_v13 = vmul.f32 0.35355338, %v3920_v12 }
0x1be0   : > { %v5329_v14 = vpop.f32.mrf.mxu1 }
0x1be1   : > { %v3925_v15 = vadd.f32 %v3924_v13, %v5949_v41 }
0x1be3   : > { %v3926_v16 = vsel %vm1802_vm11, %v3925_v15, -inf }
0x1be4   : > { %3927 = vmax.xlane.f32.xlu0 %v3926_v16 }
0x1be5   : > { %v4087_v17 = vpop.f32.mrf.mxu1 }
0x1be6   : > { %v4091_v18 = vmul.f32 0.35355338, %v4087_v17 }
0x1be7   : > { %v5339_v19 = vpop.f32.mrf.mxu1 }
0x1be8   : > { %v4092_v21 = vadd.f32 %v4091_v18, %v5949_v41  ;;  %v4950_v19 = vld [vmem:[%s6386_s13 + $0x1] ss:$0 sm:$0xff] }
0x1be9   : > { %v4254_v23 = vpop.f32.mrf.mxu1 }
0x1bea   : > { %v4258_v24 = vmul.f32 0.35355338, %v4254_v23  ;;  %v4093_v25 = vsel %vm1802_vm11, %v4092_v21, -inf }
0x1beb   : > { %4094 = vmax.xlane.f32.xlu0 %v4093_v25  ;;  %v5349_v26 = vpop.f32.mrf.mxu1 }
0x1bec   : > { %v4259_v27 = vadd.f32 %v4258_v24, %v5949_v41 }
0x1bee   : > { %v4260_v20 = vsel %vm1802_vm11, %v4259_v27, -inf }
0x1bef   : > { %4261 = vmax.xlane.f32.xlu0 %v4260_v20 }
0x1bfb   : > { %v3761_v30 = vpop.xlane.xlu1 %3760 }
0x1bfc   : > { %v3762_v31 = vsub.f32 %v3758_v10, %v3761_v30 }
0x1bfe   : > { %v3763_v22 = vmul.f32 1.442695, %v3762_v31 }
0x1bff   : > { %v3771_v34 = vpop.permute.xlu1 %3770 }
0x1c00   : > { %5510 = vpow2.f32 %v3763_v22  ;;  %5321 = vmatpush3.msra.mxu0 %v3771_v34 }
0x1c01   : > { %5330 = vmatprep.subr.mxu0 %v5566_v8 }
0x1c0d   : > { %v5511_v35 = vpop.eup %5510 }
0x1c0e   : > { %v3765_v36 = vsel %vm1802_vm11, %v5511_v35, 0.0 }
0x1c0f   : > { %3766 = vadd.xlane.f32.xlu1 %v3765_v36  ;;  %v5444_v36 = vld [vmem:[%s6387_s14 + $0x18] sm:$0xff]  }
0x1c6d   : > { %v3928_v38 = vpop.xlane.xlu0 %3927 }
0x1c6e   : > { %v3929_v39 = vsub.f32 %v3925_v15, %v3928_v38  ;;  %v5446_v38 = vld [vmem:[%s6389_s16 + $0x38] sm:$0xff]  }
0x1c70   : > { %v3930_v40 = vmul.f32 1.442695, %v3929_v39  ;;  %v5447_v39 = vld [vmem:[%s6389_s16 + $0x30] sm:$0xff]  }
0x1c72   : > { %5512 = vpow2.f32 %v3930_v40 }
0x1c74   : > { %v4095_v41 = vpop.xlane.xlu0 %4094 }
0x1c75   : > { %v4096_v37 = vsub.f32 %v4092_v21, %v4095_v41 }
0x1c77   : > { %v4097_v42 = vmul.f32 1.442695, %v4096_v37 }
0x1c78   : > { %v4262_v43 = vpop.xlane.xlu0 %4261 }
0x1c79   : > { %5514 = vpow2.f32 %v4097_v42  ;;  %v4263_v44 = vsub.f32 %v4259_v27, %v4262_v43  ;;  %v4956_v43 = vld [vmem:[%s6391_s18 + $0xa] ss:$0 sm:$0xff] }
0x1c7b   : > { %v4264_v45 = vmul.f32 1.442695, %v4263_v44 }
0x1c7d   : > { %5516 = vpow2.f32 %v4264_v45  ;;  %v4957_v45 = vld [vmem:[%s6391_s18 + $0xb] ss:$0 sm:$0xff] }
0x1c7f   : > { %v5513_v33 = vpop.eup %5512 }
0x1c80   : > { %v3932_v46 = vsel %vm1802_vm11, %v5513_v33, 0.0 }
0x1c81   : > { %3933 = vadd.xlane.f32.xlu0 %v3932_v46 }
0x1c86   : > { %v5515_v47 = vpop.eup %5514 }
0x1c87   : > { %v4099_v48 = vsel %vm1802_vm11, %v5515_v47, 0.0 }
0x1c88   : > { %4100 = vadd.xlane.f32.xlu1 %v4099_v48  ;;  %v5448_v48 = vld [vmem:[%s6389_s16 + $0x28] sm:$0xff]  }
0x1c8a   : > { %v5517_v4 = vpop.eup %5516 }
0x1c8b   : > { %v4266_v49 = vsel %vm1802_vm11, %v5517_v4, 0.0 }
0x1c8c   : > { %4267 = vadd.xlane.f32.xlu0 %v4266_v49  ;;  %v4972_v49 = vld [vmem:[%s6388_s15 + $0x1] ss:$0 sm:$0xff] }
0x1c98   : > { %v3767_v50 = vpop.xlane.xlu1 %3766 }
0x1c99   : > { %5518 = vrcp.f32 %v3767_v50  ;;  %4104 = vrot.lane.b32.xlu1 %v6214_v54, %s6458_s6  ;;  %s6473_s6 = sld [smem:[#allocation19_spill]] }
0x1c9d   : > { %4271 = vrot.lane.b32.xlu1 %v6214_v54, %s6460_s8 }
0x1ca2   : > { %3937 = vrot.lane.b32.xlu0 %v6214_v54, %s6457_s17 }
0x1ca6   : > { %v5519_v51 = vpop.eup %5518 }
0x1ca7   : > { %v3769_v53 = vmul.f32 %v5519_v51, %v5511_v35 }
0x1ca9   : > { %5323 = vmatmul.mubr.msk.f32.vlgmr.msra.gmra.mxu0 %vm799_vm3, %v3769_v53 }
0x1caa   : > { %5332 = vmatprep.mubr.msk.f32.mxu0 %vm5567_vm1, %v5566_v8 }
0x1d0a   : > { %v3934_v32 = vpop.xlane.xlu0 %3933 }
0x1d0b   : > { %5520 = vrcp.f32 %v3934_v32 }
0x1d11   : > { %v4101_v55 = vpop.xlane.xlu1 %4100 }
0x1d12   : > { %5522 = vrcp.f32 %v4101_v55 }
0x1d15   : > { %v4268_v56 = vpop.xlane.xlu0 %4267  ;;  %v4105_v60 = vpop.permute.xlu1 %4104 }
0x1d16   : > { %5524 = vrcp.f32 %v4268_v56 }
0x1d18   : > { %v5521_v57 = vpop.eup %5520 }
0x1d19   : > { %v3938_v58 = vpop.permute.xlu0 %3937  ;;  %v3936_v59 = vmul.f32 %v5521_v57, %v5513_v33  ;;  %v4272_v62 = vpop.permute.xlu1 %4271 }
0x1d1a   : > { %5331 = vmatpush3.msra.mxu0 %v3938_v58  ;;  %v4976_v58 = vld [vmem:[%s6464_s19 + $0x1] ss:$0 sm:$0xff] }
0x1d1b   : > { %5333 = vmatmul.mubr.msk.f32.vlgmr.msra.gmra.mxu0 %vm799_vm3, %v3936_v59  ;;  %5340 = vmatprep.subr.mxu0 %v5566_v8 }
0x1d1c   : > { %5341 = vmatpush3.msra.mxu0 %v4105_v60  ;;  %5342 = vmatprep.mubr.msk.f32.mxu0 %vm5567_vm1, %v5566_v8 }
0x1d1d   : > { %5350 = vmatprep.subr.mxu0 %v5566_v8 }
0x1d1f   : > { %v5523_v54 = vpop.eup %5522 }
0x1d20   : > { %v4103_v61 = vmul.f32 %v5523_v54, %v5515_v47 }
0x1d22   : > { %5343 = vmatmul.mubr.msk.f32.vlgmr.msra.gmra.mxu0 %vm799_vm3, %v4103_v61 }
0x1d23   : > { %v5525_v63 = vpop.eup %5524  ;;  %5351 = vmatpush3.msra.mxu0 %v4272_v62  ;;  %5352 = vmatprep.mubr.msk.f32.mxu0 %vm5567_vm1, %v5566_v8 }
0x1d24   : > { %v4270_v1 = vmul.f32 %v5525_v63, %v5517_v4  ;;  %5363 = vmatprep.subr.bf16.mxu0 %v5566_v8  ;;  %v5449_v4 = vld [vmem:[%s6389_s16 + $0x20] sm:$0xff]  }
0x1d26   : > { %5353 = vmatmul.mubr.msk.f32.vlgmr.msra.gmra.mxu0 %vm799_vm3, %v4270_v1 }
0x1d27   : > { %5367 = vmatprep.mubr.msk.bf16.mxu0 %vm5567_vm1, %v5566_v8  ;;  %5364 = vmatpush3.bf16.msra.mxu0 %v5444_v36 }
0x1d28   : > { %5365 = vmatprep.subr.bf16.mxu0 %v5566_v8 }
0x1d69   : > { %v3842_v0 = vpop.f32.mrf.mxu0 }
0x1d6b   : > { %v5324_v2 = vpop.f32.mrf.mxu0 }
0x1ddb   : > { %v4009_v6 = vpop.f32.mrf.mxu0 }
0x1ddc   : > { %4348 = vrot.lane.b32.xlu1 %v4009_v6, %s6461_s29  ;;  %s6475_s29 = sld [smem:[#allocation20_spill]] }
0x1ddd   : > { %v5334_v52 = vpop.f32.mrf.mxu0 }
0x1dde   : > { %v5450_v52 = vld [vmem:[%s6394_s21 + $0x8] sm:$0xff]  }
0x1de2   : > { %v4176_v7 = vpop.f32.mrf.mxu0 }
0x1de3   : > { %4352 = vrot.lane.b32.xlu0 %v4176_v7, %s6462_s26  ;;  %v5451_v7 = vld [vmem:[%s6394_s21] sm:$0xff]  }
0x1de4   : > { %v5344_v9 = vpop.f32.mrf.mxu0 }
0x1de6   : > { %v4343_v10 = vpop.f32.mrf.mxu0 }
0x1de7   : > { %4356 = vrot.lane.b32.xlu1 %v4343_v10, %s6463_s30  ;;  %s680_s30 = scalar_lea.vmem %s6475_s29, %s6474_s5 }
0x1de8   : > { %v5354_v11 = vpop.f32.mrf.mxu0 }
0x1e4e   : > { %v4349_v12 = vpop.permute.xlu1 %4348 }
0x1e4f   : > { %v4359_v14 = vsel %vm799_vm3, %v3842_v0, %v4349_v12 }
0x1e55   : > { %v4353_v13 = vpop.permute.xlu0 %4352 }
0x1e56   : > { %v4360_v15 = vsel %vm1484_vm8, %v4359_v14, %v4353_v13  ;;  %v4982_v13 = vld [vmem:[%s6471_s28] ss:$0 sm:$0xff] }
0x1e59   : > { %v4357_v16 = vpop.permute.xlu1 %4356 }
0x1e5a   : > { %v4361_v17 = vsel %vm1486_vm9, %v4360_v15, %v4357_v16  ;;  %v4983_v15 = vld [vmem:[%s6472_s2] ss:$0 sm:$0xff] }
0x1e5b   : > { %v4362_v18 = vpack.c.bf16 %v4361_v17, %v4361_v17 }
0x1e5d   : > { %5360 = vmatmul.mubr.msk.bf16.vlgmr.msra.gmra.mxu1 %vm747_vm2, %v4362_v18 }
0x1e5e   : > { %5379 = vmatprep.mubr.msk.bf16.mxu1 %vm5567_vm1, %v5566_v8  ;;  %5372 = vmatpush3.bf16.msra.mxu1 %v5446_v38 }
0x1e5f   : > { %5373 = vmatprep.subr.bf16.mxu1 %v5566_v8 }
0x1e62   : > { %5374 = vmatpush3.bf16.msra.mxu1 %v5447_v39 }
0x1e63   : > { %5375 = vmatprep.subr.bf16.mxu1 %v5566_v8 }
0x1e66   : > { %5376 = vmatpush3.bf16.msra.mxu1 %v5448_v48 }
0x1e67   : > { %5377 = vmatprep.subr.bf16.mxu1 %v5566_v8 }
0x1e6a   : > { %5378 = vmatpush3.bf16.msra.mxu1 %v5449_v4 }
0x1f1d   : > { %v4418_v21 = vpop.f32.mrf.mxu1 }
0x1f1e   : > { %v4419_v23 = vadd.f32 %v4950_v19, %v4418_v21 }
0x1f1f   : > { %v5361_v24 = vpop.f32.mrf.mxu1 }
0x1f20   : > { %v4424_v25 = vadd.f32 %v4419_v23, %v6176_v28  ;;  %v5445_v28 = vld [vmem:[%s6387_s14 + $0x10] sm:$0xff]  }
0x1f21   : > { %v4421_v26 = vpop.f32.mrf.mxu1  ;;  %5366 = vmatpush3.bf16.msra.mxu0 %v5445_v28 }
0x1f22   : > { %v4429_v27 = vsel %vm689_vm0, %v4424_v25, 0.0  ;;  %5383 = vmatprep.subr.bf16.mxu0 %v5566_v8 }
0x1f23   : > { %4430 = vadd.xlane.f32.xlu0 %v4429_v27  ;;  %v5362_v20 = vpop.f32.mrf.mxu1 }
0x1fac   : > { %v4431_v30 = vpop.xlane.xlu0 %4430 }
0x1fad   : > { %v4432_v31 = vmul.f32 0.03125, %v4431_v30 }
0x1faf   : > { %v4433_v22 = vsub.f32 %v4424_v25, %v4432_v31 }
0x1fb1   : > { %v4434_v34 = vmul.f32 %v4433_v22, %v4433_v22 }
0x1fb3   : > { %v4435_v35 = vsel %vm689_vm0, %v4434_v34, 0.0 }
0x1fb4   : > { %4436 = vadd.xlane.f32.xlu1 %v4435_v35 }
0x203d   : > { %v4437_v40 = vpop.xlane.xlu1 %4436 }
0x203e   : > { %v4438_v41 = vmul.f32 0.03125, %v4437_v40 }
0x2040   : > { %v4439_v37 = vadd.f32 1e-05, %v4438_v41 }
0x2042   : > { %5526 = vrsqrt.f32 %v4439_v37 }
0x204f   : > { %v5527_v42 = vpop.eup %5526 }
0x2050   : > { %v4441_v44 = vmul.f32 %v5527_v42, %v4433_v22 }
0x2052   : > { %v4448_v33 = vmul.f32 %v4956_v43, %v4441_v44 }
0x2054   : > { %v4455_v46 = vadd.f32 %v4957_v45, %v4448_v33 }
0x2056   : > { %v4474_v47 = vpack.c.bf16 %v4455_v46, %v4455_v46 }
0x2058   : > { %5368 = vmatmul.mubr.msk.bf16.vlgmr.msra.gmra.mxu0 %vm747_vm2, %v4474_v47 }
0x2059   : > { %5387 = vmatprep.mubr.msk.bf16.mxu0 %vm5567_vm1, %v5566_v8  ;;  %5384 = vmatpush3.bf16.msra.mxu0 %v5450_v52 }
0x205a   : > { %5385 = vmatprep.subr.bf16.mxu0 %v5566_v8  ;;  %v4984_v8 = vld [vmem:[%s6473_s6] ss:$0 sm:$0xff] }
0x205d   : > { %5386 = vmatpush3.bf16.msra.mxu0 %v5451_v7 }
0x2118   : > { %v4530_v50 = vpop.f32.mrf.mxu0 }
0x2119   : > { %v4531_v51 = vadd.f32 %v4972_v49, %v4530_v50 }
0x211a   : > { %v5369_v53 = vpop.f32.mrf.mxu0 }
0x211b   : > { %v4536_v32 = vmax.f32 %v4531_v51, 0.0 }
0x211c   : > { %v4533_v55 = vpop.f32.mrf.mxu0 }
0x211d   : > { %v4537_v56 = vpack.c.bf16 %v4536_v32, %v4536_v32 }
0x211e   : > { %v5370_v57 = vpop.f32.mrf.mxu0 }
0x211f   : > { %5380 = vmatmul.mubr.msk.bf16.vlgmr.msra.gmra.mxu1 %vm2608_vm12, %v4537_v56 }
0x21df   : > { %v4605_v59 = vpop.f32.mrf.mxu1 }
0x21e0   : > { %v4606_v60 = vadd.f32 %v4976_v58, %v4605_v59 }
0x21e1   : > { %v5381_v54 = vpop.f32.mrf.mxu1 }
0x21e2   : > { %v4611_v61 = vadd.f32 %v4606_v60, %v4424_v25 }
0x21e3   : > { %v4608_v62 = vpop.f32.mrf.mxu1 }
0x21e4   : > { %v4614_v63 = vsel %vm689_vm0, %v4611_v61, 0.0 }
0x21e5   : > { %4615 = vadd.xlane.f32.xlu0 %v4614_v63  ;;  %v5382_v1 = vpop.f32.mrf.mxu1 }
0x226e   : > { %v4616_v0 = vpop.xlane.xlu0 %4615 }
0x226f   : > { %v4617_v2 = vmul.f32 0.03125, %v4616_v0 }
0x2271   : > { %v4618_v3 = vsub.f32 %v4611_v61, %v4617_v2 }
0x2273   : > { %v4619_v5 = vmul.f32 %v4618_v3, %v4618_v3 }
0x2275   : > { %v4620_v6 = vsel %vm689_vm0, %v4619_v5, 0.0  ;;  %vm4729_vm0 = vcmask 4096  }
0x2276   : > { %4621 = vadd.xlane.f32.xlu0 %v4620_v6 }
0x22ff   : > { %v4622_v9 = vpop.xlane.xlu0 %4621 }
0x2300   : > { %v4623_v10 = vmul.f32 0.03125, %v4622_v9 }
0x2302   : > { %v4624_v11 = vadd.f32 1e-05, %v4623_v10 }
0x2304   : > { %5528 = vrsqrt.f32 %v4624_v11 }
0x2311   : > { %v5529_v12 = vpop.eup %5528 }
0x2312   : > { %v4626_v14 = vmul.f32 %v5529_v12, %v4618_v3 }
0x2314   : > { %v4633_v16 = vmul.f32 %v4982_v13, %v4626_v14 }
0x2316   : > { %v4640_v17 = vadd.f32 %v4983_v15, %v4633_v16 }
0x2318   : > { %v4641_v18 = vpack.c.bf16 %v4640_v17, %v4640_v17 }
0x231a   : > { %5388 = vmatmul.mubr.msk.bf16.vlgmr.msra.gmra.mxu0 %vm747_vm2, %v4641_v18 }
0x23da   : > { %v4702_v19 = vpop.f32.mrf.mxu0 }
0x23db   : > { %v4703_v21 = vadd.f32 %v4984_v8, %v4702_v19 }
0x23dc   : > { %v5389_v23 = vpop.f32.mrf.mxu0 }
0x23dd   : > { %v4709_v24 = vsel %vm4708_vm13, %v4703_v21, -inf }
0x23de   : > { %4710 = vmax.xlane.f32.xlu0 %v4709_v24  ;;  %v4705_v25 = vpop.f32.mrf.mxu0 }
0x23e0   : > { %v5390_v26 = vpop.f32.mrf.mxu0 }
0x2467   : > { %v4711_v27 = vpop.xlane.xlu0 %4710 }
0x2468   : > { %vm4712_vm14 = vcmp.eq.f32.partialorder %v4703_v21, %v4711_v27 }
0x2469   : > { %v4713_v20 = vsel %vm4712_vm14, %v5776_v29, 64 }
0x246a   : > { %v4714_v30 = vsel %vm4708_vm13, %v4713_v20, 2147483647 }
0x246b   : > { %v4716_v31 = vshra.s32 %v4714_v30, 16  ;;  %v4715_v34 = vand.u32 65535, %v4714_v30 }
0x246d   : > { %v4718_v22 = vcvt.s32.f32 %v4716_v31  ;;  %v4717_v36 = vcvt.s32.f32 %v4715_v34 }
0x246f   : > { %4719 = vmin.xlane.f32.xlu1 %v4718_v22 }
0x24f8   : > { %v4720_v35 = vpop.xlane.xlu1 %4719 }
0x24f9   : > { %vm4721_vm15 = vcmp.eq.f32.partialorder %v4718_v22, %v4720_v35  ;;  %v4726_v38 = vcvt.f32.s32 %v4720_v35 }
0x24fa   : > { %v4722_v28 = vsel %vm4721_vm15, %v4717_v36, inf }
0x24fb   : > { %4723 = vmin.xlane.f32.xlu0 %v4722_v28  ;;  %v4727_v40 = vshll.u32 %v4726_v38, 16 }
0x2584   : > { %v4724_v39 = vpop.xlane.xlu0 %4723 }
0x2585   : > { %v4725_v41 = vcvt.f32.s32 %v4724_v39 }
0x2587   : > { %v4728_v29 = vadd.s32 %v4727_v40, %v4725_v41 }
0x2589   : > { %4730 = vst.msk [vmem:[%s680_s30] sm:$0x1f] %vm4729_vm0, %v4728_v29 }
0x258a PF: > { %s6476_s23 = sld [smem:[#allocation6_spill]] }
0x2590   : > { %s43_s1 = sadd.s32 1, %s6476_s23  }
0x2591   : > { %p40_p0 = scmp.ge.s32.totalorder %s43_s1, 4  }
0x2593   :  { %42 = sbr.rel (!%p40_p0) target bundleno = 45 (0x2d), region = 162 }

// kernel: paraformer_forward.5
= control target key start
LH: loop header
LB: loop body
LE: loop exit
PB: predicated region body
PF: predicated region fallthrough
CT: control target
= control target key end

     0   :  { %s6464_s0 = inlined_call_operand.vmem [shape: s32[2], index: 0, kind: input, shape index: {}]   ;;  %s6465_s2 = inlined_call_operand.vmem [shape: f32[2,5,32], index: 2, kind: input, shape index: {}]   ;;  %s6466_s3 = inlined_call_operand.vmem [shape: f32[2,8,32], index: 3, kind: input, shape index: {}]   ;;  %s6467_s4 = inlined_call_operand.vmem [shape: bf16[2,32,96], index: 4, kind: input, shape index: {}]   ;;  %s6468_s5 = inlined_call_operand.vmem [shape: f32[2,1,96], index: 5, kind: input, shape index: {}]   ;;  %s6469_s6 = inlined_call_operand.vmem [shape: bf16[2,32,32], index: 6, kind: input, shape index: {}]   ;;  %s6470_s7 = inlined_call_operand.vmem [shape: f32[2,1,32], index: 7, kind: input, shape index: {}]   ;;  %s6471_s8 = inlined_call_operand.vmem [shape: bf16[2,32,32], index: 8, kind: input, shape index: {}]   ;;  %s6472_s9 = inlined_call_operand.vmem [shape: f32[2,1,32], index: 9, kind: input, shape index: {}]   ;;  %s6473_s10 = inlined_call_operand.vmem [shape: bf16[2,32,64], index: 10, kind: input, shape index: {}]   ;;  %s6474_s11 = inlined_call_operand.vmem [shape: f32[2,1,64], index: 11, kind: input, shape index: {}]   ;;  %s6475_s12 = inlined_call_operand.vmem [shape: bf16[2,32,32], index: 12, kind: input, shape index: {}]   ;;  %s6476_s13 = inlined_call_operand.vmem [shape: f32[2,1,32], index: 13, kind: input, shape index: {}]   ;;  %s6477_s14 = inlined_call_operand.vmem [shape: bf16[2,32,64], index: 14, kind: input, shape index: {}]   ;;  %s6478_s15 = inlined_call_operand.vmem [shape: f32[2,1,64], index: 15, kind: input, shape index: {}]   ;;  %s6479_s16 = inlined_call_operand.vmem [shape: bf16[2,64,32], index: 16, kind: input, shape index: {}]   ;;  %s6480_s17 = inlined_call_operand.vmem [shape: f32[2,1,32], index: 17, kind: input, shape index: {}]   ;;  %s6481_s18 = inlined_call_operand.vmem [shape: f32[2,6,1,32], index: 18, kind: input, shape index: {}]   ;;  %s6482_s19 = inlined_call_operand.vmem [shape: f32[1,32], index: 19, kind: input, shape index: {}]   ;;  %s6483_s20 = inlined_call_operand.vmem [shape: f32[1,32], index: 20, kind: input, shape index: {}]   ;;  %s6484_s21 = inlined_call_operand.vmem [shape: bf16[32,64], index: 21, kind: input, shape index: {}]   ;;  %s6485_s22 = inlined_call_operand.vmem [shape: f32[1,64], index: 22, kind: input, shape index: {}]   ;;  %s6486_s23 = inlined_call_operand.vmem [shape: s32[2,5,1], index: 23, kind: input, shape index: {}]   ;;  %s6487_s24 = inlined_call_operand.vmem [shape: f32[2,1,1], index: 24, kind: output, shape index: {}]   ;;  %s6488_s1 = inlined_call_operand.vmem [shape: s32[2], index: 1, kind: input, shape index: {}]  }
   0x1   :  { %6524 = sst [smem:[#allocation9_spill]] %s6464_s0 }
   0x2   :  { %6525 = sst [smem:[#allocation10_spill]] %s6465_s2 }
   0x3   :  { %6526 = sst [smem:[#allocation11_spill]] %s6466_s3  ;;  %s33_s3 = sshll.u32 %s6488_s1, 4  ;;  %s34_s3 = int_to_ptr.vmem [resolvable:$true] %s33_s3 }
   0x4   :  { %6527 = sst [smem:[#allocation12_spill]] %s6467_s4 }
   0x5   :  { %6528 = sst [smem:[#allocation13_spill]] %s6468_s5 }
   0x6   :  { %6529 = sst [smem:[#allocation14_spill]] %s6469_s6 }
   0x7   :  { %6530 = sst [smem:[#allocation15_spill]] %s6470_s7 }
   0x8   :  { %6531 = sst [smem:[#allocation16_spill]] %s6471_s8 }
   0x9   :  { %6532 = sst [smem:[#allocation17_spill]] %s6472_s9 }
   0xa   :  { %6533 = sst [smem:[#allocation18_spill]] %s6476_s13 }
   0xb   :  { %6534 = sst [smem:[#allocation19_spill]] %s6482_s19 }
   0xc   :  { %6535 = sst [smem:[#allocation20_spill]] %s6483_s20 }
   0xd   :  { %6536 = sst [smem:[#allocation21_spill]] %s6484_s21 }
   0xe   :  { %6537 = sst [smem:[#allocation22_spill]] %s6485_s22 }
   0xf   :  { %6538 = sst [smem:[#allocation23_spill]] %s6486_s23 }
  0x10   :  { %6539 = sst [smem:[#allocation24_spill]] %s6487_s24 }
  0x11   :  { %s6540_s27 = sld [smem:[#allocation9_spill]] }
  0x17   :  { %s29_s19 = sshll.u32 %s6540_s27, 4  ;;  %s30_s19 = int_to_ptr.vmem [resolvable:$true] %s29_s19 }
  0x18   :  { %s5603_s29 = scalar_lea.vmem %s30_s19, 16  ;;  %p5608_p1 = scmp.lt.s32.totalorder %s30_s19, %s30_s19 }
  0x19   :  { %p5604_p0 = scmp.ne.s32.totalorder %s30_s19, %s5603_s29  ;;  %p5609_p2 = scmp.lt.s32.totalorder %s5603_s29, %s5603_s29 }
  0x1b   :  { %p5610_p3 = por %p5609_p2, %p5608_p1 }
  0x1d   :  { %p5611_p4 = pnand %p5610_p3, %p5604_p0 }
  0x1f   :  { %5614 = shalt.err (!%p5611_p4)  }
  0x20   :  { %s5637_s0 = smov [#allocation3]   ;;  %s5615_s8 = scalar_lea.vmem %s34_s3, 16 }
  0x21   :  { %32 = dma.vmem_to_smem %s30_s19, 16, %s5637_s0, [#allocation2] }
  0x22   :  { %p5616_p5 = scmp.ne.s32.totalorder %s34_s3, %s5615_s8  ;;  %p5620_p6 = scmp.lt.s32.totalorder %s34_s3, %s34_s3 }
  0x23   :  { %p5621_p7 = scmp.lt.s32.totalorder %s5615_s8, %s5615_s8 }
  0x25   :  { %p5622_p8 = por %p5621_p7, %p5620_p6 }
  0x27   :  { %p5623_p9 = pnand %p5622_p8, %p5616_p5 }
  0x29   :  { %5626 = shalt.err (!%p5623_p9)  }
  0x2a   :  { %s5638_s30 = smov [#allocation4]  }
  0x2b   :  { %36 = dma.vmem_to_smem %s34_s3, 16, %s5638_s30, [#allocation2] }
  0x2c   :  { %5631 = dma.done.wait [#allocation2], 32 }
  0x2d   :  { %5632 = vsyncadd [#allocation2], 4294967264 }
  0x2e   :  { %38 = sfence }
  0x2f   :  { %s5788_s1 = smov 0  }
  0x30 LB: > { %6541 = sst [smem:[#allocation6_spill]] %s5635_s1  ;;  %s5794_s19 = sadd.s32 4294967295, %s5635_s1   ;;  %s5635_s1 = sphi %s5788_s1, %s44_s1  }
  0x31   : > { %p4867_p10 = scmp.ge.s32.totalorder %s5635_s1, 1  ;;  %p641_p11 = scmp.lt.s32.totalorder %s5635_s1, 3 }
  0x33   : > { %p642_p12 = pnand %p4867_p10, %p641_p11 }
  0x35   : > { %645 = sbr.rel (%p642_p12) target bundleno = 9663 (0x25bf), region = 108 }
  0x3a   : > { %p708_p13 = scmp.lt.s32.totalorder %s5794_s19, 1  ;;  %vm731_vm0 = vcmask 258048   ;;  %s6544_s2 = sld [smem:[#allocation10_spill]]  ;;  %v5639_v8 = vmov 0.0   ;;  %vm5640_vm1 = vmmov 0   ;;  %vm789_vm2 = vcmask 261120  }
  0x3b   : > { %s6545_s28 = sld [smem:[#allocation12_spill]]  ;;  %5170 = vmatprep.subr.bf16.mxu0 %v5639_v8  ;;  %5174 = vmatprep.mubr.msk.bf16.mxu0 %vm5640_vm1, %v5639_v8  ;;  %v4872_v14 = vld [vmem:[%s6481_s18] ss:$0 sm:$0xff]  ;;  %v4873_v16 = vld [vmem:[%s6481_s18 + $0x1] ss:$0 sm:$0xff]  ;;  %s6501_s26 = smov 96   ;;  %v833_v28 = vlaneseq }
  0x3c   : > { %s5800_s4 = scalar_select %p708_p13, %s5794_s19, 1  ;;  %5178 = vmatprep.subr.mxu1 %v5639_v8  ;;  %5180 = vmatprep.mubr.msk.f32.mxu1 %vm5640_vm1, %v5639_v8  ;;  %vm841_vm3 = vcmask 64512   ;;  %vm936_vm4 = vcmask 1044480   ;;  %v5644_v32 = vmov -1e+09   ;;  %vm918_vm6 = vcmask 36864  }
  0x3d   : > { %s6511_s27 = smov 88   ;;  %s724_s7 = sld [smem:[#allocation3 + %s5794_s19]]  ;;  %v5858_v29 = vand.u32 127, %v833_v28  ;;  %vm932_vm7 = vcmask 39936   ;;  %vm1526_vm8 = vcmask 130048   ;;  %vm1528_vm9 = vcmask 195584  }
  0x3e   : > { %6542 = sst [smem:[#allocation7_spill]] %s5800_s4  ;;  %s5803_s25 = sshll.u32 %s5800_s4, 3  ;;  %vm1844_vm11 = vcmask 61440   ;;  %vm2650_vm12 = vcmask 523264   ;;  %vm4751_vm13 = vcmask 520192  }
  0x3f   : > { %6543 = sst [smem:[#allocation8_spill]] %s5803_s25  ;;  %s6503_s3 = smov 80  }
  0x40   : > { %s711_s6 = scalar_lea.vmem %s6544_s2, %s5803_s25  ;;  %s6546_s2 = sld [smem:[#allocation13_spill]] }
  0x41   : > { %v5809_v0 = vld [vmem:[%s711_s6] sm:$0x1f]  ;;  %v5487_v7 = vld [vmem:[%s6545_s28 + $0x8] sm:$0xff]   ;;  %s6496_s6 = smov 64   ;;  %s6517_s29 = smov 120  }
  0x42   : > { %v732_v1 = vsel %vm731_vm0, %v5809_v0, 0.0  ;;  %5171 = vmatpush3.bf16.msra.mxu0 %v5487_v7  ;;  %v5488_v9 = vld [vmem:[%s6545_s28] sm:$0xff]   ;;  %s6515_s0 = smov 112   ;;  %s6499_s8 = smov 72  }
  0x43   : > { %733 = vadd.xlane.f32.xlu0 %v732_v1  ;;  %5172 = vmatprep.subr.bf16.mxu0 %v5639_v8  ;;  %v835_v30 = vstv %s724_s7  ;;  %s6513_s30 = smov 104   ;;  %s6497_s9 = smov 48  }
  0x44   : > { %vm836_vm5 = vcmp.lt.s32.totalorder %v5858_v29, %v835_v30  ;;  %s6495_s5 = smov 40   ;;  %s6498_s7 = smov 56  }
  0x45   : > { %v5862_v33 = vsel %vm836_vm5, 0.0, %v5644_v32  ;;  %s6558_s1 = smov 8   ;;  %s6559_s24 = smov 16  }
  0x46   : > { %5173 = vmatpush3.bf16.msra.mxu0 %v5488_v9  ;;  %v4874_v20 = vld [vmem:[%s6546_s2] ss:$0 sm:$0xff]  ;;  %s6561_s13 = sld [smem:[#allocation18_spill]]  ;;  %s6562_s23 = smov 120  }
  0x47   : > { %5193 = vmatprep.subr.mxu0 %v5639_v8  ;;  %s6563_s4 = smov 56   ;;  %s6564_s22 = smov 48  }
  0x48   : > { %s6566_s20 = smov 40   ;;  %s6575_s21 = sld [smem:[#allocation24_spill]] }
  0xcc   : > { %v734_v2 = vpop.xlane.xlu0 %733 }
  0xcd   : > { %v736_v3 = vmul.f32 0.03125, %v734_v2 }
  0xcf   : > { %v737_v4 = vsub.f32 %v5809_v0, %v736_v3 }
  0xd1   : > { %v738_v5 = vmul.f32 %v737_v4, %v737_v4 }
  0xd3   : > { %v739_v6 = vsel %vm731_vm0, %v738_v5, 0.0 }
  0xd4   : > { %740 = vadd.xlane.f32.xlu0 %v739_v6 }
 0x15d   : > { %v741_v10 = vpop.xlane.xlu0 %740 }
 0x15e   : > { %v742_v11 = vmul.f32 0.03125, %v741_v10 }
 0x160   : > { %v743_v12 = vadd.f32 1e-05, %v742_v11 }
 0x162   : > { %5521 = vrsqrt.f32 %v743_v12 }
 0x16f   : > { %v5522_v13 = vpop.eup %5521 }
 0x170   : > { %v745_v15 = vmul.f32 %v5522_v13, %v737_v4 }
 0x172   : > { %v752_v17 = vmul.f32 %v4872_v14, %v745_v15 }
 0x174   : > { %v759_v18 = vadd.f32 %v4873_v16, %v752_v17 }
 0x176   : > { %v770_v19 = vpack.c.bf16 %v759_v18, %v759_v18 }
 0x178   : > { %5175 = vmatmul.mubr.msk.bf16.vlgmr.msra.gmra.mxu0 %vm789_vm2, %v770_v19 }
 0x179   : > { %5195 = vmatprep.mubr.msk.f32.mxu0 %vm5640_vm1, %v5639_v8 }
 0x238   : > { %v827_v21 = vpop.f32.mrf.mxu0 }
 0x239   : > { %v5841_v22 = vadd.f32 %v4874_v20, %v827_v21 }
 0x23a   : > { %v5176_v23 = vpop.f32.mrf.mxu0 }
 0x23b   : > { %930 = vrot.lane.b32.xlu0 %v5841_v22, %s6496_s6  ;;  %839 = vrot.lane.b32.xlu1 %v5841_v22, %s6501_s26  ;;  %s6509_s26 = smov 8   ;;  %s6505_s6 = smov 24  }
 0x23c   : > { %v830_v24 = vpop.f32.mrf.mxu0 }
 0x23e   : > { %v5177_v25 = vpop.f32.mrf.mxu0 }
 0x23f   : > { %1011 = vrot.lane.b32.xlu0 %v5841_v22, %s6511_s27  ;;  %s725_s27 = sld [smem:[#allocation4 + %s5794_s19]]  ;;  %s6554_s19 = smov 88  }
 0x2ad   : > { %v840_v26 = vpop.permute.xlu1 %839  ;;  %v931_v27 = vpop.permute.xlu0 %930 }
 0x2ae   : > { %5179 = vmatpush3.xpose.msk.msra.mxu1 %vm841_vm3, %v840_v26 }
 0x2af   : > { %5183 = vmatprep.subr.mxu1 %v5639_v8 }
 0x2b1   : > { %5181 = vmatmul.mubr.msk.f32.vlgmr.msra.gmra.mxu1 %vm841_vm3, %v5841_v22  ;;  %v1012_v43 = vpop.permute.xlu0 %1011 }
 0x2b2   : > { %5184 = vmatpush3.msk.msra.mxu1 %vm936_vm4, %v931_v27  ;;  %5185 = vmatprep.mubr.msk.f32.mxu1 %vm5640_vm1, %v5639_v8 }
 0x2b3   : > { %5188 = vmatprep.subr.mxu1 %v5639_v8 }
 0x371   : > { %v912_v31 = vpop.f32.mrf.mxu1 }
 0x372   : > { %v916_v34 = vmul.f32 0.35355338, %v912_v31 }
 0x373   : > { %v5182_v35 = vpop.f32.mrf.mxu1 }
 0x374   : > { %v917_v36 = vadd.f32 %v916_v34, %v5862_v33 }
 0x376   : > { %v919_v37 = vsel %vm918_vm6, %v917_v36, -inf }
 0x377   : > { %920 = vmax.xlane.f32.xlu1 %v919_v37 }
 0x388   : > { %1179 = vrot.lane.b32.xlu1 %v5841_v22, %s6503_s3  ;;  %s6507_s3 = smov 16  }
 0x400   : > { %v921_v38 = vpop.xlane.xlu1 %920 }
 0x401   : > { %v922_v39 = vsub.f32 %v917_v36, %v921_v38 }
 0x403   : > { %v923_v40 = vmul.f32 1.442695, %v922_v39 }
 0x404   : > { %v1180_v49 = vpop.permute.xlu1 %1179 }
 0x405   : > { %5523 = vpow2.f32 %v923_v40 }
 0x412   : > { %v5524_v41 = vpop.eup %5523 }
 0x413   : > { %v925_v42 = vsel %vm918_vm6, %v5524_v41, 0.0 }
 0x414   : > { %926 = vadd.xlane.f32.xlu0 %v925_v42 }
 0x42a   : > { %1009 = vrot.lane.b32.xlu0 %v5841_v22, %s6517_s29 }
 0x42e   : > { %1177 = vrot.lane.b32.xlu0 %v5841_v22, %s6515_s0  ;;  %s6552_s0 = smov 104  }
 0x432   : > { %1347 = vrot.lane.b32.xlu0 %v5841_v22, %s6499_s8  ;;  %s6551_s8 = smov 112  }
 0x436   : > { %1345 = vrot.lane.b32.xlu0 %v5841_v22, %s6513_s30  ;;  %s6556_s30 = smov 96  }
 0x49d   : > { %v927_v44 = vpop.xlane.xlu0 %926 }
 0x49e   : > { %5525 = vrcp.f32 %v927_v44 }
 0x4a1   : > { %v1010_v45 = vpop.permute.xlu0 %1009 }
 0x4a5   : > { %v1178_v48 = vpop.permute.xlu0 %1177 }
 0x4a9   : > { %v1348_v50 = vpop.permute.xlu0 %1347 }
 0x4ab   : > { %v5526_v46 = vpop.eup %5525 }
 0x4ac   : > { %v929_v47 = vmul.f32 %v5526_v46, %v5524_v41 }
 0x4ad   : > { %v1346_v51 = vpop.permute.xlu0 %1345 }
 0x4ae   : > { %5186 = vmatmul.mubr.msk.f32.vlgmr.msra.gmra.mxu1 %vm932_vm7, %v929_v47 }
 0x4af   : > { %5189 = vmatpush3.xpose.msk.msra.mxu1 %vm841_vm3, %v1012_v43  ;;  %5190 = vmatprep.mubr.msk.f32.mxu1 %vm5640_vm1, %v5639_v8 }
 0x4b0   : > { %5198 = vmatprep.subr.mxu1 %v5639_v8 }
 0x4b2   : > { %5191 = vmatmul.mubr.msk.f32.vlgmr.msra.gmra.mxu1 %vm841_vm3, %v1010_v45 }
 0x4b3   : > { %5199 = vmatpush3.xpose.msk.msra.mxu1 %vm841_vm3, %v1180_v49  ;;  %5200 = vmatprep.mubr.msk.f32.mxu1 %vm5640_vm1, %v5639_v8 }
 0x4b4   : > { %5208 = vmatprep.subr.mxu1 %v5639_v8 }
 0x4b6   : > { %5201 = vmatmul.mubr.msk.f32.vlgmr.msra.gmra.mxu1 %vm841_vm3, %v1178_v48 }
 0x4b7   : > { %5209 = vmatpush3.xpose.msk.msra.mxu1 %vm841_vm3, %v1348_v50  ;;  %5210 = vmatprep.mubr.msk.f32.mxu1 %vm5640_vm1, %v5639_v8 }
 0x4b8   : > { %5218 = vmatprep.subr.bf16.mxu1 %v5639_v8 }
 0x4ba   : > { %5211 = vmatmul.mubr.msk.f32.vlgmr.msra.gmra.mxu1 %vm841_vm3, %v1346_v51 }
 0x4bb   : > { %5222 = vmatprep.mubr.msk.bf16.mxu1 %vm5640_vm1, %v5639_v8 }
 0x56e   : > { %v5895_v52 = vpop.f32.mrf.mxu1 }
 0x570   : > { %v5187_v53 = vpop.f32.mrf.mxu1 }
 0x572   : > { %v1083_v54 = vpop.f32.mrf.mxu1 }
 0x573   : > { %v1087_v55 = vmul.f32 0.35355338, %v1083_v54 }
 0x574   : > { %v5192_v56 = vpop.f32.mrf.mxu1 }
 0x575   : > { %v1088_v57 = vadd.f32 %v1087_v55, %v5862_v33 }
 0x576   : > { %v1251_v58 = vpop.f32.mrf.mxu1 }
 0x577   : > { %v1255_v59 = vmul.f32 0.35355338, %v1251_v58  ;;  %v1089_v60 = vsel %vm918_vm6, %v1088_v57, -inf }
 0x578   : > { %1090 = vmax.xlane.f32.xlu0 %v1089_v60  ;;  %v5202_v61 = vpop.f32.mrf.mxu1 }
 0x579   : > { %v1256_v62 = vadd.f32 %v1255_v59, %v5862_v33 }
 0x57a   : > { %v1419_v63 = vpop.f32.mrf.mxu1 }
 0x57b   : > { %v1423_v1 = vmul.f32 0.35355338, %v1419_v63  ;;  %v1257_v2 = vsel %vm918_vm6, %v1256_v62, -inf }
 0x57c   : > { %1258 = vmax.xlane.f32.xlu1 %v1257_v2  ;;  %v5212_v3 = vpop.f32.mrf.mxu1 }
 0x57d   : > { %v1424_v4 = vadd.f32 %v1423_v1, %v5862_v33  ;;  %v5492_v3 = vld [vmem:[%s6473_s10] sm:$0xff]  }
 0x57f   : > { %v1425_v5 = vsel %vm918_vm6, %v1424_v4, -inf }
 0x580   : > { %1426 = vmax.xlane.f32.xlu0 %v1425_v5 }
 0x58d   : > { %1268 = vrot.lane.b32.xlu1 %v5841_v22, %s6497_s9  ;;  %s6547_s9 = sld [smem:[#allocation14_spill]] }
 0x593   : > { %v5489_v37 = vld [vmem:[%s6547_s9 + $0x8] sm:$0xff]   ;;  %v5490_v38 = vld [vmem:[%s6547_s9] sm:$0xff]  }
 0x594   : > { %5219 = vmatpush3.bf16.msra.mxu1 %v5489_v37 }
 0x595   : > { %5220 = vmatprep.subr.bf16.mxu1 %v5639_v8 }
 0x598   : > { %5221 = vmatpush3.bf16.msra.mxu1 %v5490_v38 }
 0x599   : > { %5234 = vmatprep.subr.bf16.mxu1 %v5639_v8 }
 0x601   : > { %v1091_v6 = vpop.xlane.xlu0 %1090 }
 0x602   : > { %v1092_v7 = vsub.f32 %v1088_v57, %v1091_v6 }
 0x604   : > { %v1093_v9 = vmul.f32 1.442695, %v1092_v7 }
 0x605   : > { %v1259_v10 = vpop.xlane.xlu1 %1258 }
 0x606   : > { %5527 = vpow2.f32 %v1093_v9  ;;  %v1260_v11 = vsub.f32 %v1256_v62, %v1259_v10 }
 0x608   : > { %v1261_v12 = vmul.f32 1.442695, %v1260_v11 }
 0x609   : > { %v1427_v13 = vpop.xlane.xlu0 %1426  ;;  %v1269_v24 = vpop.permute.xlu1 %1268 }
 0x60a   : > { %5529 = vpow2.f32 %v1261_v12  ;;  %v1428_v14 = vsub.f32 %v1424_v4, %v1427_v13  ;;  %v4900_v12 = vld [vmem:[%s6481_s18 + $0x2] ss:$0 sm:$0xff] }
 0x60c   : > { %v1429_v15 = vmul.f32 1.442695, %v1428_v14  ;;  %v4901_v14 = vld [vmem:[%s6481_s18 + $0x3] ss:$0 sm:$0xff] }
 0x60e   : > { %5531 = vpow2.f32 %v1429_v15 }
 0x613   : > { %v5528_v16 = vpop.eup %5527 }
 0x614   : > { %v1095_v17 = vsel %vm918_vm6, %v5528_v16, 0.0 }
 0x615   : > { %1096 = vadd.xlane.f32.xlu0 %v1095_v17 }
 0x617   : > { %v5530_v18 = vpop.eup %5529 }
 0x618   : > { %v1263_v19 = vsel %vm918_vm6, %v5530_v18, 0.0 }
 0x619   : > { %1264 = vadd.xlane.f32.xlu0 %v1263_v19 }
 0x61b   : > { %v5532_v20 = vpop.eup %5531 }
 0x61c   : > { %v1431_v21 = vsel %vm918_vm6, %v5532_v20, 0.0 }
 0x61d   : > { %1432 = vadd.xlane.f32.xlu1 %v1431_v21 }
 0x62e   : > { %1436 = vrot.lane.b32.xlu1 %v5841_v22, %s6495_s5  ;;  %s6557_s5 = smov 72  }
 0x62f   : > { %1100 = vrot.lane.b32.xlu0 %v5841_v22, %s6498_s7  ;;  %s6548_s7 = sld [smem:[#allocation15_spill]] }
 0x635   : > { %v4894_v53 = vld [vmem:[%s6548_s7] ss:$0 sm:$0xff] }
 0x69e   : > { %v1097_v23 = vpop.xlane.xlu0 %1096 }
 0x69f   : > { %5533 = vrcp.f32 %v1097_v23 }
 0x6a2   : > { %v1265_v25 = vpop.xlane.xlu0 %1264 }
 0x6a3   : > { %5535 = vrcp.f32 %v1265_v25 }
 0x6a6   : > { %v1433_v26 = vpop.xlane.xlu1 %1432  ;;  %v1101_v27 = vpop.permute.xlu0 %1100 }
 0x6a7   : > { %5537 = vrcp.f32 %v1433_v26  ;;  %5194 = vmatpush3.msk.msra.mxu0 %vm936_vm4, %v1101_v27 }
 0x6a8   : > { %5203 = vmatprep.subr.mxu0 %v5639_v8 }
 0x6aa   : > { %v1437_v34 = vpop.permute.xlu1 %1436 }
 0x6ac   : > { %v5534_v28 = vpop.eup %5533 }
 0x6ad   : > { %v1099_v30 = vmul.f32 %v5534_v28, %v5528_v16 }
 0x6af   : > { %5196 = vmatmul.mubr.msk.f32.vlgmr.msra.gmra.mxu0 %vm932_vm7, %v1099_v30 }
 0x6b0   : > { %v5536_v31 = vpop.eup %5535  ;;  %5204 = vmatpush3.msk.msra.mxu0 %vm936_vm4, %v1269_v24  ;;  %5205 = vmatprep.mubr.msk.f32.mxu0 %vm5640_vm1, %v5639_v8 }
 0x6b1   : > { %5213 = vmatprep.subr.mxu0 %v5639_v8  ;;  %v1267_v22 = vmul.f32 %v5536_v31, %v5530_v18  ;;  %v4906_v18 = vld [vmem:[%s6474_s11] ss:$0 sm:$0xff] }
 0x6b3   : > { %5206 = vmatmul.mubr.msk.f32.vlgmr.msra.gmra.mxu0 %vm932_vm7, %v1267_v22 }
 0x6b4   : > { %v5538_v35 = vpop.eup %5537  ;;  %5214 = vmatpush3.msk.msra.mxu0 %vm936_vm4, %v1437_v34  ;;  %5215 = vmatprep.mubr.msk.f32.mxu0 %vm5640_vm1, %v5639_v8 }
 0x6b5   : > { %v1435_v36 = vmul.f32 %v5538_v35, %v5532_v20  ;;  %5226 = vmatprep.subr.bf16.mxu0 %v5639_v8 }
 0x6b7   : > { %5216 = vmatmul.mubr.msk.f32.vlgmr.msra.gmra.mxu0 %vm932_vm7, %v1435_v36 }
 0x6b8   : > { %5230 = vmatprep.mubr.msk.bf16.mxu0 %vm5640_vm1, %v5639_v8 }
 0x76f   : > { %v1173_v39 = vpop.f32.mrf.mxu0 }
 0x770   : > { %1514 = vrot.lane.b32.xlu1 %v1173_v39, %s6509_s26  ;;  %s6553_s26 = sld [smem:[#allocation17_spill]]  ;;  %v1763_v39 = vstv %s725_s27  ;;  %s6565_s27 = smov 64  }
 0x771   : > { %v5197_v40 = vpop.f32.mrf.mxu0  ;;  %vm1764_vm10 = vcmp.lt.s32.totalorder %v5858_v29, %v1763_v39 }
 0x773   : > { %v1341_v41 = vpop.f32.mrf.mxu0 }
 0x774   : > { %1518 = vrot.lane.b32.xlu0 %v1341_v41, %s6507_s3  ;;  %v6031_v41 = vsel %vm1764_vm10, 0.0, %v5644_v32 }
 0x775   : > { %v5207_v42 = vpop.f32.mrf.mxu0 }
 0x776   : > { %v4902_v26 = vld [vmem:[%s6553_s26] ss:$0 sm:$0xff] }
 0x777   : > { %v1509_v43 = vpop.f32.mrf.mxu0 }
 0x778   : > { %1522 = vrot.lane.b32.xlu1 %v1509_v43, %s6505_s6  ;;  %s6549_s6 = sld [smem:[#allocation11_spill]] }
 0x779   : > { %v5217_v44 = vpop.f32.mrf.mxu0 }
 0x77e   : > { %s715_s3 = scalar_lea.vmem %s6549_s6, %s5803_s25  ;;  %s6555_s6 = smov 80  }
 0x77f   : > { %v727_v2 = vld [vmem:[%s715_s3] sm:$0xff]  ;;  %s6550_s3 = sld [smem:[#allocation16_spill]] }
 0x780   : > { %v5966_v4 = vpack.c.bf16 %v727_v2, %v727_v2  ;;  %s6568_s25 = sld [smem:[#allocation21_spill]] }
 0x785   : > { %v5493_v5 = vld [vmem:[%s6550_s3 + $0x8] sm:$0xff]   ;;  %v5494_v6 = vld [vmem:[%s6550_s3] sm:$0xff]  }
 0x786   : > { %5227 = vmatpush3.bf16.msra.mxu0 %v5493_v5 }
 0x787   : > { %5228 = vmatprep.subr.bf16.mxu0 %v5639_v8 }
 0x78a   : > { %5229 = vmatpush3.bf16.msra.mxu0 %v5494_v6 }
 0x78b   : > { %5242 = vmatprep.subr.mxu0 %v5639_v8 }
 0x7e2   : > { %v1515_v45 = vpop.permute.xlu1 %1514 }
 0x7e3   : > { %v1525_v47 = vsel %vm841_vm3, %v5895_v52, %v1515_v45 }
 0x7e6   : > { %v1519_v46 = vpop.permute.xlu0 %1518 }
 0x7e7   : > { %v1527_v48 = vsel %vm1526_vm8, %v1525_v47, %v1519_v46 }
 0x7ea   : > { %v1523_v49 = vpop.permute.xlu1 %1522 }
 0x7eb   : > { %v1529_v50 = vsel %vm1528_vm9, %v1527_v48, %v1523_v49 }
 0x7ec   : > { %v1530_v51 = vpack.c.bf16 %v1529_v50, %v1529_v50 }
 0x7ee   : > { %5223 = vmatmul.mubr.msk.bf16.vlgmr.msra.gmra.mxu1 %vm789_vm2, %v1530_v51 }
 0x7ef   : > { %5238 = vmatprep.mubr.msk.bf16.mxu1 %vm5640_vm1, %v5639_v8 }
 0x8ae   : > { %v1586_v54 = vpop.f32.mrf.mxu1 }
 0x8af   : > { %v1587_v55 = vadd.f32 %v4894_v53, %v1586_v54 }
 0x8b0   : > { %v5224_v56 = vpop.f32.mrf.mxu1 }
 0x8b1   : > { %v5949_v52 = vadd.f32 %v1587_v55, %v5809_v0  ;;  %v5491_v0 = vld [vmem:[%s6473_s10 + $0x8] sm:$0xff]  }
 0x8b2   : > { %v1589_v57 = vpop.f32.mrf.mxu1  ;;  %5235 = vmatpush3.bf16.msra.mxu1 %v5491_v0 }
 0x8b3   : > { %v1597_v58 = vsel %vm731_vm0, %v5949_v52, 0.0  ;;  %5236 = vmatprep.subr.bf16.mxu1 %v5639_v8 }
 0x8b4   : > { %1598 = vadd.xlane.f32.xlu0 %v1597_v58  ;;  %v5225_v59 = vpop.f32.mrf.mxu1 }
 0x8b6   : > { %5237 = vmatpush3.bf16.msra.mxu1 %v5492_v3 }
 0x8b7   : > { %5252 = vmatprep.subr.mxu1 %v5639_v8 }
 0x8b9   : > { %5239 = vmatmul.mubr.msk.bf16.vlgmr.msra.gmra.mxu1 %vm789_vm2, %v5966_v4 }
 0x8ba   : > { %5254 = vmatprep.mubr.msk.f32.mxu1 %vm5640_vm1, %v5639_v8 }
 0x93d   : > { %v1599_v60 = vpop.xlane.xlu0 %1598 }
 0x93e   : > { %v1600_v61 = vmul.f32 0.03125, %v1599_v60 }
 0x940   : > { %v1601_v62 = vsub.f32 %v5949_v52, %v1600_v61 }
 0x942   : > { %v1602_v63 = vmul.f32 %v1601_v62, %v1601_v62 }
 0x944   : > { %v1603_v1 = vsel %vm731_vm0, %v1602_v63, 0.0 }
 0x945   : > { %1604 = vadd.xlane.f32.xlu1 %v1603_v1 }
 0x979   : > { %v1757_v19 = vpop.f32.mrf.mxu1 }
 0x97a   : > { %v5993_v20 = vadd.f32 %v4906_v18, %v1757_v19 }
 0x97b   : > { %v5240_v21 = vpop.f32.mrf.mxu1 }
 0x97c   : > { %1934 = vrot.lane.b32.xlu0 %v5993_v20, %s6517_s29 }
 0x97d   : > { %v1760_v23 = vpop.f32.mrf.mxu1 }
 0x97f   : > { %v5241_v24 = vpop.f32.mrf.mxu1 }
 0x980   : > { %2101 = vrot.lane.b32.xlu0 %v5993_v20, %s6551_s8 }
 0x984   : > { %2268 = vrot.lane.b32.xlu0 %v5993_v20, %s6552_s0 }
 0x9ce   : > { %v1605_v7 = vpop.xlane.xlu1 %1604 }
 0x9cf   : > { %v1606_v9 = vmul.f32 0.03125, %v1605_v7 }
 0x9d1   : > { %v1607_v10 = vadd.f32 1e-05, %v1606_v9 }
 0x9d3   : > { %5539 = vrsqrt.f32 %v1607_v10 }
 0x9e0   : > { %v5540_v11 = vpop.eup %5539 }
 0x9e1   : > { %v1609_v13 = vmul.f32 %v5540_v11, %v1601_v62 }
 0x9e3   : > { %v1616_v15 = vmul.f32 %v4900_v12, %v1609_v13 }
 0x9e5   : > { %v1623_v16 = vadd.f32 %v4901_v14, %v1616_v15 }
 0x9e7   : > { %v1639_v17 = vpack.c.bf16 %v1623_v16, %v1623_v16 }
 0x9e9   : > { %5231 = vmatmul.mubr.msk.bf16.vlgmr.msra.gmra.mxu0 %vm789_vm2, %v1639_v17 }
 0x9ea   : > { %5244 = vmatprep.mubr.msk.f32.mxu0 %vm5640_vm1, %v5639_v8  ;;  %5243 = vmatpush3.xpose.msk.msra.mxu0 %vm841_vm3, %v5993_v20 }
 0x9eb   : > { %5247 = vmatprep.subr.mxu0 %v5639_v8 }
 0x9ee   : > { %v1935_v25 = vpop.permute.xlu0 %1934 }
 0x9ef   : > { %5253 = vmatpush3.xpose.msk.msra.mxu1 %vm841_vm3, %v1935_v25 }
 0x9f0   : > { %5262 = vmatprep.subr.mxu1 %v5639_v8 }
 0x9f2   : > { %v2102_v34 = vpop.permute.xlu0 %2101 }
 0x9f6   : > { %v2269_v37 = vpop.permute.xlu0 %2268 }
 0xaa9   : > { %v1695_v27 = vpop.f32.mrf.mxu0 }
 0xaaa   : > { %v1696_v28 = vadd.f32 %v4902_v26, %v1695_v27 }
 0xaab   : > { %v5232_v30 = vpop.f32.mrf.mxu0 }
 0xaac   : > { %1932 = vrot.lane.b32.xlu1 %v1696_v28, %s6517_s29  ;;  %5245 = vmatmul.mubr.msk.f32.vlgmr.msra.gmra.mxu0 %vm841_vm3, %v1696_v28  ;;  %s6560_s29 = smov 24  }
 0xaad   : > { %v1698_v31 = vpop.f32.mrf.mxu0  ;;  %5249 = vmatprep.mubr.msk.f32.mxu0 %vm5640_vm1, %v5639_v8 }
 0xaaf   : > { %v5233_v22 = vpop.f32.mrf.mxu0 }
 0xab0   : > { %2099 = vrot.lane.b32.xlu1 %v1696_v28, %s6551_s8 }
 0xab4   : > { %2266 = vrot.lane.b32.xlu1 %v1696_v28, %s6552_s0 }
 0xb1e   : > { %v1933_v35 = vpop.permute.xlu1 %1932 }
 0xb1f   : > { %5255 = vmatmul.mubr.msk.f32.vlgmr.msra.gmra.mxu1 %vm841_vm3, %v1933_v35 }
 0xb20   : > { %5263 = vmatpush3.xpose.msk.msra.mxu1 %vm841_vm3, %v2102_v34  ;;  %5264 = vmatprep.mubr.msk.f32.mxu1 %vm5640_vm1, %v5639_v8 }
 0xb21   : > { %5272 = vmatprep.subr.mxu1 %v5639_v8 }
 0xb22   : > { %v2100_v36 = vpop.permute.xlu1 %2099 }
 0xb23   : > { %5265 = vmatmul.mubr.msk.f32.vlgmr.msra.gmra.mxu1 %vm841_vm3, %v2100_v36 }
 0xb24   : > { %5273 = vmatpush3.xpose.msk.msra.mxu1 %vm841_vm3, %v2269_v37  ;;  %5274 = vmatprep.mubr.msk.f32.mxu1 %vm5640_vm1, %v5639_v8 }
 0xb25   : > { %5282 = vmatprep.subr.bf16.mxu1 %v5639_v8 }
 0xb26   : > { %v2267_v38 = vpop.permute.xlu1 %2266 }
 0xb27   : > { %5275 = vmatmul.mubr.msk.f32.vlgmr.msra.gmra.mxu1 %vm841_vm3, %v2267_v38  ;;  %v5495_v38 = vld [vmem:[%s6475_s12 + $0x8] sm:$0xff]  }
 0xb28   : > { %5286 = vmatprep.mubr.msk.bf16.mxu1 %vm5640_vm1, %v5639_v8  ;;  %5283 = vmatpush3.bf16.msra.mxu1 %v5495_v38 }
 0xb29   : > { %5284 = vmatprep.subr.bf16.mxu1 %v5639_v8 }
 0xb6c   : > { %v1838_v40 = vpop.f32.mrf.mxu0 }
 0xb6d   : > { %v1842_v42 = vmul.f32 0.35355338, %v1838_v40 }
 0xb6e   : > { %v5246_v43 = vpop.f32.mrf.mxu0 }
 0xb6f   : > { %v1843_v44 = vadd.f32 %v1842_v42, %v6031_v41 }
 0xb71   : > { %v1845_v45 = vsel %vm1844_vm11, %v1843_v44, -inf }
 0xb72   : > { %1846 = vmax.xlane.f32.xlu0 %v1845_v45 }
 0xbdf   : > { %v2006_v46 = vpop.f32.mrf.mxu1 }
 0xbe0   : > { %v2010_v47 = vmul.f32 0.35355338, %v2006_v46  ;;  %v5496_v46 = vld [vmem:[%s6475_s12] sm:$0xff]  }
 0xbe1   : > { %v5256_v48 = vpop.f32.mrf.mxu1  ;;  %5285 = vmatpush3.bf16.msra.mxu1 %v5496_v46 }
 0xbe2   : > { %v2011_v49 = vadd.f32 %v2010_v47, %v6031_v41  ;;  %5298 = vmatprep.subr.bf16.mxu1 %v5639_v8 }
 0xbe3   : > { %v2173_v50 = vpop.f32.mrf.mxu1 }
 0xbe4   : > { %v2177_v51 = vmul.f32 0.35355338, %v2173_v50  ;;  %v2012_v53 = vsel %vm1844_vm11, %v2011_v49, -inf }
 0xbe5   : > { %2013 = vmax.xlane.f32.xlu1 %v2012_v53  ;;  %v5266_v32 = vpop.f32.mrf.mxu1 }
 0xbe6   : > { %v2178_v54 = vadd.f32 %v2177_v51, %v6031_v41 }
 0xbe7   : > { %v2340_v55 = vpop.f32.mrf.mxu1 }
 0xbe8   : > { %v2344_v56 = vmul.f32 0.35355338, %v2340_v55  ;;  %v2179_v57 = vsel %vm1844_vm11, %v2178_v54, -inf }
 0xbe9   : > { %v5276_v58 = vpop.f32.mrf.mxu1  ;;  %2180 = vmax.xlane.f32.xlu0 %v2179_v57 }
 0xbea   : > { %v2345_v59 = vadd.f32 %v2344_v56, %v6031_v41  ;;  %v4922_v56 = vld [vmem:[%s6561_s13] ss:$0 sm:$0xff] }
 0xbec   : > { %v2346_v60 = vsel %vm1844_vm11, %v2345_v59, -inf }
 0xbed   : > { %2347 = vmax.xlane.f32.xlu0 %v2346_v60 }
 0xbfb   : > { %v1847_v61 = vpop.xlane.xlu0 %1846 }
 0xbfc   : > { %v1848_v62 = vsub.f32 %v1843_v44, %v1847_v61 }
 0xbfe   : > { %v1849_v63 = vmul.f32 1.442695, %v1848_v62 }
 0xc00   : > { %5541 = vpow2.f32 %v1849_v63 }
 0xc0d   : > { %v5542_v1 = vpop.eup %5541 }
 0xc0e   : > { %v1851_v0 = vsel %vm1844_vm11, %v5542_v1, 0.0 }
 0xc0f   : > { %1852 = vadd.xlane.f32.xlu0 %v1851_v0 }
 0xc6e   : > { %v2014_v2 = vpop.xlane.xlu1 %2013 }
 0xc6f   : > { %v2015_v3 = vsub.f32 %v2011_v49, %v2014_v2 }
 0xc71   : > { %v2016_v5 = vmul.f32 1.442695, %v2015_v3 }
 0xc72   : > { %v2181_v6 = vpop.xlane.xlu0 %2180 }
 0xc73   : > { %5543 = vpow2.f32 %v2016_v5  ;;  %v2182_v7 = vsub.f32 %v2178_v54, %v2181_v6  ;;  %v5497_v6 = vld [vmem:[%s6477_s14 + $0x8] sm:$0xff]  }
 0xc75   : > { %v2183_v9 = vmul.f32 1.442695, %v2182_v7  ;;  %v5499_v7 = vld [vmem:[%s6479_s16 + $0x18] sm:$0xff]  }
 0xc76   : > { %v2348_v14 = vpop.xlane.xlu0 %2347 }
 0xc77   : > { %5545 = vpow2.f32 %v2183_v9  ;;  %v2349_v15 = vsub.f32 %v2345_v59, %v2348_v14  ;;  %v5500_v9 = vld [vmem:[%s6479_s16 + $0x10] sm:$0xff]   ;;  %v4928_v14 = vld [vmem:[%s6481_s18 + $0x4] ss:$0 sm:$0xff] }
 0xc79   : > { %v2350_v16 = vmul.f32 1.442695, %v2349_v15 }
 0xc7b   : > { %5547 = vpow2.f32 %v2350_v16  ;;  %v4929_v16 = vld [vmem:[%s6481_s18 + $0x5] ss:$0 sm:$0xff] }
 0xc80   : > { %v5544_v10 = vpop.eup %5543 }
 0xc81   : > { %v2018_v11 = vsel %vm1844_vm11, %v5544_v10, 0.0 }
 0xc82   : > { %2019 = vadd.xlane.f32.xlu1 %v2018_v11 }
 0xc84   : > { %v5546_v12 = vpop.eup %5545 }
 0xc85   : > { %v2185_v13 = vsel %vm1844_vm11, %v5546_v12, 0.0 }
 0xc86   : > { %2186 = vadd.xlane.f32.xlu0 %v2185_v13 }
 0xc88   : > { %v5548_v17 = vpop.eup %5547 }
 0xc89   : > { %v2352_v18 = vsel %vm1844_vm11, %v5548_v17, 0.0 }
 0xc93   : > { %2023 = vrot.lane.b32.xlu1 %v5993_v20, %s6554_s19 }
 0xc97   : > { %2190 = vrot.lane.b32.xlu1 %v5993_v20, %s6555_s6 }
 0xc98   : > { %v1853_v19 = vpop.xlane.xlu0 %1852 }
 0xc99   : > { %5549 = vrcp.f32 %v1853_v19 }
 0xc9c   : > { %1856 = vrot.lane.b32.xlu0 %v5993_v20, %s6556_s30 }
 0xca6   : > { %v5550_v24 = vpop.eup %5549 }
 0xca7   : > { %v1855_v26 = vmul.f32 %v5550_v24, %v5542_v1  ;;  %v4930_v24 = vld [vmem:[%s6478_s15] ss:$0 sm:$0xff] }
 0xcbb   : > { %2353 = vadd.xlane.f32.xlu1 %v2352_v18 }
 0xccc   : > { %2357 = vrot.lane.b32.xlu1 %v5993_v20, %s6557_s5 }
 0xd0b   : > { %v2020_v21 = vpop.xlane.xlu1 %2019 }
 0xd0c   : > { %5551 = vrcp.f32 %v2020_v21  ;;  %v5501_v21 = vld [vmem:[%s6479_s16 + $0x8] sm:$0xff]  }
 0xd0f   : > { %v2187_v23 = vpop.xlane.xlu0 %2186  ;;  %v2024_v27 = vpop.permute.xlu1 %2023 }
 0xd10   : > { %5553 = vrcp.f32 %v2187_v23  ;;  %v5502_v23 = vld [vmem:[%s6479_s16] sm:$0xff]  }
 0xd13   : > { %v1857_v25 = vpop.permute.xlu0 %1856  ;;  %v2191_v30 = vpop.permute.xlu1 %2190 }
 0xd14   : > { %5248 = vmatpush3.msra.mxu0 %v1857_v25 }
 0xd15   : > { %5250 = vmatmul.mubr.msk.f32.vlgmr.msra.gmra.mxu0 %vm841_vm3, %v1855_v26  ;;  %5257 = vmatprep.subr.mxu0 %v5639_v8 }
 0xd16   : > { %5258 = vmatpush3.msra.mxu0 %v2024_v27  ;;  %5259 = vmatprep.mubr.msk.f32.mxu0 %vm5640_vm1, %v5639_v8 }
 0xd17   : > { %5267 = vmatprep.subr.mxu0 %v5639_v8 }
 0xd19   : > { %v5552_v20 = vpop.eup %5551 }
 0xd1a   : > { %v2022_v28 = vmul.f32 %v5552_v20, %v5544_v10 }
 0xd1c   : > { %5260 = vmatmul.mubr.msk.f32.vlgmr.msra.gmra.mxu0 %vm841_vm3, %v2022_v28 }
 0xd1d   : > { %v5554_v31 = vpop.eup %5553  ;;  %5268 = vmatpush3.msra.mxu0 %v2191_v30  ;;  %5269 = vmatprep.mubr.msk.f32.mxu0 %vm5640_vm1, %v5639_v8 }
 0xd1e   : > { %v2189_v22 = vmul.f32 %v5554_v31, %v5546_v12  ;;  %5277 = vmatprep.subr.mxu0 %v5639_v8 }
 0xd20   : > { %5270 = vmatmul.mubr.msk.f32.vlgmr.msra.gmra.mxu0 %vm841_vm3, %v2189_v22  ;;  %v4934_v22 = vld [vmem:[%s6480_s17] ss:$0 sm:$0xff] }
 0xd21   : > { %5279 = vmatprep.mubr.msk.f32.mxu0 %vm5640_vm1, %v5639_v8 }
 0xd44   : > { %v2354_v34 = vpop.xlane.xlu1 %2353 }
 0xd45   : > { %5555 = vrcp.f32 %v2354_v34 }
 0xd48   : > { %v2358_v35 = vpop.permute.xlu1 %2357 }
 0xd49   : > { %5278 = vmatpush3.msra.mxu0 %v2358_v35 }
 0xd4a   : > { %5290 = vmatprep.subr.bf16.mxu0 %v5639_v8 }
 0xd52   : > { %v5556_v36 = vpop.eup %5555 }
 0xd53   : > { %v2356_v37 = vmul.f32 %v5556_v36, %v5548_v17 }
 0xd55   : > { %5280 = vmatmul.mubr.msk.f32.vlgmr.msra.gmra.mxu0 %vm841_vm3, %v2356_v37 }
 0xd56   : > { %5294 = vmatprep.mubr.msk.bf16.mxu0 %vm5640_vm1, %v5639_v8  ;;  %5291 = vmatpush3.bf16.msra.mxu0 %v5497_v6 }
 0xd57   : > { %5292 = vmatprep.subr.bf16.mxu0 %v5639_v8 }
 0xdd5   : > { %v1928_v39 = vpop.f32.mrf.mxu0 }
 0xdd7   : > { %v5251_v40 = vpop.f32.mrf.mxu0 }
 0xddc   : > { %v2095_v42 = vpop.f32.mrf.mxu0 }
 0xddd   : > { %2434 = vrot.lane.b32.xlu0 %v2095_v42, %s6558_s1 }
 0xdde   : > { %v5261_v43 = vpop.f32.mrf.mxu0 }
 0xde0   : > { %v2262_v44 = vpop.f32.mrf.mxu0 }
 0xde1   : > { %2438 = vrot.lane.b32.xlu1 %v2262_v44, %s6559_s24 }
 0xde2   : > { %v5271_v45 = vpop.f32.mrf.mxu0 }
 0xe15   : > { %v2429_v47 = vpop.f32.mrf.mxu0 }
 0xe16   : > { %2442 = vrot.lane.b32.xlu0 %v2429_v47, %s6560_s29  ;;  %v5503_v47 = vld [vmem:[%s6545_s28 + $0x18] sm:$0xff]  }
 0xe17   : > { %v5281_v48 = vpop.f32.mrf.mxu0 }
 0xe18   : > { %v5504_v48 = vld [vmem:[%s6545_s28 + $0x10] sm:$0xff]  }
 0xe4f   : > { %v2435_v49 = vpop.permute.xlu0 %2434 }
 0xe50   : > { %v2445_v51 = vsel %vm841_vm3, %v1928_v39, %v2435_v49 }
 0xe53   : > { %v2439_v50 = vpop.permute.xlu1 %2438 }
 0xe54   : > { %v2446_v53 = vsel %vm1526_vm8, %v2445_v51, %v2439_v50 }
 0xe88   : > { %v2443_v32 = vpop.permute.xlu0 %2442 }
 0xe89   : > { %v2447_v54 = vsel %vm1528_vm9, %v2446_v53, %v2443_v32  ;;  %v4942_v32 = vld [vmem:[%s6481_s18 + $0x6] ss:$0 sm:$0xff] }
 0xe8a   : > { %v2448_v55 = vpack.c.bf16 %v2447_v54, %v2447_v54 }
 0xe8c   : > { %5287 = vmatmul.mubr.msk.bf16.vlgmr.msra.gmra.mxu1 %vm789_vm2, %v2448_v55  ;;  %v4943_v55 = vld [vmem:[%s6481_s18 + $0x7] ss:$0 sm:$0xff] }
 0xe8d   : > { %5306 = vmatprep.mubr.msk.bf16.mxu1 %vm5640_vm1, %v5639_v8  ;;  %5299 = vmatpush3.bf16.msra.mxu1 %v5499_v7 }
 0xe8e   : > { %5300 = vmatprep.subr.bf16.mxu1 %v5639_v8 }
 0xe91   : > { %5301 = vmatpush3.bf16.msra.mxu1 %v5500_v9 }
 0xe92   : > { %5302 = vmatprep.subr.bf16.mxu1 %v5639_v8 }
 0xe95   : > { %5303 = vmatpush3.bf16.msra.mxu1 %v5501_v21 }
 0xe96   : > { %5304 = vmatprep.subr.bf16.mxu1 %v5639_v8 }
 0xe99   : > { %5305 = vmatpush3.bf16.msra.mxu1 %v5502_v23 }
 0xe9a   : > { %5328 = vmatprep.subr.mxu1 %v5639_v8 }
 0xf4c   : > { %v2504_v57 = vpop.f32.mrf.mxu1 }
 0xf4d   : > { %v2505_v58 = vadd.f32 %v4922_v56, %v2504_v57 }
 0xf4e   : > { %v5288_v59 = vpop.f32.mrf.mxu1 }
 0xf4f   : > { %v2510_v60 = vadd.f32 %v2505_v58, %v5949_v52  ;;  %v5498_v52 = vld [vmem:[%s6477_s14] sm:$0xff]  }
 0xf50   : > { %v2507_v61 = vpop.f32.mrf.mxu1  ;;  %5293 = vmatpush3.bf16.msra.mxu0 %v5498_v52  ;;  %v4954_v59 = vld [vmem:[%s6546_s2 + $0x1] ss:$0 sm:$0xff] }
 0xf51   : > { %v2515_v62 = vsel %vm731_vm0, %v2510_v60, 0.0  ;;  %5310 = vmatprep.subr.bf16.mxu0 %v5639_v8 }
 0xf52   : > { %2516 = vadd.xlane.f32.xlu1 %v2515_v62  ;;  %v5289_v63 = vpop.f32.mrf.mxu1 }
 0xfdb   : > { %v2517_v1 = vpop.xlane.xlu1 %2516 }
 0xfdc   : > { %v2518_v0 = vmul.f32 0.03125, %v2517_v1 }
 0xfde   : > { %v2519_v2 = vsub.f32 %v2510_v60, %v2518_v0 }
 0xfe0   : > { %v2520_v3 = vmul.f32 %v2519_v2, %v2519_v2 }
 0xfe2   : > { %v2521_v5 = vsel %vm731_vm0, %v2520_v3, 0.0 }
 0xfe3   : > { %2522 = vadd.xlane.f32.xlu0 %v2521_v5 }
0x106c   : > { %v2523_v10 = vpop.xlane.xlu0 %2522 }
0x106d   : > { %v2524_v11 = vmul.f32 0.03125, %v2523_v10 }
0x106f   : > { %v2525_v12 = vadd.f32 1e-05, %v2524_v11 }
0x1071   : > { %5557 = vrsqrt.f32 %v2525_v12 }
0x107e   : > { %v5558_v13 = vpop.eup %5557 }
0x107f   : > { %v2527_v15 = vmul.f32 %v5558_v13, %v2519_v2 }
0x1081   : > { %v2534_v17 = vmul.f32 %v4928_v14, %v2527_v15 }
0x1083   : > { %v2541_v18 = vadd.f32 %v4929_v16, %v2534_v17 }
0x1085   : > { %v2556_v19 = vpack.c.bf16 %v2541_v18, %v2541_v18 }
0x1087   : > { %5295 = vmatmul.mubr.msk.bf16.vlgmr.msra.gmra.mxu0 %vm789_vm2, %v2556_v19 }
0x1088   : > { %5314 = vmatprep.mubr.msk.bf16.mxu0 %vm5640_vm1, %v5639_v8  ;;  %5311 = vmatpush3.bf16.msra.mxu0 %v5503_v47 }
0x1089   : > { %5312 = vmatprep.subr.bf16.mxu0 %v5639_v8 }
0x108c   : > { %5313 = vmatpush3.bf16.msra.mxu0 %v5504_v48 }
0x108d   : > { %5318 = vmatprep.subr.mxu0 %v5639_v8 }
0x1147   : > { %v2612_v25 = vpop.f32.mrf.mxu0 }
0x1148   : > { %v2613_v26 = vadd.f32 %v4930_v24, %v2612_v25 }
0x1149   : > { %v5296_v27 = vpop.f32.mrf.mxu0 }
0x114a   : > { %v2618_v20 = vmax.f32 %v2613_v26, 0.0 }
0x114b   : > { %v2615_v28 = vpop.f32.mrf.mxu0 }
0x114c   : > { %v2619_v30 = vpack.c.bf16 %v2618_v20, %v2618_v20 }
0x114d   : > { %v5297_v31 = vpop.f32.mrf.mxu0 }
0x114e   : > { %5307 = vmatmul.mubr.msk.bf16.vlgmr.msra.gmra.mxu1 %vm2650_vm12, %v2619_v30 }
0x114f   : > { %5330 = vmatprep.mubr.msk.f32.mxu1 %vm5640_vm1, %v5639_v8 }
0x120e   : > { %v2688_v34 = vpop.f32.mrf.mxu1 }
0x120f   : > { %v2689_v35 = vadd.f32 %v4934_v22, %v2688_v34 }
0x1210   : > { %v5308_v36 = vpop.f32.mrf.mxu1 }
0x1211   : > { %v6134_v37 = vadd.f32 %v2689_v35, %v2510_v60 }
0x1212   : > { %v2691_v38 = vpop.f32.mrf.mxu1 }
0x1213   : > { %v2699_v39 = vsel %vm731_vm0, %v6134_v37, 0.0 }
0x1214   : > { %2700 = vadd.xlane.f32.xlu0 %v2699_v39  ;;  %v5309_v40 = vpop.f32.mrf.mxu1 }
0x129d   : > { %v2701_v42 = vpop.xlane.xlu0 %2700 }
0x129e   : > { %v2702_v43 = vmul.f32 0.03125, %v2701_v42 }
0x12a0   : > { %v2703_v44 = vsub.f32 %v6134_v37, %v2702_v43 }
0x12a2   : > { %v2704_v45 = vmul.f32 %v2703_v44, %v2703_v44 }
0x12a4   : > { %v2705_v46 = vsel %vm731_vm0, %v2704_v45, 0.0 }
0x12a5   : > { %2706 = vadd.xlane.f32.xlu0 %v2705_v46 }
0x132e   : > { %v2707_v49 = vpop.xlane.xlu0 %2706 }
0x132f   : > { %v2708_v50 = vmul.f32 0.03125, %v2707_v49 }
0x1331   : > { %v2709_v51 = vadd.f32 1e-05, %v2708_v50 }
0x1333   : > { %5559 = vrsqrt.f32 %v2709_v51 }
0x1340   : > { %v5560_v53 = vpop.eup %5559 }
0x1341   : > { %v2711_v54 = vmul.f32 %v5560_v53, %v2703_v44 }
0x1343   : > { %v2718_v56 = vmul.f32 %v4942_v32, %v2711_v54 }
0x1345   : > { %v2725_v57 = vadd.f32 %v4943_v55, %v2718_v56 }
0x1347   : > { %v2740_v58 = vpack.c.bf16 %v2725_v57, %v2725_v57 }
0x1349   : > { %5315 = vmatmul.mubr.msk.bf16.vlgmr.msra.gmra.mxu0 %vm789_vm2, %v2740_v58 }
0x134a   : > { %5320 = vmatprep.mubr.msk.f32.mxu0 %vm5640_vm1, %v5639_v8 }
0x1409   : > { %v2796_v60 = vpop.f32.mrf.mxu0 }
0x140a   : > { %v6160_v61 = vadd.f32 %v4954_v59, %v2796_v60 }
0x140b   : > { %v5316_v62 = vpop.f32.mrf.mxu0 }
0x140c   : > { %2971 = vrot.lane.b32.xlu0 %v6160_v61, %s6554_s19  ;;  %2803 = vrot.lane.b32.xlu1 %v6160_v61, %s6556_s30 }
0x140d   : > { %v2799_v63 = vpop.f32.mrf.mxu0 }
0x140f   : > { %v5317_v1 = vpop.f32.mrf.mxu0 }
0x1410   : > { %3307 = vrot.lane.b32.xlu0 %v6160_v61, %s6557_s5  ;;  %2969 = vrot.lane.b32.xlu1 %v6160_v61, %s6562_s23 }
0x1414   : > { %3139 = vrot.lane.b32.xlu1 %v6160_v61, %s6555_s6 }
0x1418   : > { %3137 = vrot.lane.b32.xlu1 %v6160_v61, %s6551_s8 }
0x141c   : > { %3305 = vrot.lane.b32.xlu1 %v6160_v61, %s6552_s0 }
0x147e   : > { %v2972_v0 = vpop.permute.xlu0 %2971  ;;  %v2804_v2 = vpop.permute.xlu1 %2803 }
0x147f   : > { %5319 = vmatpush3.xpose.msk.msra.mxu0 %vm841_vm3, %v2804_v2  ;;  %5329 = vmatpush3.xpose.msk.msra.mxu1 %vm841_vm3, %v2972_v0 }
0x1480   : > { %5338 = vmatprep.subr.mxu1 %v5639_v8  ;;  %5323 = vmatprep.subr.mxu0 %v5639_v8 }
0x1482   : > { %5321 = vmatmul.mubr.msk.f32.vlgmr.msra.gmra.mxu0 %vm841_vm3, %v6160_v61  ;;  %v2970_v3 = vpop.permute.xlu1 %2969  ;;  %v3308_v52 = vpop.permute.xlu0 %3307 }
0x1483   : > { %5331 = vmatmul.mubr.msk.f32.vlgmr.msra.gmra.mxu1 %vm841_vm3, %v2970_v3  ;;  %5325 = vmatprep.mubr.msk.f32.mxu0 %vm5640_vm1, %v5639_v8 }
0x1484   : > { %5340 = vmatprep.mubr.msk.f32.mxu1 %vm5640_vm1, %v5639_v8 }
0x1486   : > { %v3140_v5 = vpop.permute.xlu1 %3139 }
0x1487   : > { %5339 = vmatpush3.xpose.msk.msra.mxu1 %vm841_vm3, %v3140_v5 }
0x1488   : > { %5348 = vmatprep.subr.mxu1 %v5639_v8 }
0x148a   : > { %v3138_v6 = vpop.permute.xlu1 %3137 }
0x148b   : > { %5341 = vmatmul.mubr.msk.f32.vlgmr.msra.gmra.mxu1 %vm841_vm3, %v3138_v6  ;;  %v5505_v6 = vld [vmem:[%s6547_s9 + $0x18] sm:$0xff]  }
0x148c   : > { %5349 = vmatpush3.xpose.msk.msra.mxu1 %vm841_vm3, %v3308_v52  ;;  %5350 = vmatprep.mubr.msk.f32.mxu1 %vm5640_vm1, %v5639_v8 }
0x148d   : > { %5358 = vmatprep.subr.bf16.mxu1 %v5639_v8 }
0x148e   : > { %v3306_v7 = vpop.permute.xlu1 %3305 }
0x148f   : > { %5351 = vmatmul.mubr.msk.f32.vlgmr.msra.gmra.mxu1 %vm841_vm3, %v3306_v7 }
0x1490   : > { %5362 = vmatprep.mubr.msk.bf16.mxu1 %vm5640_vm1, %v5639_v8  ;;  %5359 = vmatpush3.bf16.msra.mxu1 %v5505_v6 }
0x1491   : > { %5360 = vmatprep.subr.bf16.mxu1 %v5639_v8 }
0x1542   : > { %v2875_v9 = vpop.f32.mrf.mxu0 }
0x1543   : > { %v2879_v10 = vmul.f32 0.35355338, %v2875_v9  ;;  %v3043_v11 = vpop.f32.mrf.mxu1 }
0x1544   : > { %v3047_v12 = vmul.f32 0.35355338, %v3043_v11  ;;  %v5322_v13 = vpop.f32.mrf.mxu0 }
0x1545   : > { %v5332_v14 = vpop.f32.mrf.mxu1  ;;  %v2880_v15 = vadd.f32 %v2879_v10, %v5862_v33  ;;  %v5506_v13 = vld [vmem:[%s6547_s9 + $0x10] sm:$0xff]  }
0x1546   : > { %v3048_v16 = vadd.f32 %v3047_v12, %v5862_v33  ;;  %5361 = vmatpush3.bf16.msra.mxu1 %v5506_v13 }
0x1547   : > { %v2881_v17 = vsel %vm918_vm6, %v2880_v15, -inf  ;;  %5374 = vmatprep.subr.bf16.mxu1 %v5639_v8 }
0x1548   : > { %2882 = vmax.xlane.f32.xlu0 %v2881_v17  ;;  %v3049_v18 = vsel %vm918_vm6, %v3048_v16, -inf }
0x1549   : > { %3050 = vmax.xlane.f32.xlu1 %v3049_v18 }
0x154b   : > { %v3211_v19 = vpop.f32.mrf.mxu1 }
0x154c   : > { %v3215_v21 = vmul.f32 0.35355338, %v3211_v19 }
0x154d   : > { %v5342_v23 = vpop.f32.mrf.mxu1 }
0x154e   : > { %v3216_v24 = vadd.f32 %v3215_v21, %v5862_v33 }
0x154f   : > { %v3379_v25 = vpop.f32.mrf.mxu1 }
0x1550   : > { %v3383_v26 = vmul.f32 0.35355338, %v3379_v25  ;;  %v3217_v27 = vsel %vm918_vm6, %v3216_v24, -inf  ;;  %v4974_v25 = vld [vmem:[%s6548_s7 + $0x1] ss:$0 sm:$0xff] }
0x1551   : > { %v5352_v20 = vpop.f32.mrf.mxu1  ;;  %3218 = vmax.xlane.f32.xlu0 %v3217_v27 }
0x1552   : > { %v3384_v28 = vadd.f32 %v3383_v26, %v5862_v33 }
0x1554   : > { %v3385_v30 = vsel %vm918_vm6, %v3384_v28, -inf }
0x1555   : > { %3386 = vmax.xlane.f32.xlu0 %v3385_v30 }
0x15d1   : > { %v2883_v31 = vpop.xlane.xlu0 %2882 }
0x15d2   : > { %v2884_v22 = vsub.f32 %v2880_v15, %v2883_v31  ;;  %v3051_v34 = vpop.xlane.xlu1 %3050 }
0x15d3   : > { %v3052_v35 = vsub.f32 %v3048_v16, %v3051_v34 }
0x15d4   : > { %v2885_v36 = vmul.f32 1.442695, %v2884_v22 }
0x15d5   : > { %v3053_v38 = vmul.f32 1.442695, %v3052_v35 }
0x15d6   : > { %5561 = vpow2.f32 %v2885_v36 }
0x15d7   : > { %5563 = vpow2.f32 %v3053_v38 }
0x15da   : > { %v3219_v39 = vpop.xlane.xlu0 %3218 }
0x15db   : > { %v3220_v40 = vsub.f32 %v3216_v24, %v3219_v39 }
0x15dd   : > { %v3221_v42 = vmul.f32 1.442695, %v3220_v40  ;;  %v5507_v40 = vld [vmem:[%s6473_s10 + $0x18] sm:$0xff]  }
0x15de   : > { %v3387_v48 = vpop.xlane.xlu0 %3386 }
0x15df   : > { %5565 = vpow2.f32 %v3221_v42  ;;  %v3388_v49 = vsub.f32 %v3384_v28, %v3387_v48  ;;  %v5509_v42 = vld [vmem:[%s6550_s3 + $0x18] sm:$0xff]  }
0x15e1   : > { %v3389_v50 = vmul.f32 1.442695, %v3388_v49 }
0x15e3   : > { %v5562_v43 = vpop.eup %5561  ;;  %5567 = vpow2.f32 %v3389_v50 }
0x15e4   : > { %v5564_v44 = vpop.eup %5563  ;;  %v2887_v45 = vsel %vm918_vm6, %v5562_v43, 0.0 }
0x15e5   : > { %2888 = vadd.xlane.f32.xlu0 %v2887_v45  ;;  %v3055_v33 = vsel %vm918_vm6, %v5564_v44, 0.0 }
0x15e6   : > { %3056 = vadd.xlane.f32.xlu1 %v3055_v33 }
0x15ec   : > { %v5566_v46 = vpop.eup %5565 }
0x15ed   : > { %v3223_v47 = vsel %vm918_vm6, %v5566_v46, 0.0 }
0x15ee   : > { %3224 = vadd.xlane.f32.xlu0 %v3223_v47  ;;  %v4980_v47 = vld [vmem:[%s6481_s18 + $0x8] ss:$0 sm:$0xff] }
0x15f0   : > { %v5568_v51 = vpop.eup %5567 }
0x15f1   : > { %v3391_v53 = vsel %vm918_vm6, %v5568_v51, 0.0 }
0x15f7   : > { %3060 = vrot.lane.b32.xlu1 %v6160_v61, %s6563_s4 }
0x15fb   : > { %3228 = vrot.lane.b32.xlu1 %v6160_v61, %s6564_s22  ;;  %s6569_s22 = sld [smem:[#allocation19_spill]] }
0x1604   : > { %2892 = vrot.lane.b32.xlu0 %v6160_v61, %s6565_s27  ;;  %s6570_s27 = sld [smem:[#allocation8_spill]] }
0x161f   : > { %3392 = vadd.xlane.f32.xlu1 %v3391_v53  ;;  %v5001_v53 = vld [vmem:[%s6474_s11 + $0x1] ss:$0 sm:$0xff] }
0x1630   : > { %3396 = vrot.lane.b32.xlu1 %v6160_v61, %s6566_s20  ;;  %s6574_s20 = sld [smem:[#allocation7_spill]] }
0x1636   : > { %s722_s4 = scalar_lea.vmem %s6575_s21, %s6574_s20 }
0x166e   : > { %v2889_v32 = vpop.xlane.xlu0 %2888 }
0x166f   : > { %5569 = vrcp.f32 %v2889_v32  ;;  %v3057_v54 = vpop.xlane.xlu1 %3056 }
0x1670   : > { %5571 = vrcp.f32 %v3057_v54 }
0x1673   : > { %v3061_v58 = vpop.permute.xlu1 %3060 }
0x1677   : > { %v3225_v55 = vpop.xlane.xlu0 %3224  ;;  %v3229_v62 = vpop.permute.xlu1 %3228 }
0x1678   : > { %5573 = vrcp.f32 %v3225_v55 }
0x167b   : > { %v2893_v56 = vpop.permute.xlu0 %2892 }
0x167c   : > { %v5570_v57 = vpop.eup %5569  ;;  %5324 = vmatpush3.msk.msra.mxu0 %vm936_vm4, %v2893_v56 }
0x167d   : > { %5333 = vmatprep.subr.mxu0 %v5639_v8  ;;  %v2891_v59 = vmul.f32 %v5570_v57, %v5562_v43  ;;  %v5572_v60 = vpop.eup %5571  ;;  %v5510_v43 = vld [vmem:[%s6550_s3 + $0x10] sm:$0xff]  }
0x167e   : > { %v3059_v61 = vmul.f32 %v5572_v60, %v5564_v44 }
0x167f   : > { %5326 = vmatmul.mubr.msk.f32.vlgmr.msra.gmra.mxu0 %vm932_vm7, %v2891_v59  ;;  %v4997_v59 = vld [vmem:[%s6553_s26 + $0x1] ss:$0 sm:$0xff] }
0x1680   : > { %5334 = vmatpush3.msk.msra.mxu0 %vm936_vm4, %v3061_v58  ;;  %5335 = vmatprep.mubr.msk.f32.mxu0 %vm5640_vm1, %v5639_v8 }
0x1681   : > { %5343 = vmatprep.subr.mxu0 %v5639_v8 }
0x1683   : > { %5336 = vmatmul.mubr.msk.f32.vlgmr.msra.gmra.mxu0 %vm932_vm7, %v3059_v61 }
0x1684   : > { %5344 = vmatpush3.msk.msra.mxu0 %vm936_vm4, %v3229_v62  ;;  %5345 = vmatprep.mubr.msk.f32.mxu0 %vm5640_vm1, %v5639_v8 }
0x1685   : > { %v5574_v63 = vpop.eup %5573  ;;  %5353 = vmatprep.subr.mxu0 %v5639_v8 }
0x1686   : > { %v3227_v1 = vmul.f32 %v5574_v63, %v5566_v46 }
0x1688   : > { %5346 = vmatmul.mubr.msk.f32.vlgmr.msra.gmra.mxu0 %vm932_vm7, %v3227_v1 }
0x1689   : > { %5355 = vmatprep.mubr.msk.f32.mxu0 %vm5640_vm1, %v5639_v8 }
0x16a8   : > { %v3393_v0 = vpop.xlane.xlu1 %3392 }
0x16a9   : > { %5575 = vrcp.f32 %v3393_v0 }
0x16ac   : > { %v3397_v2 = vpop.permute.xlu1 %3396 }
0x16ad   : > { %5354 = vmatpush3.msk.msra.mxu0 %vm936_vm4, %v3397_v2 }
0x16ae   : > { %5366 = vmatprep.subr.bf16.mxu0 %v5639_v8 }
0x16b6   : > { %v5576_v3 = vpop.eup %5575 }
0x16b7   : > { %v3395_v5 = vmul.f32 %v5576_v3, %v5568_v51 }
0x16b9   : > { %5356 = vmatmul.mubr.msk.f32.vlgmr.msra.gmra.mxu0 %vm932_vm7, %v3395_v5 }
0x16ba   : > { %5370 = vmatprep.mubr.msk.bf16.mxu0 %vm5640_vm1, %v5639_v8  ;;  %5367 = vmatpush3.bf16.msra.mxu0 %v5509_v42 }
0x16bb   : > { %5368 = vmatprep.subr.bf16.mxu0 %v5639_v8 }
0x16be   : > { %5369 = vmatpush3.bf16.msra.mxu0 %v5510_v43 }
0x16bf   : > { %5382 = vmatprep.subr.mxu0 %v5639_v8 }
0x173f   : > { %v2965_v52 = vpop.f32.mrf.mxu0 }
0x1741   : > { %v5327_v7 = vpop.f32.mrf.mxu0 }
0x1743   : > { %v3133_v9 = vpop.f32.mrf.mxu0 }
0x1744   : > { %3474 = vrot.lane.b32.xlu0 %v3133_v9, %s6558_s1 }
0x1745   : > { %v5337_v10 = vpop.f32.mrf.mxu0 }
0x1748   : > { %v3301_v11 = vpop.f32.mrf.mxu0 }
0x1749   : > { %3478 = vrot.lane.b32.xlu1 %v3301_v11, %s6559_s24 }
0x174a   : > { %v5347_v12 = vpop.f32.mrf.mxu0 }
0x1779   : > { %v3469_v14 = vpop.f32.mrf.mxu0 }
0x177a   : > { %3482 = vrot.lane.b32.xlu0 %v3469_v14, %s6560_s29 }
0x177b   : > { %v5357_v15 = vpop.f32.mrf.mxu0 }
0x17b6   : > { %v3475_v16 = vpop.permute.xlu0 %3474 }
0x17b7   : > { %v3485_v18 = vsel %vm841_vm3, %v2965_v52, %v3475_v16 }
0x17bb   : > { %v3479_v17 = vpop.permute.xlu1 %3478 }
0x17bc   : > { %v3486_v19 = vsel %vm1526_vm8, %v3485_v18, %v3479_v17 }
0x17ec   : > { %v3483_v21 = vpop.permute.xlu0 %3482 }
0x17ed   : > { %v3487_v23 = vsel %vm1528_vm9, %v3486_v19, %v3483_v21 }
0x17ee   : > { %v3488_v24 = vpack.c.bf16 %v3487_v23, %v3487_v23 }
0x17f0   : > { %5363 = vmatmul.mubr.msk.bf16.vlgmr.msra.gmra.mxu1 %vm789_vm2, %v3488_v24 }
0x17f1   : > { %5378 = vmatprep.mubr.msk.bf16.mxu1 %vm5640_vm1, %v5639_v8  ;;  %5375 = vmatpush3.bf16.msra.mxu1 %v5507_v40 }
0x17f2   : > { %5376 = vmatprep.subr.bf16.mxu1 %v5639_v8 }
0x18b0   : > { %v3544_v26 = vpop.f32.mrf.mxu1 }
0x18b1   : > { %v3545_v27 = vadd.f32 %v4974_v25, %v3544_v26 }
0x18b2   : > { %v5364_v20 = vpop.f32.mrf.mxu1 }
0x18b3   : > { %v6258_v28 = vadd.f32 %v3545_v27, %v6134_v37  ;;  %v5508_v37 = vld [vmem:[%s6473_s10 + $0x10] sm:$0xff]  }
0x18b4   : > { %v3547_v30 = vpop.f32.mrf.mxu1  ;;  %5377 = vmatpush3.bf16.msra.mxu1 %v5508_v37 }
0x18b5   : > { %v3555_v31 = vsel %vm731_vm0, %v6258_v28, 0.0  ;;  %5392 = vmatprep.subr.mxu1 %v5639_v8 }
0x18b6   : > { %3556 = vadd.xlane.f32.xlu1 %v3555_v31  ;;  %v5365_v22 = vpop.f32.mrf.mxu1 }
0x18b7   : > { %5379 = vmatmul.mubr.msk.bf16.vlgmr.msra.gmra.mxu1 %vm789_vm2, %v5966_v4  ;;  %v4981_v4 = vld [vmem:[%s6481_s18 + $0x9] ss:$0 sm:$0xff] }
0x18b8   : > { %5394 = vmatprep.mubr.msk.f32.mxu1 %vm5640_vm1, %v5639_v8 }
0x193f   : > { %v3557_v34 = vpop.xlane.xlu1 %3556 }
0x1940   : > { %v3558_v35 = vmul.f32 0.03125, %v3557_v34 }
0x1942   : > { %v3559_v36 = vsub.f32 %v6258_v28, %v3558_v35 }
0x1944   : > { %v3560_v38 = vmul.f32 %v3559_v36, %v3559_v36 }
0x1946   : > { %v3561_v39 = vsel %vm731_vm0, %v3560_v38, 0.0 }
0x1947   : > { %3562 = vadd.xlane.f32.xlu0 %v3561_v39 }
0x1977   : > { %v3717_v32 = vpop.f32.mrf.mxu1 }
0x1978   : > { %v6296_v54 = vadd.f32 %v5001_v53, %v3717_v32 }
0x1979   : > { %v5380_v55 = vpop.f32.mrf.mxu1 }
0x197a   : > { %3890 = vrot.lane.b32.xlu0 %v6296_v54, %s6562_s23 }
0x197b   : > { %v3720_v56 = vpop.f32.mrf.mxu1 }
0x197d   : > { %v5381_v57 = vpop.f32.mrf.mxu1 }
0x19d0   : > { %v3563_v44 = vpop.xlane.xlu0 %3562 }
0x19d1   : > { %v3564_v45 = vmul.f32 0.03125, %v3563_v44 }
0x19d3   : > { %v3565_v33 = vadd.f32 1e-05, %v3564_v45 }
0x19d5   : > { %5577 = vrsqrt.f32 %v3565_v33 }
0x19e2   : > { %v5578_v46 = vpop.eup %5577 }
0x19e3   : > { %v3567_v48 = vmul.f32 %v5578_v46, %v3559_v36 }
0x19e5   : > { %v3574_v49 = vmul.f32 %v4980_v47, %v3567_v48 }
0x19e7   : > { %v3581_v50 = vadd.f32 %v4981_v4, %v3574_v49 }
0x19e9   : > { %v3603_v51 = vpack.c.bf16 %v3581_v50, %v3581_v50 }
0x19eb   : > { %5371 = vmatmul.mubr.msk.bf16.vlgmr.msra.gmra.mxu0 %vm789_vm2, %v3603_v51 }
0x19ec   : > { %5384 = vmatprep.mubr.msk.f32.mxu0 %vm5640_vm1, %v5639_v8  ;;  %5383 = vmatpush3.xpose.msk.msra.mxu0 %vm841_vm3, %v6296_v54  ;;  %v3891_v58 = vpop.permute.xlu0 %3890 }
0x19ed   : > { %5387 = vmatprep.subr.mxu0 %v5639_v8  ;;  %5393 = vmatpush3.xpose.msk.msra.mxu1 %vm841_vm3, %v3891_v58 }
0x19ee   : > { %5402 = vmatprep.subr.mxu1 %v5639_v8 }
0x1aab   : > { %v3659_v60 = vpop.f32.mrf.mxu0 }
0x1aac   : > { %v3660_v61 = vadd.f32 %v4997_v59, %v3659_v60 }
0x1aad   : > { %v5372_v62 = vpop.f32.mrf.mxu0 }
0x1aae   : > { %4055 = vrot.lane.b32.xlu0 %v3660_v61, %s6551_s8  ;;  %3888 = vrot.lane.b32.xlu1 %v3660_v61, %s6562_s23 }
0x1aaf   : > { %5385 = vmatmul.mubr.msk.f32.vlgmr.msra.gmra.mxu0 %vm841_vm3, %v3660_v61  ;;  %v3662_v63 = vpop.f32.mrf.mxu0 }
0x1ab0   : > { %5389 = vmatprep.mubr.msk.f32.mxu0 %vm5640_vm1, %v5639_v8 }
0x1ab1   : > { %v5373_v1 = vpop.f32.mrf.mxu0 }
0x1ab2   : > { %4222 = vrot.lane.b32.xlu0 %v3660_v61, %s6552_s0  ;;  %4057 = vrot.lane.b32.xlu1 %v6296_v54, %s6551_s8 }
0x1ab6   : > { %4224 = vrot.lane.b32.xlu1 %v6296_v54, %s6552_s0 }
0x1b20   : > { %v3889_v0 = vpop.permute.xlu1 %3888  ;;  %v4056_v3 = vpop.permute.xlu0 %4055 }
0x1b21   : > { %5395 = vmatmul.mubr.msk.f32.vlgmr.msra.gmra.mxu1 %vm841_vm3, %v3889_v0 }
0x1b22   : > { %5404 = vmatprep.mubr.msk.f32.mxu1 %vm5640_vm1, %v5639_v8 }
0x1b24   : > { %v4058_v2 = vpop.permute.xlu1 %4057  ;;  %v4223_v6 = vpop.permute.xlu0 %4222 }
0x1b25   : > { %5403 = vmatpush3.xpose.msk.msra.mxu1 %vm841_vm3, %v4058_v2 }
0x1b26   : > { %5412 = vmatprep.subr.mxu1 %v5639_v8 }
0x1b28   : > { %5405 = vmatmul.mubr.msk.f32.vlgmr.msra.gmra.mxu1 %vm841_vm3, %v4056_v3  ;;  %v4225_v5 = vpop.permute.xlu1 %4224  ;;  %v5511_v3 = vld [vmem:[%s6475_s12 + $0x18] sm:$0xff]  }
0x1b29   : > { %5413 = vmatpush3.xpose.msk.msra.mxu1 %vm841_vm3, %v4225_v5  ;;  %5414 = vmatprep.mubr.msk.f32.mxu1 %vm5640_vm1, %v5639_v8  ;;  %v5512_v5 = vld [vmem:[%s6475_s12 + $0x10] sm:$0xff]  }
0x1b2a   : > { %5422 = vmatprep.subr.bf16.mxu1 %v5639_v8 }
0x1b2c   : > { %5415 = vmatmul.mubr.msk.f32.vlgmr.msra.gmra.mxu1 %vm841_vm3, %v4223_v6 }
0x1b2d   : > { %5426 = vmatprep.mubr.msk.bf16.mxu1 %vm5640_vm1, %v5639_v8  ;;  %5423 = vmatpush3.bf16.msra.mxu1 %v5511_v3 }
0x1b2e   : > { %5424 = vmatprep.subr.bf16.mxu1 %v5639_v8 }
0x1b31   : > { %5425 = vmatpush3.bf16.msra.mxu1 %v5512_v5 }
0x1b32   : > { %5438 = vmatprep.subr.bf16.mxu1 %v5639_v8 }
0x1b6f   : > { %v3795_v52 = vpop.f32.mrf.mxu0 }
0x1b70   : > { %v3799_v7 = vmul.f32 0.35355338, %v3795_v52 }
0x1b71   : > { %v5386_v9 = vpop.f32.mrf.mxu0 }
0x1b72   : > { %v3800_v10 = vadd.f32 %v3799_v7, %v6031_v41 }
0x1b74   : > { %v3801_v11 = vsel %vm1844_vm11, %v3800_v10, -inf }
0x1b75   : > { %3802 = vmax.xlane.f32.xlu1 %v3801_v11 }
0x1b86   : > { %3812 = vrot.lane.b32.xlu1 %v6296_v54, %s6556_s30  ;;  %s6567_s30 = sld [smem:[#allocation18_spill]] }
0x1be1   : > { %v3962_v12 = vpop.f32.mrf.mxu1 }
0x1be2   : > { %v3966_v13 = vmul.f32 0.35355338, %v3962_v12 }
0x1be3   : > { %v5396_v14 = vpop.f32.mrf.mxu1 }
0x1be4   : > { %v3967_v15 = vadd.f32 %v3966_v13, %v6031_v41 }
0x1be6   : > { %v3968_v16 = vsel %vm1844_vm11, %v3967_v15, -inf }
0x1be7   : > { %3969 = vmax.xlane.f32.xlu0 %v3968_v16 }
0x1be8   : > { %v4129_v17 = vpop.f32.mrf.mxu1 }
0x1be9   : > { %v4133_v18 = vmul.f32 0.35355338, %v4129_v17 }
0x1bea   : > { %v5406_v19 = vpop.f32.mrf.mxu1 }
0x1beb   : > { %v4134_v21 = vadd.f32 %v4133_v18, %v6031_v41  ;;  %v5017_v19 = vld [vmem:[%s6567_s30 + $0x1] ss:$0 sm:$0xff] }
0x1bec   : > { %v4296_v23 = vpop.f32.mrf.mxu1 }
0x1bed   : > { %v4300_v24 = vmul.f32 0.35355338, %v4296_v23  ;;  %v4135_v25 = vsel %vm1844_vm11, %v4134_v21, -inf }
0x1bee   : > { %4136 = vmax.xlane.f32.xlu0 %v4135_v25  ;;  %v5416_v26 = vpop.f32.mrf.mxu1 }
0x1bef   : > { %v4301_v27 = vadd.f32 %v4300_v24, %v6031_v41 }
0x1bf1   : > { %v4302_v20 = vsel %vm1844_vm11, %v4301_v27, -inf }
0x1bf2   : > { %4303 = vmax.xlane.f32.xlu0 %v4302_v20 }
0x1bfe   : > { %v3803_v30 = vpop.xlane.xlu1 %3802 }
0x1bff   : > { %v3804_v31 = vsub.f32 %v3800_v10, %v3803_v30 }
0x1c01   : > { %v3805_v22 = vmul.f32 1.442695, %v3804_v31 }
0x1c02   : > { %v3813_v34 = vpop.permute.xlu1 %3812 }
0x1c03   : > { %5579 = vpow2.f32 %v3805_v22  ;;  %5388 = vmatpush3.msra.mxu0 %v3813_v34 }
0x1c04   : > { %5397 = vmatprep.subr.mxu0 %v5639_v8 }
0x1c10   : > { %v5580_v35 = vpop.eup %5579 }
0x1c11   : > { %v3807_v36 = vsel %vm1844_vm11, %v5580_v35, 0.0 }
0x1c12   : > { %3808 = vadd.xlane.f32.xlu1 %v3807_v36  ;;  %v5513_v36 = vld [vmem:[%s6477_s14 + $0x18] sm:$0xff]  }
0x1c70   : > { %v3970_v38 = vpop.xlane.xlu0 %3969 }
0x1c71   : > { %v3971_v39 = vsub.f32 %v3967_v15, %v3970_v38  ;;  %v5515_v38 = vld [vmem:[%s6479_s16 + $0x38] sm:$0xff]  }
0x1c73   : > { %v3972_v40 = vmul.f32 1.442695, %v3971_v39  ;;  %v5516_v39 = vld [vmem:[%s6479_s16 + $0x30] sm:$0xff]  }
0x1c75   : > { %5581 = vpow2.f32 %v3972_v40 }
0x1c77   : > { %v4137_v41 = vpop.xlane.xlu0 %4136 }
0x1c78   : > { %v4138_v37 = vsub.f32 %v4134_v21, %v4137_v41 }
0x1c7a   : > { %v4139_v42 = vmul.f32 1.442695, %v4138_v37 }
0x1c7b   : > { %v4304_v43 = vpop.xlane.xlu0 %4303 }
0x1c7c   : > { %5583 = vpow2.f32 %v4139_v42  ;;  %v4305_v44 = vsub.f32 %v4301_v27, %v4304_v43  ;;  %v5023_v43 = vld [vmem:[%s6481_s18 + $0xa] ss:$0 sm:$0xff] }
0x1c7e   : > { %v4306_v45 = vmul.f32 1.442695, %v4305_v44 }
0x1c80   : > { %5585 = vpow2.f32 %v4306_v45  ;;  %v5024_v45 = vld [vmem:[%s6481_s18 + $0xb] ss:$0 sm:$0xff] }
0x1c82   : > { %v5582_v33 = vpop.eup %5581 }
0x1c83   : > { %v3974_v46 = vsel %vm1844_vm11, %v5582_v33, 0.0 }
0x1c84   : > { %3975 = vadd.xlane.f32.xlu0 %v3974_v46 }
0x1c89   : > { %v5584_v47 = vpop.eup %5583 }
0x1c8a   : > { %v4141_v48 = vsel %vm1844_vm11, %v5584_v47, 0.0 }
0x1c8b   : > { %4142 = vadd.xlane.f32.xlu1 %v4141_v48  ;;  %v5517_v48 = vld [vmem:[%s6479_s16 + $0x28] sm:$0xff]  }
0x1c8d   : > { %v5586_v4 = vpop.eup %5585 }
0x1c8e   : > { %v4308_v49 = vsel %vm1844_vm11, %v5586_v4, 0.0 }
0x1c8f   : > { %4309 = vadd.xlane.f32.xlu0 %v4308_v49  ;;  %v5039_v49 = vld [vmem:[%s6478_s15 + $0x1] ss:$0 sm:$0xff] }
0x1c9b   : > { %v3809_v50 = vpop.xlane.xlu1 %3808 }
0x1c9c   : > { %5587 = vrcp.f32 %v3809_v50  ;;  %4146 = vrot.lane.b32.xlu1 %v6296_v54, %s6555_s6 }
0x1ca0   : > { %4313 = vrot.lane.b32.xlu1 %v6296_v54, %s6557_s5 }
0x1ca5   : > { %3979 = vrot.lane.b32.xlu0 %v6296_v54, %s6554_s19  ;;  %s6571_s19 = sld [smem:[#allocation20_spill]] }
0x1ca9   : > { %v5588_v51 = vpop.eup %5587 }
0x1caa   : > { %v3811_v53 = vmul.f32 %v5588_v51, %v5580_v35 }
0x1cac   : > { %5390 = vmatmul.mubr.msk.f32.vlgmr.msra.gmra.mxu0 %vm841_vm3, %v3811_v53 }
0x1cad   : > { %5399 = vmatprep.mubr.msk.f32.mxu0 %vm5640_vm1, %v5639_v8 }
0x1d0d   : > { %v3976_v32 = vpop.xlane.xlu0 %3975 }
0x1d0e   : > { %5589 = vrcp.f32 %v3976_v32 }
0x1d14   : > { %v4143_v55 = vpop.xlane.xlu1 %4142 }
0x1d15   : > { %5591 = vrcp.f32 %v4143_v55 }
0x1d18   : > { %v4310_v56 = vpop.xlane.xlu0 %4309  ;;  %v4147_v60 = vpop.permute.xlu1 %4146 }
0x1d19   : > { %5593 = vrcp.f32 %v4310_v56 }
0x1d1b   : > { %v5590_v57 = vpop.eup %5589 }
0x1d1c   : > { %v3980_v58 = vpop.permute.xlu0 %3979  ;;  %v3978_v59 = vmul.f32 %v5590_v57, %v5582_v33  ;;  %v4314_v62 = vpop.permute.xlu1 %4313 }
0x1d1d   : > { %5398 = vmatpush3.msra.mxu0 %v3980_v58  ;;  %v5043_v58 = vld [vmem:[%s6480_s17 + $0x1] ss:$0 sm:$0xff] }
0x1d1e   : > { %5400 = vmatmul.mubr.msk.f32.vlgmr.msra.gmra.mxu0 %vm841_vm3, %v3978_v59  ;;  %5407 = vmatprep.subr.mxu0 %v5639_v8 }
0x1d1f   : > { %5408 = vmatpush3.msra.mxu0 %v4147_v60  ;;  %5409 = vmatprep.mubr.msk.f32.mxu0 %vm5640_vm1, %v5639_v8 }
0x1d20   : > { %5417 = vmatprep.subr.mxu0 %v5639_v8 }
0x1d22   : > { %v5592_v54 = vpop.eup %5591 }
0x1d23   : > { %v4145_v61 = vmul.f32 %v5592_v54, %v5584_v47 }
0x1d25   : > { %5410 = vmatmul.mubr.msk.f32.vlgmr.msra.gmra.mxu0 %vm841_vm3, %v4145_v61 }
0x1d26   : > { %v5594_v63 = vpop.eup %5593  ;;  %5418 = vmatpush3.msra.mxu0 %v4314_v62  ;;  %5419 = vmatprep.mubr.msk.f32.mxu0 %vm5640_vm1, %v5639_v8 }
0x1d27   : > { %v4312_v1 = vmul.f32 %v5594_v63, %v5586_v4  ;;  %5430 = vmatprep.subr.bf16.mxu0 %v5639_v8  ;;  %v5518_v4 = vld [vmem:[%s6479_s16 + $0x20] sm:$0xff]  }
0x1d29   : > { %5420 = vmatmul.mubr.msk.f32.vlgmr.msra.gmra.mxu0 %vm841_vm3, %v4312_v1 }
0x1d2a   : > { %5434 = vmatprep.mubr.msk.bf16.mxu0 %vm5640_vm1, %v5639_v8  ;;  %5431 = vmatpush3.bf16.msra.mxu0 %v5513_v36 }
0x1d2b   : > { %5432 = vmatprep.subr.bf16.mxu0 %v5639_v8 }
0x1d6c   : > { %v3884_v0 = vpop.f32.mrf.mxu0 }
0x1d6e   : > { %v5391_v2 = vpop.f32.mrf.mxu0 }
0x1dde   : > { %v4051_v6 = vpop.f32.mrf.mxu0 }
0x1ddf   : > { %4390 = vrot.lane.b32.xlu1 %v4051_v6, %s6558_s1  ;;  %s6572_s1 = sld [smem:[#allocation22_spill]] }
0x1de0   : > { %v5401_v52 = vpop.f32.mrf.mxu0 }
0x1de1   : > { %v5519_v52 = vld [vmem:[%s6568_s25 + $0x8] sm:$0xff]  }
0x1de5   : > { %v4218_v7 = vpop.f32.mrf.mxu0 }
0x1de6   : > { %4394 = vrot.lane.b32.xlu0 %v4218_v7, %s6559_s24  ;;  %v5520_v7 = vld [vmem:[%s6568_s25] sm:$0xff]  }
0x1de7   : > { %v5411_v9 = vpop.f32.mrf.mxu0 }
0x1de9   : > { %v4385_v10 = vpop.f32.mrf.mxu0 }
0x1dea   : > { %4398 = vrot.lane.b32.xlu1 %v4385_v10, %s6560_s29  ;;  %s6573_s29 = sld [smem:[#allocation23_spill]] }
0x1deb   : > { %v5421_v11 = vpop.f32.mrf.mxu0 }
0x1df0   : > { %s719_s23 = scalar_lea.vmem %s6573_s29, %s6570_s27 }
0x1e51   : > { %v4391_v12 = vpop.permute.xlu1 %4390 }
0x1e52   : > { %v4401_v14 = vsel %vm841_vm3, %v3884_v0, %v4391_v12 }
0x1e58   : > { %v4395_v13 = vpop.permute.xlu0 %4394 }
0x1e59   : > { %v4402_v15 = vsel %vm1526_vm8, %v4401_v14, %v4395_v13  ;;  %v5049_v13 = vld [vmem:[%s6569_s22] ss:$0 sm:$0xff] }
0x1e5c   : > { %v4399_v16 = vpop.permute.xlu1 %4398 }
0x1e5d   : > { %v4403_v17 = vsel %vm1528_vm9, %v4402_v15, %v4399_v16  ;;  %v5050_v15 = vld [vmem:[%s6571_s19] ss:$0 sm:$0xff] }
0x1e5e   : > { %v4404_v18 = vpack.c.bf16 %v4403_v17, %v4403_v17 }
0x1e60   : > { %5427 = vmatmul.mubr.msk.bf16.vlgmr.msra.gmra.mxu1 %vm789_vm2, %v4404_v18 }
0x1e61   : > { %5446 = vmatprep.mubr.msk.bf16.mxu1 %vm5640_vm1, %v5639_v8  ;;  %5439 = vmatpush3.bf16.msra.mxu1 %v5515_v38 }
0x1e62   : > { %5440 = vmatprep.subr.bf16.mxu1 %v5639_v8 }
0x1e65   : > { %5441 = vmatpush3.bf16.msra.mxu1 %v5516_v39 }
0x1e66   : > { %5442 = vmatprep.subr.bf16.mxu1 %v5639_v8 }
0x1e69   : > { %5443 = vmatpush3.bf16.msra.mxu1 %v5517_v48 }
0x1e6a   : > { %5444 = vmatprep.subr.bf16.mxu1 %v5639_v8 }
0x1e6d   : > { %5445 = vmatpush3.bf16.msra.mxu1 %v5518_v4 }
0x1f20   : > { %v4460_v21 = vpop.f32.mrf.mxu1 }
0x1f21   : > { %v4461_v23 = vadd.f32 %v5017_v19, %v4460_v21 }
0x1f22   : > { %v5428_v24 = vpop.f32.mrf.mxu1 }
0x1f23   : > { %v4466_v25 = vadd.f32 %v4461_v23, %v6258_v28  ;;  %v5514_v28 = vld [vmem:[%s6477_s14 + $0x10] sm:$0xff]  }
0x1f24   : > { %v4463_v26 = vpop.f32.mrf.mxu1  ;;  %5433 = vmatpush3.bf16.msra.mxu0 %v5514_v28 }
0x1f25   : > { %v4471_v27 = vsel %vm731_vm0, %v4466_v25, 0.0  ;;  %5450 = vmatprep.subr.bf16.mxu0 %v5639_v8 }
0x1f26   : > { %4472 = vadd.xlane.f32.xlu0 %v4471_v27  ;;  %v5429_v20 = vpop.f32.mrf.mxu1  ;;  %v5656_v27 = vmov 0  }
0x1f27   : > { %5486 = vset.pattern.permute.xlu0 %v5656_v27  ;;  %v4750_v20 = vld [vmem:[%s719_s23] sm:$0x1f] }
0x1f28   : > { %vm4780_vm15 = vcmp.ne.s32.totalorder %v4750_v20, 4294967295 }
0x1faf   : > { %v4473_v30 = vpop.xlane.xlu0 %4472 }
0x1fb0   : > { %v4474_v31 = vmul.f32 0.03125, %v4473_v30 }
0x1fb2   : > { %v4475_v22 = vsub.f32 %v4466_v25, %v4474_v31 }
0x1fb4   : > { %v4476_v34 = vmul.f32 %v4475_v22, %v4475_v22 }
0x1fb6   : > { %v4477_v35 = vsel %vm731_vm0, %v4476_v34, 0.0 }
0x1fb7   : > { %4478 = vadd.xlane.f32.xlu1 %v4477_v35 }
0x2040   : > { %v4479_v40 = vpop.xlane.xlu1 %4478 }
0x2041   : > { %v4480_v41 = vmul.f32 0.03125, %v4479_v40 }
0x2043   : > { %v4481_v37 = vadd.f32 1e-05, %v4480_v41 }
0x2045   : > { %5595 = vrsqrt.f32 %v4481_v37 }
0x2052   : > { %v5596_v42 = vpop.eup %5595 }
0x2053   : > { %v4483_v44 = vmul.f32 %v5596_v42, %v4475_v22 }
0x2055   : > { %v4490_v33 = vmul.f32 %v5023_v43, %v4483_v44 }
0x2057   : > { %v4497_v46 = vadd.f32 %v5024_v45, %v4490_v33 }
0x2059   : > { %v4516_v47 = vpack.c.bf16 %v4497_v46, %v4497_v46 }
0x205b   : > { %5435 = vmatmul.mubr.msk.bf16.vlgmr.msra.gmra.mxu0 %vm789_vm2, %v4516_v47 }
0x205c   : > { %5454 = vmatprep.mubr.msk.bf16.mxu0 %vm5640_vm1, %v5639_v8  ;;  %5451 = vmatpush3.bf16.msra.mxu0 %v5519_v52  ;;  %vm4790_vm1 = vcmask 0  }
0x205d   : > { %5452 = vmatprep.subr.bf16.mxu0 %v5639_v8  ;;  %v5051_v8 = vld [vmem:[%s6572_s1] ss:$0 sm:$0xff] }
0x2060   : > { %5453 = vmatpush3.bf16.msra.mxu0 %v5520_v7 }
0x211b   : > { %v4572_v50 = vpop.f32.mrf.mxu0 }
0x211c   : > { %v4573_v51 = vadd.f32 %v5039_v49, %v4572_v50 }
0x211d   : > { %v5436_v53 = vpop.f32.mrf.mxu0 }
0x211e   : > { %v4578_v32 = vmax.f32 %v4573_v51, 0.0 }
0x211f   : > { %v4575_v55 = vpop.f32.mrf.mxu0 }
0x2120   : > { %v4579_v56 = vpack.c.bf16 %v4578_v32, %v4578_v32 }
0x2121   : > { %v5437_v57 = vpop.f32.mrf.mxu0 }
0x2122   : > { %5447 = vmatmul.mubr.msk.bf16.vlgmr.msra.gmra.mxu1 %vm2650_vm12, %v4579_v56 }
0x21e2   : > { %v4647_v59 = vpop.f32.mrf.mxu1 }
0x21e3   : > { %v4648_v60 = vadd.f32 %v5043_v58, %v4647_v59 }
0x21e4   : > { %v5448_v54 = vpop.f32.mrf.mxu1 }
0x21e5   : > { %v4653_v61 = vadd.f32 %v4648_v60, %v4466_v25 }
0x21e6   : > { %v4650_v62 = vpop.f32.mrf.mxu1 }
0x21e7   : > { %v4656_v63 = vsel %vm731_vm0, %v4653_v61, 0.0 }
0x21e8   : > { %4657 = vadd.xlane.f32.xlu0 %v4656_v63  ;;  %v5449_v1 = vpop.f32.mrf.mxu1 }
0x2271   : > { %v4658_v0 = vpop.xlane.xlu0 %4657 }
0x2272   : > { %v4659_v2 = vmul.f32 0.03125, %v4658_v0 }
0x2274   : > { %v4660_v3 = vsub.f32 %v4653_v61, %v4659_v2 }
0x2276   : > { %v4661_v5 = vmul.f32 %v4660_v3, %v4660_v3 }
0x2278   : > { %v4662_v6 = vsel %vm731_vm0, %v4661_v5, 0.0  ;;  %vm4782_vm0 = vcmask 4096  }
0x2279   : > { %4663 = vadd.xlane.f32.xlu0 %v4662_v6 }
0x2302   : > { %v4664_v9 = vpop.xlane.xlu0 %4663 }
0x2303   : > { %v4665_v10 = vmul.f32 0.03125, %v4664_v9 }
0x2305   : > { %v4666_v11 = vadd.f32 1e-05, %v4665_v10 }
0x2307   : > { %5597 = vrsqrt.f32 %v4666_v11 }
0x2314   : > { %v5598_v12 = vpop.eup %5597 }
0x2315   : > { %v4668_v14 = vmul.f32 %v5598_v12, %v4660_v3 }
0x2317   : > { %v4675_v16 = vmul.f32 %v5049_v13, %v4668_v14 }
0x2319   : > { %v4682_v17 = vadd.f32 %v5050_v15, %v4675_v16 }
0x231b   : > { %v4683_v18 = vpack.c.bf16 %v4682_v17, %v4682_v17 }
0x231d   : > { %5455 = vmatmul.mubr.msk.bf16.vlgmr.msra.gmra.mxu0 %vm789_vm2, %v4683_v18 }
0x23dd   : > { %v4744_v19 = vpop.f32.mrf.mxu0 }
0x23de   : > { %v4745_v21 = vadd.f32 %v5051_v8, %v4744_v19 }
0x23df   : > { %v5456_v23 = vpop.f32.mrf.mxu0 }
0x23e0   : > { %v4752_v24 = vsel %vm4751_vm13, %v4745_v21, -inf }
0x23e1   : > { %4753 = vmax.xlane.f32.xlu0 %v4752_v24  ;;  %v4747_v25 = vpop.f32.mrf.mxu0 }
0x23e3   : > { %v5457_v26 = vpop.f32.mrf.mxu0 }
0x23f7   : > { %4765 = vperm.xlu0 %5486, %v4750_v20  }
0x246a   : > { %v4754_v30 = vpop.xlane.xlu0 %4753 }
0x246b   : > { %v4755_v31 = vsub.f32 %v4745_v21, %v4754_v30 }
0x246d   : > { %v4756_v22 = vmul.f32 1.442695, %v4755_v31 }
0x246f   : > { %5599 = vpow2.f32 %v4756_v22 }
0x2472   : > { %v4766_v28 = vpop.permute.xlu0 %4765 }
0x2473   : > { %vm4767_vm14 = vcmp.eq.s32.totalorder %v5858_v29, %v4766_v28 }
0x247c   : > { %v5600_v34 = vpop.eup %5599 }
0x247d   : > { %v4758_v35 = vsel %vm4751_vm13, %v5600_v34, 0.0 }
0x247e   : > { %4759 = vadd.xlane.f32.xlu1 %v4758_v35 }
0x2507   : > { %v4760_v36 = vpop.xlane.xlu1 %4759 }
0x2508   : > { %5601 = vlog2.f32 %v4760_v36 }
0x2515   : > { %v5602_v38 = vpop.eup %5601 }
0x2516   : > { %v4762_v39 = vmul.f32 0.6931472, %v5602_v38 }
0x2518   : > { %v4763_v40 = vsub.f32 %v4755_v31, %v4762_v39 }
0x251a   : > { %v4768_v41 = vsel %vm4767_vm14, %v4763_v40, 0.0  ;;  %v4772_v42 = vsel %vm4751_vm13, %v4763_v40, 0.0 }
0x251b   : > { %v4769_v37 = vsel %vm4751_vm13, %v4768_v41, 0.0 }
0x251c   : > { %4770 = vadd.xlane.f32.xlu1 %v4769_v37 }
0x2520   : > { %4773 = vadd.xlane.f32.xlu1 %v4772_v42 }
0x25a5   : > { %v4771_v43 = vpop.xlane.xlu1 %4770 }
0x25a6   : > { %v4775_v44 = vmul.f32 0.9, %v4771_v43 }
0x25a8   : > { %v4776_v46 = vsub.f32 -0.73939645, %v4775_v44 }
0x25a9   : > { %v4774_v45 = vpop.xlane.xlu1 %4773 }
0x25aa   : > { %v4777_v33 = vsub.f32 %v4774_v45, %v4771_v43 }
0x25ac   : > { %v4778_v47 = vmul.f32 0.0015873016, %v4777_v33 }
0x25ae   : > { %v4779_v48 = vsub.f32 %v4776_v46, %v4778_v47 }
0x25b0   : > { %v4781_v4 = vsel %vm4780_vm15, %v4779_v48, 0.0 }
0x25b1   : > { %v4783_v29 = vsel %vm4782_vm0, %v4781_v4, 0.0 }
0x25b2   : > { %v4784_v49 = vrot.slane %v4783_v29, 4 }
0x25b4   : > { %v4785_v50 = vadd.f32 %v4784_v49, %v4783_v29 }
0x25b6   : > { %v4786_v51 = vrot.slane %v4785_v50, 2 }
0x25b8   : > { %v4787_v53 = vadd.f32 %v4786_v51, %v4785_v50 }
0x25ba   : > { %v4788_v32 = vrot.slane %v4787_v53, 1 }
0x25bc   : > { %v4789_v55 = vadd.f32 %v4788_v32, %v4787_v53 }
0x25be   : > { %4791 = vst.msk [vmem:[%s722_s4] sm:$0x1] %vm4790_vm1, %v4789_v55 }
0x25bf PF: > { %s6576_s22 = sld [smem:[#allocation6_spill]] }
0x25c5   : > { %s44_s1 = sadd.s32 1, %s6576_s22  }
0x25c6   : > { %p41_p0 = scmp.ge.s32.totalorder %s44_s1, 4  }
0x25c8   :  { %43 = sbr.rel (!%p41_p0) target bundleno = 48 (0x30), region = 169 }

</bundles_post_ra>
